<compile_context>
chip_gen: v5e
topology: v5e:2x2
jax: 0.10.0
libtpu: 0.0.40
codegen_flags: <defaults>
</compile_context>

<pallas_src>
import math

import jax
import jax.numpy as jnp
import numpy as np
from jax.experimental import pallas as pl
from jax.experimental.pallas import tpu as pltpu


def _make_kernel(H, chunk, n_cps, fold_reduce):
    """Build the per-grid-step kernel. One step = one (batch, chunk-group) slab."""
    bf16 = jnp.bfloat16

    def attn_body(xr, wq, wk, wv, wp, bp, o_ref):
        # xr : (slab, Din) bf16, slab = n_cps * chunk
        # wq/wk/wv : (H, Din, hd) bf16 (softmax scale pre-folded into wq)
        # wp : (H, hd, dim) bf16, bp : (1, dim) f32
        slab, Din = xr.shape

        # --- q/k/v projections, head-batched, full-slab M (merged chunks) ---
        xh = jnp.broadcast_to(xr[None], (H, slab, Din))
        q = jnp.einsum("hnc,hcd->hnd", xh, wq,
                       preferred_element_type=jnp.float32).astype(bf16)
        k = jnp.einsum("hnc,hcd->hnd", xh, wk,
                       preferred_element_type=jnp.float32).astype(bf16)
        v = jnp.einsum("hnc,hcd->hnd", xh, wv,
                       preferred_element_type=jnp.float32).astype(bf16)

        # --- regroup (H, slab, hd) -> (n_cps*H, chunk, hd): chunk-local batches ---
        # static sublane-tile-aligned slices + leading-dim concat (no relayout risk)
        def chunkify(t):
            return jnp.concatenate(
                [t[:, c * chunk:(c + 1) * chunk, :] for c in range(n_cps)], axis=0)

        q3, k3, v3 = chunkify(q), chunkify(k), chunkify(v)

        # --- chunk-local attention (the slab is chunk-blocked, so no mask) ---
        s = jnp.einsum("bqd,bkd->bqk", q3, k3, preferred_element_type=jnp.float32)
        s = s - jnp.max(s, axis=-1, keepdims=True)
        p = jnp.exp(s)
        a = p * pl.reciprocal(jnp.sum(p, axis=-1, keepdims=True), approx=True)
        o3 = jnp.einsum("bqk,bkd->bqd", a.astype(bf16), v3,
                        preferred_element_type=jnp.float32).astype(bf16)

        # --- de-chunk back to (H, slab, hd) (inverse regrouping) ---
        o = jnp.concatenate([o3[c * H:(c + 1) * H] for c in range(n_cps)], axis=1)

        # --- proj Linear with the head-sum fused into the contraction:
        #     y = sum_h o[h] @ wp[h]  (== concat-heads @ Wp), accumulated in f32 ---
        acc = jnp.dot(o[0], wp[0], preferred_element_type=jnp.float32)
        for h in range(1, H):
            acc = acc + jnp.dot(o[h], wp[h], preferred_element_type=jnp.float32)
        o_ref[0] = (acc + bp).astype(o_ref.dtype)

    if fold_reduce:
        def kernel(x_ref, wq_ref, wk_ref, wv_ref, wp_ref, bp_ref, o_ref):
            # x arrives f32; cast on the VPU inside the kernel (no host bf16 copy)
            x = x_ref[0].astype(bf16)                        # (slab, dim)
            attn_body(x, wq_ref[...], wk_ref[...], wv_ref[...],
                      wp_ref[...], bp_ref[...], o_ref)
    else:
        def kernel(x_ref, wr_ref, wq_ref, wk_ref, wv_ref, wp_ref, bp_ref, o_ref):
            x = x_ref[0].astype(bf16)                        # (slab, dim)
            xr = jnp.dot(x, wr_ref[...],
                         preferred_element_type=jnp.float32).astype(bf16)
            attn_body(xr, wq_ref[...], wk_ref[...], wv_ref[...],
                      wp_ref[...], bp_ref[...], o_ref)
    return kernel


def prepare_eff_attention_params(params, *, dim, num_heads=8, reduction=1):
    """One-time host-side weight prep (hoisted out of the per-call path)."""
    C = dim // reduction
    H = num_heads
    assert C % H == 0, "C must be divisible by num_heads"
    hd = C // H
    # NOTE: the torch module scales with the *pre-reduction* head dim.
    scale = (dim // num_heads) ** (-0.5)
    bf16 = jnp.bfloat16

    wr_t = params["w_reduce"].T.astype(jnp.float32)          # (dim, C)
    wqkv_t = params["w_qkv"].T.astype(jnp.float32)           # (C, 3C)
    wq = wqkv_t[:, 0 * C:1 * C] * scale                      # scale folded into Wq
    wk = wqkv_t[:, 1 * C:2 * C]
    wv = wqkv_t[:, 2 * C:3 * C]

    fold_reduce = (reduction == 1)
    if fold_reduce:
        # Fold the reduce Linear into q/k/v (f32 combine, then bf16 cast):
        # saves one matmul + the xr round-trip in the kernel.
        wq, wk, wv = wr_t @ wq, wr_t @ wk, wr_t @ wv          # (dim, C) each

    def per_head(w):                                          # (Din, C) -> (H, Din, hd)
        Din = w.shape[0]
        return jnp.transpose(w.reshape(Din, H, hd), (1, 0, 2)).astype(bf16)

    prepped = {
        "fold_reduce": fold_reduce,
        "wq_h": per_head(wq),
        "wk_h": per_head(wk),
        "wv_h": per_head(wv),
        "wp_h": params["w_proj"].T.reshape(H, hd, dim).astype(bf16),  # (H, hd, dim)
        "bp": params["b_proj"].reshape(1, dim).astype(jnp.float32),   # (1, dim)
    }
    if not fold_reduce:
        prepped["wr"] = wr_t.astype(bf16)                     # (dim, C)
    return prepped


def eff_attention(x, prepped, *, num_heads=8, reduction=1, chunks_per_step=8):
    B, N, dim = x.shape
    C = dim // reduction
    H = num_heads
    hd = C // H
    # NOTE: torch uses math.ceil(N // 16), which equals N // 16 (floor-div).
    assert N % 16 == 0, "this kernel requires N % 16 == 0"
    chunk = N // 16
    n_chunks = 16
    # bf16 sublane tile is 16 -> require chunk % 16 == 0 for unmasked full-tile access.
    assert chunk % 16 == 0, "chunk (= N // 16) must be a multiple of 16"
    assert n_chunks % chunks_per_step == 0
    n_cps = chunks_per_step
    n_groups = n_chunks // n_cps       # >= 2 keeps both v7x TCs busy even at B == 1
    slab = n_cps * chunk

    fold_reduce = prepped["fold_reduce"]
    Din = dim if fold_reduce else C
    kernel = _make_kernel(H, chunk, n_cps, fold_reduce)

    args = [x]                                                # f32; cast inside kernel
    in_specs = [pl.BlockSpec((1, slab, dim), lambda b, g: (b, g, 0))]
    if not fold_reduce:
        args.append(prepped["wr"])
        in_specs.append(pl.BlockSpec((dim, C), lambda b, g: (0, 0)))
    args += [prepped["wq_h"], prepped["wk_h"], prepped["wv_h"],
             prepped["wp_h"], prepped["bp"]]
    # Weight blocks have constant index maps (DMA'd once, resident). At dim=128 the
    # extra default pipeline buffer is negligible, so pipeline_mode=pl.Buffered(1)
    # is intentionally omitted; add it for large-dim configs on v7x (64 MiB VMEM).
    in_specs += [
        pl.BlockSpec((H, Din, hd), lambda b, g: (0, 0, 0)),
        pl.BlockSpec((H, Din, hd), lambda b, g: (0, 0, 0)),
        pl.BlockSpec((H, Din, hd), lambda b, g: (0, 0, 0)),
        pl.BlockSpec((H, hd, dim), lambda b, g: (0, 0, 0)),
        pl.BlockSpec((1, dim), lambda b, g: (0, 0)),
    ]

    return pl.pallas_call(
        kernel,
        out_shape=jax.ShapeDtypeStruct((B, N, dim), x.dtype),
        grid=(B, n_groups),
        in_specs=in_specs,
        out_specs=pl.BlockSpec((1, slab, dim), lambda b, g: (b, g, 0)),
        compiler_params=pltpu.CompilerParams(
            # Both grid axes are independent -> megacore / v7x 2-TC sharding.
            dimension_semantics=("parallel", "parallel"),
            # Resident bf16 weights + double-buffered (slab, dim) in/out blocks +
            # intermediates stay well under this on v5e/v6e/v7x.
            vmem_limit_bytes=32 * 1024 * 1024,
        ),
    )(*args)


def eff_attention_ref(x, params, *, num_heads=8, reduction=1):
    """Pure-JAX (f32) transcription of the PyTorch forward, for verification."""
    B, N, dim = x.shape
    C = dim // reduction
    H = num_heads
    hd = C // H
    scale = (dim // num_heads) ** (-0.5)
    xr = x @ params["w_reduce"].T
    qkv = (xr @ params["w_qkv"].T).reshape(B, N, 3, H, hd).transpose(2, 0, 3, 1, 4)
    q, k, v = qkv[0], qkv[1], qkv[2]
    cs = math.ceil(N // 16)
    outs = []
    for c0 in range(0, N, cs):
        qc, kc, vc = q[:, :, c0:c0 + cs], k[:, :, c0:c0 + cs], v[:, :, c0:c0 + cs]
        attn = jnp.einsum("bhid,bhjd->bhij", qc, kc) * scale
        attn = jax.nn.softmax(attn, axis=-1)
        # attn_drop with p=0.0 is the identity in eval
        oc = jnp.einsum("bhij,bhjd->bhid", attn, vc).transpose(0, 2, 1, 3)
        outs.append(oc)
    out = jnp.concatenate(outs, axis=1).reshape(B, N, C)
    return out @ params["w_proj"].T + params["b_proj"]


def init_params(key, dim, reduction=1):
    C = dim // reduction
    k1, k2, k3, k4 = jax.random.split(key, 4)

    # deterministic synthetic init (PyTorch-Linear-like uniform bounds)
    def u(k, shape, fan_in):
        b = 1.0 / np.sqrt(fan_in)
        return jax.random.uniform(k, shape, jnp.float32, -b, b)

    return {
        "w_reduce": u(k1, (C, dim), dim),        # Linear(dim, C), bias=False
        "w_qkv":    u(k2, (3 * C, C), C),        # Linear(C, 3C), bias=False
        "w_proj":   u(k3, (dim, C), C),          # Linear(C, dim), bias=True
        "b_proj":   u(k4, (dim,), C),
    }


if __name__ == "__main__":
    B, N, dim = 2, 256, 128        # chunk = N // 16 = 16, slab = 8 * 16 = 128
    num_heads, reduction = 8, 1

    key = jax.random.PRNGKey(0)
    kx, kp = jax.random.split(key)
    x = jax.random.normal(kx, (B, N, dim), jnp.float32)
    params = init_params(kp, dim, reduction)

    # One-time host-side weight prep (hoisted out of the per-call path).
    prepped = prepare_eff_attention_params(params, dim=dim, num_heads=num_heads,
                                           reduction=reduction)

    out = eff_attention(x, prepped, num_heads=num_heads, reduction=reduction)
    out = jax.block_until_ready(out)

    ref = eff_attention_ref(x, params, num_heads=num_heads, reduction=reduction)
    # bf16 matmul inputs (f32 accumulation) + approx reciprocal -> loosened tolerance
    np.testing.assert_allclose(np.asarray(out), np.asarray(ref), rtol=3e-2, atol=3e-2)

    print("KERNEL_OK")
</pallas_src>

<mosaic_0001>
module attributes {stable_mosaic.version = 11 : i64} {
  func.func @kernel(%arg0: i32, %arg1: i32, %arg2: memref<1x128x128xf32, #tpu.memory_space<vmem>>, %arg3: memref<8x128x16xbf16, #tpu.memory_space<vmem>>, %arg4: memref<8x128x16xbf16, #tpu.memory_space<vmem>>, %arg5: memref<8x128x16xbf16, #tpu.memory_space<vmem>>, %arg6: memref<8x16x128xbf16, #tpu.memory_space<vmem>>, %arg7: memref<1x128xf32, #tpu.memory_space<vmem>>, %arg8: memref<1x128x128xf32, #tpu.memory_space<vmem>>) attributes {dimension_semantics = [#tpu.dimension_semantics<parallel>, #tpu.dimension_semantics<parallel>], iteration_bounds = array<i64: 2, 2>, scalar_prefetch = 0 : i64, scratch_operands = 0 : i64, tpu.core_type = #tpu.core_type<tc>, window_params = [{transform_indices = @transform_0, window_bounds = array<i64: 1, 128, 128>}, {pipeline_mode = #tpu.pipeline_mode<synchronous>, transform_indices = @transform_1, window_bounds = array<i64: 8, 128, 16>}, {pipeline_mode = #tpu.pipeline_mode<synchronous>, transform_indices = @transform_2, window_bounds = array<i64: 8, 128, 16>}, {pipeline_mode = #tpu.pipeline_mode<synchronous>, transform_indices = @transform_3, window_bounds = array<i64: 8, 128, 16>}, {pipeline_mode = #tpu.pipeline_mode<synchronous>, transform_indices = @transform_4, window_bounds = array<i64: 8, 16, 128>}, {pipeline_mode = #tpu.pipeline_mode<synchronous>, transform_indices = @transform_5, window_bounds = array<i64: 1, 128>}, {transform_indices = @transform_6, window_bounds = array<i64: 1, 128, 128>}]} {
    %c0 = arith.constant 0 : index
    %c0_0 = arith.constant 0 : index
    %c0_1 = arith.constant 0 : index
    %0 = vector.load %arg2[%c0, %c0_0, %c0_1] : memref<1x128x128xf32, #tpu.memory_space<vmem>>, vector<1x128x128xf32>
    %1 = vector.shape_cast %0 : vector<1x128x128xf32> to vector<128x128xf32>
    %2 = arith.truncf %1 : vector<128x128xf32> to vector<128x128xbf16>
    %c0_2 = arith.constant 0 : index
    %c0_3 = arith.constant 0 : index
    %c0_4 = arith.constant 0 : index
    %3 = vector.load %arg3[%c0_2, %c0_3, %c0_4] : memref<8x128x16xbf16, #tpu.memory_space<vmem>>, vector<8x128x16xbf16>
    %c0_5 = arith.constant 0 : index
    %c0_6 = arith.constant 0 : index
    %c0_7 = arith.constant 0 : index
    %4 = vector.load %arg4[%c0_5, %c0_6, %c0_7] : memref<8x128x16xbf16, #tpu.memory_space<vmem>>, vector<8x128x16xbf16>
    %c0_8 = arith.constant 0 : index
    %c0_9 = arith.constant 0 : index
    %c0_10 = arith.constant 0 : index
    %5 = vector.load %arg5[%c0_8, %c0_9, %c0_10] : memref<8x128x16xbf16, #tpu.memory_space<vmem>>, vector<8x128x16xbf16>
    %c0_11 = arith.constant 0 : index
    %c0_12 = arith.constant 0 : index
    %c0_13 = arith.constant 0 : index
    %6 = vector.load %arg6[%c0_11, %c0_12, %c0_13] : memref<8x16x128xbf16, #tpu.memory_space<vmem>>, vector<8x16x128xbf16>
    %c0_14 = arith.constant 0 : index
    %c0_15 = arith.constant 0 : index
    %7 = vector.load %arg7[%c0_14, %c0_15] : memref<1x128xf32, #tpu.memory_space<vmem>>, vector<1x128xf32>
    %8 = vector.shape_cast %2 : vector<128x128xbf16> to vector<1x128x128xbf16>
    %9 = vector.shape_cast %8 : vector<1x128x128xbf16> to vector<1x128x128xbf16>
    %10 = vector.broadcast %9 : vector<1x128x128xbf16> to vector<8x128x128xbf16>
    "tpu.trace_start"() <{level = 10 : i32, message = "hnc,hcd->hnd"}> : () -> ()
    %cst = arith.constant dense<0.000000e+00> : vector<8x128x16xf32>
    %11 = tpu.matmul %10, %3, %cst {dimension_numbers = #tpu.dot_dimension_numbers<[2], [1], [1], [2], [0, 0, 0, 1, 1, 2], [0], [0]>} : vector<8x128x128xbf16>, vector<8x128x16xbf16>, vector<8x128x16xf32> -> vector<8x128x16xf32>
    "tpu.trace_stop"() : () -> ()
    %12 = arith.truncf %11 : vector<8x128x16xf32> to vector<8x128x16xbf16>
    "tpu.trace_start"() <{level = 10 : i32, message = "hnc,hcd->hnd"}> : () -> ()
    %cst_16 = arith.constant dense<0.000000e+00> : vector<8x128x16xf32>
    %13 = tpu.matmul %10, %4, %cst_16 {dimension_numbers = #tpu.dot_dimension_numbers<[2], [1], [1], [2], [0, 0, 0, 1, 1, 2], [0], [0]>} : vector<8x128x128xbf16>, vector<8x128x16xbf16>, vector<8x128x16xf32> -> vector<8x128x16xf32>
    "tpu.trace_stop"() : () -> ()
    %14 = arith.truncf %13 : vector<8x128x16xf32> to vector<8x128x16xbf16>
    "tpu.trace_start"() <{level = 10 : i32, message = "hnc,hcd->hnd"}> : () -> ()
    %cst_17 = arith.constant dense<0.000000e+00> : vector<8x128x16xf32>
    %15 = tpu.matmul %10, %5, %cst_17 {dimension_numbers = #tpu.dot_dimension_numbers<[2], [1], [1], [2], [0, 0, 0, 1, 1, 2], [0], [0]>} : vector<8x128x128xbf16>, vector<8x128x16xbf16>, vector<8x128x16xf32> -> vector<8x128x16xf32>
    "tpu.trace_stop"() : () -> ()
    %16 = arith.truncf %15 : vector<8x128x16xf32> to vector<8x128x16xbf16>
    %17 = vector.extract_strided_slice %12 {offsets = [0, 0, 0], sizes = [8, 16, 16], strides = [1, 1, 1]} : vector<8x128x16xbf16> to vector<8x16x16xbf16>
    %18 = vector.extract_strided_slice %12 {offsets = [0, 16, 0], sizes = [8, 16, 16], strides = [1, 1, 1]} : vector<8x128x16xbf16> to vector<8x16x16xbf16>
    %19 = vector.extract_strided_slice %12 {offsets = [0, 32, 0], sizes = [8, 16, 16], strides = [1, 1, 1]} : vector<8x128x16xbf16> to vector<8x16x16xbf16>
    %20 = vector.extract_strided_slice %12 {offsets = [0, 48, 0], sizes = [8, 16, 16], strides = [1, 1, 1]} : vector<8x128x16xbf16> to vector<8x16x16xbf16>
    %21 = vector.extract_strided_slice %12 {offsets = [0, 64, 0], sizes = [8, 16, 16], strides = [1, 1, 1]} : vector<8x128x16xbf16> to vector<8x16x16xbf16>
    %22 = vector.extract_strided_slice %12 {offsets = [0, 80, 0], sizes = [8, 16, 16], strides = [1, 1, 1]} : vector<8x128x16xbf16> to vector<8x16x16xbf16>
    %23 = vector.extract_strided_slice %12 {offsets = [0, 96, 0], sizes = [8, 16, 16], strides = [1, 1, 1]} : vector<8x128x16xbf16> to vector<8x16x16xbf16>
    %24 = vector.extract_strided_slice %12 {offsets = [0, 112, 0], sizes = [8, 16, 16], strides = [1, 1, 1]} : vector<8x128x16xbf16> to vector<8x16x16xbf16>
    %25 = tpu.concatenate %17, %18, %19, %20, %21, %22, %23, %24 in 0 : vector<8x16x16xbf16>, vector<8x16x16xbf16>, vector<8x16x16xbf16>, vector<8x16x16xbf16>, vector<8x16x16xbf16>, vector<8x16x16xbf16>, vector<8x16x16xbf16>, vector<8x16x16xbf16> -> vector<64x16x16xbf16>
    %26 = vector.extract_strided_slice %14 {offsets = [0, 0, 0], sizes = [8, 16, 16], strides = [1, 1, 1]} : vector<8x128x16xbf16> to vector<8x16x16xbf16>
    %27 = vector.extract_strided_slice %14 {offsets = [0, 16, 0], sizes = [8, 16, 16], strides = [1, 1, 1]} : vector<8x128x16xbf16> to vector<8x16x16xbf16>
    %28 = vector.extract_strided_slice %14 {offsets = [0, 32, 0], sizes = [8, 16, 16], strides = [1, 1, 1]} : vector<8x128x16xbf16> to vector<8x16x16xbf16>
    %29 = vector.extract_strided_slice %14 {offsets = [0, 48, 0], sizes = [8, 16, 16], strides = [1, 1, 1]} : vector<8x128x16xbf16> to vector<8x16x16xbf16>
    %30 = vector.extract_strided_slice %14 {offsets = [0, 64, 0], sizes = [8, 16, 16], strides = [1, 1, 1]} : vector<8x128x16xbf16> to vector<8x16x16xbf16>
    %31 = vector.extract_strided_slice %14 {offsets = [0, 80, 0], sizes = [8, 16, 16], strides = [1, 1, 1]} : vector<8x128x16xbf16> to vector<8x16x16xbf16>
    %32 = vector.extract_strided_slice %14 {offsets = [0, 96, 0], sizes = [8, 16, 16], strides = [1, 1, 1]} : vector<8x128x16xbf16> to vector<8x16x16xbf16>
    %33 = vector.extract_strided_slice %14 {offsets = [0, 112, 0], sizes = [8, 16, 16], strides = [1, 1, 1]} : vector<8x128x16xbf16> to vector<8x16x16xbf16>
    %34 = tpu.concatenate %26, %27, %28, %29, %30, %31, %32, %33 in 0 : vector<8x16x16xbf16>, vector<8x16x16xbf16>, vector<8x16x16xbf16>, vector<8x16x16xbf16>, vector<8x16x16xbf16>, vector<8x16x16xbf16>, vector<8x16x16xbf16>, vector<8x16x16xbf16> -> vector<64x16x16xbf16>
    %35 = vector.extract_strided_slice %16 {offsets = [0, 0, 0], sizes = [8, 16, 16], strides = [1, 1, 1]} : vector<8x128x16xbf16> to vector<8x16x16xbf16>
    %36 = vector.extract_strided_slice %16 {offsets = [0, 16, 0], sizes = [8, 16, 16], strides = [1, 1, 1]} : vector<8x128x16xbf16> to vector<8x16x16xbf16>
    %37 = vector.extract_strided_slice %16 {offsets = [0, 32, 0], sizes = [8, 16, 16], strides = [1, 1, 1]} : vector<8x128x16xbf16> to vector<8x16x16xbf16>
    %38 = vector.extract_strided_slice %16 {offsets = [0, 48, 0], sizes = [8, 16, 16], strides = [1, 1, 1]} : vector<8x128x16xbf16> to vector<8x16x16xbf16>
    %39 = vector.extract_strided_slice %16 {offsets = [0, 64, 0], sizes = [8, 16, 16], strides = [1, 1, 1]} : vector<8x128x16xbf16> to vector<8x16x16xbf16>
    %40 = vector.extract_strided_slice %16 {offsets = [0, 80, 0], sizes = [8, 16, 16], strides = [1, 1, 1]} : vector<8x128x16xbf16> to vector<8x16x16xbf16>
    %41 = vector.extract_strided_slice %16 {offsets = [0, 96, 0], sizes = [8, 16, 16], strides = [1, 1, 1]} : vector<8x128x16xbf16> to vector<8x16x16xbf16>
    %42 = vector.extract_strided_slice %16 {offsets = [0, 112, 0], sizes = [8, 16, 16], strides = [1, 1, 1]} : vector<8x128x16xbf16> to vector<8x16x16xbf16>
    %43 = tpu.concatenate %35, %36, %37, %38, %39, %40, %41, %42 in 0 : vector<8x16x16xbf16>, vector<8x16x16xbf16>, vector<8x16x16xbf16>, vector<8x16x16xbf16>, vector<8x16x16xbf16>, vector<8x16x16xbf16>, vector<8x16x16xbf16>, vector<8x16x16xbf16> -> vector<64x16x16xbf16>
    "tpu.trace_start"() <{level = 10 : i32, message = "bqd,bkd->bqk"}> : () -> ()
    %cst_18 = arith.constant dense<0.000000e+00> : vector<64x16x16xf32>
    %44 = tpu.matmul %25, %34, %cst_18 {dimension_numbers = #tpu.dot_dimension_numbers<[2], [2], [1], [1], [0, 0, 0, 1, 1, 1], [0], [0]>} : vector<64x16x16xbf16>, vector<64x16x16xbf16>, vector<64x16x16xf32> -> vector<64x16x16xf32>
    "tpu.trace_stop"() : () -> ()
    %cst_19 = arith.constant dense<0xFF800000> : vector<64x16xf32>
    %45 = vector.multi_reduction <maximumf>, %44, %cst_19 [2] : vector<64x16x16xf32> to vector<64x16xf32>
    %46 = vector.shape_cast %45 : vector<64x16xf32> to vector<64x16x1xf32>
    %47 = vector.broadcast %46 : vector<64x16x1xf32> to vector<64x16x16xf32>
    %48 = arith.subf %44, %47 : vector<64x16x16xf32>
    %49 = math.exp %48 : vector<64x16x16xf32>
    %cst_20 = arith.constant dense<0.000000e+00> : vector<64x16xf32>
    %50 = vector.multi_reduction <add>, %49, %cst_20 [2] : vector<64x16x16xf32> to vector<64x16xf32>
    %51 = vector.shape_cast %50 : vector<64x16xf32> to vector<64x16x1xf32>
    %52 = tpu.reciprocal %51 {approx = true} : vector<64x16x1xf32> -> vector<64x16x1xf32>
    %53 = vector.broadcast %52 : vector<64x16x1xf32> to vector<64x16x16xf32>
    %54 = arith.mulf %49, %53 : vector<64x16x16xf32>
    %55 = arith.truncf %54 : vector<64x16x16xf32> to vector<64x16x16xbf16>
    "tpu.trace_start"() <{level = 10 : i32, message = "bqk,bkd->bqd"}> : () -> ()
    %cst_21 = arith.constant dense<0.000000e+00> : vector<64x16x16xf32>
    %56 = tpu.matmul %55, %43, %cst_21 {dimension_numbers = #tpu.dot_dimension_numbers<[2], [1], [1], [2], [0, 0, 0, 1, 1, 2], [0], [0]>} : vector<64x16x16xbf16>, vector<64x16x16xbf16>, vector<64x16x16xf32> -> vector<64x16x16xf32>
    "tpu.trace_stop"() : () -> ()
    %57 = arith.truncf %56 : vector<64x16x16xf32> to vector<64x16x16xbf16>
    %58 = vector.extract_strided_slice %57 {offsets = [0, 0, 0], sizes = [8, 16, 16], strides = [1, 1, 1]} : vector<64x16x16xbf16> to vector<8x16x16xbf16>
    %59 = vector.extract_strided_slice %57 {offsets = [8, 0, 0], sizes = [8, 16, 16], strides = [1, 1, 1]} : vector<64x16x16xbf16> to vector<8x16x16xbf16>
    %60 = vector.extract_strided_slice %57 {offsets = [16, 0, 0], sizes = [8, 16, 16], strides = [1, 1, 1]} : vector<64x16x16xbf16> to vector<8x16x16xbf16>
    %61 = vector.extract_strided_slice %57 {offsets = [24, 0, 0], sizes = [8, 16, 16], strides = [1, 1, 1]} : vector<64x16x16xbf16> to vector<8x16x16xbf16>
    %62 = vector.extract_strided_slice %57 {offsets = [32, 0, 0], sizes = [8, 16, 16], strides = [1, 1, 1]} : vector<64x16x16xbf16> to vector<8x16x16xbf16>
    %63 = vector.extract_strided_slice %57 {offsets = [40, 0, 0], sizes = [8, 16, 16], strides = [1, 1, 1]} : vector<64x16x16xbf16> to vector<8x16x16xbf16>
    %64 = vector.extract_strided_slice %57 {offsets = [48, 0, 0], sizes = [8, 16, 16], strides = [1, 1, 1]} : vector<64x16x16xbf16> to vector<8x16x16xbf16>
    %65 = vector.extract_strided_slice %57 {offsets = [56, 0, 0], sizes = [8, 16, 16], strides = [1, 1, 1]} : vector<64x16x16xbf16> to vector<8x16x16xbf16>
    %66 = tpu.concatenate %58, %59, %60, %61, %62, %63, %64, %65 in 1 : vector<8x16x16xbf16>, vector<8x16x16xbf16>, vector<8x16x16xbf16>, vector<8x16x16xbf16>, vector<8x16x16xbf16>, vector<8x16x16xbf16>, vector<8x16x16xbf16>, vector<8x16x16xbf16> -> vector<8x128x16xbf16>
    %67 = vector.extract_strided_slice %66 {offsets = [0, 0, 0], sizes = [1, 128, 16], strides = [1, 1, 1]} : vector<8x128x16xbf16> to vector<1x128x16xbf16>
    %68 = vector.shape_cast %67 : vector<1x128x16xbf16> to vector<128x16xbf16>
    %69 = vector.extract_strided_slice %6 {offsets = [0, 0, 0], sizes = [1, 16, 128], strides = [1, 1, 1]} : vector<8x16x128xbf16> to vector<1x16x128xbf16>
    %70 = vector.shape_cast %69 : vector<1x16x128xbf16> to vector<16x128xbf16>
    %cst_22 = arith.constant dense<0.000000e+00> : vector<128x128xf32>
    %71 = tpu.matmul %68, %70, %cst_22 {dimension_numbers = #tpu.dot_dimension_numbers<[1], [0], [0], [1], [0, 0, 1, 1], [], []>} : vector<128x16xbf16>, vector<16x128xbf16>, vector<128x128xf32> -> vector<128x128xf32>
    %72 = vector.extract_strided_slice %66 {offsets = [1, 0, 0], sizes = [1, 128, 16], strides = [1, 1, 1]} : vector<8x128x16xbf16> to vector<1x128x16xbf16>
    %73 = vector.shape_cast %72 : vector<1x128x16xbf16> to vector<128x16xbf16>
    %74 = vector.extract_strided_slice %6 {offsets = [1, 0, 0], sizes = [1, 16, 128], strides = [1, 1, 1]} : vector<8x16x128xbf16> to vector<1x16x128xbf16>
    %75 = vector.shape_cast %74 : vector<1x16x128xbf16> to vector<16x128xbf16>
    %cst_23 = arith.constant dense<0.000000e+00> : vector<128x128xf32>
    %76 = tpu.matmul %73, %75, %cst_23 {dimension_numbers = #tpu.dot_dimension_numbers<[1], [0], [0], [1], [0, 0, 1, 1], [], []>} : vector<128x16xbf16>, vector<16x128xbf16>, vector<128x128xf32> -> vector<128x128xf32>
    %77 = arith.addf %71, %76 : vector<128x128xf32>
    %78 = vector.extract_strided_slice %66 {offsets = [2, 0, 0], sizes = [1, 128, 16], strides = [1, 1, 1]} : vector<8x128x16xbf16> to vector<1x128x16xbf16>
    %79 = vector.shape_cast %78 : vector<1x128x16xbf16> to vector<128x16xbf16>
    %80 = vector.extract_strided_slice %6 {offsets = [2, 0, 0], sizes = [1, 16, 128], strides = [1, 1, 1]} : vector<8x16x128xbf16> to vector<1x16x128xbf16>
    %81 = vector.shape_cast %80 : vector<1x16x128xbf16> to vector<16x128xbf16>
    %cst_24 = arith.constant dense<0.000000e+00> : vector<128x128xf32>
    %82 = tpu.matmul %79, %81, %cst_24 {dimension_numbers = #tpu.dot_dimension_numbers<[1], [0], [0], [1], [0, 0, 1, 1], [], []>} : vector<128x16xbf16>, vector<16x128xbf16>, vector<128x128xf32> -> vector<128x128xf32>
    %83 = arith.addf %77, %82 : vector<128x128xf32>
    %84 = vector.extract_strided_slice %66 {offsets = [3, 0, 0], sizes = [1, 128, 16], strides = [1, 1, 1]} : vector<8x128x16xbf16> to vector<1x128x16xbf16>
    %85 = vector.shape_cast %84 : vector<1x128x16xbf16> to vector<128x16xbf16>
    %86 = vector.extract_strided_slice %6 {offsets = [3, 0, 0], sizes = [1, 16, 128], strides = [1, 1, 1]} : vector<8x16x128xbf16> to vector<1x16x128xbf16>
    %87 = vector.shape_cast %86 : vector<1x16x128xbf16> to vector<16x128xbf16>
    %cst_25 = arith.constant dense<0.000000e+00> : vector<128x128xf32>
    %88 = tpu.matmul %85, %87, %cst_25 {dimension_numbers = #tpu.dot_dimension_numbers<[1], [0], [0], [1], [0, 0, 1, 1], [], []>} : vector<128x16xbf16>, vector<16x128xbf16>, vector<128x128xf32> -> vector<128x128xf32>
    %89 = arith.addf %83, %88 : vector<128x128xf32>
    %90 = vector.extract_strided_slice %66 {offsets = [4, 0, 0], sizes = [1, 128, 16], strides = [1, 1, 1]} : vector<8x128x16xbf16> to vector<1x128x16xbf16>
    %91 = vector.shape_cast %90 : vector<1x128x16xbf16> to vector<128x16xbf16>
    %92 = vector.extract_strided_slice %6 {offsets = [4, 0, 0], sizes = [1, 16, 128], strides = [1, 1, 1]} : vector<8x16x128xbf16> to vector<1x16x128xbf16>
    %93 = vector.shape_cast %92 : vector<1x16x128xbf16> to vector<16x128xbf16>
    %cst_26 = arith.constant dense<0.000000e+00> : vector<128x128xf32>
    %94 = tpu.matmul %91, %93, %cst_26 {dimension_numbers = #tpu.dot_dimension_numbers<[1], [0], [0], [1], [0, 0, 1, 1], [], []>} : vector<128x16xbf16>, vector<16x128xbf16>, vector<128x128xf32> -> vector<128x128xf32>
    %95 = arith.addf %89, %94 : vector<128x128xf32>
    %96 = vector.extract_strided_slice %66 {offsets = [5, 0, 0], sizes = [1, 128, 16], strides = [1, 1, 1]} : vector<8x128x16xbf16> to vector<1x128x16xbf16>
    %97 = vector.shape_cast %96 : vector<1x128x16xbf16> to vector<128x16xbf16>
    %98 = vector.extract_strided_slice %6 {offsets = [5, 0, 0], sizes = [1, 16, 128], strides = [1, 1, 1]} : vector<8x16x128xbf16> to vector<1x16x128xbf16>
    %99 = vector.shape_cast %98 : vector<1x16x128xbf16> to vector<16x128xbf16>
    %cst_27 = arith.constant dense<0.000000e+00> : vector<128x128xf32>
    %100 = tpu.matmul %97, %99, %cst_27 {dimension_numbers = #tpu.dot_dimension_numbers<[1], [0], [0], [1], [0, 0, 1, 1], [], []>} : vector<128x16xbf16>, vector<16x128xbf16>, vector<128x128xf32> -> vector<128x128xf32>
    %101 = arith.addf %95, %100 : vector<128x128xf32>
    %102 = vector.extract_strided_slice %66 {offsets = [6, 0, 0], sizes = [1, 128, 16], strides = [1, 1, 1]} : vector<8x128x16xbf16> to vector<1x128x16xbf16>
    %103 = vector.shape_cast %102 : vector<1x128x16xbf16> to vector<128x16xbf16>
    %104 = vector.extract_strided_slice %6 {offsets = [6, 0, 0], sizes = [1, 16, 128], strides = [1, 1, 1]} : vector<8x16x128xbf16> to vector<1x16x128xbf16>
    %105 = vector.shape_cast %104 : vector<1x16x128xbf16> to vector<16x128xbf16>
    %cst_28 = arith.constant dense<0.000000e+00> : vector<128x128xf32>
    %106 = tpu.matmul %103, %105, %cst_28 {dimension_numbers = #tpu.dot_dimension_numbers<[1], [0], [0], [1], [0, 0, 1, 1], [], []>} : vector<128x16xbf16>, vector<16x128xbf16>, vector<128x128xf32> -> vector<128x128xf32>
    %107 = arith.addf %101, %106 : vector<128x128xf32>
    %108 = vector.extract_strided_slice %66 {offsets = [7, 0, 0], sizes = [1, 128, 16], strides = [1, 1, 1]} : vector<8x128x16xbf16> to vector<1x128x16xbf16>
    %109 = vector.shape_cast %108 : vector<1x128x16xbf16> to vector<128x16xbf16>
    %110 = vector.extract_strided_slice %6 {offsets = [7, 0, 0], sizes = [1, 16, 128], strides = [1, 1, 1]} : vector<8x16x128xbf16> to vector<1x16x128xbf16>
    %111 = vector.shape_cast %110 : vector<1x16x128xbf16> to vector<16x128xbf16>
    %cst_29 = arith.constant dense<0.000000e+00> : vector<128x128xf32>
    %112 = tpu.matmul %109, %111, %cst_29 {dimension_numbers = #tpu.dot_dimension_numbers<[1], [0], [0], [1], [0, 0, 1, 1], [], []>} : vector<128x16xbf16>, vector<16x128xbf16>, vector<128x128xf32> -> vector<128x128xf32>
    %113 = arith.addf %107, %112 : vector<128x128xf32>
    %114 = vector.broadcast %7 : vector<1x128xf32> to vector<128x128xf32>
    %115 = arith.addf %113, %114 : vector<128x128xf32>
    %c0_30 = arith.constant 0 : index
    %c0_31 = arith.constant 0 : index
    %c0_32 = arith.constant 0 : index
    %116 = vector.load %arg8[%c0_30, %c0_31, %c0_32] : memref<1x128x128xf32, #tpu.memory_space<vmem>>, vector<1x128x128xf32>
    %117 = vector.shape_cast %116 : vector<1x128x128xf32> to vector<128x128xf32>
    %118 = vector.shape_cast %115 : vector<128x128xf32> to vector<1x128x128xf32>
    tpu.vector_store %arg8[%c0_30, %c0_31, %c0_32], %118 {strides = array<i32>} : memref<1x128x128xf32, #tpu.memory_space<vmem>>, vector<1x128x128xf32>,
    return
  }
  func.func @transform_0(%arg0: i32, %arg1: i32) -> (i32, i32, i32) {
    %c0_i32 = arith.constant 0 : i32
    %c0_i32_0 = arith.constant 0 : i32
    return %arg0, %arg1, %c0_i32 : i32, i32, i32
  }
  func.func @transform_1(%arg0: i32, %arg1: i32) -> (i32, i32, i32) {
    %c0_i32 = arith.constant 0 : i32
    %c0_i32_0 = arith.constant 0 : i32
    %c0_i32_1 = arith.constant 0 : i32
    %c0_i32_2 = arith.constant 0 : i32
    return %c0_i32, %c0_i32_0, %c0_i32_1 : i32, i32, i32
  }
  func.func @transform_2(%arg0: i32, %arg1: i32) -> (i32, i32, i32) {
    %c0_i32 = arith.constant 0 : i32
    %c0_i32_0 = arith.constant 0 : i32
    %c0_i32_1 = arith.constant 0 : i32
    %c0_i32_2 = arith.constant 0 : i32
    return %c0_i32, %c0_i32_0, %c0_i32_1 : i32, i32, i32
  }
  func.func @transform_3(%arg0: i32, %arg1: i32) -> (i32, i32, i32) {
    %c0_i32 = arith.constant 0 : i32
    %c0_i32_0 = arith.constant 0 : i32
    %c0_i32_1 = arith.constant 0 : i32
    %c0_i32_2 = arith.constant 0 : i32
    return %c0_i32, %c0_i32_0, %c0_i32_1 : i32, i32, i32
  }
  func.func @transform_4(%arg0: i32, %arg1: i32) -> (i32, i32, i32) {
    %c0_i32 = arith.constant 0 : i32
    %c0_i32_0 = arith.constant 0 : i32
    %c0_i32_1 = arith.constant 0 : i32
    %c0_i32_2 = arith.constant 0 : i32
    return %c0_i32, %c0_i32_0, %c0_i32_1 : i32, i32, i32
  }
  func.func @transform_5(%arg0: i32, %arg1: i32) -> (i32, i32) {
    %c0_i32 = arith.constant 0 : i32
    %c0_i32_0 = arith.constant 0 : i32
    %c0_i32_1 = arith.constant 0 : i32
    return %c0_i32, %c0_i32_0 : i32, i32
  }
  func.func @transform_6(%arg0: i32, %arg1: i32) -> (i32, i32, i32) {
    %c0_i32 = arith.constant 0 : i32
    %c0_i32_0 = arith.constant 0 : i32
    return %arg0, %arg1, %c0_i32 : i32, i32, i32
  }
}

</mosaic_0001>

<bundles_post_ra>
// kernel: tpu_custom_call.1
= control target key start
LH: loop header
LB: loop body
LE: loop exit
PB: predicated region body
PF: predicated region fallthrough
CT: control target
= control target key end

     0   :  { %11 = vsyncpa [#allocation3], 0  ;;  %s17141_s0 = inlined_call_operand.vmem [shape: f32[2,256,128], index: 0, kind: input, shape index: {}]   ;;  %s17142_s1 = inlined_call_operand.vmem [shape: bf16[8,128,16], index: 1, kind: input, shape index: {}]   ;;  %s17143_s2 = inlined_call_operand.vmem [shape: bf16[8,128,16], index: 2, kind: input, shape index: {}]   ;;  %s17144_s3 = inlined_call_operand.vmem [shape: bf16[8,128,16], index: 3, kind: input, shape index: {}]   ;;  %s17145_s4 = inlined_call_operand.vmem [shape: bf16[8,16,128], index: 4, kind: input, shape index: {}]   ;;  %s17146_s5 = inlined_call_operand.vmem [shape: f32[1,128], index: 5, kind: input, shape index: {}]   ;;  %s17147_s6 = inlined_call_operand.hbm [shape: f32[2,256,128], index: 6, kind: output, shape index: {}]  }
   0x1   :  { %13 = vsyncpa [#allocation3 + $0x1], 0  ;;  %s11961_s21 = smov 0   ;;  %s11963_s22 = smov 0  }
   0x2   :  { %s11965_s23 = smov 0   ;;  %s11967_s24 = smov 0  }
   0x3   :  { %s11969_s25 = smov 0   ;;  %s11971_s26 = smov 0  }
   0x4   :  { %s11973_s27 = smov 0   ;;  %s11975_s28 = smov 0  }
   0x5 LB: > { %s10035_s29 = sadd.s32 4294967295, %s11922_s28   ;;  %s10036_s30 = sadd.s32 4294967294, %s11922_s28   ;;  %s11922_s28 = sphi %s11975_s28, %s19_s28   ;;  %s11918_s27 = sphi %s11973_s27, %s18847_s27   ;;  %s11914_s26 = sphi %s11971_s26, %s18846_s26   ;;  %s11910_s25 = sphi %s11969_s25, %s18845_s25   ;;  %s11906_s24 = sphi %s11967_s24, %s18844_s24   ;;  %s11902_s23 = sphi %s11965_s23, %s18843_s23   ;;  %s11898_s22 = sphi %s11963_s22, %s18842_s22   ;;  %s11894_s21 = sphi %s11961_s21, %s18841_s21  }
   0x6   : > { %s28_s7 = sadd.s32 1, %s11914_s26  ;;  %s31_s8 = sadd.s32 1, %s11918_s27 }
   0x7   : > { %p29_p0 = scmp.ge.s32.totalorder %s28_s7, 2  ;;  %p183_p1 = scmp.ne.s32.totalorder %s11902_s23, %s11898_s22 }
   0x8   : > { %p184_p2 = scmp.eq.s32.totalorder %s10035_s29, 3  ;;  %p189_p5 = scmp.ne.s32.totalorder %s11898_s22, %s11894_s21 }
   0x9   : > { %s18849_s7 = smov (%p29_p0, %s28_s7), 0  ;;  %s18851_s8 = smov (!%p29_p0, %s31_s8), %s11918_s27 }
   0xa   : > { %s169_s9 = ssub.s32 %s11914_s26, %s18849_s7  ;;  %p12012_p3 = por %p184_p2, %p183_p1 }
   0xb   : > { %p33_p4 = scmp.ge.s32.totalorder %s18851_s8, 2  ;;  %p190_p6 = scmp.eq.s32.totalorder %s10036_s30, 3 }
   0xc   : > { %p10039_p7 = scmp.ge.s32.totalorder %s11922_s28, 1  ;;  %p236_p9 = scmp.lt.s32.totalorder %s11922_s28, 5 }
   0xd   : > { %s18853_s8 = smov (%p33_p4, %s18851_s8), 0  ;;  %p12021_p8 = por %p190_p6, %p189_p5 }
   0xe   : > { %17598 = sst [smem:[#allocation5_spill]] %s18853_s8  ;;  %s168_s12 = ssub.s32 %s11918_s27, %s18853_s8 }
   0xf   : > { %s173_s13 = sadd.s32 1, %s11902_s23  ;;  %s170_s14 = sor.u32 %s169_s9, %s168_s12 }
  0x10   : > { %p237_p10 = pnand %p10039_p7, %p236_p9  ;;  %p171_p11 = scmp.eq.s32.totalorder %s170_s14, 0 }
  0x12   : > { %s12030_s15 = scalar_select %p171_p11, %s11902_s23, %s173_s13  }
  0x13   : > { %240 = sbr.rel (%p237_p10) target bundleno = 2167 (0x877), region = 44 }
  0x18   : > { %v11049_v0 = vld [vmem:[%s17142_s1 + $0x38] sm:$0xff]  ;;  %s12042_s30 = sshll.u32 %s11906_s24, 4  ;;  %p271_p12 = scmp.lt.s32.totalorder %s11910_s25, 1  ;;  %v11048_v4 = vld [vmem:[%s17142_s1 + $0x30] sm:$0xff]  ;;  %v11047_v8 = vld [vmem:[%s17142_s1 + $0x28] sm:$0xff]  ;;  %vm3485_vm0 = vcmask 130048  }
  0x19   : > { %v11057_v1 = vld [vmem:[%s17142_s1 + $0x78] sm:$0xff]  ;;  %p273_p13 = scmp.lt.s32.totalorder %s12042_s30, 31  ;;  %811 = vmatpush.bf16.msra.mxu0 %v11049_v0  ;;  %v11056_v5 = vld [vmem:[%s17142_s1 + $0x70] sm:$0xff]  ;;  %v11055_v9 = vld [vmem:[%s17142_s1 + $0x68] sm:$0xff]  ;;  %s11038_s29 = sshll.u32 %s11910_s25, 5 }
  0x1a   : > { %v11065_v2 = vld [vmem:[%s17142_s1 + $0xb8] sm:$0xff]  ;;  %908 = vmatpush.bf16.msra.mxu1 %v11057_v1  ;;  %s272_s24 = scalar_select %p271_p12, %s11910_s25, 1  ;;  %v11064_v6 = vld [vmem:[%s17142_s1 + $0xb0] sm:$0xff]  ;;  %v11063_v10 = vld [vmem:[%s17142_s1 + $0xa8] sm:$0xff] }
  0x1b   : > { %v11073_v3 = vld [vmem:[%s17142_s1 + $0xf8] sm:$0xff]  ;;  %1005 = vmatpush.bf16.msra.mxu2 %v11065_v2  ;;  %v11072_v7 = vld [vmem:[%s17142_s1 + $0xf0] sm:$0xff]  ;;  %s274_s9 = scalar_select %p273_p13, %s12042_s30, 31  ;;  %v11071_v11 = vld [vmem:[%s17142_s1 + $0xe8] sm:$0xff] }
  0x1c   : > { %1102 = vmatpush.bf16.msra.mxu3 %v11073_v3  ;;  %s10042_s17 = sshll.u32 %s272_s24, 5  ;;  %v11046_v12 = vld [vmem:[%s17142_s1 + $0x20] sm:$0xff]  ;;  %v11045_v16 = vld [vmem:[%s17142_s1 + $0x18] sm:$0xff]  ;;  %v11044_v20 = vld [vmem:[%s17142_s1 + $0x10] sm:$0xff]  ;;  %s267_s24 = sand.u32 1, %s11898_s22  }
  0x1d   : > { %812 = vmatpush.bf16.msra.mxu0 %v11048_v4  ;;  %s276_s8 = sadd.s32 %s10042_s17, %s274_s9  ;;  %v11054_v13 = vld [vmem:[%s17142_s1 + $0x60] sm:$0xff]  ;;  %v11053_v17 = vld [vmem:[%s17142_s1 + $0x58] sm:$0xff]  ;;  %v11052_v21 = vld [vmem:[%s17142_s1 + $0x50] sm:$0xff]  ;;  %s10040_s18 = sshll.u32 %s267_s24, 7 }
  0x1e   : > { %909 = vmatpush.bf16.msra.mxu1 %v11056_v5  ;;  %v11062_v14 = vld [vmem:[%s17142_s1 + $0xa0] sm:$0xff]  ;;  %s10043_s9 = sshll.u32 %s276_s8, 3  ;;  %v11061_v18 = vld [vmem:[%s17142_s1 + $0x98] sm:$0xff]  ;;  %v11060_v24 = vld [vmem:[%s17142_s1 + $0x90] sm:$0xff]  ;;  %s17048_s17 = scalar_lea.vmem [#allocation2], %s10040_s18 }
  0x1f   : > { %1006 = vmatpush.bf16.msra.mxu2 %v11064_v6  ;;  %v11070_v15 = vld [vmem:[%s17142_s1 + $0xe0] sm:$0xff]  ;;  %v11069_v19 = vld [vmem:[%s17142_s1 + $0xd8] sm:$0xff]  ;;  %s12102_s20 = scalar_lea.vmem %s17141_s0, %s10043_s9  ;;  %v11068_v25 = vld [vmem:[%s17142_s1 + $0xd0] sm:$0xff]  ;;  %s9947_s12 = sadd.s32 %s11038_s29, %s12042_s30 }
  0x20   : > { %1103 = vmatpush.bf16.msra.mxu3 %v11072_v7  ;;  %v282_v22 = vld [vmem:[%s12102_s20] sm:$0xff]  ;;  %v283_v23 = vld [vmem:[%s12102_s20 + $0x8] sm:$0xff]  ;;  %v11081_v38 = vld [vmem:[%s17142_s1 + $0x138] sm:$0xff]  ;;  %s11039_s13 = sshll.u32 %s9947_s12, 3  ;;  %s9950_s30 = sshll.u32 %s17048_s17, 4  ;;  %s9951_s30 = int_to_ptr.vmem [resolvable:$true] %s9950_s30 }
  0x21   : > { %813 = vmatpush.bf16.msra.mxu0 %v11047_v8  ;;  %v298_v26 = vpack.c.bf16 %v282_v22, %v282_v22  ;;  %v299_v27 = vpack.c.bf16 %v283_v23, %v283_v23  ;;  %v11043_v28 = vld [vmem:[%s17142_s1 + $0x8] sm:$0xff]  ;;  %v11042_v34 = vld [vmem:[%s17142_s1] sm:$0xff]  ;;  %v11097_v39 = vld [vmem:[%s17142_s1 + $0x1b8] sm:$0xff]  ;;  %s9949_s16 = scalar_lea.hbm %s17147_s6, %s11039_s13  ;;  %s9936_s9 = scalar_lea.sflag [#allocation3], %s267_s24 }
  0x22   : > { %910 = vmatpush.bf16.msra.mxu1 %v11055_v9  ;;  %v11051_v29 = vld [vmem:[%s17142_s1 + $0x48] sm:$0xff]  ;;  %v11050_v35 = vld [vmem:[%s17142_s1 + $0x40] sm:$0xff]  ;;  %v11105_v41 = vld [vmem:[%s17142_s1 + $0x1f8] sm:$0xff]  ;;  %s11848_s12 = scalar_lea.hbm %s17147_s6, 512 }
  0x23   : > { %1007 = vmatpush.bf16.msra.mxu2 %v11063_v10  ;;  %v11059_v30 = vld [vmem:[%s17142_s1 + $0x88] sm:$0xff]  ;;  %v731_v32 = vunpack.c.l.b16 %v298_v26  ;;  %v732_v33 = vunpack.c.l.b16 %v299_v27  ;;  %v11058_v36 = vld [vmem:[%s17142_s1 + $0x80] sm:$0xff]  ;;  %v11089_v42 = vld [vmem:[%s17142_s1 + $0x178] sm:$0xff] }
  0x24   : > { %1104 = vmatpush.bf16.msra.mxu3 %v11071_v11  ;;  %v11067_v31 = vld [vmem:[%s17142_s1 + $0xc8] sm:$0xff]  ;;  %v11066_v37 = vld [vmem:[%s17142_s1 + $0xc0] sm:$0xff]  ;;  %v11080_v43 = vld [vmem:[%s17142_s1 + $0x130] sm:$0xff] }
  0x25   : > { %814 = vmatpush.bf16.msra.mxu0 %v11046_v12  ;;  %v12148_v40 = vpack.c.b16 %v732_v33, %v731_v32  ;;  %v11096_v44 = vld [vmem:[%s17142_s1 + $0x1b0] sm:$0xff]  ;;  %v285_v46 = vld [vmem:[%s12102_s20 + $0x18] sm:$0xff]  ;;  %v11079_v49 = vld [vmem:[%s17142_s1 + $0x128] sm:$0xff] }
  0x26   : > { %911 = vmatpush.bf16.msra.mxu1 %v11054_v13  ;;  %v284_v45 = vld [vmem:[%s12102_s20 + $0x10] sm:$0xff]  ;;  %v11095_v50 = vld [vmem:[%s17142_s1 + $0x1a8] sm:$0xff]  ;;  %v301_v52 = vpack.c.bf16 %v285_v46, %v285_v46  ;;  %v286_v58 = vld [vmem:[%s12102_s20 + $0x20] sm:$0xff] }
  0x27   : > { %1008 = vmatpush.bf16.msra.mxu2 %v11062_v14  ;;  %v11104_v47 = vld [vmem:[%s17142_s1 + $0x1f0] sm:$0xff]  ;;  %v300_v51 = vpack.c.bf16 %v284_v45, %v284_v45  ;;  %v11103_v53 = vld [vmem:[%s17142_s1 + $0x1e8] sm:$0xff]  ;;  %v11078_v60 = vld [vmem:[%s17142_s1 + $0x120] sm:$0xff]  ;;  %v302_v0 = vpack.c.bf16 %v286_v58, %v286_v58 }
  0x28   : > { %1105 = vmatpush.bf16.msra.mxu3 %v11070_v15  ;;  %v11088_v48 = vld [vmem:[%s17142_s1 + $0x170] sm:$0xff]  ;;  %v11087_v54 = vld [vmem:[%s17142_s1 + $0x168] sm:$0xff]  ;;  %v734_v56 = vunpack.c.l.b16 %v301_v52  ;;  %v11094_v61 = vld [vmem:[%s17142_s1 + $0x1a0] sm:$0xff] }
  0x29   : > { %815 = vmatpush.bf16.msra.mxu0 %v11045_v16  ;;  %v733_v55 = vunpack.c.l.b16 %v300_v51  ;;  %v287_v59 = vld [vmem:[%s12102_s20 + $0x28] sm:$0xff]  ;;  %v11102_v62 = vld [vmem:[%s17142_s1 + $0x1e0] sm:$0xff]  ;;  %v735_v2 = vunpack.c.l.b16 %v302_v0  ;;  %v288_v5 = vld [vmem:[%s12102_s20 + $0x30] sm:$0xff] }
  0x2a   : > { %912 = vmatpush.bf16.msra.mxu1 %v11053_v17  ;;  %v11086_v63 = vld [vmem:[%s17142_s1 + $0x160] sm:$0xff]  ;;  %v303_v1 = vpack.c.bf16 %v287_v59, %v287_v59  ;;  %v289_v6 = vld [vmem:[%s12102_s20 + $0x38] sm:$0xff]  ;;  %v304_v11 = vpack.c.bf16 %v288_v5, %v288_v5  ;;  %v291_v17 = vld [vmem:[%s12102_s20 + $0x48] sm:$0xff] }
  0x2b   : > { %1009 = vmatpush.bf16.msra.mxu2 %v11061_v18  ;;  %v12186_v57 = vpack.c.b16 %v734_v56, %v733_v55  ;;  %v11077_v7 = vld [vmem:[%s17142_s1 + $0x118] sm:$0xff]  ;;  %v305_v12 = vpack.c.bf16 %v289_v6, %v289_v6  ;;  %v290_v16 = vld [vmem:[%s12102_s20 + $0x40] sm:$0xff]  ;;  %v11076_v18 = vld [vmem:[%s17142_s1 + $0x110] sm:$0xff]  ;;  %v307_v23 = vpack.c.bf16 %v291_v17, %v291_v17 }
  0x2c   : > { %1106 = vmatpush.bf16.msra.mxu3 %v11069_v19  ;;  %v736_v3 = vunpack.c.l.b16 %v303_v1  ;;  %v11093_v8 = vld [vmem:[%s17142_s1 + $0x198] sm:$0xff]  ;;  %v737_v13 = vunpack.c.l.b16 %v304_v11  ;;  %v11092_v19 = vld [vmem:[%s17142_s1 + $0x190] sm:$0xff]  ;;  %v306_v22 = vpack.c.bf16 %v290_v16, %v290_v16  ;;  %v11083_v32 = vld [vmem:[%s17142_s1 + $0x148] sm:$0xff] }
  0x2d   : > { %816 = vmatpush.bf16.msra.mxu0 %v11044_v20  ;;  %v11101_v9 = vld [vmem:[%s17142_s1 + $0x1d8] sm:$0xff]  ;;  %v738_v14 = vunpack.c.l.b16 %v305_v12  ;;  %v11100_v20 = vld [vmem:[%s17142_s1 + $0x1d0] sm:$0xff]  ;;  %v11111_v5 = vld [vmem:[%s17143_s2 + $0x28] sm:$0xff] }
  0x2e   : > { %913 = vmatpush.bf16.msra.mxu1 %v11052_v21  ;;  %v12206_v4 = vpack.c.b16 %v736_v3, %v735_v2  ;;  %v11085_v10 = vld [vmem:[%s17142_s1 + $0x158] sm:$0xff]  ;;  %v11084_v21 = vld [vmem:[%s17142_s1 + $0x150] sm:$0xff]  ;;  %v11127_v6 = vld [vmem:[%s17143_s2 + $0xa8] sm:$0xff] }
  0x2f   : > { %1010 = vmatpush.bf16.msra.mxu2 %v11060_v24  ;;  %v12226_v15 = vpack.c.b16 %v738_v14, %v737_v13  ;;  %v739_v24 = vunpack.c.l.b16 %v306_v22  ;;  %v292_v27 = vld [vmem:[%s12102_s20 + $0x50] sm:$0xff]  ;;  %v297_v51 = vld [vmem:[%s12102_s20 + $0x78] sm:$0xff] }
  0x30   : > { %1107 = vmatpush.bf16.msra.mxu3 %v11068_v25  ;;  %v740_v25 = vunpack.c.l.b16 %v307_v23  ;;  %v308_v33 = vpack.c.bf16 %v292_v27, %v292_v27  ;;  %v11113_v52 = vld [vmem:[%s17143_s2 + $0x38] sm:$0xff]  ;;  %v313_v56 = vpack.c.bf16 %v297_v51, %v297_v51  ;;  %v11136_v0 = vld [vmem:[%s17143_s2 + $0xf0] sm:$0xff]  ;;  %v11119_v23 = vld [vmem:[%s17143_s2 + $0x68] sm:$0xff] }
  0x31   : > { %817 = vmatpush.bf16.msra.mxu0 %v11043_v28  ;;  %v293_v28 = vld [vmem:[%s12102_s20 + $0x58] sm:$0xff]  ;;  %v11120_v1 = vld [vmem:[%s17143_s2 + $0x70] sm:$0xff] }
  0x32   : > { %914 = vmatpush.bf16.msra.mxu1 %v11051_v29  ;;  %v12246_v26 = vpack.c.b16 %v740_v25, %v739_v24  ;;  %v11075_v29 = vld [vmem:[%s17142_s1 + $0x108] sm:$0xff]  ;;  %v746_v59 = vunpack.c.l.b16 %v313_v56 }
  0x33   : > { %1011 = vmatpush.bf16.msra.mxu2 %v11059_v30  ;;  %v11091_v30 = vld [vmem:[%s17142_s1 + $0x188] sm:$0xff] }
  0x34   : > { %1108 = vmatpush.bf16.msra.mxu3 %v11067_v31  ;;  %v11099_v31 = vld [vmem:[%s17142_s1 + $0x1c8] sm:$0xff] }
  0x35   : > { %818 = vmatpush.bf16.msra.mxu0 %v11042_v34  ;;  %v309_v34 = vpack.c.bf16 %v293_v28, %v293_v28 }
  0x36   : > { %915 = vmatpush.bf16.msra.mxu1 %v11050_v35  ;;  %v741_v35 = vunpack.c.l.b16 %v308_v33 }
  0x37   : > { %1012 = vmatpush.bf16.msra.mxu2 %v11058_v36  ;;  %v742_v36 = vunpack.c.l.b16 %v309_v34 }
  0x38   : > { %1109 = vmatpush.bf16.msra.mxu3 %v11066_v37  ;;  %819 = vmatmul.bf16.vlgmr.msra.gmra.mxu0 %v12148_v40 }
  0x39   : > { %1199 = vmatpush.bf16.msrb.mxu0 %v11081_v38  ;;  %916 = vmatmul.bf16.vlgmr.msra.gmra.mxu1 %v12148_v40  ;;  %v12266_v37 = vpack.c.b16 %v742_v36, %v741_v35  ;;  %v294_v38 = vld [vmem:[%s12102_s20 + $0x60] sm:$0xff] }
  0x3a   : > { %1013 = vmatmul.bf16.vlgmr.msra.gmra.mxu2 %v12148_v40  ;;  %1296 = vmatpush.bf16.msrb.mxu1 %v11089_v42  ;;  %v11090_v42 = vld [vmem:[%s17142_s1 + $0x180] sm:$0xff]  ;;  %v310_v45 = vpack.c.bf16 %v294_v38, %v294_v38 }
  0x3b   : > { %1393 = vmatpush.bf16.msrb.mxu2 %v11097_v39  ;;  %1110 = vmatmul.bf16.vlgmr.msra.gmra.mxu3 %v12148_v40  ;;  %v295_v39 = vld [vmem:[%s12102_s20 + $0x68] sm:$0xff] }
  0x3c   : > { %1490 = vmatpush.bf16.msrb.mxu3 %v11105_v41  ;;  %v11074_v41 = vld [vmem:[%s17142_s1 + $0x100] sm:$0xff]  ;;  %v311_v46 = vpack.c.bf16 %v295_v39, %v295_v39 }
  0x3d   : > { %1200 = vmatpush.bf16.msrb.mxu0 %v11080_v43  ;;  %v11098_v43 = vld [vmem:[%s17142_s1 + $0x1c0] sm:$0xff] }
  0x3e   : > { %1297 = vmatpush.bf16.msrb.mxu1 %v11088_v48  ;;  %v744_v48 = vunpack.c.l.b16 %v311_v46 }
  0x3f   : > { %1394 = vmatpush.bf16.msrb.mxu2 %v11096_v44  ;;  %v11082_v44 = vld [vmem:[%s17142_s1 + $0x140] sm:$0xff] }
  0x40   : > { %1491 = vmatpush.bf16.msrb.mxu3 %v11104_v47  ;;  %v743_v47 = vunpack.c.l.b16 %v310_v45 }
  0x41   : > { %1201 = vmatpush.bf16.msrb.mxu0 %v11079_v49 }
  0x42   : > { %1298 = vmatpush.bf16.msrb.mxu1 %v11087_v54  ;;  %v12286_v49 = vpack.c.b16 %v744_v48, %v743_v47  ;;  %v11137_v54 = vld [vmem:[%s17143_s2 + $0xf8] sm:$0xff] }
  0x43   : > { %1395 = vmatpush.bf16.msrb.mxu2 %v11095_v50  ;;  %v296_v50 = vld [vmem:[%s12102_s20 + $0x70] sm:$0xff]  ;;  %s9952_s20 = sshll.u32 %s9949_s16, 4  ;;  %s9953_s20 = int_to_ptr.hbm [resolvable:$true] %s9952_s20 }
  0x44   : > { %1492 = vmatpush.bf16.msrb.mxu3 %v11103_v53  ;;  %v11129_v53 = vld [vmem:[%s17143_s2 + $0xb8] sm:$0xff]  ;;  %v312_v55 = vpack.c.bf16 %v296_v50, %v296_v50  ;;  %s11842_s18 = sshra.s32 %s9953_s20, 4  ;;  %s11843_s18 = int_to_ptr.hbm [resolvable:$true] %s11842_s18 }
  0x45   : > { %1202 = vmatpush.bf16.msrb.mxu0 %v11078_v60  ;;  %v11121_v60 = vld [vmem:[%s17143_s2 + $0x78] sm:$0xff]  ;;  %s11844_s8 = scalar_lea.hbm %s11843_s18, 128  ;;  %p11849_p4 = scmp.lt.s32.totalorder %s11843_s18, %s17147_s6 }
  0x46   : > { %1299 = vmatpush.bf16.msrb.mxu1 %v11086_v63  ;;  %v745_v58 = vunpack.c.l.b16 %v312_v55  ;;  %v11128_v63 = vld [vmem:[%s17143_s2 + $0xb0] sm:$0xff]  ;;  %p11845_p0 = scmp.ne.s32.totalorder %s11843_s18, %s11844_s8  ;;  %p11850_p5 = scmp.lt.s32.totalorder %s11848_s12, %s11844_s8 }
  0x47   : > { %1396 = vmatpush.bf16.msrb.mxu2 %v11094_v61 }
  0x48   : > { %824 = vmatmul.bf16.gmra.mxu0 %v12186_v57  ;;  %1493 = vmatpush.bf16.msrb.mxu3 %v11102_v62  ;;  %v12306_v61 = vpack.c.b16 %v746_v59, %v745_v58  ;;  %v11112_v62 = vld [vmem:[%s17143_s2 + $0x30] sm:$0xff]  ;;  %p11846_p1 = pnand %p11845_p0, %p12012_p3  ;;  %p11851_p6 = por %p11850_p5, %p11849_p4 }
  0x49   : > { %921 = vmatmul.bf16.gmra.mxu1 %v12186_v57  ;;  %1203 = vmatpush.bf16.msrb.mxu0 %v11077_v7  ;;  %v11135_v7 = vld [vmem:[%s17143_s2 + $0xe8] sm:$0xff] }
  0x4a   : > { %1018 = vmatmul.bf16.gmra.mxu2 %v12186_v57  ;;  %1300 = vmatpush.bf16.msrb.mxu1 %v11085_v10  ;;  %p11847_p2 = pneg %p11846_p1 }
  0x4b   : > { %1115 = vmatmul.bf16.gmra.mxu3 %v12186_v57  ;;  %1397 = vmatpush.bf16.msrb.mxu2 %v11093_v8 }
  0x4c   : > { %1494 = vmatpush.bf16.msrb.mxu3 %v11101_v9  ;;  %p11852_p7 = pnand %p11851_p6, %p11847_p2 }
  0x4d   : > { %1204 = vmatpush.bf16.msrb.mxu0 %v11076_v18 }
  0x4e   : > { %1301 = vmatpush.bf16.msrb.mxu1 %v11084_v21 }
  0x4f   : > { %1398 = vmatpush.bf16.msrb.mxu2 %v11092_v19 }
  0x50   : > { %1495 = vmatpush.bf16.msrb.mxu3 %v11100_v20 }
  0x51   : > { %1205 = vmatpush.bf16.msrb.mxu0 %v11075_v29 }
  0x52   : > { %1302 = vmatpush.bf16.msrb.mxu1 %v11083_v32 }
  0x53   : > { %1399 = vmatpush.bf16.msrb.mxu2 %v11091_v30 }
  0x54   : > { %1496 = vmatpush.bf16.msrb.mxu3 %v11099_v31 }
  0x55   : > { %1206 = vmatpush.bf16.msrb.mxu0 %v11074_v41  ;;  %v11110_v41 = vld [vmem:[%s17143_s2 + $0x20] sm:$0xff] }
  0x56   : > { %1303 = vmatpush.bf16.msrb.mxu1 %v11082_v44 }
  0x57   : > { %1400 = vmatpush.bf16.msrb.mxu2 %v11090_v42  ;;  %v11126_v42 = vld [vmem:[%s17143_s2 + $0xa0] sm:$0xff] }
  0x58   : > { %829 = vmatmul.bf16.gmra.mxu0 %v12206_v4  ;;  %1497 = vmatpush.bf16.msrb.mxu3 %v11098_v43  ;;  %v11134_v43 = vld [vmem:[%s17143_s2 + $0xe0] sm:$0xff] }
  0x59   : > { %926 = vmatmul.bf16.gmra.mxu1 %v12206_v4  ;;  %1715 = vmatpush.bf16.msra.mxu0 %v11113_v52 }
  0x5a   : > { %1023 = vmatmul.bf16.gmra.mxu2 %v12206_v4  ;;  %1812 = vmatpush.bf16.msra.mxu1 %v11121_v60  ;;  %v11118_v60 = vld [vmem:[%s17143_s2 + $0x60] sm:$0xff] }
  0x5b   : > { %1120 = vmatmul.bf16.gmra.mxu3 %v12206_v4  ;;  %1909 = vmatpush.bf16.msra.mxu2 %v11129_v53 }
  0x5c   : > { %2006 = vmatpush.bf16.msra.mxu3 %v11137_v54 }
  0x5d   : > { %1716 = vmatpush.bf16.msra.mxu0 %v11112_v62 }
  0x5e   : > { %1813 = vmatpush.bf16.msra.mxu1 %v11120_v1 }
  0x5f   : > { %1910 = vmatpush.bf16.msra.mxu2 %v11128_v63 }
  0x60   : > { %2007 = vmatpush.bf16.msra.mxu3 %v11136_v0 }
  0x61   : > { %1717 = vmatpush.bf16.msra.mxu0 %v11111_v5 }
  0x62   : > { %1814 = vmatpush.bf16.msra.mxu1 %v11119_v23 }
  0x63   : > { %1911 = vmatpush.bf16.msra.mxu2 %v11127_v6 }
  0x64   : > { %2008 = vmatpush.bf16.msra.mxu3 %v11135_v7 }
  0x65   : > { %1718 = vmatpush.bf16.msra.mxu0 %v11110_v41 }
  0x66   : > { %1815 = vmatpush.bf16.msra.mxu1 %v11118_v60 }
  0x67   : > { %1912 = vmatpush.bf16.msra.mxu2 %v11126_v42 }
  0x68   : > { %834 = vmatmul.bf16.gmra.mxu0 %v12226_v15  ;;  %2009 = vmatpush.bf16.msra.mxu3 %v11134_v43 }
  0x69   : > { %931 = vmatmul.bf16.gmra.mxu1 %v12226_v15 }
  0x6a   : > { %1028 = vmatmul.bf16.gmra.mxu2 %v12226_v15 }
  0x6b   : > { %1125 = vmatmul.bf16.gmra.mxu3 %v12226_v15 }
  0x78   : > { %839 = vmatmul.bf16.gmra.mxu0 %v12246_v26 }
  0x79   : > { %936 = vmatmul.bf16.gmra.mxu1 %v12246_v26 }
  0x7a   : > { %1033 = vmatmul.bf16.gmra.mxu2 %v12246_v26 }
  0x7b   : > { %1130 = vmatmul.bf16.gmra.mxu3 %v12246_v26 }
  0x88   : > { %844 = vmatmul.bf16.gmra.mxu0 %v12266_v37 }
  0x89   : > { %941 = vmatmul.bf16.gmra.mxu1 %v12266_v37 }
  0x8a   : > { %1038 = vmatmul.bf16.gmra.mxu2 %v12266_v37 }
  0x8b   : > { %1135 = vmatmul.bf16.gmra.mxu3 %v12266_v37 }
  0x98   : > { %849 = vmatmul.bf16.gmra.mxu0 %v12286_v49 }
  0x99   : > { %946 = vmatmul.bf16.gmra.mxu1 %v12286_v49 }
  0x9a   : > { %1043 = vmatmul.bf16.gmra.mxu2 %v12286_v49 }
  0x9b   : > { %1140 = vmatmul.bf16.gmra.mxu3 %v12286_v49 }
  0xa8   : > { %854 = vmatmul.bf16.gmra.mxu0 %v12306_v61 }
  0xa9   : > { %951 = vmatmul.bf16.gmra.mxu1 %v12306_v61 }
  0xaa   : > { %1048 = vmatmul.bf16.gmra.mxu2 %v12306_v61 }
  0xab   : > { %1145 = vmatmul.bf16.gmra.mxu3 %v12306_v61 }
  0xb5   : > { %v820_v2 = vpop.f32.mrf.mxu0 }
  0xb6   : > { %v917_v3 = vpop.f32.mrf.mxu1  ;;  %v1539_v8 = vpack.c.bf16 %v820_v2, %v820_v2 }
  0xb7   : > { %v1555_v9 = vpack.c.bf16 %v917_v3, %v917_v3 }
  0xb8   : > { %1207 = vmatmul.bf16.vlgmr.msrb.gmra.mxu0 %v12148_v40  ;;  %v12337_v17 = vunpack.c.l.b16 %v1539_v8 }
  0xb9   : > { %1304 = vmatmul.bf16.vlgmr.msrb.gmra.mxu1 %v12148_v40  ;;  %v12339_v18 = vunpack.c.l.b16 %v1555_v9 }
  0xba   : > { %1401 = vmatmul.bf16.vlgmr.msrb.gmra.mxu2 %v12148_v40 }
  0xbb   : > { %1498 = vmatmul.bf16.vlgmr.msrb.gmra.mxu3 %v12148_v40 }
  0xbd   : > { %v1014_v10 = vpop.f32.mrf.mxu2  ;;  %v822_v12 = vpop.f32.mrf.mxu0 }
  0xbe   : > { %v1111_v11 = vpop.f32.mrf.mxu3  ;;  %v919_v13 = vpop.f32.mrf.mxu1  ;;  %v1540_v14 = vpack.c.bf16 %v822_v12, %v822_v12  ;;  %v1571_v24 = vpack.c.bf16 %v1014_v10, %v1014_v10 }
  0xbf   : > { %v1556_v16 = vpack.c.bf16 %v919_v13, %v919_v13  ;;  %v1587_v25 = vpack.c.bf16 %v1111_v11, %v1111_v11  ;;  %v11109_v13 = vld [vmem:[%s17143_s2 + $0x18] sm:$0xff] }
  0xc0   : > { %v12341_v19 = vunpack.c.l.b16 %v1540_v14  ;;  %v12352_v33 = vunpack.c.l.b16 %v1571_v24  ;;  %v11125_v14 = vld [vmem:[%s17143_s2 + $0x98] sm:$0xff]  ;;  %1719 = vmatpush.bf16.msra.mxu0 %v11109_v13  ;;  %v11108_v13 = vld [vmem:[%s17143_s2 + $0x10] sm:$0xff] }
  0xc1   : > { %v12343_v20 = vunpack.c.l.b16 %v1556_v16  ;;  %v12354_v34 = vunpack.c.l.b16 %v1587_v25  ;;  %v11133_v16 = vld [vmem:[%s17143_s2 + $0xd8] sm:$0xff]  ;;  %1913 = vmatpush.bf16.msra.mxu2 %v11125_v14  ;;  %v11124_v14 = vld [vmem:[%s17143_s2 + $0x90] sm:$0xff] }
  0xc2   : > { %2010 = vmatpush.bf16.msra.mxu3 %v11133_v16  ;;  %v11132_v16 = vld [vmem:[%s17143_s2 + $0xd0] sm:$0xff] }
  0xc4   : > { %1720 = vmatpush.bf16.msra.mxu0 %v11108_v13 }
  0xc5   : > { %v1016_v27 = vpop.f32.mrf.mxu2  ;;  %v825_v31 = vpop.f32.mrf.mxu0  ;;  %1914 = vmatpush.bf16.msra.mxu2 %v11124_v14 }
  0xc6   : > { %v1113_v28 = vpop.f32.mrf.mxu3  ;;  %v1572_v29 = vpack.c.bf16 %v1016_v27, %v1016_v27  ;;  %v922_v32 = vpop.f32.mrf.mxu1  ;;  %v1541_v44 = vpack.c.bf16 %v825_v31, %v825_v31  ;;  %2011 = vmatpush.bf16.msra.mxu3 %v11132_v16 }
  0xc7   : > { %v1588_v30 = vpack.c.bf16 %v1113_v28, %v1113_v28  ;;  %v1557_v45 = vpack.c.bf16 %v922_v32, %v922_v32 }
  0xc8   : > { %v12356_v35 = vunpack.c.l.b16 %v1572_v29  ;;  %1212 = vmatmul.bf16.gmra.mxu0 %v12186_v57  ;;  %v12377_v53 = vunpack.c.l.b16 %v1541_v44 }
  0xc9   : > { %v12358_v36 = vunpack.c.l.b16 %v1588_v30  ;;  %1309 = vmatmul.bf16.gmra.mxu1 %v12186_v57  ;;  %v12379_v54 = vunpack.c.l.b16 %v1557_v45 }
  0xca   : > { %1406 = vmatmul.bf16.gmra.mxu2 %v12186_v57  ;;  %17600 = vst [vmem:[#allocation6_spill] sm:$0xff] %v12377_v53 }
  0xcb   : > { %1503 = vmatmul.bf16.gmra.mxu3 %v12186_v57  ;;  %17601 = vst [vmem:[#allocation7_spill] sm:$0xff] %v12379_v54 }
  0xcd   : > { %v1019_v46 = vpop.f32.mrf.mxu2  ;;  %v827_v48 = vpop.f32.mrf.mxu0 }
  0xce   : > { %v1116_v47 = vpop.f32.mrf.mxu3  ;;  %v924_v50 = vpop.f32.mrf.mxu1  ;;  %v1542_v51 = vpack.c.bf16 %v827_v48, %v827_v48  ;;  %v1573_v62 = vpack.c.bf16 %v1019_v46, %v1019_v46  ;;  %v11117_v46 = vld [vmem:[%s17143_s2 + $0x58] sm:$0xff] }
  0xcf   : > { %v1558_v52 = vpack.c.bf16 %v924_v50, %v924_v50  ;;  %v1589_v63 = vpack.c.bf16 %v1116_v47, %v1116_v47  ;;  %1816 = vmatpush.bf16.msra.mxu1 %v11117_v46 }
  0xd0   : > { %v12381_v55 = vunpack.c.l.b16 %v1542_v51  ;;  %v12392_v7 = vunpack.c.l.b16 %v1573_v62 }
  0xd1   : > { %v12383_v56 = vunpack.c.l.b16 %v1558_v52  ;;  %v12394_v8 = vunpack.c.l.b16 %v1589_v63 }
  0xd2   : > { %17602 = vst [vmem:[#allocation8_spill] sm:$0xff] %v12381_v55 }
  0xd3   : > { %17603 = vst [vmem:[#allocation9_spill] sm:$0xff] %v12383_v56 }
  0xd4   : > { %17604 = vst [vmem:[#allocation10_spill] sm:$0xff] %v12392_v7 }
  0xd5   : > { %v1021_v0 = vpop.f32.mrf.mxu2  ;;  %v830_v5 = vpop.f32.mrf.mxu0  ;;  %17605 = vst [vmem:[#allocation11_spill] sm:$0xff] %v12394_v8 }
  0xd6   : > { %v1118_v1 = vpop.f32.mrf.mxu3  ;;  %v1574_v2 = vpack.c.bf16 %v1021_v0, %v1021_v0  ;;  %v927_v6 = vpop.f32.mrf.mxu1  ;;  %v1543_v23 = vpack.c.bf16 %v830_v5, %v830_v5 }
  0xd7   : > { %v1590_v3 = vpack.c.bf16 %v1118_v1, %v1118_v1  ;;  %v1559_v24 = vpack.c.bf16 %v927_v6, %v927_v6 }
  0xd8   : > { %v12396_v9 = vunpack.c.l.b16 %v1574_v2  ;;  %1217 = vmatmul.bf16.gmra.mxu0 %v12206_v4  ;;  %v12417_v32 = vunpack.c.l.b16 %v1543_v23 }
  0xd9   : > { %v12398_v10 = vunpack.c.l.b16 %v1590_v3  ;;  %1314 = vmatmul.bf16.gmra.mxu1 %v12206_v4  ;;  %v12419_v41 = vunpack.c.l.b16 %v1559_v24 }
  0xda   : > { %17606 = vst [vmem:[#allocation12_spill] sm:$0xff] %v12396_v9  ;;  %1411 = vmatmul.bf16.gmra.mxu2 %v12206_v4 }
  0xdb   : > { %17607 = vst [vmem:[#allocation13_spill] sm:$0xff] %v12398_v10  ;;  %1508 = vmatmul.bf16.gmra.mxu3 %v12206_v4 }
  0xdc   : > { %17608 = vst [vmem:[#allocation14_spill] sm:$0xff] %v12417_v32 }
  0xdd   : > { %v1024_v25 = vpop.f32.mrf.mxu2  ;;  %v832_v28 = vpop.f32.mrf.mxu0  ;;  %17609 = vst [vmem:[#allocation15_spill] sm:$0xff] %v12419_v41 }
  0xde   : > { %v1121_v27 = vpop.f32.mrf.mxu3  ;;  %v929_v29 = vpop.f32.mrf.mxu1  ;;  %v1544_v30 = vpack.c.bf16 %v832_v28, %v832_v28  ;;  %v1575_v47 = vpack.c.bf16 %v1024_v25, %v1024_v25 }
  0xdf   : > { %v1560_v31 = vpack.c.bf16 %v929_v29, %v929_v29  ;;  %v1591_v48 = vpack.c.bf16 %v1121_v27, %v1121_v27 }
  0xe0   : > { %v12421_v42 = vunpack.c.l.b16 %v1544_v30  ;;  %v12432_v0 = vunpack.c.l.b16 %v1575_v47 }
  0xe1   : > { %v12423_v43 = vunpack.c.l.b16 %v1560_v31  ;;  %v12434_v1 = vunpack.c.l.b16 %v1591_v48 }
  0xe2   : > { %17610 = vst [vmem:[#allocation16_spill] sm:$0xff] %v12421_v42 }
  0xe3   : > { %17611 = vst [vmem:[#allocation17_spill] sm:$0xff] %v12423_v43 }
  0xe4   : > { %17612 = vst [vmem:[#allocation18_spill] sm:$0xff] %v12432_v0 }
  0xe5   : > { %v1026_v50 = vpop.f32.mrf.mxu2  ;;  %v835_v62 = vpop.f32.mrf.mxu0  ;;  %17613 = vst [vmem:[#allocation19_spill] sm:$0xff] %v12434_v1 }
  0xe6   : > { %v1123_v51 = vpop.f32.mrf.mxu3  ;;  %v1576_v52 = vpack.c.bf16 %v1026_v50, %v1026_v50  ;;  %v932_v63 = vpop.f32.mrf.mxu1  ;;  %v1545_v23 = vpack.c.bf16 %v835_v62, %v835_v62 }
  0xe7   : > { %v1592_v60 = vpack.c.bf16 %v1123_v51, %v1123_v51  ;;  %v1561_v24 = vpack.c.bf16 %v932_v63, %v932_v63 }
  0xe8   : > { %v12436_v2 = vunpack.c.l.b16 %v1576_v52  ;;  %1222 = vmatmul.bf16.gmra.mxu0 %v12226_v15  ;;  %v12457_v46 = vunpack.c.l.b16 %v1545_v23 }
  0xe9   : > { %v12438_v3 = vunpack.c.l.b16 %v1592_v60  ;;  %1319 = vmatmul.bf16.gmra.mxu1 %v12226_v15  ;;  %v12459_v47 = vunpack.c.l.b16 %v1561_v24  ;;  %v11116_v60 = vld [vmem:[%s17143_s2 + $0x50] sm:$0xff] }
  0xea   : > { %17614 = vst [vmem:[#allocation20_spill] sm:$0xff] %v12436_v2  ;;  %1416 = vmatmul.bf16.gmra.mxu2 %v12226_v15  ;;  %1817 = vmatpush.bf16.msra.mxu1 %v11116_v60  ;;  %v11107_v60 = vld [vmem:[%s17143_s2 + $0x8] sm:$0xff] }
  0xeb   : > { %17615 = vst [vmem:[#allocation21_spill] sm:$0xff] %v12438_v3  ;;  %1513 = vmatmul.bf16.gmra.mxu3 %v12226_v15  ;;  %1721 = vmatpush.bf16.msra.mxu0 %v11107_v60 }
  0xec   : > { %17616 = vst [vmem:[#allocation22_spill] sm:$0xff] %v12457_v46 }
  0xed   : > { %v1029_v25 = vpop.f32.mrf.mxu2  ;;  %v837_v28 = vpop.f32.mrf.mxu0  ;;  %17617 = vst [vmem:[#allocation23_spill] sm:$0xff] %v12459_v47 }
  0xee   : > { %v1126_v27 = vpop.f32.mrf.mxu3  ;;  %v934_v29 = vpop.f32.mrf.mxu1  ;;  %v1546_v30 = vpack.c.bf16 %v837_v28, %v837_v28  ;;  %v1577_v62 = vpack.c.bf16 %v1029_v25, %v1029_v25 }
  0xef   : > { %v1562_v31 = vpack.c.bf16 %v934_v29, %v934_v29  ;;  %v1593_v63 = vpack.c.bf16 %v1126_v27, %v1126_v27 }
  0xf0   : > { %v12461_v48 = vunpack.c.l.b16 %v1546_v30  ;;  %v12472_v29 = vunpack.c.l.b16 %v1577_v62  ;;  %v11123_v62 = vld [vmem:[%s17143_s2 + $0x88] sm:$0xff] }
  0xf1   : > { %v12463_v50 = vunpack.c.l.b16 %v1562_v31  ;;  %v12474_v30 = vunpack.c.l.b16 %v1593_v63  ;;  %v11131_v63 = vld [vmem:[%s17143_s2 + $0xc8] sm:$0xff]  ;;  %1915 = vmatpush.bf16.msra.mxu2 %v11123_v62 }
  0xf2   : > { %17618 = vst [vmem:[#allocation24_spill] sm:$0xff] %v12461_v48  ;;  %2012 = vmatpush.bf16.msra.mxu3 %v11131_v63 }
  0xf3   : > { %17619 = vst [vmem:[#allocation25_spill] sm:$0xff] %v12463_v50 }
  0xf4   : > { %17620 = vst [vmem:[#allocation26_spill] sm:$0xff] %v12472_v29 }
  0xf5   : > { %v1031_v13 = vpop.f32.mrf.mxu2  ;;  %v840_v24 = vpop.f32.mrf.mxu0  ;;  %17621 = vst [vmem:[#allocation27_spill] sm:$0xff] %v12474_v30 }
  0xf6   : > { %v1128_v14 = vpop.f32.mrf.mxu3  ;;  %v1578_v16 = vpack.c.bf16 %v1031_v13, %v1031_v13  ;;  %v937_v28 = vpop.f32.mrf.mxu1  ;;  %v1547_v13 = vpack.c.bf16 %v840_v24, %v840_v24 }
  0xf7   : > { %v1594_v23 = vpack.c.bf16 %v1128_v14, %v1128_v14  ;;  %v1563_v14 = vpack.c.bf16 %v937_v28, %v937_v28  ;;  %v11115_v28 = vld [vmem:[%s17143_s2 + $0x48] sm:$0xff] }
  0xf8   : > { %v12476_v31 = vunpack.c.l.b16 %v1578_v16  ;;  %1227 = vmatmul.bf16.gmra.mxu0 %v12246_v26  ;;  %v12497_v5 = vunpack.c.l.b16 %v1547_v13  ;;  %1818 = vmatpush.bf16.msra.mxu1 %v11115_v28  ;;  %v11106_v28 = vld [vmem:[%s17143_s2] sm:$0xff] }
  0xf9   : > { %v12478_v52 = vunpack.c.l.b16 %v1594_v23  ;;  %1324 = vmatmul.bf16.gmra.mxu1 %v12246_v26  ;;  %v12499_v45 = vunpack.c.l.b16 %v1563_v14  ;;  %1722 = vmatpush.bf16.msra.mxu0 %v11106_v28 }
  0xfa   : > { %17622 = vst [vmem:[#allocation28_spill] sm:$0xff] %v12476_v31  ;;  %1421 = vmatmul.bf16.gmra.mxu2 %v12246_v26 }
  0xfb   : > { %17623 = vst [vmem:[#allocation29_spill] sm:$0xff] %v12478_v52  ;;  %1518 = vmatmul.bf16.gmra.mxu3 %v12246_v26 }
  0xfc   : > { %17624 = vst [vmem:[#allocation30_spill] sm:$0xff] %v12497_v5 }
  0xfd   : > { %v1034_v16 = vpop.f32.mrf.mxu2  ;;  %v842_v27 = vpop.f32.mrf.mxu0  ;;  %17625 = vst [vmem:[#allocation31_spill] sm:$0xff] %v12499_v45 }
  0xfe   : > { %v1131_v23 = vpop.f32.mrf.mxu3  ;;  %v939_v25 = vpop.f32.mrf.mxu1  ;;  %v1548_v51 = vpack.c.bf16 %v842_v27, %v842_v27  ;;  %v1579_v27 = vpack.c.bf16 %v1034_v16, %v1034_v16 }
  0xff   : > { %v1564_v6 = vpack.c.bf16 %v939_v25, %v939_v25  ;;  %v1595_v25 = vpack.c.bf16 %v1131_v23, %v1131_v23 }
 0x100   : > { %v12501_v44 = vunpack.c.l.b16 %v1548_v51  ;;  %v12512_v11 = vunpack.c.l.b16 %v1579_v27  ;;  %v11122_v27 = vld [vmem:[%s17143_s2 + $0x80] sm:$0xff] }
 0x101   : > { %v12503_v12 = vunpack.c.l.b16 %v1564_v6  ;;  %v12514_v59 = vunpack.c.l.b16 %v1595_v25  ;;  %v11130_v25 = vld [vmem:[%s17143_s2 + $0xc0] sm:$0xff]  ;;  %1916 = vmatpush.bf16.msra.mxu2 %v11122_v27 }
 0x102   : > { %17626 = vst [vmem:[#allocation32_spill] sm:$0xff] %v12501_v44  ;;  %2013 = vmatpush.bf16.msra.mxu3 %v11130_v25 }
 0x103   : > { %17627 = vst [vmem:[#allocation33_spill] sm:$0xff] %v12503_v12 }
 0x104   : > { %17628 = vst [vmem:[#allocation34_spill] sm:$0xff] %v12512_v11 }
 0x105   : > { %v1036_v62 = vpop.f32.mrf.mxu2  ;;  %v845_v14 = vpop.f32.mrf.mxu0  ;;  %17629 = vst [vmem:[#allocation35_spill] sm:$0xff] %v12514_v59 }
 0x106   : > { %v1133_v63 = vpop.f32.mrf.mxu3  ;;  %v1580_v13 = vpack.c.bf16 %v1036_v62, %v1036_v62  ;;  %v942_v6 = vpop.f32.mrf.mxu1  ;;  %v1549_v62 = vpack.c.bf16 %v845_v14, %v845_v14 }
 0x107   : > { %v1596_v51 = vpack.c.bf16 %v1133_v63, %v1133_v63  ;;  %v1565_v63 = vpack.c.bf16 %v942_v6, %v942_v6  ;;  %v11114_v6 = vld [vmem:[%s17143_s2 + $0x40] sm:$0xff] }
 0x108   : > { %v12516_v60 = vunpack.c.l.b16 %v1580_v13  ;;  %1232 = vmatmul.bf16.gmra.mxu0 %v12266_v37  ;;  %v12537_v38 = vunpack.c.l.b16 %v1549_v62  ;;  %1819 = vmatpush.bf16.msra.mxu1 %v11114_v6  ;;  %v11145_v6 = vld [vmem:[%s17143_s2 + $0x138] sm:$0xff] }
 0x109   : > { %v12518_v24 = vunpack.c.l.b16 %v1596_v51  ;;  %1329 = vmatmul.bf16.gmra.mxu1 %v12266_v37  ;;  %v12539_v22 = vunpack.c.l.b16 %v1565_v63  ;;  %2103 = vmatpush.bf16.msrb.mxu0 %v11145_v6 }
 0x10a   : > { %17630 = vst [vmem:[#allocation36_spill] sm:$0xff] %v12516_v60  ;;  %1426 = vmatmul.bf16.gmra.mxu2 %v12266_v37 }
 0x10b   : > { %17631 = vst [vmem:[#allocation37_spill] sm:$0xff] %v12518_v24  ;;  %1523 = vmatmul.bf16.gmra.mxu3 %v12266_v37 }
 0x10c   : > { %17632 = vst [vmem:[#allocation38_spill] sm:$0xff] %v12537_v38 }
 0x10d   : > { %v1039_v13 = vpop.f32.mrf.mxu2  ;;  %v847_v23 = vpop.f32.mrf.mxu0  ;;  %17633 = vst [vmem:[#allocation39_spill] sm:$0xff] %v12539_v22 }
 0x10e   : > { %v1136_v51 = vpop.f32.mrf.mxu3  ;;  %v944_v16 = vpop.f32.mrf.mxu1  ;;  %v1550_v58 = vpack.c.bf16 %v847_v23, %v847_v23  ;;  %v1581_v23 = vpack.c.bf16 %v1039_v13, %v1039_v13 }
 0x10f   : > { %v1566_v39 = vpack.c.bf16 %v944_v16, %v944_v16  ;;  %v1597_v16 = vpack.c.bf16 %v1136_v51, %v1136_v51 }
 0x110   : > { %v12541_v21 = vunpack.c.l.b16 %v1550_v58  ;;  %v12552_v24 = vunpack.c.l.b16 %v1581_v23  ;;  %v11161_v23 = vld [vmem:[%s17143_s2 + $0x1b8] sm:$0xff] }
 0x111   : > { %v12543_v59 = vunpack.c.l.b16 %v1566_v39  ;;  %v12554_v11 = vunpack.c.l.b16 %v1597_v16  ;;  %v11169_v16 = vld [vmem:[%s17143_s2 + $0x1f8] sm:$0xff]  ;;  %2297 = vmatpush.bf16.msrb.mxu2 %v11161_v23 }
 0x112   : > { %17634 = vst [vmem:[#allocation40_spill] sm:$0xff] %v12541_v21  ;;  %2394 = vmatpush.bf16.msrb.mxu3 %v11169_v16 }
 0x113   : > { %17635 = vst [vmem:[#allocation41_spill] sm:$0xff] %v12543_v59 }
 0x114   : > { %17636 = vst [vmem:[#allocation42_spill] sm:$0xff] %v12552_v24 }
 0x115   : > { %v1041_v27 = vpop.f32.mrf.mxu2  ;;  %v850_v63 = vpop.f32.mrf.mxu0  ;;  %17637 = vst [vmem:[#allocation43_spill] sm:$0xff] %v12554_v11 }
 0x116   : > { %v1138_v25 = vpop.f32.mrf.mxu3  ;;  %v1582_v62 = vpack.c.bf16 %v1041_v27, %v1041_v27  ;;  %v947_v39 = vpop.f32.mrf.mxu1  ;;  %v1551_v27 = vpack.c.bf16 %v850_v63, %v850_v63 }
 0x117   : > { %v1598_v58 = vpack.c.bf16 %v1138_v25, %v1138_v25  ;;  %v1567_v25 = vpack.c.bf16 %v947_v39, %v947_v39  ;;  %v11153_v39 = vld [vmem:[%s17143_s2 + $0x178] sm:$0xff] }
 0x118   : > { %v12556_v28 = vunpack.c.l.b16 %v1582_v62  ;;  %1237 = vmatmul.bf16.gmra.mxu0 %v12286_v49  ;;  %v12577_v24 = vunpack.c.l.b16 %v1551_v27  ;;  %2200 = vmatpush.bf16.msrb.mxu1 %v11153_v39  ;;  %v11144_v39 = vld [vmem:[%s17143_s2 + $0x130] sm:$0xff] }
 0x119   : > { %v12558_v14 = vunpack.c.l.b16 %v1598_v58  ;;  %1334 = vmatmul.bf16.gmra.mxu1 %v12286_v49  ;;  %2104 = vmatpush.bf16.msrb.mxu0 %v11144_v39 }
 0x11a   : > { %17638 = vst [vmem:[#allocation44_spill] sm:$0xff] %v12556_v28  ;;  %1431 = vmatmul.bf16.gmra.mxu2 %v12286_v49  ;;  %v12579_v28 = vunpack.c.l.b16 %v1567_v25 }
 0x11b   : > { %17639 = vst [vmem:[#allocation45_spill] sm:$0xff] %v12558_v14  ;;  %1528 = vmatmul.bf16.gmra.mxu3 %v12286_v49 }
 0x11c   : > { %17640 = vst [vmem:[#allocation46_spill] sm:$0xff] %v12577_v24 }
 0x11d   : > { %v1044_v62 = vpop.f32.mrf.mxu2  ;;  %v852_v51 = vpop.f32.mrf.mxu0  ;;  %17641 = vst [vmem:[#allocation47_spill] sm:$0xff] %v12579_v28 }
 0x11e   : > { %v1141_v58 = vpop.f32.mrf.mxu3  ;;  %v949_v13 = vpop.f32.mrf.mxu1  ;;  %v1552_v11 = vpack.c.bf16 %v852_v51, %v852_v51  ;;  %v1583_v51 = vpack.c.bf16 %v1044_v62, %v1044_v62 }
 0x11f   : > { %v1568_v14 = vpack.c.bf16 %v949_v13, %v949_v13  ;;  %v1599_v13 = vpack.c.bf16 %v1141_v58, %v1141_v58 }
 0x120   : > { %v12581_v22 = vunpack.c.l.b16 %v1552_v11  ;;  %v12592_v38 = vunpack.c.l.b16 %v1583_v51  ;;  %v11160_v51 = vld [vmem:[%s17143_s2 + $0x1b0] sm:$0xff] }
 0x121   : > { %v12583_v59 = vunpack.c.l.b16 %v1568_v14  ;;  %v12594_v21 = vunpack.c.l.b16 %v1599_v13  ;;  %v11168_v13 = vld [vmem:[%s17143_s2 + $0x1f0] sm:$0xff]  ;;  %2298 = vmatpush.bf16.msrb.mxu2 %v11160_v51 }
 0x122   : > { %17642 = vst [vmem:[#allocation48_spill] sm:$0xff] %v12581_v22  ;;  %2395 = vmatpush.bf16.msrb.mxu3 %v11168_v13 }
 0x123   : > { %17643 = vst [vmem:[#allocation49_spill] sm:$0xff] %v12583_v59 }
 0x124   : > { %17644 = vst [vmem:[#allocation50_spill] sm:$0xff] %v12592_v38 }
 0x125   : > { %v1046_v23 = vpop.f32.mrf.mxu2  ;;  %v855_v25 = vpop.f32.mrf.mxu0  ;;  %17645 = vst [vmem:[#allocation51_spill] sm:$0xff] %v12594_v21 }
 0x126   : > { %v1143_v16 = vpop.f32.mrf.mxu3  ;;  %v1584_v27 = vpack.c.bf16 %v1046_v23, %v1046_v23  ;;  %v952_v14 = vpop.f32.mrf.mxu1  ;;  %v1553_v23 = vpack.c.bf16 %v855_v25, %v855_v25 }
 0x127   : > { %v1600_v11 = vpack.c.bf16 %v1143_v16, %v1143_v16  ;;  %v1569_v16 = vpack.c.bf16 %v952_v14, %v952_v14  ;;  %v11152_v14 = vld [vmem:[%s17143_s2 + $0x170] sm:$0xff] }
 0x128   : > { %v12596_v6 = vunpack.c.l.b16 %v1584_v27  ;;  %1242 = vmatmul.bf16.gmra.mxu0 %v12306_v61  ;;  %v12617_v38 = vunpack.c.l.b16 %v1553_v23  ;;  %2201 = vmatpush.bf16.msrb.mxu1 %v11152_v14  ;;  %v11143_v14 = vld [vmem:[%s17143_s2 + $0x128] sm:$0xff] }
 0x129   : > { %v12598_v63 = vunpack.c.l.b16 %v1600_v11  ;;  %1339 = vmatmul.bf16.gmra.mxu1 %v12306_v61  ;;  %2105 = vmatpush.bf16.msrb.mxu0 %v11143_v14 }
 0x12a   : > { %17646 = vst [vmem:[#allocation52_spill] sm:$0xff] %v12596_v6  ;;  %1436 = vmatmul.bf16.gmra.mxu2 %v12306_v61  ;;  %v12619_v6 = vunpack.c.l.b16 %v1569_v16 }
 0x12b   : > { %17647 = vst [vmem:[#allocation53_spill] sm:$0xff] %v12598_v63  ;;  %1533 = vmatmul.bf16.gmra.mxu3 %v12306_v61 }
 0x12c   : > { %17648 = vst [vmem:[#allocation54_spill] sm:$0xff] %v12617_v38 }
 0x12d   : > { %v1049_v27 = vpop.f32.mrf.mxu2  ;;  %v857_v58 = vpop.f32.mrf.mxu0  ;;  %17649 = vst [vmem:[#allocation55_spill] sm:$0xff] %v12619_v6 }
 0x12e   : > { %v1146_v11 = vpop.f32.mrf.mxu3  ;;  %v954_v62 = vpop.f32.mrf.mxu1  ;;  %v1554_v21 = vpack.c.bf16 %v857_v58, %v857_v58  ;;  %v1585_v58 = vpack.c.bf16 %v1049_v27, %v1049_v27 }
 0x12f   : > { %v1570_v63 = vpack.c.bf16 %v954_v62, %v954_v62  ;;  %v1601_v62 = vpack.c.bf16 %v1146_v11, %v1146_v11 }
 0x130   : > { %v12621_v28 = vunpack.c.l.b16 %v1554_v21  ;;  %v12632_v24 = vunpack.c.l.b16 %v1585_v58  ;;  %v11159_v58 = vld [vmem:[%s17143_s2 + $0x1a8] sm:$0xff] }
 0x131   : > { %v12623_v59 = vunpack.c.l.b16 %v1570_v63  ;;  %v12634_v22 = vunpack.c.l.b16 %v1601_v62  ;;  %v11167_v62 = vld [vmem:[%s17143_s2 + $0x1e8] sm:$0xff]  ;;  %2299 = vmatpush.bf16.msrb.mxu2 %v11159_v58 }
 0x132   : > { %17650 = vst [vmem:[#allocation56_spill] sm:$0xff] %v12621_v28  ;;  %2396 = vmatpush.bf16.msrb.mxu3 %v11167_v62 }
 0x133   : > { %17651 = vst [vmem:[#allocation57_spill] sm:$0xff] %v12623_v59 }
 0x134   : > { %17652 = vst [vmem:[#allocation58_spill] sm:$0xff] %v12632_v24 }
 0x135   : > { %v1051_v51 = vpop.f32.mrf.mxu2  ;;  %v1208_v16 = vpop.f32.mrf.mxu0  ;;  %17653 = vst [vmem:[#allocation59_spill] sm:$0xff] %v12634_v22 }
 0x136   : > { %v1148_v13 = vpop.f32.mrf.mxu3  ;;  %v1586_v23 = vpack.c.bf16 %v1051_v51, %v1051_v51  ;;  %v1305_v63 = vpop.f32.mrf.mxu1  ;;  %v1603_v51 = vpack.c.bf16 %v1208_v16, %v1208_v16 }
 0x137   : > { %v1602_v21 = vpack.c.bf16 %v1148_v13, %v1148_v13  ;;  %v1619_v13 = vpack.c.bf16 %v1305_v63, %v1305_v63  ;;  %v11151_v63 = vld [vmem:[%s17143_s2 + $0x168] sm:$0xff] }
 0x138   : > { %v12636_v39 = vunpack.c.l.b16 %v1586_v23  ;;  %1723 = vmatmul.bf16.vlgmr.msra.gmra.mxu0 %v12148_v40  ;;  %v12657_v24 = vunpack.c.l.b16 %v1603_v51  ;;  %2202 = vmatpush.bf16.msrb.mxu1 %v11151_v63  ;;  %v11142_v63 = vld [vmem:[%s17143_s2 + $0x120] sm:$0xff] }
 0x139   : > { %v12638_v25 = vunpack.c.l.b16 %v1602_v21  ;;  %1820 = vmatmul.bf16.vlgmr.msra.gmra.mxu1 %v12148_v40  ;;  %2106 = vmatpush.bf16.msrb.mxu0 %v11142_v63 }
 0x13a   : > { %17654 = vst [vmem:[#allocation60_spill] sm:$0xff] %v12636_v39  ;;  %1917 = vmatmul.bf16.vlgmr.msra.gmra.mxu2 %v12148_v40  ;;  %v12659_v39 = vunpack.c.l.b16 %v1619_v13 }
 0x13b   : > { %17655 = vst [vmem:[#allocation61_spill] sm:$0xff] %v12638_v25  ;;  %2014 = vmatmul.bf16.vlgmr.msra.gmra.mxu3 %v12148_v40 }
 0x13d   : > { %v1402_v23 = vpop.f32.mrf.mxu2  ;;  %v1210_v11 = vpop.f32.mrf.mxu0 }
 0x13e   : > { %v1499_v21 = vpop.f32.mrf.mxu3  ;;  %v1307_v27 = vpop.f32.mrf.mxu1  ;;  %v1604_v22 = vpack.c.bf16 %v1210_v11, %v1210_v11  ;;  %v1635_v11 = vpack.c.bf16 %v1402_v23, %v1402_v23 }
 0x13f   : > { %v1620_v25 = vpack.c.bf16 %v1307_v27, %v1307_v27  ;;  %v1651_v27 = vpack.c.bf16 %v1499_v21, %v1499_v21 }
 0x140   : > { %v12661_v6 = vunpack.c.l.b16 %v1604_v22  ;;  %v12672_v38 = vunpack.c.l.b16 %v1635_v11  ;;  %v11158_v11 = vld [vmem:[%s17143_s2 + $0x1a0] sm:$0xff] }
 0x141   : > { %v12663_v59 = vunpack.c.l.b16 %v1620_v25  ;;  %v12674_v28 = vunpack.c.l.b16 %v1651_v27  ;;  %v11166_v27 = vld [vmem:[%s17143_s2 + $0x1e0] sm:$0xff]  ;;  %2300 = vmatpush.bf16.msrb.mxu2 %v11158_v11 }
 0x142   : > { %2397 = vmatpush.bf16.msrb.mxu3 %v11166_v27 }
 0x145   : > { %v1404_v58 = vpop.f32.mrf.mxu2  ;;  %v1213_v13 = vpop.f32.mrf.mxu0 }
 0x146   : > { %v1501_v62 = vpop.f32.mrf.mxu3  ;;  %v1636_v51 = vpack.c.bf16 %v1404_v58, %v1404_v58  ;;  %v1310_v25 = vpop.f32.mrf.mxu1  ;;  %v1605_v58 = vpack.c.bf16 %v1213_v13, %v1213_v13 }
 0x147   : > { %v1652_v22 = vpack.c.bf16 %v1501_v62, %v1501_v62  ;;  %v1621_v62 = vpack.c.bf16 %v1310_v25, %v1310_v25  ;;  %v11150_v25 = vld [vmem:[%s17143_s2 + $0x160] sm:$0xff] }
 0x148   : > { %v12676_v14 = vunpack.c.l.b16 %v1636_v51  ;;  %1728 = vmatmul.bf16.gmra.mxu0 %v12186_v57  ;;  %v12697_v12 = vunpack.c.l.b16 %v1605_v58  ;;  %2203 = vmatpush.bf16.msrb.mxu1 %v11150_v25  ;;  %v11141_v25 = vld [vmem:[%s17143_s2 + $0x118] sm:$0xff] }
 0x149   : > { %v12678_v16 = vunpack.c.l.b16 %v1652_v22  ;;  %1825 = vmatmul.bf16.gmra.mxu1 %v12186_v57  ;;  %v12699_v5 = vunpack.c.l.b16 %v1621_v62  ;;  %2107 = vmatpush.bf16.msrb.mxu0 %v11141_v25 }
 0x14a   : > { %1922 = vmatmul.bf16.gmra.mxu2 %v12186_v57  ;;  %17656 = vst [vmem:[#allocation62_spill] sm:$0xff] %v12697_v12 }
 0x14b   : > { %2019 = vmatmul.bf16.gmra.mxu3 %v12186_v57  ;;  %17657 = vst [vmem:[#allocation63_spill] sm:$0xff] %v12699_v5 }
 0x14d   : > { %v1407_v51 = vpop.f32.mrf.mxu2  ;;  %v1215_v21 = vpop.f32.mrf.mxu0 }
 0x14e   : > { %v1504_v22 = vpop.f32.mrf.mxu3  ;;  %v1312_v23 = vpop.f32.mrf.mxu1  ;;  %v1606_v60 = vpack.c.bf16 %v1215_v21, %v1215_v21  ;;  %v1637_v21 = vpack.c.bf16 %v1407_v51, %v1407_v51 }
 0x14f   : > { %v1622_v45 = vpack.c.bf16 %v1312_v23, %v1312_v23  ;;  %v1653_v23 = vpack.c.bf16 %v1504_v22, %v1504_v22 }
 0x150   : > { %v12701_v44 = vunpack.c.l.b16 %v1606_v60  ;;  %v12712_v52 = vunpack.c.l.b16 %v1637_v21  ;;  %v11157_v21 = vld [vmem:[%s17143_s2 + $0x198] sm:$0xff] }
 0x151   : > { %v12703_v30 = vunpack.c.l.b16 %v1622_v45  ;;  %v12714_v29 = vunpack.c.l.b16 %v1653_v23  ;;  %v11165_v23 = vld [vmem:[%s17143_s2 + $0x1d8] sm:$0xff]  ;;  %2301 = vmatpush.bf16.msrb.mxu2 %v11157_v21 }
 0x152   : > { %17658 = vst [vmem:[#allocation64_spill] sm:$0xff] %v12701_v44  ;;  %2398 = vmatpush.bf16.msrb.mxu3 %v11165_v23 }
 0x153   : > { %17659 = vst [vmem:[#allocation65_spill] sm:$0xff] %v12703_v30 }
 0x154   : > { %17660 = vst [vmem:[#allocation66_spill] sm:$0xff] %v12712_v52 }
 0x155   : > { %v1409_v11 = vpop.f32.mrf.mxu2  ;;  %v1218_v62 = vpop.f32.mrf.mxu0  ;;  %17661 = vst [vmem:[#allocation67_spill] sm:$0xff] %v12714_v29 }
 0x156   : > { %v1506_v27 = vpop.f32.mrf.mxu3  ;;  %v1638_v58 = vpack.c.bf16 %v1409_v11, %v1409_v11  ;;  %v1315_v45 = vpop.f32.mrf.mxu1  ;;  %v1607_v11 = vpack.c.bf16 %v1218_v62, %v1218_v62 }
 0x157   : > { %v1654_v60 = vpack.c.bf16 %v1506_v27, %v1506_v27  ;;  %v1623_v27 = vpack.c.bf16 %v1315_v45, %v1315_v45  ;;  %v11149_v45 = vld [vmem:[%s17143_s2 + $0x158] sm:$0xff] }
 0x158   : > { %v12716_v63 = vunpack.c.l.b16 %v1638_v58  ;;  %1733 = vmatmul.bf16.gmra.mxu0 %v12206_v4  ;;  %v12737_v50 = vunpack.c.l.b16 %v1607_v11  ;;  %2204 = vmatpush.bf16.msrb.mxu1 %v11149_v45  ;;  %v11140_v45 = vld [vmem:[%s17143_s2 + $0x110] sm:$0xff] }
 0x159   : > { %v12718_v13 = vunpack.c.l.b16 %v1654_v60  ;;  %1830 = vmatmul.bf16.gmra.mxu1 %v12206_v4  ;;  %v12739_v46 = vunpack.c.l.b16 %v1623_v27  ;;  %2108 = vmatpush.bf16.msrb.mxu0 %v11140_v45 }
 0x15a   : > { %17662 = vst [vmem:[#allocation68_spill] sm:$0xff] %v12716_v63  ;;  %1927 = vmatmul.bf16.gmra.mxu2 %v12206_v4 }
 0x15b   : > { %17663 = vst [vmem:[#allocation69_spill] sm:$0xff] %v12718_v13  ;;  %2024 = vmatmul.bf16.gmra.mxu3 %v12206_v4 }
 0x15c   : > { %17664 = vst [vmem:[#allocation70_spill] sm:$0xff] %v12737_v50 }
 0x15d   : > { %v1412_v58 = vpop.f32.mrf.mxu2  ;;  %v1220_v22 = vpop.f32.mrf.mxu0  ;;  %17665 = vst [vmem:[#allocation71_spill] sm:$0xff] %v12739_v46 }
 0x15e   : > { %v1509_v60 = vpop.f32.mrf.mxu3  ;;  %v1317_v51 = vpop.f32.mrf.mxu1  ;;  %v1608_v31 = vpack.c.bf16 %v1220_v22, %v1220_v22  ;;  %v1639_v22 = vpack.c.bf16 %v1412_v58, %v1412_v58 }
 0x15f   : > { %v1624_v47 = vpack.c.bf16 %v1317_v51, %v1317_v51  ;;  %v1655_v51 = vpack.c.bf16 %v1509_v60, %v1509_v60 }
 0x160   : > { %v12741_v48 = vunpack.c.l.b16 %v1608_v31  ;;  %v12752_v3 = vunpack.c.l.b16 %v1639_v22  ;;  %v11156_v22 = vld [vmem:[%s17143_s2 + $0x190] sm:$0xff] }
 0x161   : > { %v12743_v1 = vunpack.c.l.b16 %v1624_v47  ;;  %v12754_v0 = vunpack.c.l.b16 %v1655_v51  ;;  %v11164_v51 = vld [vmem:[%s17143_s2 + $0x1d0] sm:$0xff]  ;;  %2302 = vmatpush.bf16.msrb.mxu2 %v11156_v22 }
 0x162   : > { %17666 = vst [vmem:[#allocation72_spill] sm:$0xff] %v12741_v48  ;;  %2399 = vmatpush.bf16.msrb.mxu3 %v11164_v51 }
 0x163   : > { %17667 = vst [vmem:[#allocation73_spill] sm:$0xff] %v12743_v1 }
 0x164   : > { %17668 = vst [vmem:[#allocation74_spill] sm:$0xff] %v12752_v3 }
 0x165   : > { %v1414_v21 = vpop.f32.mrf.mxu2  ;;  %v1223_v27 = vpop.f32.mrf.mxu0  ;;  %17669 = vst [vmem:[#allocation75_spill] sm:$0xff] %v12754_v0 }
 0x166   : > { %v1511_v23 = vpop.f32.mrf.mxu3  ;;  %v1640_v11 = vpack.c.bf16 %v1414_v21, %v1414_v21  ;;  %v1320_v47 = vpop.f32.mrf.mxu1  ;;  %v1609_v21 = vpack.c.bf16 %v1223_v27, %v1223_v27 }
 0x167   : > { %v1656_v31 = vpack.c.bf16 %v1511_v23, %v1511_v23  ;;  %v1625_v23 = vpack.c.bf16 %v1320_v47, %v1320_v47  ;;  %v11148_v47 = vld [vmem:[%s17143_s2 + $0x150] sm:$0xff] }
 0x168   : > { %v12756_v25 = vunpack.c.l.b16 %v1640_v11  ;;  %1738 = vmatmul.bf16.gmra.mxu0 %v12226_v15  ;;  %v12777_v3 = vunpack.c.l.b16 %v1609_v21  ;;  %2205 = vmatpush.bf16.msrb.mxu1 %v11148_v47  ;;  %v11139_v47 = vld [vmem:[%s17143_s2 + $0x108] sm:$0xff] }
 0x169   : > { %v12758_v62 = vunpack.c.l.b16 %v1656_v31  ;;  %1835 = vmatmul.bf16.gmra.mxu1 %v12226_v15  ;;  %2109 = vmatpush.bf16.msrb.mxu0 %v11139_v47 }
 0x16a   : > { %17670 = vst [vmem:[#allocation76_spill] sm:$0xff] %v12756_v25  ;;  %1932 = vmatmul.bf16.gmra.mxu2 %v12226_v15  ;;  %v12779_v25 = vunpack.c.l.b16 %v1625_v23 }
 0x16b   : > { %17671 = vst [vmem:[#allocation77_spill] sm:$0xff] %v12758_v62  ;;  %2029 = vmatmul.bf16.gmra.mxu3 %v12226_v15 }
 0x16c   : > { %17672 = vst [vmem:[#allocation78_spill] sm:$0xff] %v12777_v3 }
 0x16d   : > { %v1417_v11 = vpop.f32.mrf.mxu2  ;;  %v1225_v60 = vpop.f32.mrf.mxu0  ;;  %17673 = vst [vmem:[#allocation79_spill] sm:$0xff] %v12779_v25 }
 0x16e   : > { %v1514_v31 = vpop.f32.mrf.mxu3  ;;  %v1322_v58 = vpop.f32.mrf.mxu1  ;;  %v1610_v0 = vpack.c.bf16 %v1225_v60, %v1225_v60  ;;  %v1641_v60 = vpack.c.bf16 %v1417_v11, %v1417_v11 }
 0x16f   : > { %v1626_v62 = vpack.c.bf16 %v1322_v58, %v1322_v58  ;;  %v1657_v58 = vpack.c.bf16 %v1514_v31, %v1514_v31 }
 0x170   : > { %v12781_v46 = vunpack.c.l.b16 %v1610_v0  ;;  %v12792_v50 = vunpack.c.l.b16 %v1641_v60  ;;  %v11155_v60 = vld [vmem:[%s17143_s2 + $0x188] sm:$0xff] }
 0x171   : > { %v12783_v1 = vunpack.c.l.b16 %v1626_v62  ;;  %v12794_v48 = vunpack.c.l.b16 %v1657_v58  ;;  %v11163_v58 = vld [vmem:[%s17143_s2 + $0x1c8] sm:$0xff]  ;;  %2303 = vmatpush.bf16.msrb.mxu2 %v11155_v60 }
 0x172   : > { %17674 = vst [vmem:[#allocation80_spill] sm:$0xff] %v12781_v46  ;;  %2400 = vmatpush.bf16.msrb.mxu3 %v11163_v58 }
 0x173   : > { %17675 = vst [vmem:[#allocation81_spill] sm:$0xff] %v12783_v1 }
 0x174   : > { %17676 = vst [vmem:[#allocation82_spill] sm:$0xff] %v12792_v50 }
 0x175   : > { %v1419_v22 = vpop.f32.mrf.mxu2  ;;  %v1228_v23 = vpop.f32.mrf.mxu0  ;;  %17677 = vst [vmem:[#allocation83_spill] sm:$0xff] %v12794_v48 }
 0x176   : > { %v1516_v51 = vpop.f32.mrf.mxu3  ;;  %v1642_v21 = vpack.c.bf16 %v1419_v22, %v1419_v22  ;;  %v1325_v62 = vpop.f32.mrf.mxu1  ;;  %v1611_v22 = vpack.c.bf16 %v1228_v23, %v1228_v23 }
 0x177   : > { %v1658_v0 = vpack.c.bf16 %v1516_v51, %v1516_v51  ;;  %v1627_v51 = vpack.c.bf16 %v1325_v62, %v1325_v62  ;;  %v11147_v62 = vld [vmem:[%s17143_s2 + $0x148] sm:$0xff] }
 0x178   : > { %v12796_v45 = vunpack.c.l.b16 %v1642_v21  ;;  %1743 = vmatmul.bf16.gmra.mxu0 %v12246_v26  ;;  %v12817_v50 = vunpack.c.l.b16 %v1611_v22  ;;  %2206 = vmatpush.bf16.msrb.mxu1 %v11147_v62  ;;  %v11138_v62 = vld [vmem:[%s17143_s2 + $0x100] sm:$0xff] }
 0x179   : > { %v12798_v27 = vunpack.c.l.b16 %v1658_v0  ;;  %1840 = vmatmul.bf16.gmra.mxu1 %v12246_v26  ;;  %2110 = vmatpush.bf16.msrb.mxu0 %v11138_v62 }
 0x17a   : > { %17678 = vst [vmem:[#allocation84_spill] sm:$0xff] %v12796_v45  ;;  %1937 = vmatmul.bf16.gmra.mxu2 %v12246_v26  ;;  %v12819_v45 = vunpack.c.l.b16 %v1627_v51 }
 0x17b   : > { %17679 = vst [vmem:[#allocation85_spill] sm:$0xff] %v12798_v27  ;;  %2034 = vmatmul.bf16.gmra.mxu3 %v12246_v26 }
 0x17c   : > { %17680 = vst [vmem:[#allocation86_spill] sm:$0xff] %v12817_v50 }
 0x17d   : > { %v1422_v21 = vpop.f32.mrf.mxu2  ;;  %v1230_v31 = vpop.f32.mrf.mxu0  ;;  %17681 = vst [vmem:[#allocation87_spill] sm:$0xff] %v12819_v45 }
 0x17e   : > { %v1519_v0 = vpop.f32.mrf.mxu3  ;;  %v1327_v11 = vpop.f32.mrf.mxu1  ;;  %v1612_v48 = vpack.c.bf16 %v1230_v31, %v1230_v31  ;;  %v1643_v31 = vpack.c.bf16 %v1422_v21, %v1422_v21 }
 0x17f   : > { %v1628_v27 = vpack.c.bf16 %v1327_v11, %v1327_v11  ;;  %v1659_v11 = vpack.c.bf16 %v1519_v0, %v1519_v0 }
 0x180   : > { %v12821_v25 = vunpack.c.l.b16 %v1612_v48  ;;  %v12832_v3 = vunpack.c.l.b16 %v1643_v31  ;;  %v11154_v31 = vld [vmem:[%s17143_s2 + $0x180] sm:$0xff] }
 0x181   : > { %v12823_v1 = vunpack.c.l.b16 %v1628_v27  ;;  %v12834_v46 = vunpack.c.l.b16 %v1659_v11  ;;  %v11162_v11 = vld [vmem:[%s17143_s2 + $0x1c0] sm:$0xff]  ;;  %2304 = vmatpush.bf16.msrb.mxu2 %v11154_v31 }
 0x182   : > { %17682 = vst [vmem:[#allocation88_spill] sm:$0xff] %v12821_v25  ;;  %2401 = vmatpush.bf16.msrb.mxu3 %v11162_v11 }
 0x183   : > { %17683 = vst [vmem:[#allocation89_spill] sm:$0xff] %v12823_v1 }
 0x184   : > { %17684 = vst [vmem:[#allocation90_spill] sm:$0xff] %v12832_v3 }
 0x185   : > { %v1424_v60 = vpop.f32.mrf.mxu2  ;;  %v1233_v51 = vpop.f32.mrf.mxu0  ;;  %17685 = vst [vmem:[#allocation91_spill] sm:$0xff] %v12834_v46 }
 0x186   : > { %v1521_v58 = vpop.f32.mrf.mxu3  ;;  %v1644_v22 = vpack.c.bf16 %v1424_v60, %v1424_v60  ;;  %v1330_v27 = vpop.f32.mrf.mxu1  ;;  %v1613_v60 = vpack.c.bf16 %v1233_v51, %v1233_v51 }
 0x187   : > { %v1660_v48 = vpack.c.bf16 %v1521_v58, %v1521_v58  ;;  %v1629_v58 = vpack.c.bf16 %v1330_v27, %v1330_v27  ;;  %v11146_v27 = vld [vmem:[%s17143_s2 + $0x140] sm:$0xff] }
 0x188   : > { %v12836_v47 = vunpack.c.l.b16 %v1644_v22  ;;  %1748 = vmatmul.bf16.gmra.mxu0 %v12266_v37  ;;  %v12857_v3 = vunpack.c.l.b16 %v1613_v60  ;;  %2207 = vmatpush.bf16.msrb.mxu1 %v11146_v27  ;;  %v11177_v27 = vld [vmem:[%s17144_s3 + $0x38] sm:$0xff] }
 0x189   : > { %v12838_v23 = vunpack.c.l.b16 %v1660_v48  ;;  %1845 = vmatmul.bf16.gmra.mxu1 %v12266_v37  ;;  %2619 = vmatpush.bf16.msra.mxu0 %v11177_v27 }
 0x18a   : > { %17686 = vst [vmem:[#allocation92_spill] sm:$0xff] %v12836_v47  ;;  %1942 = vmatmul.bf16.gmra.mxu2 %v12266_v37  ;;  %v12859_v47 = vunpack.c.l.b16 %v1629_v58 }
 0x18b   : > { %17687 = vst [vmem:[#allocation93_spill] sm:$0xff] %v12838_v23  ;;  %2039 = vmatmul.bf16.gmra.mxu3 %v12266_v37 }
 0x18c   : > { %17688 = vst [vmem:[#allocation94_spill] sm:$0xff] %v12857_v3 }
 0x18d   : > { %v1427_v22 = vpop.f32.mrf.mxu2  ;;  %v1235_v0 = vpop.f32.mrf.mxu0  ;;  %17689 = vst [vmem:[#allocation95_spill] sm:$0xff] %v12859_v47 }
 0x18e   : > { %v1524_v48 = vpop.f32.mrf.mxu3  ;;  %v1332_v21 = vpop.f32.mrf.mxu1  ;;  %v1614_v46 = vpack.c.bf16 %v1235_v0, %v1235_v0  ;;  %v1645_v0 = vpack.c.bf16 %v1427_v22, %v1427_v22 }
 0x18f   : > { %v1630_v23 = vpack.c.bf16 %v1332_v21, %v1332_v21  ;;  %v1661_v21 = vpack.c.bf16 %v1524_v48, %v1524_v48 }
 0x190   : > { %v12861_v45 = vunpack.c.l.b16 %v1614_v46  ;;  %v12872_v50 = vunpack.c.l.b16 %v1645_v0  ;;  %v11193_v0 = vld [vmem:[%s17144_s3 + $0xb8] sm:$0xff] }
 0x191   : > { %v12863_v1 = vunpack.c.l.b16 %v1630_v23  ;;  %v12874_v25 = vunpack.c.l.b16 %v1661_v21  ;;  %v11201_v21 = vld [vmem:[%s17144_s3 + $0xf8] sm:$0xff]  ;;  %2813 = vmatpush.bf16.msra.mxu2 %v11193_v0 }
 0x192   : > { %17690 = vst [vmem:[#allocation96_spill] sm:$0xff] %v12861_v45  ;;  %2910 = vmatpush.bf16.msra.mxu3 %v11201_v21 }
 0x193   : > { %17691 = vst [vmem:[#allocation97_spill] sm:$0xff] %v12863_v1 }
 0x194   : > { %17692 = vst [vmem:[#allocation98_spill] sm:$0xff] %v12872_v50 }
 0x195   : > { %v1429_v31 = vpop.f32.mrf.mxu2  ;;  %v1238_v58 = vpop.f32.mrf.mxu0  ;;  %17693 = vst [vmem:[#allocation99_spill] sm:$0xff] %v12874_v25 }
 0x196   : > { %v1526_v11 = vpop.f32.mrf.mxu3  ;;  %v1646_v60 = vpack.c.bf16 %v1429_v31, %v1429_v31  ;;  %v1335_v23 = vpop.f32.mrf.mxu1  ;;  %v1615_v31 = vpack.c.bf16 %v1238_v58, %v1238_v58 }
 0x197   : > { %v1662_v46 = vpack.c.bf16 %v1526_v11, %v1526_v11  ;;  %v1631_v11 = vpack.c.bf16 %v1335_v23, %v1335_v23  ;;  %v11185_v23 = vld [vmem:[%s17144_s3 + $0x78] sm:$0xff] }
 0x198   : > { %v12876_v62 = vunpack.c.l.b16 %v1646_v60  ;;  %1753 = vmatmul.bf16.gmra.mxu0 %v12286_v49  ;;  %v12897_v50 = vunpack.c.l.b16 %v1615_v31  ;;  %2716 = vmatpush.bf16.msra.mxu1 %v11185_v23  ;;  %v11176_v23 = vld [vmem:[%s17144_s3 + $0x30] sm:$0xff] }
 0x199   : > { %v12878_v51 = vunpack.c.l.b16 %v1662_v46  ;;  %1850 = vmatmul.bf16.gmra.mxu1 %v12286_v49  ;;  %2620 = vmatpush.bf16.msra.mxu0 %v11176_v23 }
 0x19a   : > { %17694 = vst [vmem:[#allocation100_spill] sm:$0xff] %v12876_v62  ;;  %1947 = vmatmul.bf16.gmra.mxu2 %v12286_v49  ;;  %v12899_v62 = vunpack.c.l.b16 %v1631_v11 }
 0x19b   : > { %17695 = vst [vmem:[#allocation101_spill] sm:$0xff] %v12878_v51  ;;  %2044 = vmatmul.bf16.gmra.mxu3 %v12286_v49 }
 0x19c   : > { %17696 = vst [vmem:[#allocation102_spill] sm:$0xff] %v12897_v50 }
 0x19d   : > { %v1432_v60 = vpop.f32.mrf.mxu2  ;;  %v1240_v48 = vpop.f32.mrf.mxu0  ;;  %17697 = vst [vmem:[#allocation103_spill] sm:$0xff] %v12899_v62 }
 0x19e   : > { %v1529_v46 = vpop.f32.mrf.mxu3  ;;  %v1337_v22 = vpop.f32.mrf.mxu1  ;;  %v1616_v25 = vpack.c.bf16 %v1240_v48, %v1240_v48  ;;  %v1647_v48 = vpack.c.bf16 %v1432_v60, %v1432_v60 }
 0x19f   : > { %v1632_v51 = vpack.c.bf16 %v1337_v22, %v1337_v22  ;;  %v1663_v22 = vpack.c.bf16 %v1529_v46, %v1529_v46 }
 0x1a0   : > { %v12901_v47 = vunpack.c.l.b16 %v1616_v25  ;;  %v12912_v3 = vunpack.c.l.b16 %v1647_v48  ;;  %v11192_v48 = vld [vmem:[%s17144_s3 + $0xb0] sm:$0xff] }
 0x1a1   : > { %v12903_v1 = vunpack.c.l.b16 %v1632_v51  ;;  %v12914_v45 = vunpack.c.l.b16 %v1663_v22  ;;  %v11200_v22 = vld [vmem:[%s17144_s3 + $0xf0] sm:$0xff]  ;;  %2814 = vmatpush.bf16.msra.mxu2 %v11192_v48 }
 0x1a2   : > { %17698 = vst [vmem:[#allocation104_spill] sm:$0xff] %v12901_v47  ;;  %2911 = vmatpush.bf16.msra.mxu3 %v11200_v22 }
 0x1a3   : > { %17699 = vst [vmem:[#allocation105_spill] sm:$0xff] %v12903_v1 }
 0x1a4   : > { %17700 = vst [vmem:[#allocation106_spill] sm:$0xff] %v12912_v3 }
 0x1a5   : > { %v1434_v0 = vpop.f32.mrf.mxu2  ;;  %v1243_v11 = vpop.f32.mrf.mxu0  ;;  %17701 = vst [vmem:[#allocation107_spill] sm:$0xff] %v12914_v45 }
 0x1a6   : > { %v1531_v21 = vpop.f32.mrf.mxu3  ;;  %v1648_v31 = vpack.c.bf16 %v1434_v0, %v1434_v0  ;;  %v1340_v51 = vpop.f32.mrf.mxu1  ;;  %v1617_v0 = vpack.c.bf16 %v1243_v11, %v1243_v11 }
 0x1a7   : > { %v1664_v25 = vpack.c.bf16 %v1531_v21, %v1531_v21  ;;  %v1633_v21 = vpack.c.bf16 %v1340_v51, %v1340_v51  ;;  %v11184_v51 = vld [vmem:[%s17144_s3 + $0x70] sm:$0xff] }
 0x1a8   : > { %v12916_v27 = vunpack.c.l.b16 %v1648_v31  ;;  %1758 = vmatmul.bf16.gmra.mxu0 %v12306_v61  ;;  %v12937_v3 = vunpack.c.l.b16 %v1617_v0  ;;  %2717 = vmatpush.bf16.msra.mxu1 %v11184_v51  ;;  %v11175_v51 = vld [vmem:[%s17144_s3 + $0x28] sm:$0xff] }
 0x1a9   : > { %v12918_v58 = vunpack.c.l.b16 %v1664_v25  ;;  %1855 = vmatmul.bf16.gmra.mxu1 %v12306_v61  ;;  %2621 = vmatpush.bf16.msra.mxu0 %v11175_v51 }
 0x1aa   : > { %17702 = vst [vmem:[#allocation108_spill] sm:$0xff] %v12916_v27  ;;  %1952 = vmatmul.bf16.gmra.mxu2 %v12306_v61  ;;  %v12939_v27 = vunpack.c.l.b16 %v1633_v21 }
 0x1ab   : > { %17703 = vst [vmem:[#allocation109_spill] sm:$0xff] %v12918_v58  ;;  %2049 = vmatmul.bf16.gmra.mxu3 %v12306_v61 }
 0x1ac   : > { %17704 = vst [vmem:[#allocation110_spill] sm:$0xff] %v12937_v3 }
 0x1ad   : > { %v1437_v31 = vpop.f32.mrf.mxu2  ;;  %v1245_v46 = vpop.f32.mrf.mxu0  ;;  %17705 = vst [vmem:[#allocation111_spill] sm:$0xff] %v12939_v27 }
 0x1ae   : > { %v1534_v25 = vpop.f32.mrf.mxu3  ;;  %v1342_v60 = vpop.f32.mrf.mxu1  ;;  %v1618_v45 = vpack.c.bf16 %v1245_v46, %v1245_v46  ;;  %v1649_v46 = vpack.c.bf16 %v1437_v31, %v1437_v31 }
 0x1af   : > { %v1634_v58 = vpack.c.bf16 %v1342_v60, %v1342_v60  ;;  %v1665_v60 = vpack.c.bf16 %v1534_v25, %v1534_v25 }
 0x1b0   : > { %v12941_v62 = vunpack.c.l.b16 %v1618_v45  ;;  %v12952_v50 = vunpack.c.l.b16 %v1649_v46  ;;  %v11191_v46 = vld [vmem:[%s17144_s3 + $0xa8] sm:$0xff] }
 0x1b1   : > { %v12943_v1 = vunpack.c.l.b16 %v1634_v58  ;;  %v12954_v47 = vunpack.c.l.b16 %v1665_v60  ;;  %v11199_v60 = vld [vmem:[%s17144_s3 + $0xe8] sm:$0xff]  ;;  %2815 = vmatpush.bf16.msra.mxu2 %v11191_v46 }
 0x1b2   : > { %17706 = vst [vmem:[#allocation112_spill] sm:$0xff] %v12941_v62  ;;  %2912 = vmatpush.bf16.msra.mxu3 %v11199_v60 }
 0x1b3   : > { %17707 = vst [vmem:[#allocation113_spill] sm:$0xff] %v12943_v1 }
 0x1b4   : > { %17708 = vst [vmem:[#allocation114_spill] sm:$0xff] %v12952_v50 }
 0x1b5   : > { %v1439_v48 = vpop.f32.mrf.mxu2  ;;  %v1724_v21 = vpop.f32.mrf.mxu0  ;;  %17709 = vst [vmem:[#allocation115_spill] sm:$0xff] %v12954_v47 }
 0x1b6   : > { %v1536_v22 = vpop.f32.mrf.mxu3  ;;  %v1650_v0 = vpack.c.bf16 %v1439_v48, %v1439_v48  ;;  %v1821_v58 = vpop.f32.mrf.mxu1  ;;  %v2443_v48 = vpack.c.bf16 %v1724_v21, %v1724_v21 }
 0x1b7   : > { %v1666_v45 = vpack.c.bf16 %v1536_v22, %v1536_v22  ;;  %v2459_v22 = vpack.c.bf16 %v1821_v58, %v1821_v58  ;;  %v11183_v58 = vld [vmem:[%s17144_s3 + $0x68] sm:$0xff] }
 0x1b8   : > { %v12956_v23 = vunpack.c.l.b16 %v1650_v0  ;;  %2111 = vmatmul.bf16.vlgmr.msrb.gmra.mxu0 %v12148_v40  ;;  %v12977_v50 = vunpack.c.l.b16 %v2443_v48  ;;  %2718 = vmatpush.bf16.msra.mxu1 %v11183_v58  ;;  %v11174_v58 = vld [vmem:[%s17144_s3 + $0x20] sm:$0xff] }
 0x1b9   : > { %v12958_v11 = vunpack.c.l.b16 %v1666_v45  ;;  %2208 = vmatmul.bf16.vlgmr.msrb.gmra.mxu1 %v12148_v40  ;;  %2622 = vmatpush.bf16.msra.mxu0 %v11174_v58 }
 0x1ba   : > { %17710 = vst [vmem:[#allocation116_spill] sm:$0xff] %v12956_v23  ;;  %2305 = vmatmul.bf16.vlgmr.msrb.gmra.mxu2 %v12148_v40  ;;  %v12979_v23 = vunpack.c.l.b16 %v2459_v22 }
 0x1bb   : > { %17711 = vst [vmem:[#allocation117_spill] sm:$0xff] %v12958_v11  ;;  %2402 = vmatmul.bf16.vlgmr.msrb.gmra.mxu3 %v12148_v40 }
 0x1bd   : > { %v1918_v0 = vpop.f32.mrf.mxu2  ;;  %v1726_v25 = vpop.f32.mrf.mxu0 }
 0x1be   : > { %v2015_v45 = vpop.f32.mrf.mxu3  ;;  %v1823_v31 = vpop.f32.mrf.mxu1  ;;  %v2444_v47 = vpack.c.bf16 %v1726_v25, %v1726_v25  ;;  %v2475_v25 = vpack.c.bf16 %v1918_v0, %v1918_v0 }
 0x1bf   : > { %v2460_v11 = vpack.c.bf16 %v1823_v31, %v1823_v31  ;;  %v2491_v31 = vpack.c.bf16 %v2015_v45, %v2015_v45 }
 0x1c0   : > { %v12981_v27 = vunpack.c.l.b16 %v2444_v47  ;;  %v12992_v3 = vunpack.c.l.b16 %v2475_v25  ;;  %v11190_v25 = vld [vmem:[%s17144_s3 + $0xa0] sm:$0xff] }
 0x1c1   : > { %v12983_v1 = vunpack.c.l.b16 %v2460_v11  ;;  %v12994_v62 = vunpack.c.l.b16 %v2491_v31  ;;  %v11198_v31 = vld [vmem:[%s17144_s3 + $0xe0] sm:$0xff]  ;;  %2816 = vmatpush.bf16.msra.mxu2 %v11190_v25 }
 0x1c2   : > { %2913 = vmatpush.bf16.msra.mxu3 %v11198_v31 }
 0x1c5   : > { %v1920_v46 = vpop.f32.mrf.mxu2  ;;  %v1729_v22 = vpop.f32.mrf.mxu0 }
 0x1c6   : > { %v2017_v60 = vpop.f32.mrf.mxu3  ;;  %v2476_v48 = vpack.c.bf16 %v1920_v46, %v1920_v46  ;;  %v1826_v11 = vpop.f32.mrf.mxu1  ;;  %v2445_v46 = vpack.c.bf16 %v1729_v22, %v1729_v22 }
 0x1c7   : > { %v2492_v47 = vpack.c.bf16 %v2017_v60, %v2017_v60  ;;  %v2461_v60 = vpack.c.bf16 %v1826_v11, %v1826_v11  ;;  %v11182_v11 = vld [vmem:[%s17144_s3 + $0x60] sm:$0xff] }
 0x1c8   : > { %v12996_v51 = vunpack.c.l.b16 %v2476_v48  ;;  %2116 = vmatmul.bf16.gmra.mxu0 %v12186_v57  ;;  %v13017_v43 = vunpack.c.l.b16 %v2445_v46  ;;  %2719 = vmatpush.bf16.msra.mxu1 %v11182_v11  ;;  %v11173_v11 = vld [vmem:[%s17144_s3 + $0x18] sm:$0xff] }
 0x1c9   : > { %v12998_v21 = vunpack.c.l.b16 %v2492_v47  ;;  %2213 = vmatmul.bf16.gmra.mxu1 %v12186_v57  ;;  %v13019_v32 = vunpack.c.l.b16 %v2461_v60  ;;  %2623 = vmatpush.bf16.msra.mxu0 %v11173_v11 }
 0x1ca   : > { %2310 = vmatmul.bf16.gmra.mxu2 %v12186_v57 }
 0x1cb   : > { %2407 = vmatmul.bf16.gmra.mxu3 %v12186_v57 }
 0x1cd   : > { %v1923_v48 = vpop.f32.mrf.mxu2  ;;  %v1731_v45 = vpop.f32.mrf.mxu0 }
 0x1ce   : > { %v2020_v47 = vpop.f32.mrf.mxu3  ;;  %v1828_v0 = vpop.f32.mrf.mxu1  ;;  %v2446_v2 = vpack.c.bf16 %v1731_v45, %v1731_v45  ;;  %v2477_v45 = vpack.c.bf16 %v1923_v48, %v1923_v48 }
 0x1cf   : > { %v2462_v41 = vpack.c.bf16 %v1828_v0, %v1828_v0  ;;  %v2493_v0 = vpack.c.bf16 %v2020_v47, %v2020_v47 }
 0x1d0   : > { %v13021_v42 = vunpack.c.l.b16 %v2446_v2  ;;  %v13032_v13 = vunpack.c.l.b16 %v2477_v45  ;;  %v11189_v45 = vld [vmem:[%s17144_s3 + $0x98] sm:$0xff] }
 0x1d1   : > { %v13023_v29 = vunpack.c.l.b16 %v2462_v41  ;;  %v13034_v52 = vunpack.c.l.b16 %v2493_v0  ;;  %v11197_v0 = vld [vmem:[%s17144_s3 + $0xd8] sm:$0xff]  ;;  %2817 = vmatpush.bf16.msra.mxu2 %v11189_v45 }
 0x1d2   : > { %2914 = vmatpush.bf16.msra.mxu3 %v11197_v0 }
 0x1d5   : > { %v1925_v25 = vpop.f32.mrf.mxu2  ;;  %v1734_v60 = vpop.f32.mrf.mxu0 }
 0x1d6   : > { %v2022_v31 = vpop.f32.mrf.mxu3  ;;  %v2478_v46 = vpack.c.bf16 %v1925_v25, %v1925_v25  ;;  %v1831_v41 = vpop.f32.mrf.mxu1  ;;  %v2447_v25 = vpack.c.bf16 %v1734_v60, %v1734_v60 }
 0x1d7   : > { %v2494_v2 = vpack.c.bf16 %v2022_v31, %v2022_v31  ;;  %v2463_v31 = vpack.c.bf16 %v1831_v41, %v1831_v41  ;;  %v11181_v41 = vld [vmem:[%s17144_s3 + $0x58] sm:$0xff] }
 0x1d8   : > { %v13036_v58 = vunpack.c.l.b16 %v2478_v46  ;;  %2121 = vmatmul.bf16.gmra.mxu0 %v12206_v4  ;;  %v13057_v30 = vunpack.c.l.b16 %v2447_v25  ;;  %2720 = vmatpush.bf16.msra.mxu1 %v11181_v41  ;;  %v11172_v41 = vld [vmem:[%s17144_s3 + $0x10] sm:$0xff] }
 0x1d9   : > { %v13038_v22 = vunpack.c.l.b16 %v2494_v2  ;;  %2218 = vmatmul.bf16.gmra.mxu1 %v12206_v4  ;;  %v13059_v12 = vunpack.c.l.b16 %v2463_v31  ;;  %2624 = vmatpush.bf16.msra.mxu0 %v11172_v41 }
 0x1da   : > { %2315 = vmatmul.bf16.gmra.mxu2 %v12206_v4  ;;  %17712 = vst [vmem:[#allocation118_spill] sm:$0xff] %v13057_v30  ;;  %v11171_v30 = vld [vmem:[%s17144_s3 + $0x8] sm:$0xff] }
 0x1db   : > { %2412 = vmatmul.bf16.gmra.mxu3 %v12206_v4  ;;  %17713 = vst [vmem:[#allocation119_spill] sm:$0xff] %v13059_v12 }
 0x1dd   : > { %v1928_v46 = vpop.f32.mrf.mxu2  ;;  %v1736_v47 = vpop.f32.mrf.mxu0  ;;  %2625 = vmatpush.bf16.msra.mxu0 %v11171_v30  ;;  %v11178_v30 = vld [vmem:[%s17144_s3 + $0x40] sm:$0xff] }
 0x1de   : > { %v2025_v2 = vpop.f32.mrf.mxu3  ;;  %v1833_v48 = vpop.f32.mrf.mxu1  ;;  %v2448_v63 = vpack.c.bf16 %v1736_v47, %v1736_v47  ;;  %v2479_v47 = vpack.c.bf16 %v1928_v46, %v1928_v46 }
 0x1df   : > { %v2464_v5 = vpack.c.bf16 %v1833_v48, %v1833_v48  ;;  %v2495_v48 = vpack.c.bf16 %v2025_v2, %v2025_v2 }
 0x1e0   : > { %v13061_v44 = vunpack.c.l.b16 %v2448_v63  ;;  %v13072_v10 = vunpack.c.l.b16 %v2479_v47  ;;  %v11188_v47 = vld [vmem:[%s17144_s3 + $0x90] sm:$0xff] }
 0x1e1   : > { %v13063_v8 = vunpack.c.l.b16 %v2464_v5  ;;  %v13074_v7 = vunpack.c.l.b16 %v2495_v48  ;;  %v11196_v48 = vld [vmem:[%s17144_s3 + $0xd0] sm:$0xff]  ;;  %2818 = vmatpush.bf16.msra.mxu2 %v11188_v47 }
 0x1e2   : > { %17714 = vst [vmem:[#allocation120_spill] sm:$0xff] %v13061_v44  ;;  %2915 = vmatpush.bf16.msra.mxu3 %v11196_v48 }
 0x1e3   : > { %17715 = vst [vmem:[#allocation121_spill] sm:$0xff] %v13063_v8 }
 0x1e4   : > { %17716 = vst [vmem:[#allocation122_spill] sm:$0xff] %v13072_v10 }
 0x1e5   : > { %v1930_v45 = vpop.f32.mrf.mxu2  ;;  %v1739_v31 = vpop.f32.mrf.mxu0  ;;  %17717 = vst [vmem:[#allocation123_spill] sm:$0xff] %v13074_v7 }
 0x1e6   : > { %v2027_v0 = vpop.f32.mrf.mxu3  ;;  %v2480_v25 = vpack.c.bf16 %v1930_v45, %v1930_v45  ;;  %v1836_v5 = vpop.f32.mrf.mxu1  ;;  %v2449_v45 = vpack.c.bf16 %v1739_v31, %v1739_v31  ;;  %v11180_v31 = vld [vmem:[%s17144_s3 + $0x50] sm:$0xff] }
 0x1e7   : > { %v2496_v63 = vpack.c.bf16 %v2027_v0, %v2027_v0  ;;  %v2465_v0 = vpack.c.bf16 %v1836_v5, %v1836_v5  ;;  %2721 = vmatpush.bf16.msra.mxu1 %v11180_v31  ;;  %v11179_v5 = vld [vmem:[%s17144_s3 + $0x48] sm:$0xff] }
 0x1e8   : > { %v13076_v11 = vunpack.c.l.b16 %v2480_v25  ;;  %2126 = vmatmul.bf16.gmra.mxu0 %v12226_v15  ;;  %v13097_v10 = vunpack.c.l.b16 %v2449_v45 }
 0x1e9   : > { %v13078_v60 = vunpack.c.l.b16 %v2496_v63  ;;  %2223 = vmatmul.bf16.gmra.mxu1 %v12226_v15 }
 0x1ea   : > { %17718 = vst [vmem:[#allocation124_spill] sm:$0xff] %v13076_v11  ;;  %2320 = vmatmul.bf16.gmra.mxu2 %v12226_v15  ;;  %v13099_v11 = vunpack.c.l.b16 %v2465_v0 }
 0x1eb   : > { %17719 = vst [vmem:[#allocation125_spill] sm:$0xff] %v13078_v60  ;;  %2417 = vmatmul.bf16.gmra.mxu3 %v12226_v15  ;;  %2722 = vmatpush.bf16.msra.mxu1 %v11179_v5  ;;  %v11186_v5 = vld [vmem:[%s17144_s3 + $0x80] sm:$0xff] }
 0x1ec   : > { %17720 = vst [vmem:[#allocation126_spill] sm:$0xff] %v13097_v10 }
 0x1ed   : > { %v1933_v25 = vpop.f32.mrf.mxu2  ;;  %v1741_v2 = vpop.f32.mrf.mxu0  ;;  %17721 = vst [vmem:[#allocation127_spill] sm:$0xff] %v13099_v11 }
 0x1ee   : > { %v2030_v63 = vpop.f32.mrf.mxu3  ;;  %v1838_v46 = vpop.f32.mrf.mxu1  ;;  %v2450_v7 = vpack.c.bf16 %v1741_v2, %v1741_v2  ;;  %v2481_v2 = vpack.c.bf16 %v1933_v25, %v1933_v25  ;;  %v11187_v25 = vld [vmem:[%s17144_s3 + $0x88] sm:$0xff] }
 0x1ef   : > { %v2466_v60 = vpack.c.bf16 %v1838_v46, %v1838_v46  ;;  %v2497_v46 = vpack.c.bf16 %v2030_v63, %v2030_v63  ;;  %v11195_v63 = vld [vmem:[%s17144_s3 + $0xc8] sm:$0xff]  ;;  %2819 = vmatpush.bf16.msra.mxu2 %v11187_v25  ;;  %2723 = vmatpush.bf16.msra.mxu1 %v11178_v30  ;;  %v11233_v25 = vld [vmem:[%s17144_s3 + $0x1f8] sm:$0xff]  ;;  %v11216_v30 = vld [vmem:[%s17144_s3 + $0x170] sm:$0xff] }
 0x1f0   : > { %v13101_v12 = vunpack.c.l.b16 %v2450_v7  ;;  %v13124_v31 = vunpack.c.l.b16 %v2481_v2  ;;  %v11170_v2 = vld [vmem:[%s17144_s3] sm:$0xff]  ;;  %2916 = vmatpush.bf16.msra.mxu3 %v11195_v63 }
 0x1f1   : > { %v13103_v8 = vunpack.c.l.b16 %v2466_v60  ;;  %2626 = vmatpush.bf16.msra.mxu0 %v11170_v2  ;;  %v11208_v2 = vld [vmem:[%s17144_s3 + $0x130] sm:$0xff] }
 0x1f2   : > { %17722 = vst [vmem:[#allocation128_spill] sm:$0xff] %v13101_v12 }
 0x1f3   : > { %17723 = vst [vmem:[#allocation129_spill] sm:$0xff] %v13103_v8  ;;  %v11225_v8 = vld [vmem:[%s17144_s3 + $0x1b8] sm:$0xff]  ;;  %2820 = vmatpush.bf16.msra.mxu2 %v11186_v5 }
 0x1f4   : > { %17724 = vst [vmem:[#allocation130_spill] sm:$0xff] %v13124_v31 }
 0x1f5   : > { %v1935_v47 = vpop.f32.mrf.mxu2  ;;  %v1744_v0 = vpop.f32.mrf.mxu0 }
 0x1f6   : > { %v2032_v48 = vpop.f32.mrf.mxu3  ;;  %v2482_v45 = vpack.c.bf16 %v1935_v47, %v1935_v47  ;;  %v1841_v60 = vpop.f32.mrf.mxu1  ;;  %v13126_v47 = vunpack.c.l.b16 %v2497_v46  ;;  %v11194_v46 = vld [vmem:[%s17144_s3 + $0xc0] sm:$0xff]  ;;  %v2451_v63 = vpack.c.bf16 %v1744_v0, %v1744_v0  ;;  %v11224_v0 = vld [vmem:[%s17144_s3 + $0x1b0] sm:$0xff] }
 0x1f7   : > { %v2498_v7 = vpack.c.bf16 %v2032_v48, %v2032_v48  ;;  %v2467_v11 = vpack.c.bf16 %v1841_v60, %v1841_v60  ;;  %2917 = vmatpush.bf16.msra.mxu3 %v11194_v46  ;;  %3201 = vmatpush.bf16.msrb.mxu2 %v11225_v8  ;;  %v11232_v60 = vld [vmem:[%s17144_s3 + $0x1f0] sm:$0xff] }
 0x1f8   : > { %17725 = vst [vmem:[#allocation131_spill] sm:$0xff] %v13126_v47  ;;  %v13128_v48 = vunpack.c.l.b16 %v2482_v45  ;;  %2131 = vmatmul.bf16.gmra.mxu0 %v12246_v26  ;;  %v11209_v45 = vld [vmem:[%s17144_s3 + $0x138] sm:$0xff] }
 0x1f9   : > { %v13130_v41 = vunpack.c.l.b16 %v2498_v7  ;;  %2228 = vmatmul.bf16.gmra.mxu1 %v12246_v26  ;;  %v11217_v7 = vld [vmem:[%s17144_s3 + $0x178] sm:$0xff]  ;;  %3007 = vmatpush.bf16.msrb.mxu0 %v11209_v45 }
 0x1fa   : > { %17726 = vst [vmem:[#allocation132_spill] sm:$0xff] %v13128_v48  ;;  %2325 = vmatmul.bf16.gmra.mxu2 %v12246_v26  ;;  %3104 = vmatpush.bf16.msrb.mxu1 %v11217_v7  ;;  %v11207_v7 = vld [vmem:[%s17144_s3 + $0x128] sm:$0xff] }
 0x1fb   : > { %17727 = vst [vmem:[#allocation133_spill] sm:$0xff] %v13130_v41  ;;  %2422 = vmatmul.bf16.gmra.mxu3 %v12246_v26  ;;  %3202 = vmatpush.bf16.msrb.mxu2 %v11224_v0 }
 0x1fc   : > { %3298 = vmatpush.bf16.msrb.mxu3 %v11233_v25 }
 0x1fd   : > { %v1938_v47 = vpop.f32.mrf.mxu2  ;;  %v1746_v31 = vpop.f32.mrf.mxu0  ;;  %3008 = vmatpush.bf16.msrb.mxu0 %v11208_v2 }
 0x1fe   : > { %v2035_v41 = vpop.f32.mrf.mxu3  ;;  %v1843_v48 = vpop.f32.mrf.mxu1  ;;  %v2452_v10 = vpack.c.bf16 %v1746_v31, %v1746_v31  ;;  %v13176_v31 = vunpack.c.l.b16 %v2451_v63  ;;  %3105 = vmatpush.bf16.msrb.mxu1 %v11216_v30  ;;  %v11231_v63 = vld [vmem:[%s17144_s3 + $0x1e8] sm:$0xff] }
 0x1ff   : > { %v2468_v12 = vpack.c.bf16 %v1843_v48, %v1843_v48  ;;  %v13178_v48 = vunpack.c.l.b16 %v2467_v11  ;;  %v11215_v11 = vld [vmem:[%s17144_s3 + $0x168] sm:$0xff]  ;;  %v2499_v25 = vpack.c.bf16 %v2035_v41, %v2035_v41  ;;  %v11206_v41 = vld [vmem:[%s17144_s3 + $0x120] sm:$0xff] }
 0x200   : > { %17728 = vst [vmem:[#allocation134_spill] sm:$0xff] %v13176_v31  ;;  %v13180_v5 = vunpack.c.l.b16 %v2452_v10  ;;  %v2483_v10 = vpack.c.bf16 %v1938_v47, %v1938_v47  ;;  %3299 = vmatpush.bf16.msrb.mxu3 %v11232_v60  ;;  %v11214_v47 = vld [vmem:[%s17144_s3 + $0x160] sm:$0xff] }
 0x201   : > { %17729 = vst [vmem:[#allocation135_spill] sm:$0xff] %v13178_v48  ;;  %v13182_v46 = vunpack.c.l.b16 %v2468_v12  ;;  %v11223_v12 = vld [vmem:[%s17144_s3 + $0x1a8] sm:$0xff]  ;;  %3009 = vmatpush.bf16.msrb.mxu0 %v11207_v7  ;;  %v13208_v60 = vunpack.c.l.b16 %v2499_v25  ;;  %v11213_v25 = vld [vmem:[%s17144_s3 + $0x158] sm:$0xff] }
 0x202   : > { %17730 = vst [vmem:[#allocation136_spill] sm:$0xff] %v13180_v5  ;;  %3106 = vmatpush.bf16.msrb.mxu1 %v11215_v11  ;;  %v13206_v0 = vunpack.c.l.b16 %v2483_v10  ;;  %3203 = vmatpush.bf16.msrb.mxu2 %v11223_v12  ;;  %v11222_v11 = vld [vmem:[%s17144_s3 + $0x1a0] sm:$0xff]  ;;  %v11205_v10 = vld [vmem:[%s17144_s3 + $0x118] sm:$0xff] }
 0x203   : > { %17731 = vst [vmem:[#allocation137_spill] sm:$0xff] %v13182_v46  ;;  %v11221_v12 = vld [vmem:[%s17144_s3 + $0x198] sm:$0xff] }
 0x204   : > { %17732 = vst [vmem:[#allocation138_spill] sm:$0xff] %v13206_v0  ;;  %3300 = vmatpush.bf16.msrb.mxu3 %v11231_v63  ;;  %v11229_v63 = vld [vmem:[%s17144_s3 + $0x1d8] sm:$0xff] }
 0x205   : > { %v1940_v2 = vpop.f32.mrf.mxu2  ;;  %v1749_v48 = vpop.f32.mrf.mxu0  ;;  %17733 = vst [vmem:[#allocation139_spill] sm:$0xff] %v13208_v60  ;;  %3010 = vmatpush.bf16.msrb.mxu0 %v11206_v41 }
 0x206   : > { %v2037_v30 = vpop.f32.mrf.mxu3  ;;  %v2484_v45 = vpack.c.bf16 %v1940_v2, %v1940_v2  ;;  %v1846_v46 = vpop.f32.mrf.mxu1  ;;  %v11230_v2 = vld [vmem:[%s17144_s3 + $0x1e0] sm:$0xff]  ;;  %3107 = vmatpush.bf16.msrb.mxu1 %v11214_v47  ;;  %3204 = vmatpush.bf16.msrb.mxu2 %v11222_v11  ;;  %v11204_v11 = vld [vmem:[%s17144_s3 + $0x110] sm:$0xff] }
 0x207   : > { %v2500_v8 = vpack.c.bf16 %v2037_v30, %v2037_v30  ;;  %v2453_v30 = vpack.c.bf16 %v1749_v48, %v1749_v48  ;;  %v2469_v41 = vpack.c.bf16 %v1846_v46, %v1846_v46  ;;  %v11220_v48 = vld [vmem:[%s17144_s3 + $0x190] sm:$0xff] }
 0x208   : > { %v13210_v31 = vunpack.c.l.b16 %v2484_v45  ;;  %2136 = vmatmul.bf16.gmra.mxu0 %v12266_v37  ;;  %3301 = vmatpush.bf16.msrb.mxu3 %v11230_v2  ;;  %v11212_v2 = vld [vmem:[%s17144_s3 + $0x150] sm:$0xff] }
 0x209   : > { %v13212_v7 = vunpack.c.l.b16 %v2500_v8  ;;  %2233 = vmatmul.bf16.gmra.mxu1 %v12266_v37  ;;  %3011 = vmatpush.bf16.msrb.mxu0 %v11205_v10  ;;  %v11228_v46 = vld [vmem:[%s17144_s3 + $0x1d0] sm:$0xff] }
 0x20a   : > { %17734 = vst [vmem:[#allocation140_spill] sm:$0xff] %v13210_v31  ;;  %2330 = vmatmul.bf16.gmra.mxu2 %v12266_v37  ;;  %3108 = vmatpush.bf16.msrb.mxu1 %v11213_v25  ;;  %v11203_v31 = vld [vmem:[%s17144_s3 + $0x108] sm:$0xff] }
 0x20b   : > { %17735 = vst [vmem:[#allocation141_spill] sm:$0xff] %v13212_v7  ;;  %2427 = vmatmul.bf16.gmra.mxu3 %v12266_v37  ;;  %3205 = vmatpush.bf16.msrb.mxu2 %v11221_v12 }
 0x20c   : > { %3302 = vmatpush.bf16.msrb.mxu3 %v11229_v63 }
 0x20d   : > { %v1943_v47 = vpop.f32.mrf.mxu2  ;;  %v1751_v45 = vpop.f32.mrf.mxu0  ;;  %3012 = vmatpush.bf16.msrb.mxu0 %v11204_v11  ;;  %v11227_v11 = vld [vmem:[%s17144_s3 + $0x1c8] sm:$0xff] }
 0x20e   : > { %v2040_v8 = vpop.f32.mrf.mxu3  ;;  %v1848_v60 = vpop.f32.mrf.mxu1  ;;  %v2454_v7 = vpack.c.bf16 %v1751_v45, %v1751_v45  ;;  %v13254_v45 = vunpack.c.l.b16 %v2469_v41  ;;  %3109 = vmatpush.bf16.msrb.mxu1 %v11212_v2 }
 0x20f   : > { %v2470_v0 = vpack.c.bf16 %v1848_v60, %v1848_v60  ;;  %v13252_v60 = vunpack.c.l.b16 %v2453_v30  ;;  %v11211_v30 = vld [vmem:[%s17144_s3 + $0x148] sm:$0xff]  ;;  %v2501_v41 = vpack.c.bf16 %v2040_v8, %v2040_v8  ;;  %3206 = vmatpush.bf16.msrb.mxu2 %v11220_v48  ;;  %v11202_v8 = vld [vmem:[%s17144_s3 + $0x100] sm:$0xff] }
 0x210   : > { %17737 = vst [vmem:[#allocation143_spill] sm:$0xff] %v13254_v45  ;;  %v13256_v10 = vunpack.c.l.b16 %v2454_v7  ;;  %v2485_v7 = vpack.c.bf16 %v1943_v47, %v1943_v47  ;;  %3303 = vmatpush.bf16.msrb.mxu3 %v11228_v46  ;;  %v11210_v47 = vld [vmem:[%s17144_s3 + $0x140] sm:$0xff] }
 0x211   : > { %17736 = vst [vmem:[#allocation142_spill] sm:$0xff] %v13252_v60  ;;  %v13258_v25 = vunpack.c.l.b16 %v2470_v0  ;;  %v11219_v0 = vld [vmem:[%s17144_s3 + $0x188] sm:$0xff]  ;;  %3013 = vmatpush.bf16.msrb.mxu0 %v11203_v31  ;;  %v13284_v46 = vunpack.c.l.b16 %v2501_v41  ;;  %v11218_v31 = vld [vmem:[%s17144_s3 + $0x180] sm:$0xff] }
 0x212   : > { %17738 = vst [vmem:[#allocation144_spill] sm:$0xff] %v13256_v10  ;;  %3110 = vmatpush.bf16.msrb.mxu1 %v11211_v30  ;;  %v13282_v48 = vunpack.c.l.b16 %v2485_v7 }
 0x213   : > { %17739 = vst [vmem:[#allocation145_spill] sm:$0xff] %v13258_v25  ;;  %3207 = vmatpush.bf16.msrb.mxu2 %v11219_v0 }
 0x214   : > { %17740 = vst [vmem:[#allocation146_spill] sm:$0xff] %v13282_v48  ;;  %3304 = vmatpush.bf16.msrb.mxu3 %v11227_v11 }
 0x215   : > { %v1945_v2 = vpop.f32.mrf.mxu2  ;;  %v1754_v25 = vpop.f32.mrf.mxu0  ;;  %17741 = vst [vmem:[#allocation147_spill] sm:$0xff] %v13284_v46  ;;  %3014 = vmatpush.bf16.msrb.mxu0 %v11202_v8 }
 0x216   : > { %v2042_v63 = vpop.f32.mrf.mxu3  ;;  %v2486_v12 = vpack.c.bf16 %v1945_v2, %v1945_v2  ;;  %v1851_v60 = vpop.f32.mrf.mxu1  ;;  %3111 = vmatpush.bf16.msrb.mxu1 %v11210_v47  ;;  %v2455_v30 = vpack.c.bf16 %v1754_v25, %v1754_v25 }
 0x217   : > { %v2502_v45 = vpack.c.bf16 %v2042_v63, %v2042_v63  ;;  %v11226_v63 = vld [vmem:[%s17144_s3 + $0x1c0] sm:$0xff]  ;;  %3208 = vmatpush.bf16.msrb.mxu2 %v11218_v31  ;;  %v2471_v7 = vpack.c.bf16 %v1851_v60, %v1851_v60 }
 0x218   : > { %v13286_v10 = vunpack.c.l.b16 %v2486_v12  ;;  %2141 = vmatmul.bf16.gmra.mxu0 %v12286_v49  ;;  %3305 = vmatpush.bf16.msrb.mxu3 %v11226_v63  ;;  %v13304_v12 = vunpack.c.l.b16 %v2455_v30 }
 0x219   : > { %v13288_v2 = vunpack.c.l.b16 %v2502_v45  ;;  %2238 = vmatmul.bf16.gmra.mxu1 %v12286_v49  ;;  %v13306_v48 = vunpack.c.l.b16 %v2471_v7 }
 0x21a   : > { %17742 = vst [vmem:[#allocation148_spill] sm:$0xff] %v13286_v10  ;;  %2335 = vmatmul.bf16.gmra.mxu2 %v12286_v49 }
 0x21b   : > { %17743 = vst [vmem:[#allocation149_spill] sm:$0xff] %v13288_v2  ;;  %2432 = vmatmul.bf16.gmra.mxu3 %v12286_v49 }
 0x21c   : > { %17744 = vst [vmem:[#allocation150_spill] sm:$0xff] %v13304_v12 }
 0x21d   : > { %v1948_v41 = vpop.f32.mrf.mxu2  ;;  %v1756_v11 = vpop.f32.mrf.mxu0  ;;  %17745 = vst [vmem:[#allocation151_spill] sm:$0xff] %v13306_v48 }
 0x21e   : > { %v2045_v0 = vpop.f32.mrf.mxu3  ;;  %v1853_v5 = vpop.f32.mrf.mxu1  ;;  %v2456_v44 = vpack.c.bf16 %v1756_v11, %v1756_v11  ;;  %v2487_v25 = vpack.c.bf16 %v1948_v41, %v1948_v41 }
 0x21f   : > { %v2472_v9 = vpack.c.bf16 %v1853_v5, %v1853_v5  ;;  %v2503_v47 = vpack.c.bf16 %v2045_v0, %v2045_v0 }
 0x220   : > { %v13308_v45 = vunpack.c.l.b16 %v2456_v44  ;;  %v13316_v7 = vunpack.c.l.b16 %v2487_v25 }
 0x221   : > { %v13310_v46 = vunpack.c.l.b16 %v2472_v9  ;;  %v13318_v44 = vunpack.c.l.b16 %v2503_v47 }
 0x222   : > { %17746 = vst [vmem:[#allocation152_spill] sm:$0xff] %v13308_v45 }
 0x223   : > { %17747 = vst [vmem:[#allocation153_spill] sm:$0xff] %v13310_v46 }
 0x224   : > { %17748 = vst [vmem:[#allocation154_spill] sm:$0xff] %v13316_v7 }
 0x225   : > { %v1950_v31 = vpop.f32.mrf.mxu2  ;;  %v1759_v30 = vpop.f32.mrf.mxu0  ;;  %17749 = vst [vmem:[#allocation155_spill] sm:$0xff] %v13318_v44 }
 0x226   : > { %v2047_v63 = vpop.f32.mrf.mxu3  ;;  %v2488_v11 = vpack.c.bf16 %v1950_v31, %v1950_v31  ;;  %v1856_v2 = vpop.f32.mrf.mxu1  ;;  %v2457_v25 = vpack.c.bf16 %v1759_v30, %v1759_v30 }
 0x227   : > { %v2504_v5 = vpack.c.bf16 %v2047_v63, %v2047_v63  ;;  %v2473_v47 = vpack.c.bf16 %v1856_v2, %v1856_v2 }
 0x228   : > { %v13320_v9 = vunpack.c.l.b16 %v2488_v11  ;;  %2146 = vmatmul.bf16.gmra.mxu0 %v12306_v61  ;;  %v13332_v48 = vunpack.c.l.b16 %v2457_v25 }
 0x229   : > { %v13322_v10 = vunpack.c.l.b16 %v2504_v5  ;;  %2243 = vmatmul.bf16.gmra.mxu1 %v12306_v61  ;;  %v13334_v46 = vunpack.c.l.b16 %v2473_v47 }
 0x22a   : > { %17750 = vst [vmem:[#allocation156_spill] sm:$0xff] %v13320_v9  ;;  %2340 = vmatmul.bf16.gmra.mxu2 %v12306_v61 }
 0x22b   : > { %17751 = vst [vmem:[#allocation157_spill] sm:$0xff] %v13322_v10  ;;  %2437 = vmatmul.bf16.gmra.mxu3 %v12306_v61 }
 0x22c   : > { %17752 = vst [vmem:[#allocation158_spill] sm:$0xff] %v13332_v48 }
 0x22d   : > { %v1953_v31 = vpop.f32.mrf.mxu2  ;;  %v1761_v11 = vpop.f32.mrf.mxu0  ;;  %17753 = vst [vmem:[#allocation159_spill] sm:$0xff] %v13334_v46 }
 0x22e   : > { %v2050_v63 = vpop.f32.mrf.mxu3  ;;  %v1858_v5 = vpop.f32.mrf.mxu1  ;;  %v2458_v60 = vpack.c.bf16 %v1761_v11, %v1761_v11  ;;  %v2489_v30 = vpack.c.bf16 %v1953_v31, %v1953_v31 }
 0x22f   : > { %v2474_v8 = vpack.c.bf16 %v1858_v5, %v1858_v5  ;;  %v2505_v44 = vpack.c.bf16 %v2050_v63, %v2050_v63  ;;  %v17761_v63 = vpack.c.b16 %v12983_v1, %v12979_v23 }
 0x230   : > { %v13336_v41 = vunpack.c.l.b16 %v2458_v60  ;;  %v13344_v47 = vunpack.c.l.b16 %v2489_v30 }
 0x231   : > { %v13338_v7 = vunpack.c.l.b16 %v2474_v8  ;;  %v13346_v60 = vunpack.c.l.b16 %v2505_v44  ;;  %v17760_v44 = vpack.c.b16 %v12981_v27, %v12977_v50  ;;  %v3520_v30 = vsel %vm3485_vm0, %v17761_v63, 0 }
 0x232   : > { %17754 = vst [vmem:[#allocation160_spill] sm:$0xff] %v13336_v41 }
 0x233   : > { %17755 = vst [vmem:[#allocation161_spill] sm:$0xff] %v13338_v7 }
 0x234   : > { %17756 = vst [vmem:[#allocation162_spill] sm:$0xff] %v13344_v47 }
 0x235   : > { %v1955_v10 = vpop.f32.mrf.mxu2  ;;  %v2112_v25 = vpop.f32.mrf.mxu0  ;;  %17757 = vst [vmem:[#allocation163_spill] sm:$0xff] %v13346_v60 }
 0x236   : > { %v2052_v9 = vpop.f32.mrf.mxu3  ;;  %v2490_v11 = vpack.c.bf16 %v1955_v10, %v1955_v10  ;;  %v2209_v12 = vpop.f32.mrf.mxu1  ;;  %v17763_v10 = vpack.c.b16 %v12998_v21, %v12994_v62  ;;  %v2507_v50 = vpack.c.bf16 %v2112_v25, %v2112_v25 }
 0x237   : > { %v2506_v5 = vpack.c.bf16 %v2052_v9, %v2052_v9  ;;  %v3490_v9 = vsel %vm3485_vm0, %v17760_v44, 0  ;;  %v2523_v27 = vpack.c.bf16 %v2209_v12, %v2209_v12 }
 0x238   : > { %v13348_v8 = vunpack.c.l.b16 %v2490_v11  ;;  %2627 = vmatmul.bf16.vlgmr.msra.gmra.mxu0 %v12148_v40  ;;  %v17762_v11 = vpack.c.b16 %v12996_v51, %v12992_v3  ;;  %v3580_v31 = vsel %vm3485_vm0, %v17763_v10, 0  ;;  %v13376_v2 = vunpack.c.l.b16 %v2507_v50 }
 0x239   : > { %v13350_v45 = vunpack.c.l.b16 %v2506_v5  ;;  %2724 = vmatmul.bf16.vlgmr.msra.gmra.mxu1 %v12148_v40  ;;  %3499 = vmatpush.bf16.xpose.msra.mxu0 %v3490_v9  ;;  %v13378_v3 = vunpack.c.l.b16 %v2523_v27 }
 0x23a   : > { %17758 = vst [vmem:[#allocation164_spill] sm:$0xff] %v13348_v8  ;;  %2821 = vmatmul.bf16.vlgmr.msra.gmra.mxu2 %v12148_v40  ;;  %3529 = vmatpush.bf16.xpose.msra.mxu1 %v3520_v30  ;;  %v3550_v5 = vsel %vm3485_vm0, %v17762_v11, 0 }
 0x23b   : > { %17759 = vst [vmem:[#allocation165_spill] sm:$0xff] %v13350_v45  ;;  %2918 = vmatmul.bf16.vlgmr.msra.gmra.mxu3 %v12148_v40  ;;  %3559 = vmatpush.bf16.xpose.msra.mxu2 %v3550_v5 }
 0x23c   : > { %3589 = vmatpush.bf16.xpose.msra.mxu3 %v3580_v31 }
 0x23d   : > { %v2306_v44 = vpop.f32.mrf.mxu2  ;;  %v2114_v23 = vpop.f32.mrf.mxu0 }
 0x23e   : > { %v2403_v1 = vpop.f32.mrf.mxu3  ;;  %v2211_v63 = vpop.f32.mrf.mxu1  ;;  %v2508_v9 = vpack.c.bf16 %v2114_v23, %v2114_v23  ;;  %v2539_v12 = vpack.c.bf16 %v2306_v44, %v2306_v44 }
 0x23f   : > { %v2524_v30 = vpack.c.bf16 %v2211_v63, %v2211_v63  ;;  %v2555_v25 = vpack.c.bf16 %v2403_v1, %v2403_v1 }
 0x240   : > { %v13380_v51 = vunpack.c.l.b16 %v2508_v9  ;;  %v13388_v27 = vunpack.c.l.b16 %v2539_v12 }
 0x241   : > { %v13382_v11 = vunpack.c.l.b16 %v2524_v30  ;;  %v13390_v9 = vunpack.c.l.b16 %v2555_v25 }
 0x245   : > { %v2308_v31 = vpop.f32.mrf.mxu2  ;;  %v2117_v50 = vpop.f32.mrf.mxu0 }
 0x246   : > { %v2405_v10 = vpop.f32.mrf.mxu3  ;;  %v2540_v5 = vpack.c.bf16 %v2308_v31, %v2308_v31  ;;  %v2214_v63 = vpop.f32.mrf.mxu1  ;;  %v2509_v12 = vpack.c.bf16 %v2117_v50, %v2117_v50 }
 0x247   : > { %v2556_v23 = vpack.c.bf16 %v2405_v10, %v2405_v10  ;;  %v2525_v25 = vpack.c.bf16 %v2214_v63, %v2214_v63 }
 0x248   : > { %v13392_v30 = vunpack.c.l.b16 %v2540_v5  ;;  %2632 = vmatmul.bf16.gmra.mxu0 %v12186_v57  ;;  %v13404_v60 = vunpack.c.l.b16 %v2509_v12 }
 0x249   : > { %v13394_v0 = vunpack.c.l.b16 %v2556_v23  ;;  %2729 = vmatmul.bf16.gmra.mxu1 %v12186_v57  ;;  %v13406_v45 = vunpack.c.l.b16 %v2525_v25 }
 0x24a   : > { %2826 = vmatmul.bf16.gmra.mxu2 %v12186_v57 }
 0x24b   : > { %2923 = vmatmul.bf16.gmra.mxu3 %v12186_v57 }
 0x24d   : > { %v2311_v31 = vpop.f32.mrf.mxu2  ;;  %v2119_v5 = vpop.f32.mrf.mxu0 }
 0x24e   : > { %v2408_v10 = vpop.f32.mrf.mxu3  ;;  %v2216_v23 = vpop.f32.mrf.mxu1  ;;  %v2510_v21 = vpack.c.bf16 %v2119_v5, %v2119_v5  ;;  %v2541_v63 = vpack.c.bf16 %v2311_v31, %v2311_v31 }
 0x24f   : > { %v2526_v62 = vpack.c.bf16 %v2216_v23, %v2216_v23  ;;  %v2557_v8 = vpack.c.bf16 %v2408_v10, %v2408_v10 }
 0x250   : > { %v13408_v44 = vunpack.c.l.b16 %v2510_v21  ;;  %v13416_v25 = vunpack.c.l.b16 %v2541_v63 }
 0x251   : > { %v13410_v47 = vunpack.c.l.b16 %v2526_v62  ;;  %v13418_v21 = vunpack.c.l.b16 %v2557_v8 }
 0x252   : > { %17764 = vst [vmem:[#allocation166_spill] sm:$0xff] %v13416_v25 }
 0x253   : > { %17765 = vst [vmem:[#allocation167_spill] sm:$0xff] %v13418_v21 }
 0x255   : > { %v2313_v46 = vpop.f32.mrf.mxu2  ;;  %v2122_v12 = vpop.f32.mrf.mxu0 }
 0x256   : > { %v2410_v7 = vpop.f32.mrf.mxu3  ;;  %v2542_v5 = vpack.c.bf16 %v2313_v46, %v2313_v46  ;;  %v2219_v48 = vpop.f32.mrf.mxu1 }
 0x257   : > { %v2558_v23 = vpack.c.bf16 %v2410_v7, %v2410_v7  ;;  %v2511_v7 = vpack.c.bf16 %v2122_v12, %v2122_v12  ;;  %v2527_v8 = vpack.c.bf16 %v2219_v48, %v2219_v48 }
 0x258   : > { %v13420_v62 = vunpack.c.l.b16 %v2542_v5  ;;  %2637 = vmatmul.bf16.gmra.mxu0 %v12206_v4 }
 0x259   : > { %v13422_v41 = vunpack.c.l.b16 %v2558_v23  ;;  %2734 = vmatmul.bf16.gmra.mxu1 %v12206_v4  ;;  %v13432_v54 = vunpack.c.l.b16 %v2511_v7  ;;  %v13434_v56 = vunpack.c.l.b16 %v2527_v8 }
 0x25a   : > { %17766 = vst [vmem:[#allocation168_spill] sm:$0xff] %v13420_v62  ;;  %2831 = vmatmul.bf16.gmra.mxu2 %v12206_v4 }
 0x25b   : > { %17767 = vst [vmem:[#allocation169_spill] sm:$0xff] %v13422_v41  ;;  %2928 = vmatmul.bf16.gmra.mxu3 %v12206_v4 }
 0x25c   : > { %17768 = vst [vmem:[#allocation170_spill] sm:$0xff] %v13432_v54 }
 0x25d   : > { %v2316_v10 = vpop.f32.mrf.mxu2  ;;  %v2124_v5 = vpop.f32.mrf.mxu0  ;;  %17769 = vst [vmem:[#allocation171_spill] sm:$0xff] %v13434_v56 }
 0x25e   : > { %v2413_v63 = vpop.f32.mrf.mxu3  ;;  %v2221_v23 = vpop.f32.mrf.mxu1  ;;  %v2512_v50 = vpack.c.bf16 %v2124_v5, %v2124_v5  ;;  %v2543_v12 = vpack.c.bf16 %v2316_v10, %v2316_v10 }
 0x25f   : > { %v2528_v1 = vpack.c.bf16 %v2221_v23, %v2221_v23  ;;  %v2559_v55 = vpack.c.bf16 %v2413_v63, %v2413_v63 }
 0x260   : > { %v13436_v31 = vunpack.c.l.b16 %v2512_v50  ;;  %v13444_v8 = vunpack.c.l.b16 %v2543_v12 }
 0x261   : > { %v13438_v53 = vunpack.c.l.b16 %v2528_v1  ;;  %v13446_v50 = vunpack.c.l.b16 %v2559_v55 }
 0x262   : > { %17770 = vst [vmem:[#allocation172_spill] sm:$0xff] %v13436_v31 }
 0x263   : > { %17771 = vst [vmem:[#allocation173_spill] sm:$0xff] %v13438_v53 }
 0x264   : > { %17772 = vst [vmem:[#allocation174_spill] sm:$0xff] %v13444_v8 }
 0x265   : > { %v2318_v21 = vpop.f32.mrf.mxu2  ;;  %v2127_v7 = vpop.f32.mrf.mxu0  ;;  %17773 = vst [vmem:[#allocation175_spill] sm:$0xff] %v13446_v50 }
 0x266   : > { %v2415_v41 = vpop.f32.mrf.mxu3  ;;  %v2544_v5 = vpack.c.bf16 %v2318_v21, %v2318_v21  ;;  %v2224_v25 = vpop.f32.mrf.mxu1  ;;  %v2513_v55 = vpack.c.bf16 %v2127_v7, %v2127_v7 }
 0x267   : > { %v2560_v23 = vpack.c.bf16 %v2415_v41, %v2415_v41  ;;  %v2529_v21 = vpack.c.bf16 %v2224_v25, %v2224_v25 }
 0x268   : > { %v13448_v1 = vunpack.c.l.b16 %v2544_v5  ;;  %2642 = vmatmul.bf16.gmra.mxu0 %v12226_v15  ;;  %v13460_v56 = vunpack.c.l.b16 %v2513_v55 }
 0x269   : > { %v13450_v62 = vunpack.c.l.b16 %v2560_v23  ;;  %2739 = vmatmul.bf16.gmra.mxu1 %v12226_v15  ;;  %v13462_v53 = vunpack.c.l.b16 %v2529_v21 }
 0x26a   : > { %17774 = vst [vmem:[#allocation176_spill] sm:$0xff] %v13448_v1  ;;  %2836 = vmatmul.bf16.gmra.mxu2 %v12226_v15 }
 0x26b   : > { %17775 = vst [vmem:[#allocation177_spill] sm:$0xff] %v13450_v62  ;;  %2933 = vmatmul.bf16.gmra.mxu3 %v12226_v15 }
 0x26c   : > { %17776 = vst [vmem:[#allocation178_spill] sm:$0xff] %v13460_v56 }
 0x26d   : > { %v2321_v63 = vpop.f32.mrf.mxu2  ;;  %v2129_v5 = vpop.f32.mrf.mxu0  ;;  %17777 = vst [vmem:[#allocation179_spill] sm:$0xff] %v13462_v53 }
 0x26e   : > { %v2418_v12 = vpop.f32.mrf.mxu3  ;;  %v2226_v23 = vpop.f32.mrf.mxu1  ;;  %v2514_v48 = vpack.c.bf16 %v2129_v5, %v2129_v5  ;;  %v2545_v7 = vpack.c.bf16 %v2321_v63, %v2321_v63 }
 0x26f   : > { %v2530_v46 = vpack.c.bf16 %v2226_v23, %v2226_v23  ;;  %v2561_v50 = vpack.c.bf16 %v2418_v12, %v2418_v12 }
 0x270   : > { %v13464_v10 = vunpack.c.l.b16 %v2514_v48  ;;  %v13472_v21 = vunpack.c.l.b16 %v2545_v7 }
 0x271   : > { %v13466_v8 = vunpack.c.l.b16 %v2530_v46  ;;  %v13474_v48 = vunpack.c.l.b16 %v2561_v50 }
 0x272   : > { %17778 = vst [vmem:[#allocation180_spill] sm:$0xff] %v13464_v10 }
 0x273   : > { %17779 = vst [vmem:[#allocation181_spill] sm:$0xff] %v13466_v8 }
 0x274   : > { %17780 = vst [vmem:[#allocation182_spill] sm:$0xff] %v13472_v21 }
 0x275   : > { %v2323_v62 = vpop.f32.mrf.mxu2  ;;  %v2132_v55 = vpop.f32.mrf.mxu0  ;;  %17781 = vst [vmem:[#allocation183_spill] sm:$0xff] %v13474_v48 }
 0x276   : > { %v2420_v1 = vpop.f32.mrf.mxu3  ;;  %v2546_v5 = vpack.c.bf16 %v2323_v62, %v2323_v62  ;;  %v2229_v54 = vpop.f32.mrf.mxu1  ;;  %v2515_v50 = vpack.c.bf16 %v2132_v55, %v2132_v55 }
 0x277   : > { %v2562_v23 = vpack.c.bf16 %v2420_v1, %v2420_v1  ;;  %v2531_v1 = vpack.c.bf16 %v2229_v54, %v2229_v54 }
 0x278   : > { %v13476_v46 = vunpack.c.l.b16 %v2546_v5  ;;  %2647 = vmatmul.bf16.gmra.mxu0 %v12246_v26  ;;  %v13488_v53 = vunpack.c.l.b16 %v2515_v50 }
 0x279   : > { %v13478_v31 = vunpack.c.l.b16 %v2562_v23  ;;  %2744 = vmatmul.bf16.gmra.mxu1 %v12246_v26  ;;  %v13490_v8 = vunpack.c.l.b16 %v2531_v1 }
 0x27a   : > { %17782 = vst [vmem:[#allocation184_spill] sm:$0xff] %v13476_v46  ;;  %2841 = vmatmul.bf16.gmra.mxu2 %v12246_v26 }
 0x27b   : > { %17783 = vst [vmem:[#allocation185_spill] sm:$0xff] %v13478_v31  ;;  %2938 = vmatmul.bf16.gmra.mxu3 %v12246_v26 }
 0x27c   : > { %17784 = vst [vmem:[#allocation186_spill] sm:$0xff] %v13488_v53 }
 0x27d   : > { %v2326_v12 = vpop.f32.mrf.mxu2  ;;  %v2134_v5 = vpop.f32.mrf.mxu0  ;;  %17785 = vst [vmem:[#allocation187_spill] sm:$0xff] %v13490_v8 }
 0x27e   : > { %v2423_v7 = vpop.f32.mrf.mxu3  ;;  %v2231_v23 = vpop.f32.mrf.mxu1  ;;  %v2516_v25 = vpack.c.bf16 %v2134_v5, %v2134_v5  ;;  %v2547_v55 = vpack.c.bf16 %v2326_v12, %v2326_v12 }
 0x27f   : > { %v2532_v41 = vpack.c.bf16 %v2231_v23, %v2231_v23  ;;  %v2563_v48 = vpack.c.bf16 %v2423_v7, %v2423_v7 }
 0x280   : > { %v13492_v63 = vunpack.c.l.b16 %v2516_v25  ;;  %v13500_v1 = vunpack.c.l.b16 %v2547_v55 }
 0x281   : > { %v13494_v21 = vunpack.c.l.b16 %v2532_v41  ;;  %v13502_v25 = vunpack.c.l.b16 %v2563_v48 }
 0x282   : > { %17786 = vst [vmem:[#allocation188_spill] sm:$0xff] %v13492_v63 }
 0x283   : > { %17787 = vst [vmem:[#allocation189_spill] sm:$0xff] %v13494_v21 }
 0x284   : > { %17788 = vst [vmem:[#allocation190_spill] sm:$0xff] %v13500_v1 }
 0x285   : > { %v2328_v31 = vpop.f32.mrf.mxu2  ;;  %v2137_v50 = vpop.f32.mrf.mxu0  ;;  %17789 = vst [vmem:[#allocation191_spill] sm:$0xff] %v13502_v25 }
 0x286   : > { %v2425_v46 = vpop.f32.mrf.mxu3  ;;  %v2548_v5 = vpack.c.bf16 %v2328_v31, %v2328_v31  ;;  %v2234_v56 = vpop.f32.mrf.mxu1  ;;  %v2517_v48 = vpack.c.bf16 %v2137_v50, %v2137_v50 }
 0x287   : > { %v2564_v23 = vpack.c.bf16 %v2425_v46, %v2425_v46  ;;  %v2533_v46 = vpack.c.bf16 %v2234_v56, %v2234_v56 }
 0x288   : > { %v13504_v41 = vunpack.c.l.b16 %v2548_v5  ;;  %2652 = vmatmul.bf16.gmra.mxu0 %v12266_v37  ;;  %v13516_v8 = vunpack.c.l.b16 %v2517_v48 }
 0x289   : > { %v13506_v10 = vunpack.c.l.b16 %v2564_v23  ;;  %2749 = vmatmul.bf16.gmra.mxu1 %v12266_v37  ;;  %v13518_v21 = vunpack.c.l.b16 %v2533_v46 }
 0x28a   : > { %17790 = vst [vmem:[#allocation192_spill] sm:$0xff] %v13504_v41  ;;  %2846 = vmatmul.bf16.gmra.mxu2 %v12266_v37 }
 0x28b   : > { %17791 = vst [vmem:[#allocation193_spill] sm:$0xff] %v13506_v10  ;;  %2943 = vmatmul.bf16.gmra.mxu3 %v12266_v37 }
 0x28c   : > { %17792 = vst [vmem:[#allocation194_spill] sm:$0xff] %v13516_v8 }
 0x28d   : > { %v2331_v7 = vpop.f32.mrf.mxu2  ;;  %v2139_v5 = vpop.f32.mrf.mxu0  ;;  %17793 = vst [vmem:[#allocation195_spill] sm:$0xff] %v13518_v21 }
 0x28e   : > { %v2428_v55 = vpop.f32.mrf.mxu3  ;;  %v2236_v23 = vpop.f32.mrf.mxu1  ;;  %v2518_v54 = vpack.c.bf16 %v2139_v5, %v2139_v5  ;;  %v2549_v50 = vpack.c.bf16 %v2331_v7, %v2331_v7 }
 0x28f   : > { %v2534_v62 = vpack.c.bf16 %v2236_v23, %v2236_v23  ;;  %v2565_v25 = vpack.c.bf16 %v2428_v55, %v2428_v55 }
 0x290   : > { %v13520_v12 = vunpack.c.l.b16 %v2518_v54  ;;  %v13528_v46 = vunpack.c.l.b16 %v2549_v50 }
 0x291   : > { %v13522_v1 = vunpack.c.l.b16 %v2534_v62  ;;  %v13530_v54 = vunpack.c.l.b16 %v2565_v25 }
 0x292   : > { %17794 = vst [vmem:[#allocation196_spill] sm:$0xff] %v13520_v12 }
 0x293   : > { %17795 = vst [vmem:[#allocation197_spill] sm:$0xff] %v13522_v1 }
 0x294   : > { %17796 = vst [vmem:[#allocation198_spill] sm:$0xff] %v13528_v46 }
 0x295   : > { %v2333_v10 = vpop.f32.mrf.mxu2  ;;  %v2142_v48 = vpop.f32.mrf.mxu0  ;;  %17797 = vst [vmem:[#allocation199_spill] sm:$0xff] %v13530_v54 }
 0x296   : > { %v2430_v41 = vpop.f32.mrf.mxu3  ;;  %v2550_v5 = vpack.c.bf16 %v2333_v10, %v2333_v10  ;;  %v2239_v53 = vpop.f32.mrf.mxu1  ;;  %v2519_v25 = vpack.c.bf16 %v2142_v48, %v2142_v48 }
 0x297   : > { %v2566_v23 = vpack.c.bf16 %v2430_v41, %v2430_v41  ;;  %v2535_v41 = vpack.c.bf16 %v2239_v53, %v2239_v53 }
 0x298   : > { %v13532_v62 = vunpack.c.l.b16 %v2550_v5  ;;  %2657 = vmatmul.bf16.gmra.mxu0 %v12286_v49  ;;  %v13544_v21 = vunpack.c.l.b16 %v2519_v25 }
 0x299   : > { %v13534_v63 = vunpack.c.l.b16 %v2566_v23  ;;  %2754 = vmatmul.bf16.gmra.mxu1 %v12286_v49  ;;  %v13546_v1 = vunpack.c.l.b16 %v2535_v41 }
 0x29a   : > { %17798 = vst [vmem:[#allocation200_spill] sm:$0xff] %v13532_v62  ;;  %2851 = vmatmul.bf16.gmra.mxu2 %v12286_v49 }
 0x29b   : > { %17799 = vst [vmem:[#allocation201_spill] sm:$0xff] %v13534_v63  ;;  %2948 = vmatmul.bf16.gmra.mxu3 %v12286_v49 }
 0x29c   : > { %17800 = vst [vmem:[#allocation202_spill] sm:$0xff] %v13544_v21 }
 0x29d   : > { %v2336_v55 = vpop.f32.mrf.mxu2  ;;  %v2144_v5 = vpop.f32.mrf.mxu0  ;;  %17801 = vst [vmem:[#allocation203_spill] sm:$0xff] %v13546_v1 }
 0x29e   : > { %v2433_v50 = vpop.f32.mrf.mxu3  ;;  %v2241_v23 = vpop.f32.mrf.mxu1  ;;  %v2520_v56 = vpack.c.bf16 %v2144_v5, %v2144_v5  ;;  %v2551_v48 = vpack.c.bf16 %v2336_v55, %v2336_v55 }
 0x29f   : > { %v2536_v31 = vpack.c.bf16 %v2241_v23, %v2241_v23  ;;  %v2567_v54 = vpack.c.bf16 %v2433_v50, %v2433_v50 }
 0x2a0   : > { %v13548_v7 = vunpack.c.l.b16 %v2520_v56  ;;  %v13556_v41 = vunpack.c.l.b16 %v2551_v48 }
 0x2a1   : > { %v13550_v46 = vunpack.c.l.b16 %v2536_v31  ;;  %v13558_v56 = vunpack.c.l.b16 %v2567_v54 }
 0x2a2   : > { %17802 = vst [vmem:[#allocation204_spill] sm:$0xff] %v13548_v7 }
 0x2a3   : > { %17803 = vst [vmem:[#allocation205_spill] sm:$0xff] %v13550_v46 }
 0x2a4   : > { %17804 = vst [vmem:[#allocation206_spill] sm:$0xff] %v13556_v41 }
 0x2a5   : > { %v2338_v63 = vpop.f32.mrf.mxu2  ;;  %v2147_v25 = vpop.f32.mrf.mxu0  ;;  %17805 = vst [vmem:[#allocation207_spill] sm:$0xff] %v13558_v56 }
 0x2a6   : > { %v2435_v62 = vpop.f32.mrf.mxu3  ;;  %v2552_v5 = vpack.c.bf16 %v2338_v63, %v2338_v63  ;;  %v2244_v8 = vpop.f32.mrf.mxu1  ;;  %v2521_v54 = vpack.c.bf16 %v2147_v25, %v2147_v25 }
 0x2a7   : > { %v2568_v23 = vpack.c.bf16 %v2435_v62, %v2435_v62  ;;  %v2537_v62 = vpack.c.bf16 %v2244_v8, %v2244_v8 }
 0x2a8   : > { %v13560_v31 = vunpack.c.l.b16 %v2552_v5  ;;  %2662 = vmatmul.bf16.gmra.mxu0 %v12306_v61  ;;  %v13572_v1 = vunpack.c.l.b16 %v2521_v54 }
 0x2a9   : > { %v13562_v12 = vunpack.c.l.b16 %v2568_v23  ;;  %2759 = vmatmul.bf16.gmra.mxu1 %v12306_v61  ;;  %v13574_v46 = vunpack.c.l.b16 %v2537_v62 }
 0x2aa   : > { %17806 = vst [vmem:[#allocation208_spill] sm:$0xff] %v13560_v31  ;;  %2856 = vmatmul.bf16.gmra.mxu2 %v12306_v61 }
 0x2ab   : > { %17807 = vst [vmem:[#allocation209_spill] sm:$0xff] %v13562_v12  ;;  %2953 = vmatmul.bf16.gmra.mxu3 %v12306_v61 }
 0x2ad   : > { %v2341_v50 = vpop.f32.mrf.mxu2  ;;  %v2149_v5 = vpop.f32.mrf.mxu0 }
 0x2ae   : > { %v2438_v48 = vpop.f32.mrf.mxu3  ;;  %v2246_v23 = vpop.f32.mrf.mxu1  ;;  %v2522_v53 = vpack.c.bf16 %v2149_v5, %v2149_v5  ;;  %v2553_v25 = vpack.c.bf16 %v2341_v50, %v2341_v50 }
 0x2af   : > { %v2538_v10 = vpack.c.bf16 %v2246_v23, %v2246_v23  ;;  %v2569_v56 = vpack.c.bf16 %v2438_v48, %v2438_v48  ;;  %v17809_v48 = vpack.c.b16 %v13382_v11, %v13378_v3 }
 0x2b0   : > { %v13576_v55 = vunpack.c.l.b16 %v2522_v53  ;;  %v13584_v62 = vunpack.c.l.b16 %v2553_v25 }
 0x2b1   : > { %v13578_v41 = vunpack.c.l.b16 %v2538_v10  ;;  %v13586_v53 = vunpack.c.l.b16 %v2569_v56  ;;  %v17808_v56 = vpack.c.b16 %v13380_v51, %v13376_v2  ;;  %v3640_v25 = vsel %vm3485_vm0, %v17809_v48, 0 }
 0x2b5   : > { %v2343_v12 = vpop.f32.mrf.mxu2  ;;  %v2628_v54 = vpop.f32.mrf.mxu0 }
 0x2b6   : > { %v2440_v31 = vpop.f32.mrf.mxu3  ;;  %v2554_v5 = vpack.c.bf16 %v2343_v12, %v2343_v12  ;;  %v2725_v21 = vpop.f32.mrf.mxu1  ;;  %v3347_v2 = vpack.c.bf16 %v2628_v54, %v2628_v54 }
 0x2b7   : > { %v2570_v23 = vpack.c.bf16 %v2440_v31, %v2440_v31  ;;  %v3610_v31 = vsel %vm3485_vm0, %v17808_v56, 0  ;;  %v3363_v51 = vpack.c.bf16 %v2725_v21, %v2725_v21 }
 0x2b8   : > { %v13588_v10 = vunpack.c.l.b16 %v2554_v5  ;;  %3015 = vmatmul.bf16.vlgmr.msrb.gmra.mxu0 %v12148_v40  ;;  %v17810_v5 = vpack.c.b16 %v13392_v30, %v13388_v27  ;;  %v13616_v50 = vunpack.c.l.b16 %v3347_v2 }
 0x2b9   : > { %v13590_v7 = vunpack.c.l.b16 %v2570_v23  ;;  %3112 = vmatmul.bf16.vlgmr.msrb.gmra.mxu1 %v12148_v40  ;;  %3619 = vmatpush.bf16.xpose.msrb.mxu0 %v3610_v31  ;;  %v13618_v27 = vunpack.c.l.b16 %v3363_v51 }
 0x2ba   : > { %3209 = vmatmul.bf16.vlgmr.msrb.gmra.mxu2 %v12148_v40  ;;  %3649 = vmatpush.bf16.xpose.msrb.mxu1 %v3640_v25  ;;  %v3670_v23 = vsel %vm3485_vm0, %v17810_v5, 0 }
 0x2bb   : > { %3306 = vmatmul.bf16.vlgmr.msrb.gmra.mxu3 %v12148_v40  ;;  %v17811_v40 = vpack.c.b16 %v13394_v0, %v13390_v9  ;;  %3679 = vmatpush.bf16.xpose.msrb.mxu2 %v3670_v23  ;;  %17812 = vst [vmem:[#allocation210_spill] sm:$0xff] %v13618_v27 }
 0x2bd   : > { %v3700_v12 = vsel %vm3485_vm0, %v17811_v40, 0  ;;  %v2822_v56 = vpop.f32.mrf.mxu2  ;;  %v2630_v11 = vpop.f32.mrf.mxu0 }
 0x2be   : > { %3709 = vmatpush.bf16.xpose.msrb.mxu3 %v3700_v12  ;;  %v2919_v3 = vpop.f32.mrf.mxu3  ;;  %v2727_v48 = vpop.f32.mrf.mxu1  ;;  %v3348_v31 = vpack.c.bf16 %v2630_v11, %v2630_v11  ;;  %v3379_v21 = vpack.c.bf16 %v2822_v56, %v2822_v56 }
 0x2bf   : > { %v3364_v25 = vpack.c.bf16 %v2727_v48, %v2727_v48  ;;  %v3395_v54 = vpack.c.bf16 %v2919_v3, %v2919_v3 }
 0x2c0   : > { %v13620_v30 = vunpack.c.l.b16 %v3348_v31  ;;  %v13628_v51 = vunpack.c.l.b16 %v3379_v21 }
 0x2c1   : > { %v13622_v5 = vunpack.c.l.b16 %v3364_v25  ;;  %v13630_v31 = vunpack.c.l.b16 %v3395_v54 }
 0x2c2   : > { %17814 = vst [vmem:[#allocation212_spill] sm:$0xff] %v13628_v51 }
 0x2c3   : > { %17813 = vst [vmem:[#allocation211_spill] sm:$0xff] %v13622_v5 }
 0x2c4   : > { %17815 = vst [vmem:[#allocation213_spill] sm:$0xff] %v13630_v31 }
 0x2c5   : > { %v2824_v12 = vpop.f32.mrf.mxu2  ;;  %v2633_v2 = vpop.f32.mrf.mxu0 }
 0x2c6   : > { %v2921_v23 = vpop.f32.mrf.mxu3  ;;  %v3380_v40 = vpack.c.bf16 %v2824_v12, %v2824_v12  ;;  %v2730_v48 = vpop.f32.mrf.mxu1  ;;  %v3349_v21 = vpack.c.bf16 %v2633_v2, %v2633_v2 }
 0x2c7   : > { %v3396_v11 = vpack.c.bf16 %v2921_v23, %v2921_v23  ;;  %v3365_v54 = vpack.c.bf16 %v2730_v48, %v2730_v48 }
 0x2c8   : > { %v13632_v25 = vunpack.c.l.b16 %v3380_v40  ;;  %3020 = vmatmul.bf16.gmra.mxu0 %v12186_v57  ;;  %v13644_v63 = vunpack.c.l.b16 %v3349_v21 }
 0x2c9   : > { %v13634_v8 = vunpack.c.l.b16 %v3396_v11  ;;  %3117 = vmatmul.bf16.gmra.mxu1 %v12186_v57  ;;  %v13646_v27 = vunpack.c.l.b16 %v3365_v54 }
 0x2ca   : > { %17816 = vst [vmem:[#allocation214_spill] sm:$0xff] %v13632_v25  ;;  %3214 = vmatmul.bf16.gmra.mxu2 %v12186_v57 }
 0x2cb   : > { %17817 = vst [vmem:[#allocation215_spill] sm:$0xff] %v13634_v8  ;;  %3311 = vmatmul.bf16.gmra.mxu3 %v12186_v57 }
 0x2cc   : > { %17818 = vst [vmem:[#allocation216_spill] sm:$0xff] %v13644_v63 }
 0x2cd   : > { %v2827_v12 = vpop.f32.mrf.mxu2  ;;  %v2635_v40 = vpop.f32.mrf.mxu0  ;;  %17819 = vst [vmem:[#allocation217_spill] sm:$0xff] %v13646_v27 }
 0x2ce   : > { %v2924_v23 = vpop.f32.mrf.mxu3  ;;  %v2732_v11 = vpop.f32.mrf.mxu1  ;;  %v3350_v9 = vpack.c.bf16 %v2635_v40, %v2635_v40  ;;  %v3381_v2 = vpack.c.bf16 %v2827_v12, %v2827_v12 }
 0x2cf   : > { %v3366_v0 = vpack.c.bf16 %v2732_v11, %v2732_v11  ;;  %v3397_v48 = vpack.c.bf16 %v2924_v23, %v2924_v23 }
 0x2d0   : > { %v13648_v56 = vunpack.c.l.b16 %v3350_v9  ;;  %v13656_v54 = vunpack.c.l.b16 %v3381_v2 }
 0x2d1   : > { %v13650_v51 = vunpack.c.l.b16 %v3366_v0  ;;  %v13658_v9 = vunpack.c.l.b16 %v3397_v48 }
 0x2d2   : > { %17820 = vst [vmem:[#allocation218_spill] sm:$0xff] %v13648_v56 }
 0x2d3   : > { %17821 = vst [vmem:[#allocation219_spill] sm:$0xff] %v13650_v51 }
 0x2d4   : > { %17822 = vst [vmem:[#allocation220_spill] sm:$0xff] %v13656_v54 }
 0x2d5   : > { %v2829_v31 = vpop.f32.mrf.mxu2  ;;  %v2638_v21 = vpop.f32.mrf.mxu0  ;;  %17823 = vst [vmem:[#allocation221_spill] sm:$0xff] %v13658_v9 }
 0x2d6   : > { %v2926_v8 = vpop.f32.mrf.mxu3  ;;  %v3382_v40 = vpack.c.bf16 %v2829_v31, %v2829_v31  ;;  %v2735_v25 = vpop.f32.mrf.mxu1  ;;  %v3351_v31 = vpack.c.bf16 %v2638_v21, %v2638_v21 }
 0x2d7   : > { %v3398_v11 = vpack.c.bf16 %v2926_v8, %v2926_v8  ;;  %v3367_v23 = vpack.c.bf16 %v2735_v25, %v2735_v25 }
 0x2d8   : > { %v13660_v0 = vunpack.c.l.b16 %v3382_v40  ;;  %3025 = vmatmul.bf16.gmra.mxu0 %v12206_v4  ;;  %v13672_v27 = vunpack.c.l.b16 %v3351_v31 }
 0x2d9   : > { %v13662_v5 = vunpack.c.l.b16 %v3398_v11  ;;  %3122 = vmatmul.bf16.gmra.mxu1 %v12206_v4  ;;  %v13674_v51 = vunpack.c.l.b16 %v3367_v23 }
 0x2da   : > { %17824 = vst [vmem:[#allocation222_spill] sm:$0xff] %v13660_v0  ;;  %3219 = vmatmul.bf16.gmra.mxu2 %v12206_v4 }
 0x2db   : > { %17825 = vst [vmem:[#allocation223_spill] sm:$0xff] %v13662_v5  ;;  %3316 = vmatmul.bf16.gmra.mxu3 %v12206_v4 }
 0x2dc   : > { %17826 = vst [vmem:[#allocation224_spill] sm:$0xff] %v13672_v27 }
 0x2dd   : > { %v2832_v2 = vpop.f32.mrf.mxu2  ;;  %v2640_v40 = vpop.f32.mrf.mxu0  ;;  %17827 = vst [vmem:[#allocation225_spill] sm:$0xff] %v13674_v51 }
 0x2de   : > { %v2929_v48 = vpop.f32.mrf.mxu3  ;;  %v2737_v11 = vpop.f32.mrf.mxu1  ;;  %v3352_v57 = vpack.c.bf16 %v2640_v40, %v2640_v40  ;;  %v3383_v25 = vpack.c.bf16 %v2832_v2, %v2832_v2 }
 0x2df   : > { %v3368_v3 = vpack.c.bf16 %v2737_v11, %v2737_v11  ;;  %v3399_v21 = vpack.c.bf16 %v2929_v48, %v2929_v48 }
 0x2e0   : > { %v13676_v12 = vunpack.c.l.b16 %v3352_v57  ;;  %v13684_v23 = vunpack.c.l.b16 %v3383_v25 }
 0x2e1   : > { %v13678_v54 = vunpack.c.l.b16 %v3368_v3  ;;  %v13686_v57 = vunpack.c.l.b16 %v3399_v21 }
 0x2e2   : > { %17828 = vst [vmem:[#allocation226_spill] sm:$0xff] %v13676_v12 }
 0x2e3   : > { %17829 = vst [vmem:[#allocation227_spill] sm:$0xff] %v13678_v54 }
 0x2e4   : > { %17830 = vst [vmem:[#allocation228_spill] sm:$0xff] %v13684_v23 }
 0x2e5   : > { %v2834_v0 = vpop.f32.mrf.mxu2  ;;  %v2643_v31 = vpop.f32.mrf.mxu0  ;;  %17831 = vst [vmem:[#allocation229_spill] sm:$0xff] %v13686_v57 }
 0x2e6   : > { %v2931_v9 = vpop.f32.mrf.mxu3  ;;  %v3384_v40 = vpack.c.bf16 %v2834_v0, %v2834_v0  ;;  %v2740_v5 = vpop.f32.mrf.mxu1  ;;  %v3353_v0 = vpack.c.bf16 %v2643_v31, %v2643_v31 }
 0x2e7   : > { %v3400_v11 = vpack.c.bf16 %v2931_v9, %v2931_v9  ;;  %v3369_v48 = vpack.c.bf16 %v2740_v5, %v2740_v5 }
 0x2e8   : > { %v13688_v3 = vunpack.c.l.b16 %v3384_v40  ;;  %3030 = vmatmul.bf16.gmra.mxu0 %v12226_v15  ;;  %v13700_v51 = vunpack.c.l.b16 %v3353_v0 }
 0x2e9   : > { %v13690_v63 = vunpack.c.l.b16 %v3400_v11  ;;  %3127 = vmatmul.bf16.gmra.mxu1 %v12226_v15  ;;  %v13702_v54 = vunpack.c.l.b16 %v3369_v48 }
 0x2ea   : > { %17832 = vst [vmem:[#allocation230_spill] sm:$0xff] %v13688_v3  ;;  %3224 = vmatmul.bf16.gmra.mxu2 %v12226_v15 }
 0x2eb   : > { %17833 = vst [vmem:[#allocation231_spill] sm:$0xff] %v13690_v63  ;;  %3321 = vmatmul.bf16.gmra.mxu3 %v12226_v15 }
 0x2ec   : > { %17834 = vst [vmem:[#allocation232_spill] sm:$0xff] %v13700_v51 }
 0x2ed   : > { %v2837_v25 = vpop.f32.mrf.mxu2  ;;  %v2645_v40 = vpop.f32.mrf.mxu0  ;;  %17835 = vst [vmem:[#allocation233_spill] sm:$0xff] %v13702_v54 }
 0x2ee   : > { %v2934_v21 = vpop.f32.mrf.mxu3  ;;  %v2742_v11 = vpop.f32.mrf.mxu1  ;;  %v3354_v4 = vpack.c.bf16 %v2645_v40, %v2645_v40  ;;  %v3385_v5 = vpack.c.bf16 %v2837_v25, %v2837_v25 }
 0x2ef   : > { %v3370_v8 = vpack.c.bf16 %v2742_v11, %v2742_v11  ;;  %v3401_v31 = vpack.c.bf16 %v2934_v21, %v2934_v21 }
 0x2f0   : > { %v13704_v2 = vunpack.c.l.b16 %v3354_v4  ;;  %v13712_v48 = vunpack.c.l.b16 %v3385_v5 }
 0x2f1   : > { %v13706_v23 = vunpack.c.l.b16 %v3370_v8  ;;  %v13714_v4 = vunpack.c.l.b16 %v3401_v31 }
 0x2f2   : > { %17836 = vst [vmem:[#allocation234_spill] sm:$0xff] %v13704_v2 }
 0x2f3   : > { %17837 = vst [vmem:[#allocation235_spill] sm:$0xff] %v13706_v23 }
 0x2f4   : > { %17838 = vst [vmem:[#allocation236_spill] sm:$0xff] %v13712_v48 }
 0x2f5   : > { %v2839_v3 = vpop.f32.mrf.mxu2  ;;  %v2648_v0 = vpop.f32.mrf.mxu0  ;;  %17839 = vst [vmem:[#allocation237_spill] sm:$0xff] %v13714_v4 }
 0x2f6   : > { %v2936_v57 = vpop.f32.mrf.mxu3  ;;  %v3386_v40 = vpack.c.bf16 %v2839_v3, %v2839_v3  ;;  %v2745_v63 = vpop.f32.mrf.mxu1  ;;  %v3355_v3 = vpack.c.bf16 %v2648_v0, %v2648_v0 }
 0x2f7   : > { %v3402_v11 = vpack.c.bf16 %v2936_v57, %v2936_v57  ;;  %v3371_v21 = vpack.c.bf16 %v2745_v63, %v2745_v63 }
 0x2f8   : > { %v13716_v8 = vunpack.c.l.b16 %v3386_v40  ;;  %3035 = vmatmul.bf16.gmra.mxu0 %v12246_v26  ;;  %v13728_v54 = vunpack.c.l.b16 %v3355_v3 }
 0x2f9   : > { %v13718_v27 = vunpack.c.l.b16 %v3402_v11  ;;  %3132 = vmatmul.bf16.gmra.mxu1 %v12246_v26  ;;  %v13730_v23 = vunpack.c.l.b16 %v3371_v21 }
 0x2fa   : > { %17840 = vst [vmem:[#allocation238_spill] sm:$0xff] %v13716_v8  ;;  %3229 = vmatmul.bf16.gmra.mxu2 %v12246_v26 }
 0x2fb   : > { %17841 = vst [vmem:[#allocation239_spill] sm:$0xff] %v13718_v27  ;;  %3326 = vmatmul.bf16.gmra.mxu3 %v12246_v26 }
 0x2fc   : > { %17842 = vst [vmem:[#allocation240_spill] sm:$0xff] %v13728_v54 }
 0x2fd   : > { %v2842_v5 = vpop.f32.mrf.mxu2  ;;  %v2650_v40 = vpop.f32.mrf.mxu0  ;;  %17843 = vst [vmem:[#allocation241_spill] sm:$0xff] %v13730_v23 }
 0x2fe   : > { %v2939_v31 = vpop.f32.mrf.mxu3  ;;  %v2747_v11 = vpop.f32.mrf.mxu1  ;;  %v3356_v15 = vpack.c.bf16 %v2650_v40, %v2650_v40  ;;  %v3387_v63 = vpack.c.bf16 %v2842_v5, %v2842_v5 }
 0x2ff   : > { %v3372_v9 = vpack.c.bf16 %v2747_v11, %v2747_v11  ;;  %v3403_v0 = vpack.c.bf16 %v2939_v31, %v2939_v31 }
 0x300   : > { %v13732_v25 = vunpack.c.l.b16 %v3356_v15  ;;  %v13740_v21 = vunpack.c.l.b16 %v3387_v63 }
 0x301   : > { %v13734_v48 = vunpack.c.l.b16 %v3372_v9  ;;  %v13742_v15 = vunpack.c.l.b16 %v3403_v0 }
 0x302   : > { %17844 = vst [vmem:[#allocation242_spill] sm:$0xff] %v13732_v25 }
 0x303   : > { %17845 = vst [vmem:[#allocation243_spill] sm:$0xff] %v13734_v48 }
 0x304   : > { %17846 = vst [vmem:[#allocation244_spill] sm:$0xff] %v13740_v21 }
 0x305   : > { %v2844_v8 = vpop.f32.mrf.mxu2  ;;  %v2653_v3 = vpop.f32.mrf.mxu0  ;;  %17847 = vst [vmem:[#allocation245_spill] sm:$0xff] %v13742_v15 }
 0x306   : > { %v2941_v4 = vpop.f32.mrf.mxu3  ;;  %v3388_v40 = vpack.c.bf16 %v2844_v8, %v2844_v8  ;;  %v2750_v27 = vpop.f32.mrf.mxu1  ;;  %v3357_v8 = vpack.c.bf16 %v2653_v3, %v2653_v3 }
 0x307   : > { %v3404_v11 = vpack.c.bf16 %v2941_v4, %v2941_v4  ;;  %v3373_v31 = vpack.c.bf16 %v2750_v27, %v2750_v27 }
 0x308   : > { %v13744_v9 = vunpack.c.l.b16 %v3388_v40  ;;  %3040 = vmatmul.bf16.gmra.mxu0 %v12266_v37  ;;  %v13756_v23 = vunpack.c.l.b16 %v3357_v8 }
 0x309   : > { %v13746_v51 = vunpack.c.l.b16 %v3404_v11  ;;  %3137 = vmatmul.bf16.gmra.mxu1 %v12266_v37  ;;  %v13758_v48 = vunpack.c.l.b16 %v3373_v31 }
 0x30a   : > { %17848 = vst [vmem:[#allocation246_spill] sm:$0xff] %v13744_v9  ;;  %3234 = vmatmul.bf16.gmra.mxu2 %v12266_v37 }
 0x30b   : > { %17849 = vst [vmem:[#allocation247_spill] sm:$0xff] %v13746_v51  ;;  %3331 = vmatmul.bf16.gmra.mxu3 %v12266_v37 }
 0x30c   : > { %17850 = vst [vmem:[#allocation248_spill] sm:$0xff] %v13756_v23 }
 0x30d   : > { %v2847_v63 = vpop.f32.mrf.mxu2  ;;  %v2655_v40 = vpop.f32.mrf.mxu0  ;;  %17851 = vst [vmem:[#allocation249_spill] sm:$0xff] %v13758_v48 }
 0x30e   : > { %v2944_v0 = vpop.f32.mrf.mxu3  ;;  %v2752_v11 = vpop.f32.mrf.mxu1  ;;  %v3358_v26 = vpack.c.bf16 %v2655_v40, %v2655_v40  ;;  %v3389_v27 = vpack.c.bf16 %v2847_v63, %v2847_v63 }
 0x30f   : > { %v3374_v57 = vpack.c.bf16 %v2752_v11, %v2752_v11  ;;  %v3405_v3 = vpack.c.bf16 %v2944_v0, %v2944_v0 }
 0x310   : > { %v13760_v5 = vunpack.c.l.b16 %v3358_v26  ;;  %v13768_v31 = vunpack.c.l.b16 %v3389_v27 }
 0x311   : > { %v13762_v21 = vunpack.c.l.b16 %v3374_v57  ;;  %v13770_v26 = vunpack.c.l.b16 %v3405_v3 }
 0x312   : > { %17852 = vst [vmem:[#allocation250_spill] sm:$0xff] %v13760_v5 }
 0x313   : > { %17853 = vst [vmem:[#allocation251_spill] sm:$0xff] %v13762_v21 }
 0x314   : > { %17854 = vst [vmem:[#allocation252_spill] sm:$0xff] %v13768_v31 }
 0x315   : > { %v2849_v9 = vpop.f32.mrf.mxu2  ;;  %v2658_v8 = vpop.f32.mrf.mxu0  ;;  %17855 = vst [vmem:[#allocation253_spill] sm:$0xff] %v13770_v26 }
 0x316   : > { %v2946_v15 = vpop.f32.mrf.mxu3  ;;  %v3390_v40 = vpack.c.bf16 %v2849_v9, %v2849_v9  ;;  %v2755_v51 = vpop.f32.mrf.mxu1  ;;  %v3359_v9 = vpack.c.bf16 %v2658_v8, %v2658_v8 }
 0x317   : > { %v3406_v11 = vpack.c.bf16 %v2946_v15, %v2946_v15  ;;  %v3375_v0 = vpack.c.bf16 %v2755_v51, %v2755_v51 }
 0x318   : > { %v13772_v57 = vunpack.c.l.b16 %v3390_v40  ;;  %3045 = vmatmul.bf16.gmra.mxu0 %v12286_v49  ;;  %v13784_v48 = vunpack.c.l.b16 %v3359_v9 }
 0x319   : > { %v13774_v54 = vunpack.c.l.b16 %v3406_v11  ;;  %3142 = vmatmul.bf16.gmra.mxu1 %v12286_v49  ;;  %v13786_v21 = vunpack.c.l.b16 %v3375_v0 }
 0x31a   : > { %17856 = vst [vmem:[#allocation254_spill] sm:$0xff] %v13772_v57  ;;  %3239 = vmatmul.bf16.gmra.mxu2 %v12286_v49 }
 0x31b   : > { %17857 = vst [vmem:[#allocation255_spill] sm:$0xff] %v13774_v54  ;;  %3336 = vmatmul.bf16.gmra.mxu3 %v12286_v49 }
 0x31c   : > { %17858 = vst [vmem:[#allocation256_spill] sm:$0xff] %v13784_v48 }
 0x31d   : > { %v2852_v27 = vpop.f32.mrf.mxu2  ;;  %v2660_v40 = vpop.f32.mrf.mxu0  ;;  %17859 = vst [vmem:[#allocation257_spill] sm:$0xff] %v13786_v21 }
 0x31e   : > { %v2949_v3 = vpop.f32.mrf.mxu3  ;;  %v2757_v11 = vpop.f32.mrf.mxu1  ;;  %v3360_v37 = vpack.c.bf16 %v2660_v40, %v2660_v40  ;;  %v3391_v51 = vpack.c.bf16 %v2852_v27, %v2852_v27 }
 0x31f   : > { %v3376_v4 = vpack.c.bf16 %v2757_v11, %v2757_v11  ;;  %v3407_v8 = vpack.c.bf16 %v2949_v3, %v2949_v3 }
 0x320   : > { %v13788_v63 = vunpack.c.l.b16 %v3360_v37  ;;  %v13796_v0 = vunpack.c.l.b16 %v3391_v51 }
 0x321   : > { %v13790_v31 = vunpack.c.l.b16 %v3376_v4  ;;  %v13798_v37 = vunpack.c.l.b16 %v3407_v8 }
 0x322   : > { %17860 = vst [vmem:[#allocation258_spill] sm:$0xff] %v13788_v63 }
 0x323   : > { %17861 = vst [vmem:[#allocation259_spill] sm:$0xff] %v13790_v31 }
 0x324   : > { %17862 = vst [vmem:[#allocation260_spill] sm:$0xff] %v13796_v0 }
 0x325   : > { %v2854_v57 = vpop.f32.mrf.mxu2  ;;  %v2663_v9 = vpop.f32.mrf.mxu0  ;;  %17863 = vst [vmem:[#allocation261_spill] sm:$0xff] %v13798_v37 }
 0x326   : > { %v2951_v23 = vpop.f32.mrf.mxu3  ;;  %v3392_v40 = vpack.c.bf16 %v2854_v57, %v2854_v57  ;;  %v2760_v5 = vpop.f32.mrf.mxu1  ;;  %v3361_v57 = vpack.c.bf16 %v2663_v9, %v2663_v9 }
 0x327   : > { %v3408_v11 = vpack.c.bf16 %v2951_v23, %v2951_v23  ;;  %v3377_v3 = vpack.c.bf16 %v2760_v5, %v2760_v5  ;;  %v17874_v23 = vpack.c.b16 %v12341_v19, %v12337_v17  ;;  %v17877_v17 = vpack.c.b16 %v12358_v36, %v12354_v34 }
 0x328   : > { %v13800_v4 = vunpack.c.l.b16 %v3392_v40  ;;  %3050 = vmatmul.bf16.gmra.mxu0 %v12306_v61  ;;  %v13812_v21 = vunpack.c.l.b16 %v3361_v57  ;;  %v17881_v34 = vpack.c.b16 %v13038_v22, %v13034_v52  ;;  %v17949_v22 = vld [vmem:[#allocation173_spill] sm:$0xff] }
 0x329   : > { %v13802_v26 = vunpack.c.l.b16 %v3408_v11  ;;  %3147 = vmatmul.bf16.gmra.mxu1 %v12306_v61  ;;  %v13814_v31 = vunpack.c.l.b16 %v3377_v3 }
 0x32a   : > { %17864 = vst [vmem:[#allocation262_spill] sm:$0xff] %v13800_v4  ;;  %3244 = vmatmul.bf16.gmra.mxu2 %v12306_v61  ;;  %v3820_v36 = vsel %vm3485_vm0, %v17881_v34, 0 }
 0x32b   : > { %17865 = vst [vmem:[#allocation263_spill] sm:$0xff] %v13802_v26  ;;  %3341 = vmatmul.bf16.gmra.mxu3 %v12306_v61  ;;  %v17918_v61 = vld [vmem:[#allocation119_spill] sm:$0xff] }
 0x32c   : > { %17866 = vst [vmem:[#allocation264_spill] sm:$0xff] %v13812_v21  ;;  %v17981_v21 = vld [vmem:[#allocation129_spill] sm:$0xff] }
 0x32d   : > { %v2857_v51 = vpop.f32.mrf.mxu2  ;;  %v2665_v40 = vpop.f32.mrf.mxu0  ;;  %17867 = vst [vmem:[#allocation265_spill] sm:$0xff] %v13814_v31 }
 0x32e   : > { %v2954_v8 = vpop.f32.mrf.mxu3  ;;  %v2762_v11 = vpop.f32.mrf.mxu1  ;;  %v3362_v49 = vpack.c.bf16 %v2665_v40, %v2665_v40  ;;  %v3393_v5 = vpack.c.bf16 %v2857_v51, %v2857_v51  ;;  %v17875_v51 = vpack.c.b16 %v12343_v20, %v12339_v18  ;;  %v17878_v18 = vpack.c.b16 %v13021_v42, %v13017_v43 }
 0x32f   : > { %v3378_v15 = vpack.c.bf16 %v2762_v11, %v2762_v11  ;;  %v3409_v9 = vpack.c.bf16 %v2954_v8, %v2954_v8  ;;  %v17876_v8 = vpack.c.b16 %v12356_v35, %v12352_v33  ;;  %v17879_v20 = vpack.c.b16 %v13023_v29, %v13019_v32 }
 0x330   : > { %v13816_v27 = vunpack.c.l.b16 %v3362_v49  ;;  %v13824_v3 = vunpack.c.l.b16 %v3393_v5  ;;  %v3730_v19 = vsel %vm3485_vm0, %v17878_v18, 0  ;;  %v17880_v33 = vpack.c.b16 %v13036_v58, %v13032_v13 }
 0x331   : > { %v13818_v0 = vunpack.c.l.b16 %v3378_v15  ;;  %v13826_v49 = vunpack.c.l.b16 %v3409_v9 }
 0x332   : > { %17868 = vst [vmem:[#allocation266_spill] sm:$0xff] %v13816_v27  ;;  %v3790_v35 = vsel %vm3485_vm0, %v17880_v33, 0 }
 0x333   : > { %17869 = vst [vmem:[#allocation267_spill] sm:$0xff] %v13818_v0 }
 0x334   : > { %17870 = vst [vmem:[#allocation268_spill] sm:$0xff] %v13824_v3  ;;  %v17967_v3 = vld [vmem:[#allocation14_spill] sm:$0xff] }
 0x335   : > { %v2859_v4 = vpop.f32.mrf.mxu2  ;;  %v3016_v57 = vpop.f32.mrf.mxu0  ;;  %17871 = vst [vmem:[#allocation269_spill] sm:$0xff] %v13826_v49 }
 0x336   : > { %v2956_v37 = vpop.f32.mrf.mxu3  ;;  %v3394_v40 = vpack.c.bf16 %v2859_v4, %v2859_v4  ;;  %v3113_v26 = vpop.f32.mrf.mxu1  ;;  %v3411_v42 = vpack.c.bf16 %v3016_v57, %v3016_v57 }
 0x337   : > { %v3410_v11 = vpack.c.bf16 %v2956_v37, %v2956_v37  ;;  %v3427_v43 = vpack.c.bf16 %v3113_v26, %v3113_v26 }
 0x338   : > { %v13828_v15 = vunpack.c.l.b16 %v3394_v40  ;;  %10812 = vmatmul.msk.bf16.vlgmr.msra.gmra.mxu0 %vm3485_vm0, %v17874_v23  ;;  %v3760_v23 = vsel %vm3485_vm0, %v17879_v20, 0 }
 0x339   : > { %v13830_v48 = vunpack.c.l.b16 %v3410_v11  ;;  %10813 = vmatmul.msk.bf16.vlgmr.msra.gmra.mxu1 %vm3485_vm0, %v17875_v51  ;;  %3739 = vmatpush.bf16.xpose.msra.mxu0 %v3730_v19  ;;  %v13868_v51 = vunpack.c.l.b16 %v3411_v42  ;;  %v13870_v13 = vunpack.c.l.b16 %v3427_v43  ;;  %v17882_v43 = vpack.c.b16 %v12661_v6, %v12657_v24 }
 0x33a   : > { %17872 = vst [vmem:[#allocation270_spill] sm:$0xff] %v13828_v15  ;;  %10814 = vmatmul.msk.bf16.vlgmr.msra.gmra.mxu2 %vm3485_vm0, %v17876_v8  ;;  %3769 = vmatpush.bf16.xpose.msra.mxu1 %v3760_v23  ;;  %v17885_v24 = vpack.c.b16 %v12678_v16, %v12674_v28  ;;  %v17891_v28 = vld [vmem:[#allocation169_spill] sm:$0xff]  ;;  %v17892_v16 = vld [vmem:[#allocation167_spill] sm:$0xff] }
 0x33b   : > { %17873 = vst [vmem:[#allocation271_spill] sm:$0xff] %v13830_v48  ;;  %10815 = vmatmul.msk.bf16.vlgmr.msra.gmra.mxu3 %vm3485_vm0, %v17877_v17  ;;  %3799 = vmatpush.bf16.xpose.msra.mxu2 %v3790_v35 }
 0x33c   : > { %3829 = vmatpush.bf16.xpose.msra.mxu3 %v3820_v36 }
 0x33d   : > { %v3210_v5 = vpop.f32.mrf.mxu2  ;;  %v3018_v29 = vpop.f32.mrf.mxu0 }
 0x33e   : > { %v3307_v32 = vpop.f32.mrf.mxu3  ;;  %v3115_v9 = vpop.f32.mrf.mxu1  ;;  %v3412_v40 = vpack.c.bf16 %v3018_v29, %v3018_v29  ;;  %v3443_v26 = vpack.c.bf16 %v3210_v5, %v3210_v5  ;;  %v17883_v5 = vpack.c.b16 %v12663_v59, %v12659_v39  ;;  %v17886_v59 = vpack.c.b16 %v13408_v44, %v13404_v60  ;;  %v17935_v29 = vld [vmem:[#allocation62_spill] sm:$0xff] }
 0x33f   : > { %v3428_v11 = vpack.c.bf16 %v3115_v9, %v3115_v9  ;;  %v3459_v57 = vpack.c.bf16 %v3307_v32, %v3307_v32  ;;  %v17884_v9 = vpack.c.b16 %v12676_v14, %v12672_v38  ;;  %v17887_v39 = vpack.c.b16 %v13410_v47, %v13406_v45  ;;  %v17888_v38 = vld [vmem:[#allocation168_spill] sm:$0xff]  ;;  %v17889_v14 = vld [vmem:[#allocation166_spill] sm:$0xff] }
 0x340   : > { %v13872_v58 = vunpack.c.l.b16 %v3412_v40  ;;  %v13880_v35 = vunpack.c.l.b16 %v3443_v26  ;;  %v3850_v6 = vsel %vm3485_vm0, %v17886_v59, 0 }
 0x341   : > { %v13874_v8 = vunpack.c.l.b16 %v3428_v11  ;;  %v13882_v34 = vunpack.c.l.b16 %v3459_v57  ;;  %v3880_v40 = vsel %vm3485_vm0, %v17887_v39, 0  ;;  %v17890_v11 = vpack.c.b16 %v17888_v38, %v17889_v14 }
 0x342   : > { %v17893_v57 = vpack.c.b16 %v17891_v28, %v17892_v16 }
 0x343   : > { %v3910_v26 = vsel %vm3485_vm0, %v17890_v11, 0 }
 0x345   : > { %v3212_v17 = vpop.f32.mrf.mxu2  ;;  %v3021_v23 = vpop.f32.mrf.mxu0 }
 0x346   : > { %v3309_v18 = vpop.f32.mrf.mxu3  ;;  %v3444_v19 = vpack.c.bf16 %v3212_v17, %v3212_v17  ;;  %v3118_v33 = vpop.f32.mrf.mxu1  ;;  %v3940_v17 = vsel %vm3485_vm0, %v17893_v57, 0  ;;  %v3413_v60 = vpack.c.bf16 %v3021_v23, %v3021_v23 }
 0x347   : > { %v3460_v20 = vpack.c.bf16 %v3309_v18, %v3309_v18  ;;  %v3429_v44 = vpack.c.bf16 %v3118_v33, %v3118_v33 }
 0x348   : > { %v13884_v36 = vunpack.c.l.b16 %v3444_v19  ;;  %10816 = vmatmul.msk.bf16.vlgmr.msrb.gmra.mxu0 %vm3485_vm0, %v17882_v43 }
 0x349   : > { %v13886_v42 = vunpack.c.l.b16 %v3460_v20  ;;  %10817 = vmatmul.msk.bf16.vlgmr.msrb.gmra.mxu1 %vm3485_vm0, %v17883_v5  ;;  %3859 = vmatpush.bf16.xpose.msrb.mxu0 %v3850_v6  ;;  %v13924_v5 = vunpack.c.l.b16 %v3413_v60 }
 0x34a   : > { %10818 = vmatmul.msk.bf16.vlgmr.msrb.gmra.mxu2 %vm3485_vm0, %v17884_v9  ;;  %3889 = vmatpush.bf16.xpose.msrb.mxu1 %v3880_v40  ;;  %v13926_v9 = vunpack.c.l.b16 %v3429_v44  ;;  %v17902_v44 = vld [vmem:[#allocation8_spill] sm:$0xff] }
 0x34b   : > { %10819 = vmatmul.msk.bf16.vlgmr.msrb.gmra.mxu3 %vm3485_vm0, %v17885_v24  ;;  %3919 = vmatpush.bf16.xpose.msrb.mxu2 %v3910_v26  ;;  %17894 = vst [vmem:[#allocation168_spill] sm:$0xff] %v13924_v5 }
 0x34c   : > { %3949 = vmatpush.bf16.xpose.msrb.mxu3 %v3940_v17  ;;  %17895 = vst [vmem:[#allocation166_spill] sm:$0xff] %v13926_v9  ;;  %v18197_v9 = vld [vmem:[#allocation50_spill] sm:$0xff] }
 0x34d   : > { %v3215_v18 = vpop.f32.mrf.mxu2  ;;  %v3023_v47 = vpop.f32.mrf.mxu0 }
 0x34e   : > { %v3312_v45 = vpop.f32.mrf.mxu3  ;;  %v3120_v19 = vpop.f32.mrf.mxu1  ;;  %v3414_v20 = vpack.c.bf16 %v3023_v47, %v3023_v47  ;;  %v3445_v33 = vpack.c.bf16 %v3215_v18, %v3215_v18  ;;  %v17903_v47 = vld [vmem:[#allocation6_spill] sm:$0xff]  ;;  %v17905_v18 = vld [vmem:[#allocation9_spill] sm:$0xff] }
 0x34f   : > { %v3430_v43 = vpack.c.bf16 %v3120_v19, %v3120_v19  ;;  %v3461_v39 = vpack.c.bf16 %v3312_v45, %v3312_v45  ;;  %v17904_v19 = vpack.c.b16 %v17902_v44, %v17903_v47  ;;  %v17906_v45 = vld [vmem:[#allocation7_spill] sm:$0xff]  ;;  %v17914_v47 = vld [vmem:[#allocation120_spill] sm:$0xff] }
 0x350   : > { %v13928_v24 = vunpack.c.l.b16 %v3414_v20  ;;  %v13936_v16 = vunpack.c.l.b16 %v3445_v33  ;;  %v17907_v20 = vpack.c.b16 %v17905_v18, %v17906_v45 }
 0x351   : > { %v13930_v59 = vunpack.c.l.b16 %v3430_v43  ;;  %v13938_v57 = vunpack.c.l.b16 %v3461_v39  ;;  %v17908_v39 = vld [vmem:[#allocation12_spill] sm:$0xff] }
 0x352   : > { %17896 = vst [vmem:[#allocation169_spill] sm:$0xff] %v13928_v24 }
 0x353   : > { %17897 = vst [vmem:[#allocation167_spill] sm:$0xff] %v13930_v59 }
 0x354   : > { %17898 = vst [vmem:[#allocation272_spill] sm:$0xff] %v13936_v16 }
 0x355   : > { %v3217_v40 = vpop.f32.mrf.mxu2  ;;  %v3026_v26 = vpop.f32.mrf.mxu0  ;;  %17899 = vst [vmem:[#allocation273_spill] sm:$0xff] %v13938_v57  ;;  %v18199_v57 = vld [vmem:[#allocation53_spill] sm:$0xff] }
 0x356   : > { %v3314_v38 = vpop.f32.mrf.mxu3  ;;  %v3446_v14 = vpack.c.bf16 %v3217_v40, %v3217_v40  ;;  %v3123_v28 = vpop.f32.mrf.mxu1  ;;  %v17909_v40 = vld [vmem:[#allocation10_spill] sm:$0xff] }
 0x357   : > { %v3462_v11 = vpack.c.bf16 %v3314_v38, %v3314_v38  ;;  %v17910_v38 = vpack.c.b16 %v17908_v39, %v17909_v40  ;;  %v17920_v39 = vld [vmem:[#allocation124_spill] sm:$0xff]  ;;  %v17921_v40 = vld [vmem:[#allocation122_spill] sm:$0xff] }
 0x358   : > { %v13940_v17 = vunpack.c.l.b16 %v3446_v14  ;;  %10820 = vmatmul.msk.bf16.vlgmr.msra.gmra.mxu0 %vm3485_vm0, %v17904_v19  ;;  %v17911_v14 = vld [vmem:[#allocation13_spill] sm:$0xff]  ;;  %v17915_v19 = vld [vmem:[#allocation118_spill] sm:$0xff] }
 0x359   : > { %v13942_v60 = vunpack.c.l.b16 %v3462_v11  ;;  %10821 = vmatmul.msk.bf16.vlgmr.msra.gmra.mxu1 %vm3485_vm0, %v17907_v20  ;;  %v17912_v11 = vld [vmem:[#allocation11_spill] sm:$0xff]  ;;  %v17916_v18 = vpack.c.b16 %v17914_v47, %v17915_v19  ;;  %v17917_v20 = vld [vmem:[#allocation121_spill] sm:$0xff]  ;;  %v3415_v47 = vpack.c.bf16 %v3026_v26, %v3026_v26  ;;  %v3431_v19 = vpack.c.bf16 %v3123_v28, %v3123_v28 }
 0x35a   : > { %17900 = vst [vmem:[#allocation274_spill] sm:$0xff] %v13940_v17  ;;  %10822 = vmatmul.msk.bf16.vlgmr.msra.gmra.mxu2 %vm3485_vm0, %v17910_v38  ;;  %v17913_v44 = vpack.c.b16 %v17911_v14, %v17912_v11  ;;  %v17919_v4 = vpack.c.b16 %v17917_v20, %v17918_v61  ;;  %v17922_v38 = vpack.c.b16 %v17920_v39, %v17921_v40  ;;  %v17923_v14 = vld [vmem:[#allocation125_spill] sm:$0xff]  ;;  %v17924_v11 = vld [vmem:[#allocation123_spill] sm:$0xff] }
 0x35b   : > { %17901 = vst [vmem:[#allocation275_spill] sm:$0xff] %v13942_v60  ;;  %v3970_v45 = vsel %vm3485_vm0, %v17916_v18, 0  ;;  %v13980_v33 = vunpack.c.l.b16 %v3415_v47  ;;  %v13982_v39 = vunpack.c.l.b16 %v3431_v19 }
 0x35c   : > { %10823 = vmatmul.msk.bf16.vlgmr.msra.gmra.mxu3 %vm3485_vm0, %v17913_v44  ;;  %v4000_v37 = vsel %vm3485_vm0, %v17919_v4, 0  ;;  %3979 = vmatpush.bf16.xpose.msra.mxu0 %v3970_v45  ;;  %v4030_v43 = vsel %vm3485_vm0, %v17922_v38, 0  ;;  %v17925_v44 = vpack.c.b16 %v17923_v14, %v17924_v11 }
 0x35d   : > { %4009 = vmatpush.bf16.xpose.msra.mxu1 %v4000_v37  ;;  %4039 = vmatpush.bf16.xpose.msra.mxu2 %v4030_v43  ;;  %v3220_v18 = vpop.f32.mrf.mxu2  ;;  %v3028_v20 = vpop.f32.mrf.mxu0  ;;  %17926 = vst [vmem:[#allocation8_spill] sm:$0xff] %v13980_v33  ;;  %v17934_v43 = vld [vmem:[#allocation64_spill] sm:$0xff]  ;;  %v18175_v33 = vld [vmem:[#allocation101_spill] sm:$0xff] }
 0x35e   : > { %v4060_v23 = vsel %vm3485_vm0, %v17925_v44, 0  ;;  %v3317_v61 = vpop.f32.mrf.mxu3  ;;  %v3125_v4 = vpop.f32.mrf.mxu1  ;;  %v3416_v45 = vpack.c.bf16 %v3028_v20, %v3028_v20  ;;  %17927 = vst [vmem:[#allocation6_spill] sm:$0xff] %v13982_v39  ;;  %v3447_v26 = vpack.c.bf16 %v3220_v18, %v3220_v18  ;;  %v17936_v32 = vpack.c.b16 %v17934_v43, %v17935_v29  ;;  %v17937_v18 = vld [vmem:[#allocation65_spill] sm:$0xff]  ;;  %v17944_v29 = vld [vmem:[#allocation67_spill] sm:$0xff] }
 0x35f   : > { %4069 = vmatpush.bf16.xpose.msra.mxu3 %v4060_v23  ;;  %v3432_v37 = vpack.c.bf16 %v3125_v4, %v3125_v4  ;;  %v3463_v28 = vpack.c.bf16 %v3317_v61, %v3317_v61  ;;  %v17938_v61 = vld [vmem:[#allocation63_spill] sm:$0xff] }
 0x360   : > { %v13984_v40 = vunpack.c.l.b16 %v3416_v45  ;;  %v13992_v19 = vunpack.c.l.b16 %v3447_v26  ;;  %v17939_v23 = vpack.c.b16 %v17937_v18, %v17938_v61  ;;  %v17947_v18 = vld [vmem:[#allocation170_spill] sm:$0xff]  ;;  %v17950_v26 = vld [vmem:[#allocation171_spill] sm:$0xff] }
 0x361   : > { %v13986_v38 = vunpack.c.l.b16 %v3432_v37  ;;  %v13994_v45 = vunpack.c.l.b16 %v3463_v28  ;;  %v17951_v52 = vpack.c.b16 %v17949_v22, %v17950_v26 }
 0x362   : > { %17928 = vst [vmem:[#allocation9_spill] sm:$0xff] %v13984_v40 }
 0x363   : > { %17929 = vst [vmem:[#allocation7_spill] sm:$0xff] %v13986_v38  ;;  %v4120_v28 = vsel %vm3485_vm0, %v17951_v52, 0 }
 0x364   : > { %17930 = vst [vmem:[#allocation12_spill] sm:$0xff] %v13992_v19  ;;  %v18151_v19 = vld [vmem:[#allocation45_spill] sm:$0xff] }
 0x365   : > { %v3222_v14 = vpop.f32.mrf.mxu2  ;;  %v3031_v47 = vpop.f32.mrf.mxu0  ;;  %17931 = vst [vmem:[#allocation10_spill] sm:$0xff] %v13994_v45 }
 0x366   : > { %v3319_v11 = vpop.f32.mrf.mxu3  ;;  %v3448_v44 = vpack.c.bf16 %v3222_v14, %v3222_v14  ;;  %v3128_v4 = vpop.f32.mrf.mxu1  ;;  %v17940_v14 = vld [vmem:[#allocation68_spill] sm:$0xff] }
 0x367   : > { %v3464_v20 = vpack.c.bf16 %v3319_v11, %v3319_v11  ;;  %v17941_v11 = vld [vmem:[#allocation66_spill] sm:$0xff] }
 0x368   : > { %v13996_v37 = vunpack.c.l.b16 %v3448_v44  ;;  %10824 = vmatmul.msk.bf16.vlgmr.msrb.gmra.mxu0 %vm3485_vm0, %v17936_v32  ;;  %v17942_v44 = vpack.c.b16 %v17940_v14, %v17941_v11  ;;  %v17946_v32 = vld [vmem:[#allocation172_spill] sm:$0xff]  ;;  %v17953_v11 = vld [vmem:[#allocation174_spill] sm:$0xff] }
 0x369   : > { %v13998_v6 = vunpack.c.l.b16 %v3464_v20  ;;  %10825 = vmatmul.msk.bf16.vlgmr.msrb.gmra.mxu1 %vm3485_vm0, %v17939_v23  ;;  %v17943_v20 = vld [vmem:[#allocation69_spill] sm:$0xff]  ;;  %v17948_v61 = vpack.c.b16 %v17946_v32, %v17947_v18  ;;  %v17952_v14 = vld [vmem:[#allocation176_spill] sm:$0xff]  ;;  %v3417_v32 = vpack.c.bf16 %v3031_v47, %v3031_v47  ;;  %v3433_v18 = vpack.c.bf16 %v3128_v4, %v3128_v4 }
 0x36a   : > { %17932 = vst [vmem:[#allocation13_spill] sm:$0xff] %v13996_v37  ;;  %10826 = vmatmul.msk.bf16.vlgmr.msrb.gmra.mxu2 %vm3485_vm0, %v17942_v44  ;;  %v17945_v43 = vpack.c.b16 %v17943_v20, %v17944_v29  ;;  %4129 = vmatpush.bf16.xpose.msrb.mxu1 %v4120_v28  ;;  %v17954_v44 = vpack.c.b16 %v17952_v14, %v17953_v11  ;;  %v17955_v20 = vld [vmem:[#allocation177_spill] sm:$0xff]  ;;  %v17956_v29 = vld [vmem:[#allocation175_spill] sm:$0xff] }
 0x36b   : > { %17933 = vst [vmem:[#allocation11_spill] sm:$0xff] %v13998_v6  ;;  %v4090_v23 = vsel %vm3485_vm0, %v17948_v61, 0  ;;  %v14036_v49 = vunpack.c.l.b16 %v3417_v32  ;;  %v14038_v14 = vunpack.c.l.b16 %v3433_v18 }
 0x36c   : > { %10827 = vmatmul.msk.bf16.vlgmr.msrb.gmra.mxu3 %vm3485_vm0, %v17945_v43  ;;  %4099 = vmatpush.bf16.xpose.msrb.mxu0 %v4090_v23  ;;  %v4150_v31 = vsel %vm3485_vm0, %v17954_v44, 0  ;;  %v17957_v43 = vpack.c.b16 %v17955_v20, %v17956_v29 }
 0x36d   : > { %4159 = vmatpush.bf16.xpose.msrb.mxu2 %v4150_v31  ;;  %v3225_v61 = vpop.f32.mrf.mxu2  ;;  %v3033_v26 = vpop.f32.mrf.mxu0  ;;  %17958 = vst [vmem:[#allocation120_spill] sm:$0xff] %v14036_v49  ;;  %v17966_v31 = vld [vmem:[#allocation16_spill] sm:$0xff] }
 0x36e   : > { %v4180_v0 = vsel %vm3485_vm0, %v17957_v43, 0  ;;  %v3322_v22 = vpop.f32.mrf.mxu3  ;;  %v3130_v52 = vpop.f32.mrf.mxu1  ;;  %v3418_v23 = vpack.c.bf16 %v3033_v26, %v3033_v26  ;;  %17959 = vst [vmem:[#allocation118_spill] sm:$0xff] %v14038_v14  ;;  %v3449_v47 = vpack.c.bf16 %v3225_v61, %v3225_v61  ;;  %v17968_v15 = vpack.c.b16 %v17966_v31, %v17967_v3  ;;  %v17969_v61 = vld [vmem:[#allocation17_spill] sm:$0xff]  ;;  %v17976_v3 = vld [vmem:[#allocation19_spill] sm:$0xff] }
 0x36f   : > { %4189 = vmatpush.bf16.xpose.msrb.mxu3 %v4180_v0  ;;  %v3434_v28 = vpack.c.bf16 %v3130_v52, %v3130_v52  ;;  %v3465_v4 = vpack.c.bf16 %v3322_v22, %v3322_v22  ;;  %v17970_v22 = vld [vmem:[#allocation15_spill] sm:$0xff]  ;;  %v18127_v14 = vld [vmem:[#allocation93_spill] sm:$0xff] }
 0x370   : > { %v14040_v11 = vunpack.c.l.b16 %v3418_v23  ;;  %v14048_v18 = vunpack.c.l.b16 %v3449_v47  ;;  %v17971_v0 = vpack.c.b16 %v17969_v61, %v17970_v22  ;;  %v17979_v61 = vld [vmem:[#allocation126_spill] sm:$0xff]  ;;  %v17982_v47 = vld [vmem:[#allocation127_spill] sm:$0xff] }
 0x371   : > { %v14042_v44 = vunpack.c.l.b16 %v3434_v28  ;;  %v14050_v23 = vunpack.c.l.b16 %v3465_v4  ;;  %v17983_v27 = vpack.c.b16 %v17981_v21, %v17982_v47 }
 0x372   : > { %17960 = vst [vmem:[#allocation121_spill] sm:$0xff] %v14040_v11  ;;  %v18149_v11 = vld [vmem:[#allocation42_spill] sm:$0xff] }
 0x373   : > { %17961 = vst [vmem:[#allocation119_spill] sm:$0xff] %v14042_v44  ;;  %v4240_v4 = vsel %vm3485_vm0, %v17983_v27, 0  ;;  %v18128_v44 = vld [vmem:[#allocation91_spill] sm:$0xff] }
 0x374   : > { %17962 = vst [vmem:[#allocation124_spill] sm:$0xff] %v14048_v18 }
 0x375   : > { %v3227_v20 = vpop.f32.mrf.mxu2  ;;  %v3036_v32 = vpop.f32.mrf.mxu0  ;;  %17963 = vst [vmem:[#allocation122_spill] sm:$0xff] %v14050_v23  ;;  %v18129_v23 = vpack.c.b16 %v18127_v14, %v18128_v44  ;;  %v18139_v14 = vld [vmem:[#allocation201_spill] sm:$0xff]  ;;  %v18140_v44 = vld [vmem:[#allocation199_spill] sm:$0xff] }
 0x376   : > { %v3324_v29 = vpop.f32.mrf.mxu3  ;;  %v3450_v43 = vpack.c.bf16 %v3227_v20, %v3227_v20  ;;  %v3133_v52 = vpop.f32.mrf.mxu1  ;;  %v17972_v20 = vld [vmem:[#allocation20_spill] sm:$0xff] }
 0x377   : > { %v3466_v26 = vpack.c.bf16 %v3324_v29, %v3324_v29  ;;  %v17973_v29 = vld [vmem:[#allocation18_spill] sm:$0xff] }
 0x378   : > { %v14052_v28 = vunpack.c.l.b16 %v3450_v43  ;;  %10828 = vmatmul.msk.bf16.vlgmr.msra.gmra.mxu0 %vm3485_vm0, %v17968_v15  ;;  %v17974_v43 = vpack.c.b16 %v17972_v20, %v17973_v29  ;;  %v17978_v15 = vld [vmem:[#allocation128_spill] sm:$0xff]  ;;  %v17985_v29 = vld [vmem:[#allocation130_spill] sm:$0xff] }
 0x379   : > { %v14054_v48 = vunpack.c.l.b16 %v3466_v26  ;;  %10829 = vmatmul.msk.bf16.vlgmr.msra.gmra.mxu1 %vm3485_vm0, %v17971_v0  ;;  %v17975_v26 = vld [vmem:[#allocation21_spill] sm:$0xff]  ;;  %v17980_v22 = vpack.c.b16 %v17978_v15, %v17979_v61  ;;  %v17984_v20 = vld [vmem:[#allocation132_spill] sm:$0xff]  ;;  %v3419_v15 = vpack.c.bf16 %v3036_v32, %v3036_v32  ;;  %v3435_v61 = vpack.c.bf16 %v3133_v52, %v3133_v52 }
 0x37a   : > { %17964 = vst [vmem:[#allocation125_spill] sm:$0xff] %v14052_v28  ;;  %10830 = vmatmul.msk.bf16.vlgmr.msra.gmra.mxu2 %vm3485_vm0, %v17974_v43  ;;  %v17977_v31 = vpack.c.b16 %v17975_v26, %v17976_v3  ;;  %4249 = vmatpush.bf16.xpose.msra.mxu1 %v4240_v4  ;;  %v17986_v43 = vpack.c.b16 %v17984_v20, %v17985_v29  ;;  %v17987_v26 = vld [vmem:[#allocation133_spill] sm:$0xff]  ;;  %v17988_v3 = vld [vmem:[#allocation131_spill] sm:$0xff] }
 0x37b   : > { %17965 = vst [vmem:[#allocation123_spill] sm:$0xff] %v14054_v48  ;;  %v4210_v0 = vsel %vm3485_vm0, %v17980_v22, 0  ;;  %v14092_v25 = vunpack.c.l.b16 %v3419_v15  ;;  %v14094_v20 = vunpack.c.l.b16 %v3435_v61  ;;  %v18134_v48 = vld [vmem:[#allocation195_spill] sm:$0xff] }
 0x37c   : > { %10831 = vmatmul.msk.bf16.vlgmr.msra.gmra.mxu3 %vm3485_vm0, %v17977_v31  ;;  %4219 = vmatpush.bf16.xpose.msra.mxu0 %v4210_v0  ;;  %v4270_v63 = vsel %vm3485_vm0, %v17986_v43, 0  ;;  %v17989_v31 = vpack.c.b16 %v17987_v26, %v17988_v3 }
 0x37d   : > { %4279 = vmatpush.bf16.xpose.msra.mxu2 %v4270_v63  ;;  %v3230_v22 = vpop.f32.mrf.mxu2  ;;  %v3038_v47 = vpop.f32.mrf.mxu0  ;;  %17990 = vst [vmem:[#allocation64_spill] sm:$0xff] %v14092_v25  ;;  %v17998_v63 = vld [vmem:[#allocation72_spill] sm:$0xff]  ;;  %v17999_v25 = vld [vmem:[#allocation70_spill] sm:$0xff] }
 0x37e   : > { %v4300_v54 = vsel %vm3485_vm0, %v17989_v31, 0  ;;  %v3327_v21 = vpop.f32.mrf.mxu3  ;;  %v3135_v27 = vpop.f32.mrf.mxu1  ;;  %v3420_v0 = vpack.c.bf16 %v3038_v47, %v3038_v47  ;;  %17991 = vst [vmem:[#allocation62_spill] sm:$0xff] %v14094_v20  ;;  %v3451_v32 = vpack.c.bf16 %v3230_v22, %v3230_v22  ;;  %v18001_v22 = vld [vmem:[#allocation73_spill] sm:$0xff] }
 0x37f   : > { %4309 = vmatpush.bf16.xpose.msra.mxu3 %v4300_v54  ;;  %v3436_v4 = vpack.c.bf16 %v3135_v27, %v3135_v27  ;;  %v3467_v52 = vpack.c.bf16 %v3327_v21, %v3327_v21  ;;  %v18002_v21 = vld [vmem:[#allocation71_spill] sm:$0xff]  ;;  %v18013_v20 = vld [vmem:[#allocation181_spill] sm:$0xff] }
 0x380   : > { %v14096_v29 = vunpack.c.l.b16 %v3420_v0  ;;  %v14104_v61 = vunpack.c.l.b16 %v3451_v32  ;;  %v18003_v54 = vpack.c.b16 %v18001_v22, %v18002_v21  ;;  %v18011_v22 = vld [vmem:[#allocation178_spill] sm:$0xff]  ;;  %v18014_v32 = vld [vmem:[#allocation179_spill] sm:$0xff] }
 0x381   : > { %v14098_v43 = vunpack.c.l.b16 %v3436_v4  ;;  %v14106_v0 = vunpack.c.l.b16 %v3467_v52 }
 0x382   : > { %17992 = vst [vmem:[#allocation65_spill] sm:$0xff] %v14096_v29  ;;  %v18000_v29 = vpack.c.b16 %v17998_v63, %v17999_v25  ;;  %v18008_v25 = vld [vmem:[#allocation75_spill] sm:$0xff] }
 0x383   : > { %17993 = vst [vmem:[#allocation63_spill] sm:$0xff] %v14098_v43 }
 0x384   : > { %17994 = vst [vmem:[#allocation68_spill] sm:$0xff] %v14104_v61  ;;  %v18015_v61 = vpack.c.b16 %v18013_v20, %v18014_v32 }
 0x385   : > { %v3232_v26 = vpop.f32.mrf.mxu2  ;;  %v3041_v15 = vpop.f32.mrf.mxu0  ;;  %17995 = vst [vmem:[#allocation66_spill] sm:$0xff] %v14106_v0 }
 0x386   : > { %v3329_v3 = vpop.f32.mrf.mxu3  ;;  %v3452_v31 = vpack.c.bf16 %v3232_v26, %v3232_v26  ;;  %v3138_v27 = vpop.f32.mrf.mxu1  ;;  %v18004_v26 = vld [vmem:[#allocation76_spill] sm:$0xff]  ;;  %v4360_v52 = vsel %vm3485_vm0, %v18015_v61, 0 }
 0x387   : > { %v3468_v47 = vpack.c.bf16 %v3329_v3, %v3329_v3  ;;  %v18005_v3 = vld [vmem:[#allocation74_spill] sm:$0xff] }
 0x388   : > { %v14108_v4 = vunpack.c.l.b16 %v3452_v31  ;;  %10832 = vmatmul.msk.bf16.vlgmr.msrb.gmra.mxu0 %vm3485_vm0, %v18000_v29  ;;  %v18006_v31 = vpack.c.b16 %v18004_v26, %v18005_v3  ;;  %v18010_v29 = vld [vmem:[#allocation180_spill] sm:$0xff]  ;;  %v18017_v3 = vld [vmem:[#allocation182_spill] sm:$0xff] }
 0x389   : > { %v14110_v18 = vunpack.c.l.b16 %v3468_v47  ;;  %10833 = vmatmul.msk.bf16.vlgmr.msrb.gmra.mxu1 %vm3485_vm0, %v18003_v54  ;;  %v18007_v47 = vld [vmem:[#allocation77_spill] sm:$0xff]  ;;  %v18012_v21 = vpack.c.b16 %v18010_v29, %v18011_v22  ;;  %v18016_v26 = vld [vmem:[#allocation184_spill] sm:$0xff]  ;;  %v3421_v29 = vpack.c.bf16 %v3041_v15, %v3041_v15  ;;  %v3437_v22 = vpack.c.bf16 %v3138_v27, %v3138_v27 }
 0x38a   : > { %17996 = vst [vmem:[#allocation69_spill] sm:$0xff] %v14108_v4  ;;  %10834 = vmatmul.msk.bf16.vlgmr.msrb.gmra.mxu2 %vm3485_vm0, %v18006_v31  ;;  %v18009_v63 = vpack.c.b16 %v18007_v47, %v18008_v25  ;;  %4369 = vmatpush.bf16.xpose.msrb.mxu1 %v4360_v52  ;;  %v18018_v31 = vpack.c.b16 %v18016_v26, %v18017_v3  ;;  %v18019_v47 = vld [vmem:[#allocation185_spill] sm:$0xff]  ;;  %v18020_v25 = vld [vmem:[#allocation183_spill] sm:$0xff] }
 0x38b   : > { %17997 = vst [vmem:[#allocation67_spill] sm:$0xff] %v14110_v18  ;;  %v4330_v54 = vsel %vm3485_vm0, %v18012_v21, 0  ;;  %v14148_v4 = vunpack.c.l.b16 %v3421_v29  ;;  %v14150_v26 = vunpack.c.l.b16 %v3437_v22 }
 0x38c   : > { %10835 = vmatmul.msk.bf16.vlgmr.msrb.gmra.mxu3 %vm3485_vm0, %v18009_v63  ;;  %4339 = vmatpush.bf16.xpose.msrb.mxu0 %v4330_v54  ;;  %v4390_v0 = vsel %vm3485_vm0, %v18018_v31, 0  ;;  %v18021_v63 = vpack.c.b16 %v18019_v47, %v18020_v25 }
 0x38d   : > { %4399 = vmatpush.bf16.xpose.msrb.mxu2 %v4390_v0  ;;  %v3235_v21 = vpop.f32.mrf.mxu2  ;;  %v3043_v32 = vpop.f32.mrf.mxu0  ;;  %18022 = vst [vmem:[#allocation172_spill] sm:$0xff] %v14148_v4  ;;  %v18030_v0 = vld [vmem:[#allocation24_spill] sm:$0xff]  ;;  %v18031_v4 = vld [vmem:[#allocation22_spill] sm:$0xff] }
 0x38e   : > { %v4420_v18 = vsel %vm3485_vm0, %v18021_v63, 0  ;;  %v3332_v20 = vpop.f32.mrf.mxu3  ;;  %v3140_v61 = vpop.f32.mrf.mxu1  ;;  %v3422_v54 = vpack.c.bf16 %v3043_v32, %v3043_v32  ;;  %18023 = vst [vmem:[#allocation170_spill] sm:$0xff] %v14150_v26  ;;  %v3453_v15 = vpack.c.bf16 %v3235_v21, %v3235_v21  ;;  %v18033_v21 = vld [vmem:[#allocation25_spill] sm:$0xff] }
 0x38f   : > { %4429 = vmatpush.bf16.xpose.msrb.mxu3 %v4420_v18  ;;  %v3438_v52 = vpack.c.bf16 %v3140_v61, %v3140_v61  ;;  %v3469_v27 = vpack.c.bf16 %v3332_v20, %v3332_v20  ;;  %v18034_v20 = vld [vmem:[#allocation23_spill] sm:$0xff]  ;;  %v18045_v26 = vld [vmem:[#allocation137_spill] sm:$0xff] }
 0x390   : > { %v14152_v3 = vunpack.c.l.b16 %v3422_v54  ;;  %v14160_v22 = vunpack.c.l.b16 %v3453_v15  ;;  %v18035_v18 = vpack.c.b16 %v18033_v21, %v18034_v20  ;;  %v18043_v21 = vld [vmem:[#allocation134_spill] sm:$0xff]  ;;  %v18046_v15 = vld [vmem:[#allocation135_spill] sm:$0xff] }
 0x391   : > { %v14154_v31 = vunpack.c.l.b16 %v3438_v52  ;;  %v14162_v54 = vunpack.c.l.b16 %v3469_v27 }
 0x392   : > { %18024 = vst [vmem:[#allocation173_spill] sm:$0xff] %v14152_v3  ;;  %v18032_v3 = vpack.c.b16 %v18030_v0, %v18031_v4  ;;  %v18040_v4 = vld [vmem:[#allocation27_spill] sm:$0xff] }
 0x393   : > { %18025 = vst [vmem:[#allocation171_spill] sm:$0xff] %v14154_v31  ;;  %v18047_v31 = vpack.c.b16 %v18045_v26, %v18046_v15 }
 0x394   : > { %18026 = vst [vmem:[#allocation176_spill] sm:$0xff] %v14160_v22 }
 0x395   : > { %v3237_v47 = vpop.f32.mrf.mxu2  ;;  %v3046_v29 = vpop.f32.mrf.mxu0  ;;  %18027 = vst [vmem:[#allocation174_spill] sm:$0xff] %v14162_v54  ;;  %v4480_v27 = vsel %vm3485_vm0, %v18047_v31, 0 }
 0x396   : > { %v3334_v25 = vpop.f32.mrf.mxu3  ;;  %v3454_v63 = vpack.c.bf16 %v3237_v47, %v3237_v47  ;;  %v3143_v61 = vpop.f32.mrf.mxu1  ;;  %v18036_v47 = vld [vmem:[#allocation28_spill] sm:$0xff] }
 0x397   : > { %v3470_v32 = vpack.c.bf16 %v3334_v25, %v3334_v25  ;;  %v18037_v25 = vld [vmem:[#allocation26_spill] sm:$0xff] }
 0x398   : > { %v14164_v52 = vunpack.c.l.b16 %v3454_v63  ;;  %10836 = vmatmul.msk.bf16.vlgmr.msra.gmra.mxu0 %vm3485_vm0, %v18032_v3  ;;  %v18038_v63 = vpack.c.b16 %v18036_v47, %v18037_v25  ;;  %v18042_v3 = vld [vmem:[#allocation136_spill] sm:$0xff]  ;;  %v18049_v25 = vld [vmem:[#allocation138_spill] sm:$0xff] }
 0x399   : > { %v14166_v43 = vunpack.c.l.b16 %v3470_v32  ;;  %10837 = vmatmul.msk.bf16.vlgmr.msra.gmra.mxu1 %vm3485_vm0, %v18035_v18  ;;  %v18039_v32 = vld [vmem:[#allocation29_spill] sm:$0xff]  ;;  %v18044_v20 = vpack.c.b16 %v18042_v3, %v18043_v21  ;;  %v18048_v47 = vld [vmem:[#allocation140_spill] sm:$0xff]  ;;  %v3423_v3 = vpack.c.bf16 %v3046_v29, %v3046_v29  ;;  %v3439_v21 = vpack.c.bf16 %v3143_v61, %v3143_v61 }
 0x39a   : > { %18028 = vst [vmem:[#allocation177_spill] sm:$0xff] %v14164_v52  ;;  %10838 = vmatmul.msk.bf16.vlgmr.msra.gmra.mxu2 %vm3485_vm0, %v18038_v63  ;;  %v18041_v0 = vpack.c.b16 %v18039_v32, %v18040_v4  ;;  %4489 = vmatpush.bf16.xpose.msra.mxu1 %v4480_v27  ;;  %v18050_v63 = vpack.c.b16 %v18048_v47, %v18049_v25  ;;  %v18051_v32 = vld [vmem:[#allocation141_spill] sm:$0xff]  ;;  %v18052_v4 = vld [vmem:[#allocation139_spill] sm:$0xff] }
 0x39b   : > { %18029 = vst [vmem:[#allocation175_spill] sm:$0xff] %v14166_v43  ;;  %v4450_v18 = vsel %vm3485_vm0, %v18044_v20, 0  ;;  %v14204_v22 = vunpack.c.l.b16 %v3423_v3  ;;  %v14206_v47 = vunpack.c.l.b16 %v3439_v21 }
 0x39c   : > { %10839 = vmatmul.msk.bf16.vlgmr.msra.gmra.mxu3 %vm3485_vm0, %v18041_v0  ;;  %4459 = vmatpush.bf16.xpose.msra.mxu0 %v4450_v18  ;;  %v4510_v54 = vsel %vm3485_vm0, %v18050_v63, 0  ;;  %v18053_v0 = vpack.c.b16 %v18051_v32, %v18052_v4 }
 0x39d   : > { %4519 = vmatpush.bf16.xpose.msra.mxu2 %v4510_v54  ;;  %v3240_v20 = vpop.f32.mrf.mxu2  ;;  %v3048_v15 = vpop.f32.mrf.mxu0  ;;  %18054 = vst [vmem:[#allocation16_spill] sm:$0xff] %v14204_v22  ;;  %v18062_v54 = vld [vmem:[#allocation80_spill] sm:$0xff]  ;;  %v18063_v22 = vld [vmem:[#allocation78_spill] sm:$0xff] }
 0x39e   : > { %v4540_v43 = vsel %vm3485_vm0, %v18053_v0, 0  ;;  %v3337_v26 = vpop.f32.mrf.mxu3  ;;  %v3145_v31 = vpop.f32.mrf.mxu1  ;;  %v3424_v18 = vpack.c.bf16 %v3048_v15, %v3048_v15  ;;  %18055 = vst [vmem:[#allocation14_spill] sm:$0xff] %v14206_v47  ;;  %v3455_v29 = vpack.c.bf16 %v3240_v20, %v3240_v20  ;;  %v18065_v20 = vld [vmem:[#allocation81_spill] sm:$0xff] }
 0x39f   : > { %4549 = vmatpush.bf16.xpose.msra.mxu3 %v4540_v43  ;;  %v3440_v27 = vpack.c.bf16 %v3145_v31, %v3145_v31  ;;  %v3471_v61 = vpack.c.bf16 %v3337_v26, %v3337_v26  ;;  %v18066_v26 = vld [vmem:[#allocation79_spill] sm:$0xff]  ;;  %v18077_v47 = vld [vmem:[#allocation189_spill] sm:$0xff] }
 0x3a0   : > { %v14208_v25 = vunpack.c.l.b16 %v3424_v18  ;;  %v14216_v21 = vunpack.c.l.b16 %v3455_v29  ;;  %v18067_v43 = vpack.c.b16 %v18065_v20, %v18066_v26  ;;  %v18075_v20 = vld [vmem:[#allocation186_spill] sm:$0xff]  ;;  %v18078_v29 = vld [vmem:[#allocation187_spill] sm:$0xff] }
 0x3a1   : > { %v14210_v63 = vunpack.c.l.b16 %v3440_v27  ;;  %v14218_v18 = vunpack.c.l.b16 %v3471_v61 }
 0x3a2   : > { %18056 = vst [vmem:[#allocation17_spill] sm:$0xff] %v14208_v25  ;;  %v18064_v25 = vpack.c.b16 %v18062_v54, %v18063_v22  ;;  %v18072_v22 = vld [vmem:[#allocation83_spill] sm:$0xff] }
 0x3a3   : > { %18057 = vst [vmem:[#allocation15_spill] sm:$0xff] %v14210_v63  ;;  %v18079_v63 = vpack.c.b16 %v18077_v47, %v18078_v29 }
 0x3a4   : > { %18058 = vst [vmem:[#allocation20_spill] sm:$0xff] %v14216_v21 }
 0x3a5   : > { %v3242_v32 = vpop.f32.mrf.mxu2  ;;  %v3051_v3 = vpop.f32.mrf.mxu0  ;;  %18059 = vst [vmem:[#allocation18_spill] sm:$0xff] %v14218_v18  ;;  %v4600_v61 = vsel %vm3485_vm0, %v18079_v63, 0 }
 0x3a6   : > { %v3339_v4 = vpop.f32.mrf.mxu3  ;;  %v3456_v0 = vpack.c.bf16 %v3242_v32, %v3242_v32  ;;  %v3148_v31 = vpop.f32.mrf.mxu1  ;;  %v18068_v32 = vld [vmem:[#allocation84_spill] sm:$0xff] }
 0x3a7   : > { %v3472_v15 = vpack.c.bf16 %v3339_v4, %v3339_v4  ;;  %v18069_v4 = vld [vmem:[#allocation82_spill] sm:$0xff] }
 0x3a8   : > { %v14220_v27 = vunpack.c.l.b16 %v3456_v0  ;;  %10840 = vmatmul.msk.bf16.vlgmr.msrb.gmra.mxu0 %vm3485_vm0, %v18064_v25  ;;  %v18070_v0 = vpack.c.b16 %v18068_v32, %v18069_v4  ;;  %v18074_v25 = vld [vmem:[#allocation188_spill] sm:$0xff]  ;;  %v18081_v4 = vld [vmem:[#allocation190_spill] sm:$0xff] }
 0x3a9   : > { %v14222_v52 = vunpack.c.l.b16 %v3472_v15  ;;  %10841 = vmatmul.msk.bf16.vlgmr.msrb.gmra.mxu1 %vm3485_vm0, %v18067_v43  ;;  %v18071_v15 = vld [vmem:[#allocation85_spill] sm:$0xff]  ;;  %v18076_v26 = vpack.c.b16 %v18074_v25, %v18075_v20  ;;  %v18080_v32 = vld [vmem:[#allocation192_spill] sm:$0xff]  ;;  %v3425_v25 = vpack.c.bf16 %v3051_v3, %v3051_v3  ;;  %v3441_v20 = vpack.c.bf16 %v3148_v31, %v3148_v31 }
 0x3aa   : > { %18060 = vst [vmem:[#allocation21_spill] sm:$0xff] %v14220_v27  ;;  %10842 = vmatmul.msk.bf16.vlgmr.msrb.gmra.mxu2 %vm3485_vm0, %v18070_v0  ;;  %v18073_v54 = vpack.c.b16 %v18071_v15, %v18072_v22  ;;  %4609 = vmatpush.bf16.xpose.msrb.mxu1 %v4600_v61  ;;  %v18082_v0 = vpack.c.b16 %v18080_v32, %v18081_v4  ;;  %v18083_v15 = vld [vmem:[#allocation193_spill] sm:$0xff]  ;;  %v18084_v22 = vld [vmem:[#allocation191_spill] sm:$0xff] }
 0x3ab   : > { %18061 = vst [vmem:[#allocation19_spill] sm:$0xff] %v14222_v52  ;;  %v4570_v43 = vsel %vm3485_vm0, %v18076_v26, 0  ;;  %v14260_v18 = vunpack.c.l.b16 %v3425_v25  ;;  %v14262_v32 = vunpack.c.l.b16 %v3441_v20  ;;  %v18124_v52 = vld [vmem:[#allocation92_spill] sm:$0xff] }
 0x3ac   : > { %10843 = vmatmul.msk.bf16.vlgmr.msrb.gmra.mxu3 %vm3485_vm0, %v18073_v54  ;;  %4579 = vmatpush.bf16.xpose.msrb.mxu0 %v4570_v43  ;;  %v4630_v21 = vsel %vm3485_vm0, %v18082_v0, 0  ;;  %v18085_v54 = vpack.c.b16 %v18083_v15, %v18084_v22 }
 0x3ad   : > { %4639 = vmatpush.bf16.xpose.msrb.mxu2 %v4630_v21  ;;  %v3245_v26 = vpop.f32.mrf.mxu2  ;;  %v3053_v29 = vpop.f32.mrf.mxu0  ;;  %18086 = vst [vmem:[#allocation128_spill] sm:$0xff] %v14260_v18 }
 0x3ae   : > { %v4660_v27 = vsel %vm3485_vm0, %v18085_v54, 0  ;;  %v3342_v47 = vpop.f32.mrf.mxu3  ;;  %v3150_v63 = vpop.f32.mrf.mxu1  ;;  %v3426_v43 = vpack.c.bf16 %v3053_v29, %v3053_v29  ;;  %18087 = vst [vmem:[#allocation126_spill] sm:$0xff] %v14262_v32  ;;  %v3457_v31 = vpack.c.bf16 %v3245_v26, %v3245_v26  ;;  %v18097_v32 = vld [vmem:[#allocation33_spill] sm:$0xff] }
 0x3af   : > { %4669 = vmatpush.bf16.xpose.msrb.mxu3 %v4660_v27  ;;  %v3442_v61 = vpack.c.bf16 %v3150_v63, %v3150_v63  ;;  %v3473_v27 = vpack.c.bf16 %v3342_v47, %v3342_v47 }
 0x3b0   : > { %v14264_v4 = vunpack.c.l.b16 %v3426_v43 }
 0x3b1   : > { %v14266_v0 = vunpack.c.l.b16 %v3442_v61  ;;  %v14280_v61 = vunpack.c.l.b16 %v3457_v31  ;;  %v14282_v21 = vunpack.c.l.b16 %v3473_v27  ;;  %v18110_v31 = vld [vmem:[#allocation143_spill] sm:$0xff] }
 0x3b2   : > { %18088 = vst [vmem:[#allocation129_spill] sm:$0xff] %v14264_v4  ;;  %v18109_v4 = vld [vmem:[#allocation145_spill] sm:$0xff] }
 0x3b3   : > { %18089 = vst [vmem:[#allocation127_spill] sm:$0xff] %v14266_v0  ;;  %v18098_v0 = vld [vmem:[#allocation31_spill] sm:$0xff] }
 0x3b4   : > { %18090 = vst [vmem:[#allocation132_spill] sm:$0xff] %v14280_v61  ;;  %v18099_v18 = vpack.c.b16 %v18097_v32, %v18098_v0  ;;  %v18107_v32 = vld [vmem:[#allocation142_spill] sm:$0xff]  ;;  %v18111_v61 = vpack.c.b16 %v18109_v4, %v18110_v31 }
 0x3b5   : > { %v3247_v15 = vpop.f32.mrf.mxu2  ;;  %v14272_v25 = vpop.f32.mrf.mxu0  ;;  %18091 = vst [vmem:[#allocation130_spill] sm:$0xff] %v14282_v21 }
 0x3b6   : > { %v3344_v22 = vpop.f32.mrf.mxu3  ;;  %v3458_v54 = vpack.c.bf16 %v3247_v15, %v3247_v15  ;;  %v14274_v20 = vpop.f32.mrf.mxu1  ;;  %v5396_v43 = vsel %vm3485_vm0, %v14272_v25, -inf  ;;  %v18094_v15 = vld [vmem:[#allocation32_spill] sm:$0xff]  ;;  %v4720_v27 = vsel %vm3485_vm0, %v18111_v61, 0 }
 0x3b7   : > { %v3474_v29 = vpack.c.bf16 %v3344_v22, %v3344_v22  ;;  %v5402_v63 = vsel %vm3485_vm0, %v14274_v20, -inf  ;;  %5397 = vmax.xlane.f32.xlu0 %v5396_v43  ;;  %v18095_v22 = vld [vmem:[#allocation30_spill] sm:$0xff]  ;;  %v18103_v43 = vld [vmem:[#allocation37_spill] sm:$0xff] }
 0x3b8   : > { %v14284_v26 = vunpack.c.l.b16 %v3458_v54  ;;  %5403 = vmax.xlane.f32.xlu1 %v5402_v63  ;;  %v18096_v3 = vpack.c.b16 %v18094_v15, %v18095_v22  ;;  %v18100_v54 = vld [vmem:[#allocation36_spill] sm:$0xff]  ;;  %v18104_v15 = vld [vmem:[#allocation35_spill] sm:$0xff] }
 0x3b9   : > { %v14286_v47 = vunpack.c.l.b16 %v3474_v29  ;;  %10845 = vmatmul.msk.bf16.vlgmr.msra.gmra.mxu1 %vm3485_vm0, %v18099_v18  ;;  %v18101_v29 = vld [vmem:[#allocation34_spill] sm:$0xff]  ;;  %v18105_v22 = vpack.c.b16 %v18103_v43, %v18104_v15  ;;  %v18115_v43 = vld [vmem:[#allocation149_spill] sm:$0xff]  ;;  %v18116_v15 = vld [vmem:[#allocation147_spill] sm:$0xff] }
 0x3ba   : > { %18092 = vst [vmem:[#allocation133_spill] sm:$0xff] %v14284_v26  ;;  %10844 = vmatmul.msk.bf16.vlgmr.msra.gmra.mxu0 %vm3485_vm0, %v18096_v3  ;;  %v18102_v63 = vpack.c.b16 %v18100_v54, %v18101_v29  ;;  %v18106_v3 = vld [vmem:[#allocation144_spill] sm:$0xff]  ;;  %4729 = vmatpush.bf16.xpose.msra.mxu1 %v4720_v27  ;;  %v18113_v29 = vld [vmem:[#allocation146_spill] sm:$0xff] }
 0x3bb   : > { %18093 = vst [vmem:[#allocation131_spill] sm:$0xff] %v14286_v47  ;;  %v18108_v0 = vpack.c.b16 %v18106_v3, %v18107_v32  ;;  %v18112_v54 = vld [vmem:[#allocation148_spill] sm:$0xff] }
 0x3bc   : > { %10846 = vmatmul.msk.bf16.vlgmr.msra.gmra.mxu2 %vm3485_vm0, %v18102_v63  ;;  %10847 = vmatmul.msk.bf16.vlgmr.msra.gmra.mxu3 %vm3485_vm0, %v18105_v22  ;;  %v18114_v63 = vpack.c.b16 %v18112_v54, %v18113_v29  ;;  %v18117_v22 = vpack.c.b16 %v18115_v43, %v18116_v15  ;;  %v18118_v15 = vld [vmem:[#allocation88_spill] sm:$0xff] }
 0x3bd   : > { %v4690_v18 = vsel %vm3485_vm0, %v18108_v0, 0  ;;  %v14324_v3 = vpop.f32.mrf.mxu2  ;;  %v14330_v61 = vpop.f32.mrf.mxu0 }
 0x3be   : > { %4699 = vmatpush.bf16.xpose.msra.mxu0 %v4690_v18  ;;  %v4750_v26 = vsel %vm3485_vm0, %v18114_v63, 0  ;;  %v4780_v21 = vsel %vm3485_vm0, %v18117_v22, 0  ;;  %v14326_v32 = vpop.f32.mrf.mxu3  ;;  %v5408_v4 = vsel %vm3485_vm0, %v14324_v3, -inf  ;;  %v14332_v31 = vpop.f32.mrf.mxu1  ;;  %v5399_v43 = vsel %vm3485_vm0, %v14330_v61, -inf  ;;  %v18119_v22 = vld [vmem:[#allocation86_spill] sm:$0xff] }
 0x3bf   : > { %4759 = vmatpush.bf16.xpose.msra.mxu2 %v4750_v26  ;;  %4789 = vmatpush.bf16.xpose.msra.mxu3 %v4780_v21  ;;  %v5405_v27 = vsel %vm3485_vm0, %v14332_v31, -inf  ;;  %v5414_v0 = vsel %vm3485_vm0, %v14326_v32, -inf }
 0x3c0   : > { %5409 = vmax.xlane.f32.xlu2 %v5408_v4  ;;  %5406 = vmax.xlane.f32.xlu1 %v5405_v27  ;;  %v18120_v4 = vpack.c.b16 %v18118_v15, %v18119_v22  ;;  %v18121_v27 = vld [vmem:[#allocation89_spill] sm:$0xff] }
 0x3c1   : > { %5415 = vmax.xlane.f32.xlu0 %v5414_v0  ;;  %v18122_v0 = vld [vmem:[#allocation87_spill] sm:$0xff] }
 0x3c2   : > { %v18123_v47 = vpack.c.b16 %v18121_v27, %v18122_v0  ;;  %v18137_v0 = vld [vmem:[#allocation198_spill] sm:$0xff] }
 0x3c5   : > { %v14338_v21 = vpop.f32.mrf.mxu2  ;;  %v14344_v54 = vpop.f32.mrf.mxu0 }
 0x3c6   : > { %v14340_v26 = vpop.f32.mrf.mxu3  ;;  %v5411_v18 = vsel %vm3485_vm0, %v14338_v21, -inf  ;;  %v14346_v29 = vpop.f32.mrf.mxu1 }
 0x3c7   : > { %v5417_v63 = vsel %vm3485_vm0, %v14340_v26, -inf }
 0x3c8   : > { %5412 = vmax.xlane.f32.xlu2 %v5411_v18  ;;  %5418 = vmax.xlane.f32.xlu1 %v5417_v63  ;;  %v18125_v18 = vld [vmem:[#allocation90_spill] sm:$0xff]  ;;  %v18130_v63 = vld [vmem:[#allocation196_spill] sm:$0xff] }
 0x3c9   : > { %5400 = vmax.xlane.f32.xlu0 %v5399_v43  ;;  %10849 = vmatmul.msk.bf16.vlgmr.msrb.gmra.mxu1 %vm3485_vm0, %v18123_v47  ;;  %v18126_v28 = vpack.c.b16 %v18124_v52, %v18125_v18  ;;  %v18131_v43 = vld [vmem:[#allocation194_spill] sm:$0xff]  ;;  %v18136_v52 = vld [vmem:[#allocation200_spill] sm:$0xff] }
 0x3ca   : > { %10848 = vmatmul.msk.bf16.vlgmr.msrb.gmra.mxu0 %vm3485_vm0, %v18120_v4  ;;  %v18132_v15 = vpack.c.b16 %v18130_v63, %v18131_v43  ;;  %v18133_v4 = vld [vmem:[#allocation197_spill] sm:$0xff] }
 0x3cb   : > { %v18135_v27 = vpack.c.b16 %v18133_v4, %v18134_v48  ;;  %v5420_v48 = vsel %vm3485_vm0, %v14344_v54, -inf }
 0x3cc   : > { %10850 = vmatmul.msk.bf16.vlgmr.msrb.gmra.mxu2 %vm3485_vm0, %v18126_v28  ;;  %10851 = vmatmul.msk.bf16.vlgmr.msrb.gmra.mxu3 %vm3485_vm0, %v18129_v23  ;;  %v4810_v22 = vsel %vm3485_vm0, %v18132_v15, 0  ;;  %v18138_v28 = vpack.c.b16 %v18136_v52, %v18137_v0  ;;  %v18141_v23 = vpack.c.b16 %v18139_v14, %v18140_v44  ;;  %v18143_v14 = vld [vmem:[#allocation38_spill] sm:$0xff] }
 0x3cd   : > { %v4840_v47 = vsel %vm3485_vm0, %v18135_v27, 0  ;;  %4819 = vmatpush.bf16.xpose.msrb.mxu0 %v4810_v22  ;;  %v14384_v63 = vpop.f32.mrf.mxu2  ;;  %v14390_v15 = vpop.f32.mrf.mxu0  ;;  %v5426_v22 = vsel %vm3485_vm0, %v14346_v29, -inf }
 0x3ce   : > { %4849 = vmatpush.bf16.xpose.msrb.mxu1 %v4840_v47  ;;  %v4870_v18 = vsel %vm3485_vm0, %v18138_v28, 0  ;;  %v4900_v49 = vsel %vm3485_vm0, %v18141_v23, 0  ;;  %v14386_v43 = vpop.f32.mrf.mxu3  ;;  %v5423_v4 = vsel %vm3485_vm0, %v14390_v15, -inf  ;;  %v14396_v27 = vpop.f32.mrf.mxu1  ;;  %v5432_v47 = vsel %vm3485_vm0, %v14384_v63, -inf  ;;  %v18145_v23 = vld [vmem:[#allocation41_spill] sm:$0xff] }
 0x3cf   : > { %4879 = vmatpush.bf16.xpose.msrb.mxu2 %v4870_v18  ;;  %4909 = vmatpush.bf16.xpose.msrb.mxu3 %v4900_v49  ;;  %v5438_v52 = vsel %vm3485_vm0, %v14386_v43, -inf  ;;  %v5429_v0 = vsel %vm3485_vm0, %v14396_v27, -inf  ;;  %v18142_v18 = vld [vmem:[#allocation40_spill] sm:$0xff] }
 0x3d0   : > { %5421 = vmax.xlane.f32.xlu2 %v5420_v48  ;;  %5427 = vmax.xlane.f32.xlu1 %v5426_v22  ;;  %v18144_v44 = vpack.c.b16 %v18142_v18, %v18143_v14  ;;  %v18146_v48 = vld [vmem:[#allocation39_spill] sm:$0xff]  ;;  %v18154_v18 = vld [vmem:[#allocation152_spill] sm:$0xff]  ;;  %v18155_v14 = vld [vmem:[#allocation150_spill] sm:$0xff] }
 0x3d1   : > { %5424 = vmax.xlane.f32.xlu0 %v5423_v4  ;;  %v18147_v22 = vpack.c.b16 %v18145_v23, %v18146_v48  ;;  %v18157_v23 = vld [vmem:[#allocation153_spill] sm:$0xff]  ;;  %v18158_v48 = vld [vmem:[#allocation151_spill] sm:$0xff] }
 0x3d5   : > { %v14398_v49 = vpop.f32.mrf.mxu2 }
 0x3d6   : > { %v14406_v28 = vpop.f32.mrf.mxu3  ;;  %v14416_v4 = vpop.f32.mrf.mxu1 }
 0x3d8   : > { %5433 = vmax.xlane.f32.xlu2 %v5432_v47  ;;  %5439 = vmax.xlane.f32.xlu1 %v5438_v52  ;;  %v18148_v47 = vld [vmem:[#allocation44_spill] sm:$0xff]  ;;  %v18152_v52 = vld [vmem:[#allocation43_spill] sm:$0xff] }
 0x3d9   : > { %5430 = vmax.xlane.f32.xlu0 %v5429_v0  ;;  %10853 = vmatmul.msk.bf16.vlgmr.msra.gmra.mxu1 %vm3485_vm0, %v18147_v22  ;;  %v18150_v2 = vpack.c.b16 %v18148_v47, %v18149_v11  ;;  %v18153_v0 = vpack.c.b16 %v18151_v19, %v18152_v52  ;;  %v18159_v22 = vpack.c.b16 %v18157_v23, %v18158_v48  ;;  %v18160_v11 = vld [vmem:[#allocation156_spill] sm:$0xff]  ;;  %v18161_v47 = vld [vmem:[#allocation154_spill] sm:$0xff]  ;;  %v18163_v19 = vld [vmem:[#allocation157_spill] sm:$0xff] }
 0x3da   : > { %10852 = vmatmul.msk.bf16.vlgmr.msra.gmra.mxu0 %vm3485_vm0, %v18144_v44  ;;  %v18156_v44 = vpack.c.b16 %v18154_v18, %v18155_v14  ;;  %v18164_v52 = vld [vmem:[#allocation155_spill] sm:$0xff]  ;;  %v5441_v14 = vsel %vm3485_vm0, %v14406_v28, -inf }
 0x3db   : > { %v4960_v39 = vsel %vm3485_vm0, %v18159_v22, 0 }
 0x3dc   : > { %10854 = vmatmul.msk.bf16.vlgmr.msra.gmra.mxu2 %vm3485_vm0, %v18150_v2  ;;  %10855 = vmatmul.msk.bf16.vlgmr.msra.gmra.mxu3 %vm3485_vm0, %v18153_v0  ;;  %v4930_v37 = vsel %vm3485_vm0, %v18156_v44, 0  ;;  %v18162_v2 = vpack.c.b16 %v18160_v11, %v18161_v47  ;;  %v18165_v0 = vpack.c.b16 %v18163_v19, %v18164_v52  ;;  %v14450_v44 = vpop.f32.mrf.mxu0  ;;  %v18166_v47 = vld [vmem:[#allocation96_spill] sm:$0xff]  ;;  %v18169_v52 = vld [vmem:[#allocation97_spill] sm:$0xff] }
 0x3dd   : > { %4939 = vmatpush.bf16.xpose.msra.mxu0 %v4930_v37  ;;  %4969 = vmatpush.bf16.xpose.msra.mxu1 %v4960_v39  ;;  %v14442_v18 = vpop.f32.mrf.mxu2  ;;  %v5450_v39 = vsel %vm3485_vm0, %v14416_v4, -inf  ;;  %v5435_v37 = vsel %vm3485_vm0, %v14398_v49, -inf  ;;  %v5444_v48 = vsel %vm3485_vm0, %v14450_v44, -inf }
 0x3de   : > { %v4990_v38 = vsel %vm3485_vm0, %v18162_v2, 0  ;;  %v5020_v45 = vsel %vm3485_vm0, %v18165_v0, 0  ;;  %v5456_v22 = vsel %vm3485_vm0, %v14442_v18, -inf  ;;  %v18167_v2 = vld [vmem:[#allocation94_spill] sm:$0xff]  ;;  %v18170_v0 = vld [vmem:[#allocation95_spill] sm:$0xff] }
 0x3df   : > { %4999 = vmatpush.bf16.xpose.msra.mxu2 %v4990_v38  ;;  %5029 = vmatpush.bf16.xpose.msra.mxu3 %v5020_v45  ;;  %v14452_v23 = vpop.f32.mrf.mxu3  ;;  %v14454_v38 = vpop.f32.mrf.mxu1  ;;  %v18168_v19 = vpack.c.b16 %v18166_v47, %v18167_v2  ;;  %v18178_v47 = vld [vmem:[#allocation204_spill] sm:$0xff]  ;;  %v18179_v2 = vld [vmem:[#allocation202_spill] sm:$0xff] }
 0x3e0   : > { %5442 = vmax.xlane.f32.xlu2 %v5441_v14  ;;  %5451 = vmax.xlane.f32.xlu1 %v5450_v39  ;;  %v5462_v11 = vsel %vm3485_vm0, %v14452_v23, -inf  ;;  %v18171_v14 = vpack.c.b16 %v18169_v52, %v18170_v0  ;;  %v18181_v52 = vld [vmem:[#allocation205_spill] sm:$0xff]  ;;  %v18182_v0 = vld [vmem:[#allocation203_spill] sm:$0xff] }
 0x3e1   : > { %5436 = vmax.xlane.f32.xlu0 %v5435_v37  ;;  %v18172_v37 = vld [vmem:[#allocation100_spill] sm:$0xff] }
 0x3e4   : > { %v14472_v39 = vpop.f32.mrf.mxu0 }
 0x3e5   : > { %v14456_v45 = vpop.f32.mrf.mxu2 }
 0x3e8   : > { %5445 = vmax.xlane.f32.xlu2 %v5444_v48  ;;  %5457 = vmax.xlane.f32.xlu1 %v5456_v22  ;;  %v18173_v48 = vld [vmem:[#allocation98_spill] sm:$0xff]  ;;  %v18176_v22 = vld [vmem:[#allocation99_spill] sm:$0xff] }
 0x3e9   : > { %5463 = vmax.xlane.f32.xlu0 %v5462_v11  ;;  %10857 = vmatmul.msk.bf16.vlgmr.msrb.gmra.mxu1 %vm3485_vm0, %v18171_v14  ;;  %v18174_v6 = vpack.c.b16 %v18172_v37, %v18173_v48  ;;  %v18177_v11 = vpack.c.b16 %v18175_v33, %v18176_v22  ;;  %v18183_v14 = vpack.c.b16 %v18181_v52, %v18182_v0  ;;  %v18184_v37 = vld [vmem:[#allocation208_spill] sm:$0xff]  ;;  %v18185_v48 = vld [vmem:[#allocation206_spill] sm:$0xff]  ;;  %v18187_v33 = vld [vmem:[#allocation209_spill] sm:$0xff] }
 0x3ea   : > { %10856 = vmatmul.msk.bf16.vlgmr.msrb.gmra.mxu0 %vm3485_vm0, %v18168_v19  ;;  %v18180_v19 = vpack.c.b16 %v18178_v47, %v18179_v2  ;;  %v18188_v22 = vld [vmem:[#allocation207_spill] sm:$0xff]  ;;  %v14498_v47 = vpop.f32.mrf.mxu3  ;;  %v14500_v2 = vpop.f32.mrf.mxu1 }
 0x3eb   : > { %v5080_v12 = vsel %vm3485_vm0, %v18183_v14, 0 }
 0x3ec   : > { %10858 = vmatmul.msk.bf16.vlgmr.msrb.gmra.mxu2 %vm3485_vm0, %v18174_v6  ;;  %10859 = vmatmul.msk.bf16.vlgmr.msrb.gmra.mxu3 %vm3485_vm0, %v18177_v11  ;;  %v5050_v40 = vsel %vm3485_vm0, %v18180_v19, 0  ;;  %v18186_v6 = vpack.c.b16 %v18184_v37, %v18185_v48  ;;  %v18189_v11 = vpack.c.b16 %v18187_v33, %v18188_v22  ;;  %v5447_v19 = vsel %vm3485_vm0, %v14472_v39, -inf  ;;  %v14510_v0 = vpop.f32.mrf.mxu0  ;;  %v18191_v33 = vld [vmem:[#allocation46_spill] sm:$0xff] }
 0x3ed   : > { %5059 = vmatpush.bf16.xpose.msrb.mxu0 %v5050_v40  ;;  %5089 = vmatpush.bf16.xpose.msrb.mxu1 %v5080_v12  ;;  %v5453_v40 = vsel %vm3485_vm0, %v14454_v38, -inf  ;;  %v5465_v12 = vsel %vm3485_vm0, %v14498_v47, -inf  ;;  %v14508_v52 = vpop.f32.mrf.mxu2  ;;  %v5468_v37 = vsel %vm3485_vm0, %v14510_v0, -inf }
 0x3ee   : > { %v5110_v16 = vsel %vm3485_vm0, %v18186_v6, 0  ;;  %v5140_v17 = vsel %vm3485_vm0, %v18189_v11, 0  ;;  %v5480_v14 = vsel %vm3485_vm0, %v14508_v52, -inf  ;;  %v18190_v6 = vld [vmem:[#allocation48_spill] sm:$0xff]  ;;  %v18193_v11 = vld [vmem:[#allocation49_spill] sm:$0xff] }
 0x3ef   : > { %5119 = vmatpush.bf16.xpose.msrb.mxu2 %v5110_v16  ;;  %5149 = vmatpush.bf16.xpose.msrb.mxu3 %v5140_v17  ;;  %v5459_v17 = vsel %vm3485_vm0, %v14456_v45, -inf  ;;  %v18192_v22 = vpack.c.b16 %v18190_v6, %v18191_v33  ;;  %v18202_v6 = vld [vmem:[#allocation160_spill] sm:$0xff]  ;;  %v18203_v33 = vld [vmem:[#allocation158_spill] sm:$0xff] }
 0x3f0   : > { %5454 = vmax.xlane.f32.xlu2 %v5453_v40  ;;  %5466 = vmax.xlane.f32.xlu1 %v5465_v12  ;;  %v18194_v40 = vld [vmem:[#allocation47_spill] sm:$0xff] }
 0x3f1   : > { %5448 = vmax.xlane.f32.xlu0 %v5447_v19  ;;  %v18195_v12 = vpack.c.b16 %v18193_v11, %v18194_v40  ;;  %v18205_v11 = vld [vmem:[#allocation161_spill] sm:$0xff]  ;;  %v18206_v40 = vld [vmem:[#allocation159_spill] sm:$0xff] }
 0x3f2   : > { %v14512_v16 = vpop.f32.mrf.mxu3  ;;  %v14520_v48 = vpop.f32.mrf.mxu1 }
 0x3f5   : > { %v14530_v19 = vpop.f32.mrf.mxu2 }
 0x3f8   : > { %5460 = vmax.xlane.f32.xlu2 %v5459_v17  ;;  %5469 = vmax.xlane.f32.xlu1 %v5468_v37  ;;  %v18196_v17 = vld [vmem:[#allocation52_spill] sm:$0xff] }
 0x3f9   : > { %5481 = vmax.xlane.f32.xlu0 %v5480_v14  ;;  %10861 = vmatmul.msk.bf16.vlgmr.msra.gmra.mxu1 %vm3485_vm0, %v18195_v12  ;;  %v18198_v59 = vpack.c.b16 %v18196_v17, %v18197_v9  ;;  %v18200_v14 = vld [vmem:[#allocation51_spill] sm:$0xff]  ;;  %v18207_v12 = vpack.c.b16 %v18205_v11, %v18206_v40  ;;  %v18208_v9 = vld [vmem:[#allocation164_spill] sm:$0xff]  ;;  %v18209_v17 = vld [vmem:[#allocation162_spill] sm:$0xff] }
 0x3fa   : > { %10860 = vmatmul.msk.bf16.vlgmr.msra.gmra.mxu0 %vm3485_vm0, %v18192_v22  ;;  %v18201_v37 = vpack.c.b16 %v18199_v57, %v18200_v14  ;;  %v18204_v22 = vpack.c.b16 %v18202_v6, %v18203_v33  ;;  %v18211_v57 = vld [vmem:[#allocation165_spill] sm:$0xff]  ;;  %v18212_v14 = vld [vmem:[#allocation163_spill] sm:$0xff]  ;;  %v5474_v6 = vsel %vm3485_vm0, %v14500_v2, -inf  ;;  %v14562_v33 = vpop.f32.mrf.mxu3  ;;  %v14566_v11 = vpop.f32.mrf.mxu1 }
 0x3fb   : > { %v5200_v5 = vsel %vm3485_vm0, %v18207_v12, 0  ;;  %v5489_v40 = vsel %vm3485_vm0, %v14562_v33, -inf }
 0x3fc   : > { %10862 = vmatmul.msk.bf16.vlgmr.msra.gmra.mxu2 %vm3485_vm0, %v18198_v59  ;;  %10863 = vmatmul.msk.bf16.vlgmr.msra.gmra.mxu3 %vm3485_vm0, %v18201_v37  ;;  %v5170_v60 = vsel %vm3485_vm0, %v18204_v22, 0  ;;  %v18210_v59 = vpack.c.b16 %v18208_v9, %v18209_v17  ;;  %v18213_v37 = vpack.c.b16 %v18211_v57, %v18212_v14  ;;  %v14564_v22 = vpop.f32.mrf.mxu0  ;;  %v18215_v9 = vld [vmem:[#allocation104_spill] sm:$0xff]  ;;  %v18216_v17 = vld [vmem:[#allocation102_spill] sm:$0xff]  ;;  %v18218_v57 = vld [vmem:[#allocation105_spill] sm:$0xff] }
 0x3fd   : > { %5179 = vmatpush.bf16.xpose.msra.mxu0 %v5170_v60  ;;  %5209 = vmatpush.bf16.xpose.msra.mxu1 %v5200_v5  ;;  %v5477_v60 = vsel %vm3485_vm0, %v14520_v48, -inf  ;;  %v5483_v5 = vsel %vm3485_vm0, %v14530_v19, -inf  ;;  %v18219_v14 = vld [vmem:[#allocation103_spill] sm:$0xff] }
 0x3fe   : > { %v5230_v24 = vsel %vm3485_vm0, %v18210_v59, 0  ;;  %v5260_v56 = vsel %vm3485_vm0, %v18213_v37, 0  ;;  %v18217_v59 = vpack.c.b16 %v18215_v9, %v18216_v17  ;;  %v18220_v37 = vpack.c.b16 %v18218_v57, %v18219_v14 }
 0x3ff   : > { %5239 = vmatpush.bf16.xpose.msra.mxu2 %v5230_v24  ;;  %5269 = vmatpush.bf16.xpose.msra.mxu3 %v5260_v56  ;;  %v14568_v24 = vpop.f32.mrf.mxu2  ;;  %v5486_v56 = vsel %vm3485_vm0, %v14512_v16, -inf  ;;  %v18228_v9 = vpack.c.b16 %v13576_v55, %v13572_v1  ;;  %v18230_v14 = vpack.c.b16 %v13588_v10, %v13584_v62 }
 0x400   : > { %5475 = vmax.xlane.f32.xlu2 %v5474_v6  ;;  %5484 = vmax.xlane.f32.xlu1 %v5483_v5  ;;  %18214 = vst [vmem:[#allocation72_spill] sm:$0xff] %v14568_v24  ;;  %v5504_v12 = vsel %vm3485_vm0, %v14568_v24, -inf  ;;  %v18223_v5 = vld [vmem:[#allocation106_spill] sm:$0xff]  ;;  %v18225_v24 = vld [vmem:[#allocation109_spill] sm:$0xff] }
 0x401   : > { %5478 = vmax.xlane.f32.xlu0 %v5477_v60  ;;  %v18222_v60 = vld [vmem:[#allocation108_spill] sm:$0xff]  ;;  %v5290_v17 = vsel %vm3485_vm0, %v18228_v9, 0  ;;  %v18238_v9 = vld [vmem:[#allocation54_spill] sm:$0xff] }
 0x402   : > { %v14584_v6 = vpop.f32.mrf.mxu3  ;;  %v14612_v55 = vpop.f32.mrf.mxu1 }
 0x403   : > { %18221 = vst [vmem:[#allocation70_spill] sm:$0xff] %v14584_v6  ;;  %v5501_v62 = vsel %vm3485_vm0, %v14612_v55, -inf }
 0x404   : > { %v14610_v1 = vpop.f32.mrf.mxu0  ;;  %18233 = vst [vmem:[#allocation71_spill] sm:$0xff] %v14612_v55 }
 0x405   : > { %18232 = vst [vmem:[#allocation73_spill] sm:$0xff] %v14610_v1 }
 0x408   : > { %5487 = vmax.xlane.f32.xlu2 %v5486_v56  ;;  %5505 = vmax.xlane.f32.xlu1 %v5504_v12  ;;  %v18224_v56 = vpack.c.b16 %v18222_v60, %v18223_v5  ;;  %v5492_v5 = vsel %vm3485_vm0, %v14610_v1, -inf }
 0x409   : > { %5490 = vmax.xlane.f32.xlu0 %v5489_v40  ;;  %10865 = vmatmul.msk.bf16.vlgmr.msrb.gmra.mxu1 %vm3485_vm0, %v18220_v37  ;;  %v18226_v40 = vld [vmem:[#allocation107_spill] sm:$0xff]  ;;  %v5350_v37 = vsel %vm3485_vm0, %v18230_v14, 0 }
 0x40a   : > { %10864 = vmatmul.msk.bf16.vlgmr.msrb.gmra.mxu0 %vm3485_vm0, %v18217_v59  ;;  %v18227_v12 = vpack.c.b16 %v18225_v24, %v18226_v40  ;;  %v18229_v59 = vpack.c.b16 %v13578_v41, %v13574_v46  ;;  %v18231_v24 = vpack.c.b16 %v13590_v7, %v13586_v53  ;;  %v5471_v46 = vsel %vm3485_vm0, %v14564_v22, -inf  ;;  %v14620_v7 = vpop.f32.mrf.mxu2  ;;  %v14622_v53 = vpop.f32.mrf.mxu3 }
 0x40b   : > { %5299 = vmatpush.bf16.xpose.msrb.mxu0 %v5290_v17  ;;  %v5498_v41 = vsel %vm3485_vm0, %v14566_v11, -inf  ;;  %18234 = vst [vmem:[#allocation76_spill] sm:$0xff] %v14620_v7  ;;  %v5513_v40 = vsel %vm3485_vm0, %v14622_v53, -inf }
 0x40c   : > { %10866 = vmatmul.msk.bf16.vlgmr.msrb.gmra.mxu2 %vm3485_vm0, %v18224_v56  ;;  %10867 = vmatmul.msk.bf16.vlgmr.msrb.gmra.mxu3 %vm3485_vm0, %v18227_v12  ;;  %v5320_v57 = vsel %vm3485_vm0, %v18229_v59, 0  ;;  %v5380_v60 = vsel %vm3485_vm0, %v18231_v24, 0  ;;  %18235 = vst [vmem:[#allocation74_spill] sm:$0xff] %v14622_v53  ;;  %v14624_v10 = vpop.f32.mrf.mxu0  ;;  %v5510_v56 = vsel %vm3485_vm0, %v14584_v6, -inf  ;;  %v18237_v12 = vld [vmem:[#allocation56_spill] sm:$0xff]  ;;  %v18240_v59 = vld [vmem:[#allocation57_spill] sm:$0xff] }
 0x40d   : > { %5329 = vmatpush.bf16.xpose.msrb.mxu1 %v5320_v57  ;;  %5359 = vmatpush.bf16.xpose.msrb.mxu2 %v5350_v37  ;;  %18236 = vst [vmem:[#allocation77_spill] sm:$0xff] %v14624_v10  ;;  %v18239_v17 = vpack.c.b16 %v18237_v12, %v18238_v9  ;;  %v18241_v57 = vld [vmem:[#allocation55_spill] sm:$0xff]  ;;  %v14640_v37 = vpop.f32.mrf.mxu1  ;;  %v18244_v24 = vld [vmem:[#allocation60_spill] sm:$0xff]  ;;  %v18252_v12 = vld [vmem:[#allocation210_spill] sm:$0xff] }
 0x40e   : > { %5389 = vmatpush.bf16.xpose.msrb.mxu3 %v5380_v60  ;;  %v18242_v14 = vpack.c.b16 %v18240_v59, %v18241_v57  ;;  %18243 = vst [vmem:[#allocation75_spill] sm:$0xff] %v14640_v37  ;;  %v18245_v60 = vld [vmem:[#allocation58_spill] sm:$0xff]  ;;  %v18256_v57 = vld [vmem:[#allocation212_spill] sm:$0xff] }
 0x40f   : > { %v18255_v59 = vld [vmem:[#allocation214_spill] sm:$0xff] }
 0x410   : > { %5472 = vmax.xlane.f32.xlu2 %v5471_v46  ;;  %5502 = vmax.xlane.f32.xlu1 %v5501_v62  ;;  %v18246_v46 = vpack.c.b16 %v18244_v24, %v18245_v60  ;;  %v18248_v62 = vld [vmem:[#allocation59_spill] sm:$0xff]  ;;  %v18259_v60 = vld [vmem:[#allocation213_spill] sm:$0xff] }
 0x411   : > { %5499 = vmax.xlane.f32.xlu0 %v5498_v41  ;;  %v18247_v41 = vld [vmem:[#allocation61_spill] sm:$0xff]  ;;  %v18258_v24 = vld [vmem:[#allocation215_spill] sm:$0xff] }
 0x418   : > { %5493 = vmax.xlane.f32.xlu2 %v5492_v5  ;;  %5514 = vmax.xlane.f32.xlu1 %v5513_v40  ;;  %v18249_v5 = vpack.c.b16 %v18247_v41, %v18248_v62  ;;  %v18251_v40 = vld [vmem:[#allocation211_spill] sm:$0xff]  ;;  %v5507_v41 = vsel %vm3485_vm0, %v14620_v7, -inf  ;;  %v14670_v62 = vpop.f32.mrf.mxu0 }
 0x419   : > { %5511 = vmax.xlane.f32.xlu0 %v5510_v56  ;;  %10869 = vmatmul.msk.bf16.vlgmr.msra.gmra.mxu1 %vm3485_vm0, %v18242_v14  ;;  %v18250_v56 = vpack.c.b16 %v13620_v30, %v13616_v50  ;;  %v18253_v9 = vpack.c.b16 %v18251_v40, %v18252_v12  ;;  %v18257_v14 = vpack.c.b16 %v18255_v59, %v18256_v57  ;;  %v5522_v50 = vsel %vm3485_vm0, %v14640_v37, -inf  ;;  %v18265_v57 = vld [vmem:[#allocation112_spill] sm:$0xff] }
 0x41a   : > { %10868 = vmatmul.msk.bf16.vlgmr.msra.gmra.mxu0 %vm3485_vm0, %v18239_v17  ;;  %v14656_v17 = vpop.f32.mrf.mxu2  ;;  %v5495_v30 = vsel %vm3485_vm0, %v14624_v10, -inf  ;;  %18261 = vst [vmem:[#allocation178_spill] sm:$0xff] %v14670_v62  ;;  %v5516_v59 = vsel %vm3485_vm0, %v14670_v62, -inf }
 0x41b   : > { %6953 = vmatpush.bf16.msra.mxu0 %v18250_v56  ;;  %6981 = vmatpush.bf16.msra.mxu1 %v18253_v9  ;;  %18254 = vst [vmem:[#allocation180_spill] sm:$0xff] %v14656_v17  ;;  %v14674_v56 = vpop.f32.mrf.mxu1  ;;  %v5528_v12 = vsel %vm3485_vm0, %v14656_v17, -inf }
 0x41c   : > { %10870 = vmatmul.msk.bf16.vlgmr.msra.gmra.mxu2 %vm3485_vm0, %v18246_v46  ;;  %10871 = vmatmul.msk.bf16.vlgmr.msra.gmra.mxu3 %vm3485_vm0, %v18249_v5  ;;  %v18260_v46 = vpack.c.b16 %v18258_v24, %v18259_v60  ;;  %v14672_v5 = vpop.f32.mrf.mxu3  ;;  %18263 = vst [vmem:[#allocation179_spill] sm:$0xff] %v14674_v56  ;;  %v18268_v60 = vld [vmem:[#allocation113_spill] sm:$0xff] }
 0x41d   : > { %7009 = vmatpush.bf16.msra.mxu2 %v18257_v14  ;;  %18262 = vst [vmem:[#allocation181_spill] sm:$0xff] %v14672_v5  ;;  %v5534_v9 = vsel %vm3485_vm0, %v14672_v5, -inf  ;;  %v18266_v14 = vld [vmem:[#allocation110_spill] sm:$0xff]  ;;  %v18275_v5 = vld [vmem:[#allocation117_spill] sm:$0xff] }
 0x41e   : > { %7037 = vmatpush.bf16.msra.mxu3 %v18260_v46  ;;  %v18267_v24 = vpack.c.b16 %v18265_v57, %v18266_v14  ;;  %v18269_v46 = vld [vmem:[#allocation111_spill] sm:$0xff]  ;;  %v18278_v57 = vpack.c.b16 %v13872_v58, %v13868_v51  ;;  %v18279_v14 = vpack.c.b16 %v13874_v8, %v13870_v13  ;;  %v5525_v13 = vsel %vm3485_vm0, %v14674_v56, -inf }
 0x420   : > { %5508 = vmax.xlane.f32.xlu2 %v5507_v41  ;;  %5523 = vmax.xlane.f32.xlu1 %v5522_v50  ;;  %v18270_v41 = vpack.c.b16 %v18268_v60, %v18269_v46  ;;  %v14692_v50 = vpop.f32.mrf.mxu0 }
 0x421   : > { %5496 = vmax.xlane.f32.xlu0 %v5495_v30  ;;  %18271 = vst [vmem:[#allocation182_spill] sm:$0xff] %v14692_v50  ;;  %v18272_v30 = vld [vmem:[#allocation116_spill] sm:$0xff]  ;;  %v5519_v8 = vsel %vm3485_vm0, %v14692_v50, -inf }
 0x422   : > { %v14676_v40 = vpop.f32.mrf.mxu2 }
 0x423   : > { %18264 = vst [vmem:[#allocation184_spill] sm:$0xff] %v14676_v40  ;;  %v14720_v51 = vpop.f32.mrf.mxu1  ;;  %v5531_v58 = vsel %vm3485_vm0, %v14676_v40, -inf }
 0x424   : > { %v14712_v46 = vpop.f32.mrf.mxu3  ;;  %18283 = vst [vmem:[#allocation183_spill] sm:$0xff] %v14720_v51 }
 0x425   : > { %18280 = vst [vmem:[#allocation185_spill] sm:$0xff] %v14712_v46 }
 0x428   : > { %5529 = vmax.xlane.f32.xlu2 %v5528_v12  ;;  %5535 = vmax.xlane.f32.xlu1 %v5534_v9  ;;  %v18273_v12 = vld [vmem:[#allocation114_spill] sm:$0xff]  ;;  %v18276_v9 = vld [vmem:[#allocation115_spill] sm:$0xff] }
 0x429   : > { %5517 = vmax.xlane.f32.xlu0 %v5516_v59  ;;  %10873 = vmatmul.msk.bf16.vlgmr.msrb.gmra.mxu1 %vm3485_vm0, %v18270_v41  ;;  %v18274_v17 = vpack.c.b16 %v18272_v30, %v18273_v12  ;;  %v18277_v59 = vpack.c.b16 %v18275_v5, %v18276_v9  ;;  %v18282_v5 = vpack.c.b16 %v13886_v42, %v13882_v34  ;;  %v14734_v42 = vpop.f32.mrf.mxu0  ;;  %v5537_v12 = vsel %vm3485_vm0, %v14712_v46, -inf }
 0x42a   : > { %10872 = vmatmul.msk.bf16.vlgmr.msrb.gmra.mxu0 %vm3485_vm0, %v18267_v24  ;;  %7093 = vmatpush.bf16.msrb.mxu1 %v18279_v14  ;;  %v14710_v60 = vpop.xlane.xlu0 %5397  ;;  %v14728_v41 = vpop.f32.mrf.mxu2  ;;  %18285 = vst [vmem:[#allocation22_spill] sm:$0xff] %v14734_v42 }
 0x42b   : > { %7065 = vmatpush.bf16.msrb.mxu0 %v18278_v57  ;;  %v14708_v24 = vpop.xlane.xlu1 %5403  ;;  %18284 = vst [vmem:[#allocation24_spill] sm:$0xff] %v14728_v41  ;;  %v5552_v9 = vsel %vm3485_vm0, %v14728_v41, -inf  ;;  %v14744_v57 = vpop.f32.mrf.mxu1 }
 0x42c   : > { %10874 = vmatmul.msk.bf16.vlgmr.msrb.gmra.mxu2 %vm3485_vm0, %v18274_v17  ;;  %10875 = vmatmul.msk.bf16.vlgmr.msrb.gmra.mxu3 %vm3485_vm0, %v18277_v59  ;;  %v18281_v17 = vpack.c.b16 %v13884_v36, %v13880_v35  ;;  %v14736_v30 = vpop.f32.mrf.mxu3  ;;  %v5540_v59 = vsel %vm3485_vm0, %v14734_v42, -inf  ;;  %18287 = vst [vmem:[#allocation23_spill] sm:$0xff] %v14744_v57 }
 0x42d   : > { %7149 = vmatpush.bf16.msrb.mxu3 %v18282_v5  ;;  %18286 = vst [vmem:[#allocation25_spill] sm:$0xff] %v14736_v30 }
 0x42e   : > { %7121 = vmatpush.bf16.msrb.mxu2 %v18281_v17 }
 0x430   : > { %5526 = vmax.xlane.f32.xlu2 %v5525_v13  ;;  %5520 = vmax.xlane.f32.xlu1 %v5519_v8  ;;  %v5549_v8 = vsel %vm3485_vm0, %v14744_v57, -inf }
 0x431   : > { %5532 = vmax.xlane.f32.xlu0 %v5531_v58  ;;  %v5546_v58 = vsel %vm3485_vm0, %v14720_v51, -inf }
 0x432   : > { %v14746_v14 = vpop.f32.mrf.mxu2 }
 0x433   : > { %v14730_v35 = vpop.xlane.xlu2 %5409  ;;  %v14732_v34 = vpop.xlane.xlu1 %5406  ;;  %18288 = vst [vmem:[#allocation28_spill] sm:$0xff] %v14746_v14 }
 0x434   : > { %v5416_v36 = vpop.xlane.xlu0 %5415 }
 0x438   : > { %5538 = vmax.xlane.f32.xlu2 %v5537_v12  ;;  %5541 = vmax.xlane.f32.xlu1 %v5540_v59  ;;  %v5555_v12 = vsel %vm3485_vm0, %v14746_v14, -inf  ;;  %v14762_v59 = vpop.f32.mrf.mxu1 }
 0x439   : > { %5553 = vmax.xlane.f32.xlu0 %v5552_v9  ;;  %v14760_v9 = vpop.f32.mrf.mxu3  ;;  %18290 = vst [vmem:[#allocation29_spill] sm:$0xff] %v14762_v59 }
 0x43a   : > { %18289 = vst [vmem:[#allocation26_spill] sm:$0xff] %v14760_v9  ;;  %v14770_v51 = vpop.f32.mrf.mxu2  ;;  %v5561_v14 = vsel %vm3485_vm0, %v14760_v9, -inf }
 0x43b   : > { %v14748_v17 = vpop.xlane.xlu2 %5412  ;;  %v14750_v5 = vpop.xlane.xlu1 %5418  ;;  %18291 = vst [vmem:[#allocation27_spill] sm:$0xff] %v14770_v51 }
 0x43c   : > { %v14752_v13 = vpop.xlane.xlu0 %5400  ;;  %v5787_v55 = vsub.f32 %v14340_v26, %v14750_v5 }
 0x440   : > { %5547 = vmax.xlane.f32.xlu2 %v5546_v58  ;;  %5556 = vmax.xlane.f32.xlu1 %v5555_v12  ;;  %v5558_v58 = vsel %vm3485_vm0, %v14736_v30, -inf  ;;  %v14778_v12 = vpop.f32.mrf.mxu0  ;;  %v14788_v30 = vpop.f32.mrf.mxu1 }
 0x441   : > { %5550 = vmax.xlane.f32.xlu0 %v5549_v8  ;;  %v5576_v8 = vsel %vm3485_vm0, %v14770_v51, -inf  ;;  %18292 = vst [vmem:[#allocation136_spill] sm:$0xff] %v14778_v12  ;;  %v14780_v57 = vpop.f32.mrf.mxu3  ;;  %v5570_v51 = vsel %vm3485_vm0, %v14762_v59, -inf  ;;  %v5780_v59 = vsub.f32 %v14272_v25, %v14710_v60 }
 0x442   : > { %18293 = vst [vmem:[#allocation134_spill] sm:$0xff] %v14780_v57  ;;  %v14817_v10 = vpop.f32.mrf.mxu2 }
 0x443   : > { %v14764_v41 = vpop.xlane.xlu2 %5421  ;;  %v14766_v42 = vpop.xlane.xlu1 %5427  ;;  %18294 = vst [vmem:[#allocation137_spill] sm:$0xff] %v14788_v30 }
 0x444   : > { %v14768_v40 = vpop.xlane.xlu0 %5424  ;;  %18297 = vst [vmem:[#allocation138_spill] sm:$0xff] %v14817_v10 }
 0x448   : > { %5559 = vmax.xlane.f32.xlu2 %v5558_v58  ;;  %5577 = vmax.xlane.f32.xlu1 %v5576_v8  ;;  %v5543_v58 = vsel %vm3485_vm0, %v14778_v12, -inf  ;;  %v14796_v8 = vpop.f32.mrf.mxu0  ;;  %v5782_v12 = vsub.f32 %v14274_v20, %v14708_v24  ;;  %v5908_v20 = vmul.f32 1.442695, %v5780_v59 }
 0x449   : > { %5562 = vmax.xlane.f32.xlu0 %v5561_v14  ;;  %v5573_v14 = vsel %vm3485_vm0, %v14788_v30, -inf  ;;  %18295 = vst [vmem:[#allocation135_spill] sm:$0xff] %v14796_v8  ;;  %v5786_v30 = vsub.f32 %v14326_v32, %v5416_v36 }
 0x44a   : > { %v5912_v53 = vmul.f32 1.442695, %v5782_v12 }
 0x44b   : > { %v14782_v56 = vpop.xlane.xlu2 %5433  ;;  %v14784_v46 = vpop.xlane.xlu1 %5439  ;;  %v5920_v24 = vmul.f32 1.442695, %v5786_v30 }
 0x44c   : > { %v14786_v50 = vpop.xlane.xlu0 %5430  ;;  %11316 = vpow2.f32 %v5912_v53 }
 0x44d   : > { %11318 = vpow2.f32 %v5908_v20 }
 0x44e   : > { %11320 = vpow2.f32 %v5920_v24 }
 0x450   : > { %5544 = vmax.xlane.f32.xlu2 %v5543_v58  ;;  %5574 = vmax.xlane.f32.xlu1 %v5573_v14  ;;  %v14806_v58 = vpop.f32.mrf.mxu3  ;;  %v5582_v14 = vsel %vm3485_vm0, %v14780_v57, -inf  ;;  %v14825_v36 = vpop.f32.mrf.mxu0 }
 0x451   : > { %5571 = vmax.xlane.f32.xlu0 %v5570_v51  ;;  %18296 = vst [vmem:[#allocation140_spill] sm:$0xff] %v14806_v58  ;;  %v5564_v51 = vsel %vm3485_vm0, %v14796_v8, -inf  ;;  %v5585_v7 = vsel %vm3485_vm0, %v14806_v58, -inf  ;;  %v5567_v59 = vsel %vm3485_vm0, %v14825_v36, -inf  ;;  %v14857_v8 = vpop.f32.mrf.mxu2 }
 0x452   : > { %18298 = vst [vmem:[#allocation141_spill] sm:$0xff] %v14825_v36  ;;  %v14835_v12 = vpop.eup %11316 }
 0x453   : > { %v14798_v9 = vpop.xlane.xlu2 %5442  ;;  %v14800_v62 = vpop.xlane.xlu1 %5451  ;;  %18300 = vst [vmem:[#allocation80_spill] sm:$0xff] %v14857_v8 }
 0x454   : > { %v14802_v37 = vpop.xlane.xlu0 %5436 }
 0x458   : > { %5565 = vmax.xlane.f32.xlu2 %v5564_v51  ;;  %5586 = vmax.xlane.f32.xlu1 %v5585_v7  ;;  %v14827_v51 = vpop.f32.mrf.mxu1  ;;  %v5579_v7 = vsel %vm3485_vm0, %v14817_v10, -inf }
 0x459   : > { %5583 = vmax.xlane.f32.xlu0 %v5582_v14  ;;  %18299 = vst [vmem:[#allocation139_spill] sm:$0xff] %v14827_v51  ;;  %v5594_v30 = vsel %vm3485_vm0, %v14827_v51, -inf  ;;  %v14839_v14 = vpop.eup %11318  ;;  %v5781_v51 = vsub.f32 %v14330_v61, %v14752_v13  ;;  %v14865_v13 = vpop.f32.mrf.mxu0 }
 0x45a   : > { %v14845_v10 = vpop.eup %11320  ;;  %v6164_v58 = vsel %vm3485_vm0, %v14839_v14, 0.0  ;;  %18301 = vst [vmem:[#allocation78_spill] sm:$0xff] %v14865_v13 }
 0x45b   : > { %v14819_v25 = vpop.xlane.xlu2 %5445  ;;  %v14821_v32 = vpop.xlane.xlu1 %5457  ;;  %v5910_v57 = vmul.f32 1.442695, %v5781_v51  ;;  %v5600_v51 = vsel %vm3485_vm0, %v14857_v8, -inf }
 0x45c   : > { %v14823_v60 = vpop.xlane.xlu0 %5463 }
 0x460   : > { %5580 = vmax.xlane.f32.xlu2 %v5579_v7  ;;  %5595 = vmax.xlane.f32.xlu1 %v5594_v30  ;;  %v5784_v7 = vsub.f32 %v14324_v3, %v14730_v35  ;;  %v6170_v30 = vsel %vm3485_vm0, %v14835_v12, 0.0  ;;  %v14879_v1 = vpop.f32.mrf.mxu1 }
 0x461   : > { %5568 = vmax.xlane.f32.xlu0 %v5567_v59  ;;  %v6182_v59 = vsel %vm3485_vm0, %v14845_v10, 0.0  ;;  %18303 = vst [vmem:[#allocation79_spill] sm:$0xff] %v14879_v1 }
 0x462   : > { %v5916_v36 = vmul.f32 1.442695, %v5784_v7 }
 0x463   : > { %v14837_v53 = vpop.xlane.xlu2 %5454  ;;  %v14841_v20 = vpop.xlane.xlu1 %5466 }
 0x464   : > { %v14843_v24 = vpop.xlane.xlu0 %5448  ;;  %11322 = vpow2.f32 %v5916_v36  ;;  %v5922_v36 = vmul.f32 1.442695, %v5787_v55  ;;  %v5597_v55 = vsel %vm3485_vm0, %v14879_v1, -inf  ;;  %v5788_v1 = vsub.f32 %v14344_v54, %v14764_v41 }
 0x465   : > { %11324 = vpow2.f32 %v5910_v57 }
 0x466   : > { %11326 = vpow2.f32 %v5922_v36 }
 0x468   : > { %6171 = vadd.xlane.f32.xlu2 %v6170_v30  ;;  %6183 = vadd.xlane.f32.xlu1 %v6182_v59  ;;  %v14867_v30 = vpop.f32.mrf.mxu3  ;;  %v5588_v59 = vsel %vm3485_vm0, %v14865_v13, -inf }
 0x469   : > { %6165 = vadd.xlane.f32.xlu0 %v6164_v58  ;;  %18302 = vst [vmem:[#allocation81_spill] sm:$0xff] %v14867_v30  ;;  %v5783_v58 = vsub.f32 %v14332_v31, %v14732_v34  ;;  %v5606_v7 = vsel %vm3485_vm0, %v14867_v30, -inf  ;;  %v5924_v30 = vmul.f32 1.442695, %v5788_v1 }
 0x46a   : > { %v14883_v31 = vpop.eup %11322 }
 0x46b   : > { %v14859_v3 = vpop.xlane.xlu2 %5460  ;;  %v14863_v61 = vpop.xlane.xlu1 %5469  ;;  %v5914_v6 = vmul.f32 1.442695, %v5783_v58  ;;  %18304 = vst [vmem:[#allocation84_spill] sm:$0xff] %v14883_v31 }
 0x46c   : > { %v14861_v35 = vpop.xlane.xlu0 %5481  ;;  %v14889_v5 = vpop.eup %11324 }
 0x46d   : > { %11328 = vpow2.f32 %v5914_v6  ;;  %v6167_v58 = vsel %vm3485_vm0, %v14889_v5, 0.0  ;;  %v14901_v36 = vpop.eup %11326 }
 0x470   : > { %5601 = vmax.xlane.f32.xlu2 %v5600_v51  ;;  %5607 = vmax.xlane.f32.xlu1 %v5606_v7  ;;  %v5785_v51 = vsub.f32 %v14338_v21, %v14748_v17  ;;  %v6176_v7 = vsel %vm3485_vm0, %v14883_v31, 0.0  ;;  %v14921_v31 = vpop.f32.mrf.mxu3 }
 0x471   : > { %5589 = vmax.xlane.f32.xlu0 %v5588_v59  ;;  %18307 = vst [vmem:[#allocation83_spill] sm:$0xff] %v14921_v31  ;;  %v5609_v1 = vsel %vm3485_vm0, %v14921_v31, -inf }
 0x472   : > { %v5918_v59 = vmul.f32 1.442695, %v5785_v51  ;;  %v6185_v51 = vsel %vm3485_vm0, %v14901_v36, 0.0 }
 0x473   : > { %v14881_v26 = vpop.xlane.xlu2 %5475  ;;  %v14887_v57 = vpop.xlane.xlu1 %5484 }
 0x474   : > { %v14885_v34 = vpop.xlane.xlu0 %5478  ;;  %v14907_v17 = vpop.eup %11328  ;;  %11330 = vpow2.f32 %v5918_v59 }
 0x475   : > { %v14931_v59 = vpop.f32.mrf.mxu2  ;;  %11332 = vpow2.f32 %v5924_v30 }
 0x476   : > { %18309 = vst [vmem:[#allocation186_spill] sm:$0xff] %v14931_v59 }
 0x478   : > { %5598 = vmax.xlane.f32.xlu2 %v5597_v55  ;;  %6168 = vadd.xlane.f32.xlu1 %v6167_v58  ;;  %v14909_v55 = vpop.f32.mrf.mxu0  ;;  %v5790_v58 = vsub.f32 %v14346_v29, %v14766_v42 }
 0x479   : > { %6177 = vadd.xlane.f32.xlu0 %v6176_v7  ;;  %18306 = vst [vmem:[#allocation85_spill] sm:$0xff] %v14909_v55  ;;  %v6173_v7 = vsel %vm3485_vm0, %v14907_v17, 0.0  ;;  %v5591_v13 = vsel %vm3485_vm0, %v14909_v55, -inf  ;;  %v14941_v55 = vpop.f32.mrf.mxu1 }
 0x47a   : > { %v14929_v42 = vpop.eup %11330  ;;  %18310 = vst [vmem:[#allocation189_spill] sm:$0xff] %v14941_v55 }
 0x47b   : > { %v14899_v8 = vpop.xlane.xlu2 %5487  ;;  %v14905_v21 = vpop.xlane.xlu1 %5505 }
 0x47c   : > { %v14903_v6 = vpop.xlane.xlu0 %5490  ;;  %18305 = vst [vmem:[#allocation82_spill] sm:$0xff] %v14905_v21  ;;  %v5928_v21 = vmul.f32 1.442695, %v5790_v58  ;;  %v6179_v58 = vsel %vm3485_vm0, %v14929_v42, 0.0 }
 0x47e   : > { %11334 = vpow2.f32 %v5928_v21 }
 0x480   : > { %6186 = vadd.xlane.f32.xlu2 %v6185_v51  ;;  %5592 = vmax.xlane.f32.xlu1 %v5591_v13  ;;  %v5794_v51 = vsub.f32 %v14386_v43, %v14784_v46  ;;  %v5603_v13 = vsel %vm3485_vm0, %v14931_v59, -inf }
 0x481   : > { %6174 = vadd.xlane.f32.xlu0 %v6173_v7 }
 0x482   : > { %v5936_v7 = vmul.f32 1.442695, %v5794_v51 }
 0x483   : > { %v14923_v54 = vpop.xlane.xlu2 %5472  ;;  %v14927_v29 = vpop.xlane.xlu1 %5502 }
 0x484   : > { %v14925_v41 = vpop.xlane.xlu0 %5499  ;;  %18308 = vst [vmem:[#allocation188_spill] sm:$0xff] %v14927_v29  ;;  %v14945_v29 = vpop.eup %11332  ;;  %11336 = vpow2.f32 %v5936_v7 }
 0x485   : > { %v14951_v21 = vpop.eup %11334 }
 0x486   : > { %18312 = vst [vmem:[#allocation192_spill] sm:$0xff] %v14951_v21  ;;  %v6194_v51 = vsel %vm3485_vm0, %v14951_v21, 0.0  ;;  %v14985_v21 = vpop.f32.mrf.mxu3 }
 0x487   : > { %18317 = vst [vmem:[#allocation30_spill] sm:$0xff] %v14985_v21 }
 0x488   : > { %5610 = vmax.xlane.f32.xlu2 %v5609_v1  ;;  %6180 = vadd.xlane.f32.xlu1 %v6179_v58  ;;  %v5792_v1 = vsub.f32 %v14384_v63, %v14782_v56  ;;  %v6188_v58 = vsel %vm3485_vm0, %v14945_v29, 0.0  ;;  %v5789_v56 = vsub.f32 %v14390_v15, %v14768_v40 }
 0x489   : > { %5604 = vmax.xlane.f32.xlu0 %v5603_v13  ;;  %v5618_v13 = vsel %vm3485_vm0, %v14941_v55, -inf  ;;  %v14973_v55 = vpop.f32.mrf.mxu2 }
 0x48a   : > { %v5932_v59 = vmul.f32 1.442695, %v5792_v1  ;;  %18316 = vst [vmem:[#allocation32_spill] sm:$0xff] %v14973_v55  ;;  %v5795_v1 = vsub.f32 %v14406_v28, %v14798_v9  ;;  %v5926_v40 = vmul.f32 1.442695, %v5789_v56 }
 0x48b   : > { %v14943_v30 = vpop.xlane.xlu2 %5493  ;;  %v14949_v46 = vpop.xlane.xlu1 %5514 }
 0x48c   : > { %v14947_v43 = vpop.xlane.xlu0 %5511  ;;  %18311 = vst [vmem:[#allocation187_spill] sm:$0xff] %v14949_v46  ;;  %v14963_v46 = vpop.eup %11336  ;;  %11338 = vpow2.f32 %v5932_v59 }
 0x48d   : > { %11340 = vpow2.f32 %v5926_v40 }
 0x490   : > { %5619 = vmax.xlane.f32.xlu2 %v5618_v13  ;;  %6189 = vadd.xlane.f32.xlu1 %v6188_v58  ;;  %v14971_v13 = vpop.f32.mrf.mxu0  ;;  %v6206_v58 = vsel %vm3485_vm0, %v14963_v46, 0.0 }
 0x491   : > { %6195 = vadd.xlane.f32.xlu0 %v6194_v51  ;;  %18315 = vst [vmem:[#allocation191_spill] sm:$0xff] %v14971_v13  ;;  %v5791_v51 = vsub.f32 %v14396_v27, %v14786_v50  ;;  %v5612_v15 = vsel %vm3485_vm0, %v14971_v13, -inf  ;;  %v5938_v27 = vmul.f32 1.442695, %v5795_v1 }
 0x492   : > { %v14993_v59 = vpop.eup %11338 }
 0x493   : > { %v14961_v31 = vpop.xlane.xlu2 %5508  ;;  %v14965_v7 = vpop.xlane.xlu1 %5523 }
 0x494   : > { %18313 = vst [vmem:[#allocation190_spill] sm:$0xff] %v14961_v31  ;;  %v14967_v63 = vpop.xlane.xlu0 %5496  ;;  %v5930_v31 = vmul.f32 1.442695, %v5791_v51  ;;  %v6200_v51 = vsel %vm3485_vm0, %v14993_v59, 0.0  ;;  %v15003_v1 = vpop.eup %11340 }
 0x495   : > { %18314 = vst [vmem:[#allocation193_spill] sm:$0xff] %v14965_v7  ;;  %v5624_v7 = vsel %vm3485_vm0, %v14973_v55, -inf }
 0x496   : > { %11342 = vpow2.f32 %v5930_v31 }
 0x497   : > { %11344 = vpow2.f32 %v5938_v27 }
 0x498   : > { %6207 = vadd.xlane.f32.xlu2 %v6206_v58  ;;  %5613 = vmax.xlane.f32.xlu1 %v5612_v15  ;;  %v14995_v58 = vpop.f32.mrf.mxu1 }
 0x499   : > { %5625 = vmax.xlane.f32.xlu0 %v5624_v7  ;;  %18318 = vst [vmem:[#allocation33_spill] sm:$0xff] %v14995_v58  ;;  %v5630_v7 = vsel %vm3485_vm0, %v14985_v21, -inf  ;;  %v5621_v56 = vsel %vm3485_vm0, %v14995_v58, -inf  ;;  %v5798_v58 = vsub.f32 %v14416_v4, %v14800_v62  ;;  %v15033_v62 = vpop.f32.mrf.mxu2 }
 0x49a   : > { %18325 = vst [vmem:[#allocation142_spill] sm:$0xff] %v15033_v62 }
 0x49b   : > { %v14987_v50 = vpop.xlane.xlu2 %5529  ;;  %v14989_v28 = vpop.xlane.xlu1 %5535 }
 0x49c   : > { %v14991_v9 = vpop.xlane.xlu0 %5517  ;;  %v15007_v40 = vpop.eup %11342 }
 0x49d   : > { %v15013_v55 = vpop.eup %11344  ;;  %v6197_v13 = vsel %vm3485_vm0, %v15007_v40, 0.0 }
 0x4a0   : > { %5631 = vmax.xlane.f32.xlu2 %v5630_v7  ;;  %6201 = vadd.xlane.f32.xlu1 %v6200_v51  ;;  %v5793_v7 = vsub.f32 %v14398_v49, %v14802_v37  ;;  %v6209_v51 = vsel %vm3485_vm0, %v15013_v55, 0.0 }
 0x4a1   : > { %5622 = vmax.xlane.f32.xlu0 %v5621_v56  ;;  %v6191_v56 = vsel %vm3485_vm0, %v15003_v1, 0.0 }
 0x4a2   : > { %v5934_v21 = vmul.f32 1.442695, %v5793_v7 }
 0x4a3   : > { %v15005_v15 = vpop.xlane.xlu2 %5526  ;;  %v15011_v27 = vpop.xlane.xlu1 %5520 }
 0x4a4   : > { %18319 = vst [vmem:[#allocation31_spill] sm:$0xff] %v15005_v15  ;;  %v15009_v31 = vpop.xlane.xlu0 %5532  ;;  %v5944_v15 = vmul.f32 1.442695, %v5798_v58  ;;  %11346 = vpow2.f32 %v5934_v21 }
 0x4a5   : > { %18320 = vst [vmem:[#allocation36_spill] sm:$0xff] %v15009_v31  ;;  %v15025_v31 = vpop.f32.mrf.mxu0 }
 0x4a6   : > { %18321 = vst [vmem:[#allocation34_spill] sm:$0xff] %v15011_v27  ;;  %v5796_v27 = vsub.f32 %v14450_v44, %v14819_v25  ;;  %11348 = vpow2.f32 %v5944_v15  ;;  %v5615_v58 = vsel %vm3485_vm0, %v15025_v31, -inf  ;;  %v15057_v15 = vpop.f32.mrf.mxu1 }
 0x4a7   : > { %18322 = vst [vmem:[#allocation37_spill] sm:$0xff] %v15025_v31 }
 0x4a8   : > { %6192 = vadd.xlane.f32.xlu2 %v6191_v56  ;;  %6198 = vadd.xlane.f32.xlu1 %v6197_v13  ;;  %v15035_v56 = vpop.f32.mrf.mxu3  ;;  %v5802_v13 = vsub.f32 %v14452_v23, %v14823_v60  ;;  %v5940_v21 = vmul.f32 1.442695, %v5796_v27  ;;  %18328 = vst [vmem:[#allocation148_spill] sm:$0xff] %v15057_v15  ;;  %v5642_v27 = vsel %vm3485_vm0, %v15057_v15, -inf  ;;  %v5803_v15 = vsub.f32 %v14498_v47, %v14841_v20 }
 0x4a9   : > { %6210 = vadd.xlane.f32.xlu0 %v6209_v51  ;;  %18326 = vst [vmem:[#allocation145_spill] sm:$0xff] %v15035_v56  ;;  %v5633_v7 = vsel %vm3485_vm0, %v15035_v56, -inf  ;;  %v5627_v51 = vsel %vm3485_vm0, %v15033_v62, -inf  ;;  %v15077_v62 = vpop.f32.mrf.mxu2 }
 0x4aa   : > { %v15049_v44 = vpop.eup %11346  ;;  %11350 = vpow2.f32 %v5940_v21  ;;  %18331 = vst [vmem:[#allocation147_spill] sm:$0xff] %v15077_v62 }
 0x4ab   : > { %v15027_v49 = vpop.xlane.xlu2 %5538  ;;  %v15031_v4 = vpop.xlane.xlu1 %5541 }
 0x4ac   : > { %v15029_v37 = vpop.xlane.xlu0 %5553  ;;  %18324 = vst [vmem:[#allocation144_spill] sm:$0xff] %v15031_v4  ;;  %v15055_v60 = vpop.eup %11348 }
 0x4ad   : > { %18323 = vst [vmem:[#allocation35_spill] sm:$0xff] %v15029_v37  ;;  %v5952_v37 = vmul.f32 1.442695, %v5802_v13  ;;  %v6218_v13 = vsel %vm3485_vm0, %v15055_v60, 0.0 }
 0x4af   : > { %11352 = vpow2.f32 %v5952_v37 }
 0x4b0   : > { %5616 = vmax.xlane.f32.xlu2 %v5615_v58  ;;  %5628 = vmax.xlane.f32.xlu1 %v5627_v51  ;;  %v6203_v58 = vsel %vm3485_vm0, %v15049_v44, 0.0  ;;  %v15067_v51 = vpop.eup %11350 }
 0x4b1   : > { %5634 = vmax.xlane.f32.xlu0 %v5633_v7 }
 0x4b3   : > { %v15047_v4 = vpop.xlane.xlu2 %5547  ;;  %v15053_v23 = vpop.xlane.xlu1 %5556 }
 0x4b4   : > { %v15051_v25 = vpop.xlane.xlu0 %5550  ;;  %18327 = vst [vmem:[#allocation143_spill] sm:$0xff] %v15053_v23 }
 0x4b5   : > { %v15073_v37 = vpop.eup %11352 }
 0x4b6   : > { %v6230_v31 = vsel %vm3485_vm0, %v15073_v37, 0.0 }
 0x4b8   : > { %6204 = vadd.xlane.f32.xlu2 %v6203_v58  ;;  %6219 = vadd.xlane.f32.xlu1 %v6218_v13  ;;  %v5800_v58 = vsub.f32 %v14442_v18, %v14821_v32  ;;  %v6212_v13 = vsel %vm3485_vm0, %v15067_v51, 0.0  ;;  %v5954_v18 = vmul.f32 1.442695, %v5803_v15  ;;  %v15089_v32 = vpop.f32.mrf.mxu0 }
 0x4b9   : > { %5643 = vmax.xlane.f32.xlu0 %v5642_v27  ;;  %v5797_v27 = vsub.f32 %v14472_v39, %v14843_v24  ;;  %18332 = vst [vmem:[#allocation88_spill] sm:$0xff] %v15089_v32 }
 0x4ba   : > { %v5948_v23 = vmul.f32 1.442695, %v5800_v58  ;;  %v5799_v58 = vsub.f32 %v14454_v38, %v14837_v53 }
 0x4bb   : > { %v15065_v7 = vpop.xlane.xlu2 %5559  ;;  %v15071_v21 = vpop.xlane.xlu1 %5577  ;;  %v5942_v47 = vmul.f32 1.442695, %v5797_v27 }
 0x4bc   : > { %v15069_v56 = vpop.xlane.xlu0 %5562  ;;  %18330 = vst [vmem:[#allocation149_spill] sm:$0xff] %v15071_v21  ;;  %v5648_v21 = vsel %vm3485_vm0, %v15077_v62, -inf  ;;  %11354 = vpow2.f32 %v5948_v23  ;;  %v5946_v23 = vmul.f32 1.442695, %v5799_v58 }
 0x4bd   : > { %18329 = vst [vmem:[#allocation146_spill] sm:$0xff] %v15069_v56  ;;  %v15099_v56 = vpop.f32.mrf.mxu1  ;;  %11356 = vpow2.f32 %v5954_v18 }
 0x4be   : > { %18335 = vst [vmem:[#allocation87_spill] sm:$0xff] %v15099_v56  ;;  %11358 = vpow2.f32 %v5942_v47 }
 0x4bf   : > { %11360 = vpow2.f32 %v5946_v23 }
 0x4c0   : > { %6213 = vadd.xlane.f32.xlu2 %v6212_v13  ;;  %5649 = vmax.xlane.f32.xlu1 %v5648_v21  ;;  %v15097_v13 = vpop.f32.mrf.mxu3  ;;  %v5645_v21 = vsel %vm3485_vm0, %v15099_v56, -inf }
 0x4c1   : > { %6231 = vadd.xlane.f32.xlu0 %v6230_v31  ;;  %18334 = vst [vmem:[#allocation89_spill] sm:$0xff] %v15097_v13  ;;  %v5636_v31 = vsel %vm3485_vm0, %v15089_v32, -inf  ;;  %v5654_v15 = vsel %vm3485_vm0, %v15097_v13, -inf }
 0x4c2   : > { %v15109_v27 = vpop.eup %11354 }
 0x4c3   : > { %v15091_v20 = vpop.xlane.xlu2 %5544  ;;  %v15095_v24 = vpop.xlane.xlu1 %5574 }
 0x4c4   : > { %v15093_v39 = vpop.xlane.xlu0 %5571  ;;  %18333 = vst [vmem:[#allocation86_spill] sm:$0xff] %v15095_v24  ;;  %v15113_v38 = vpop.eup %11356 }
 0x4c5   : > { %v15119_v47 = vpop.eup %11358 }
 0x4c6   : > { %v6215_v58 = vsel %vm3485_vm0, %v15119_v47, 0.0  ;;  %v15131_v32 = vpop.eup %11360 }
 0x4c8   : > { %5637 = vmax.xlane.f32.xlu2 %v5636_v31  ;;  %5646 = vmax.xlane.f32.xlu1 %v5645_v21  ;;  %v5801_v31 = vsub.f32 %v14456_v45, %v14859_v3  ;;  %v6233_v21 = vsel %vm3485_vm0, %v15113_v38, 0.0  ;;  %v15137_v3 = vpop.f32.mrf.mxu0 }
 0x4c9   : > { %5655 = vmax.xlane.f32.xlu0 %v5654_v15  ;;  %v6224_v15 = vsel %vm3485_vm0, %v15109_v27, 0.0  ;;  %18340 = vst [vmem:[#allocation196_spill] sm:$0xff] %v15137_v3 }
 0x4ca   : > { %v5950_v56 = vmul.f32 1.442695, %v5801_v31  ;;  %v5810_v31 = vsub.f32 %v14512_v16, %v14899_v8 }
 0x4cb   : > { %v15111_v62 = vpop.xlane.xlu2 %5565  ;;  %v15117_v18 = vpop.xlane.xlu1 %5586 }
 0x4cc   : > { %v15115_v53 = vpop.xlane.xlu0 %5583  ;;  %18336 = vst [vmem:[#allocation92_spill] sm:$0xff] %v15117_v18  ;;  %v5804_v18 = vsub.f32 %v14510_v0, %v14863_v61  ;;  %11362 = vpow2.f32 %v5950_v56  ;;  %v15153_v61 = vpop.f32.mrf.mxu2 }
 0x4cd   : > { %18342 = vst [vmem:[#allocation197_spill] sm:$0xff] %v15153_v61 }
 0x4ce   : > { %v5956_v24 = vmul.f32 1.442695, %v5804_v18 }
 0x4d0   : > { %6225 = vadd.xlane.f32.xlu2 %v6224_v15  ;;  %6234 = vadd.xlane.f32.xlu1 %v6233_v21  ;;  %v15139_v15 = vpop.f32.mrf.mxu3  ;;  %v6221_v21 = vsel %vm3485_vm0, %v15131_v32, 0.0  ;;  %11364 = vpow2.f32 %v5956_v24 }
 0x4d1   : > { %6216 = vadd.xlane.f32.xlu0 %v6215_v58  ;;  %18341 = vst [vmem:[#allocation194_spill] sm:$0xff] %v15139_v15  ;;  %v5806_v58 = vsub.f32 %v14500_v2, %v14881_v26  ;;  %v5968_v2 = vmul.f32 1.442695, %v5810_v31 }
 0x4d2   : > { %v15155_v8 = vpop.eup %11362 }
 0x4d3   : > { %v15129_v13 = vpop.xlane.xlu2 %5580  ;;  %v15133_v23 = vpop.xlane.xlu1 %5595  ;;  %v5960_v0 = vmul.f32 1.442695, %v5806_v58  ;;  %v6227_v18 = vsel %vm3485_vm0, %v15155_v8, 0.0  ;;  %v5808_v58 = vsub.f32 %v14508_v52, %v14861_v35 }
 0x4d4   : > { %18337 = vst [vmem:[#allocation90_spill] sm:$0xff] %v15129_v13  ;;  %v15135_v45 = vpop.xlane.xlu0 %5568  ;;  %v5639_v13 = vsel %vm3485_vm0, %v15137_v3, -inf  ;;  %v15193_v3 = vpop.f32.mrf.mxu0 }
 0x4d5   : > { %18338 = vst [vmem:[#allocation93_spill] sm:$0xff] %v15133_v23  ;;  %v5657_v23 = vsel %vm3485_vm0, %v15139_v15, -inf  ;;  %11366 = vpow2.f32 %v5960_v0  ;;  %v5805_v0 = vsub.f32 %v14564_v22, %v14923_v54  ;;  %v15187_v22 = vpop.f32.mrf.mxu2  ;;  %v5807_v54 = vsub.f32 %v14520_v48, %v14885_v34 }
 0x4d6   : > { %18339 = vst [vmem:[#allocation91_spill] sm:$0xff] %v15135_v45  ;;  %v15157_v45 = vpop.f32.mrf.mxu1  ;;  %11368 = vpow2.f32 %v5968_v2  ;;  %v5672_v48 = vsel %vm3485_vm0, %v15187_v22, -inf }
 0x4d7   : > { %18343 = vst [vmem:[#allocation195_spill] sm:$0xff] %v15157_v45 }
 0x4d8   : > { %6222 = vadd.xlane.f32.xlu2 %v6221_v21  ;;  %5658 = vmax.xlane.f32.xlu1 %v5657_v23  ;;  %v5651_v21 = vsel %vm3485_vm0, %v15153_v61, -inf  ;;  %v15165_v23 = vpop.eup %11364  ;;  %v5958_v61 = vmul.f32 1.442695, %v5805_v0  ;;  %18345 = vst [vmem:[#allocation198_spill] sm:$0xff] %v15187_v22  ;;  %v15195_v15 = vpop.f32.mrf.mxu3 }
 0x4d9   : > { %5640 = vmax.xlane.f32.xlu0 %v5639_v13  ;;  %v5666_v13 = vsel %vm3485_vm0, %v15157_v45, -inf  ;;  %v6236_v35 = vsel %vm3485_vm0, %v15165_v23, 0.0  ;;  %18347 = vst [vmem:[#allocation199_spill] sm:$0xff] %v15193_v3 }
 0x4da   : > { %18348 = vst [vmem:[#allocation40_spill] sm:$0xff] %v15195_v15 }
 0x4db   : > { %v6172_v26 = vpop.xlane.xlu2 %6171  ;;  %v6184_v56 = vpop.xlane.xlu1 %6183 }
 0x4dc   : > { %v6166_v16 = vpop.xlane.xlu0 %6165  ;;  %v15171_v31 = vpop.eup %11366 }
 0x4dd   : > { %v15179_v45 = vpop.eup %11368  ;;  %11370 = vrcp.f32 %v6166_v16 }
 0x4de   : > { %v6254_v52 = vsel %vm3485_vm0, %v15179_v45, 0.0 }
 0x4e0   : > { %5652 = vmax.xlane.f32.xlu2 %v5651_v21  ;;  %5667 = vmax.xlane.f32.xlu1 %v5666_v13  ;;  %v5964_v13 = vmul.f32 1.442695, %v5808_v58 }
 0x4e1   : > { %6228 = vadd.xlane.f32.xlu0 %v6227_v18  ;;  %v6242_v18 = vsel %vm3485_vm0, %v15171_v31, 0.0 }
 0x4e2   : > { %11372 = vpow2.f32 %v5964_v13  ;;  %v5962_v13 = vmul.f32 1.442695, %v5807_v54 }
 0x4e3   : > { %v15169_v24 = vpop.xlane.xlu2 %5601  ;;  %v15175_v2 = vpop.xlane.xlu1 %5607  ;;  %11374 = vpow2.f32 %v5958_v61  ;;  %v5678_v61 = vsel %vm3485_vm0, %v15195_v15, -inf }
 0x4e4   : > { %18344 = vst [vmem:[#allocation200_spill] sm:$0xff] %v15169_v24  ;;  %v15177_v21 = vpop.xlane.xlu0 %5589 }
 0x4e8   : > { %6243 = vadd.xlane.f32.xlu2 %v6242_v18  ;;  %6255 = vadd.xlane.f32.xlu1 %v6254_v52  ;;  %v11371_v18 = vpop.eup %11370  ;;  %v5811_v52 = vsub.f32 %v14562_v33, %v14903_v6 }
 0x4e9   : > { %6237 = vadd.xlane.f32.xlu0 %v6236_v35  ;;  %v6676_v34 = vmul.f32 %v11371_v18, %v14839_v14  ;;  %v5660_v35 = vsel %vm3485_vm0, %v15193_v3, -inf }
 0x4ea   : > { %v5970_v6 = vmul.f32 1.442695, %v5811_v52 }
 0x4eb   : > { %v15191_v16 = vpop.xlane.xlu2 %5598  ;;  %v6169_v58 = vpop.xlane.xlu1 %6168 }
 0x4ec   : > { %18346 = vst [vmem:[#allocation201_spill] sm:$0xff] %v15191_v16  ;;  %v6178_v0 = vpop.xlane.xlu0 %6177  ;;  %11376 = vrcp.f32 %v6169_v58  ;;  %v15206_v16 = vpop.eup %11372  ;;  %v6804_v58 = vpack.c.bf16 %v6676_v34, %v6676_v34 }
 0x4ed   : > { %11378 = vrcp.f32 %v6184_v56  ;;  %v15208_v33 = vpop.eup %11374  ;;  %v15210_v56 = vpop.f32.mrf.mxu1 }
 0x4ee   : > { %11380 = vrcp.f32 %v6172_v26  ;;  %18349 = vst [vmem:[#allocation38_spill] sm:$0xff] %v15210_v56 }
 0x4ef   : > { %11382 = vpow2.f32 %v5962_v13  ;;  %v5669_v13 = vsel %vm3485_vm0, %v15210_v56, -inf }
 0x4f0   : > { %5673 = vmax.xlane.f32.xlu2 %v5672_v48  ;;  %5679 = vmax.xlane.f32.xlu1 %v5678_v61  ;;  %v5809_v61 = vsub.f32 %v14530_v19, %v14887_v57 }
 0x4f1   : > { %5661 = vmax.xlane.f32.xlu0 %v5660_v35 }
 0x4f2   : > { %v11377_v26 = vpop.eup %11376  ;;  %v5966_v57 = vmul.f32 1.442695, %v5809_v61 }
 0x4f3   : > { %v6187_v54 = vpop.xlane.xlu2 %6186  ;;  %v11379_v14 = vpop.eup %11378  ;;  %v6677_v18 = vmul.f32 %v11377_v26, %v14889_v5  ;;  %v6248_v5 = vsel %vm3485_vm0, %v15206_v16, 0.0  ;;  %v6934_v26 = vunpack.c.l.b16 %v6804_v58 }
 0x4f4   : > { %11384 = vrcp.f32 %v6187_v54  ;;  %v6175_v48 = vpop.xlane.xlu0 %6174  ;;  %v15213_v22 = vpop.xlane.xlu1 %5592  ;;  %v6682_v35 = vmul.f32 %v11379_v14, %v14845_v10 }
 0x4f5   : > { %v11381_v3 = vpop.eup %11380  ;;  %11386 = vrcp.f32 %v6175_v48  ;;  %v6805_v52 = vpack.c.bf16 %v6677_v18, %v6677_v18  ;;  %v6239_v48 = vsel %vm3485_vm0, %v15208_v33, 0.0  ;;  %v15227_v14 = vpop.f32.mrf.mxu0 }
 0x4f6   : > { %11388 = vpow2.f32 %v5970_v6  ;;  %v6678_v34 = vmul.f32 %v11381_v3, %v14835_v12  ;;  %v15225_v19 = vpop.eup %11382  ;;  %18350 = vst [vmem:[#allocation41_spill] sm:$0xff] %v15227_v14  ;;  %v6810_v18 = vpack.c.bf16 %v6682_v35, %v6682_v35 }
 0x4f7   : > { %11390 = vrcp.f32 %v6178_v0  ;;  %v6935_v54 = vunpack.c.l.b16 %v6805_v52 }
 0x4f8   : > { %5670 = vmax.xlane.f32.xlu2 %v5669_v13  ;;  %6240 = vadd.xlane.f32.xlu1 %v6239_v48  ;;  %v6806_v58 = vpack.c.bf16 %v6678_v34, %v6678_v34  ;;  %v18355_v34 = vld [vmem:[#allocation73_spill] sm:$0xff]  ;;  %v7018_v15 = vunpack.c.l.b16 %v6810_v18 }
 0x4f9   : > { %6249 = vadd.xlane.f32.xlu0 %v6248_v5  ;;  %v6936_v0 = vpack.c.b16 %v6935_v54, %v6934_v26  ;;  %v18352_v26 = vld [vmem:[#allocation218_spill] sm:$0xff]  ;;  %v18353_v54 = vld [vmem:[#allocation216_spill] sm:$0xff] }
 0x4fa   : > { %v11385_v10 = vpop.eup %11384  ;;  %v18354_v35 = vpack.c.b16 %v18352_v26, %v18353_v54 }
 0x4fb   : > { %v11387_v6 = vpop.eup %11386  ;;  %v6683_v56 = vmul.f32 %v11385_v10, %v14901_v36  ;;  %v15230_v12 = vpop.xlane.xlu2 %5610  ;;  %10876 = vmatmul.msk.bf16.vlgmr.msra.gmra.mxu0 %vm3485_vm0, %v6936_v0  ;;  %v5814_v36 = vsub.f32 %v14566_v11, %v14925_v41  ;;  %v6245_v11 = vsel %vm3485_vm0, %v15225_v19, 0.0 }
 0x4fc   : > { %v15232_v3 = vpop.eup %11388  ;;  %v6679_v52 = vmul.f32 %v11387_v6, %v14907_v17  ;;  %v15235_v13 = vpop.xlane.xlu0 %5604  ;;  %7177 = vmatpush.bf16.msra.mxu0 %v18354_v35  ;;  %v5663_v17 = vsel %vm3485_vm0, %v15227_v14, -inf  ;;  %v5812_v6 = vsub.f32 %v18355_v34, %v14943_v30  ;;  %v18360_v34 = vld [vmem:[#allocation221_spill] sm:$0xff] }
 0x4fd   : > { %18351 = vst [vmem:[#allocation39_spill] sm:$0xff] %v15235_v13  ;;  %v6181_v48 = vpop.xlane.xlu1 %6180  ;;  %v11391_v61 = vpop.eup %11390  ;;  %v6811_v5 = vpack.c.bf16 %v6683_v56, %v6683_v56  ;;  %v6257_v56 = vsel %vm3485_vm0, %v15232_v3, 0.0  ;;  %v18356_v13 = vld [vmem:[#allocation84_spill] sm:$0xff] }
 0x4fe   : > { %11392 = vrcp.f32 %v6181_v48  ;;  %v6807_v10 = vpack.c.bf16 %v6679_v52, %v6679_v52  ;;  %v6962_v48 = vunpack.c.l.b16 %v6806_v58  ;;  %v6680_v26 = vmul.f32 %v11391_v61, %v18356_v13  ;;  %v15252_v30 = vpop.f32.mrf.mxu3 }
 0x4ff   : > { %11394 = vpow2.f32 %v5966_v57  ;;  %v7019_v0 = vunpack.c.l.b16 %v6811_v5  ;;  %v5976_v57 = vmul.f32 1.442695, %v5814_v36  ;;  %18357 = vst [vmem:[#allocation44_spill] sm:$0xff] %v15252_v30  ;;  %v5972_v18 = vmul.f32 1.442695, %v5812_v6  ;;  %v18363_v6 = vld [vmem:[#allocation219_spill] sm:$0xff] }
 0x500   : > { %v6963_v54 = vunpack.c.l.b16 %v6807_v10  ;;  %6258 = vadd.xlane.f32.xlu2 %v6257_v56  ;;  %5664 = vmax.xlane.f32.xlu1 %v5663_v17  ;;  %v6808_v13 = vpack.c.bf16 %v6680_v26, %v6680_v26  ;;  %v18359_v10 = vld [vmem:[#allocation223_spill] sm:$0xff]  ;;  %v18364_v56 = vld [vmem:[#allocation217_spill] sm:$0xff] }
 0x501   : > { %v7020_v41 = vpack.c.b16 %v7019_v0, %v7018_v15  ;;  %6246 = vadd.xlane.f32.xlu0 %v6245_v11  ;;  %v18361_v15 = vpack.c.b16 %v18359_v10, %v18360_v34  ;;  %v15264_v0 = vpop.f32.mrf.mxu2  ;;  %11396 = vpow2.f32 %v5976_v57 }
 0x502   : > { %v6964_v52 = vpack.c.b16 %v6963_v54, %v6962_v48  ;;  %18362 = vst [vmem:[#allocation45_spill] sm:$0xff] %v15264_v0  ;;  %v18365_v48 = vpack.c.b16 %v18363_v6, %v18364_v56  ;;  %v18366_v54 = vld [vmem:[#allocation70_spill] sm:$0xff]  ;;  %11398 = vpow2.f32 %v5972_v18 }
 0x503   : > { %10879 = vmatmul.msk.bf16.vlgmr.msra.gmra.mxu3 %vm3485_vm0, %v7020_v41  ;;  %v15255_v5 = vpop.xlane.xlu2 %5619  ;;  %v5818_v26 = vsub.f32 %v18366_v54, %v14947_v43  ;;  %v6990_v41 = vunpack.c.l.b16 %v6808_v13  ;;  %v18370_v56 = vld [vmem:[#allocation82_spill] sm:$0xff] }
 0x504   : > { %v11393_v35 = vpop.eup %11392  ;;  %18358 = vst [vmem:[#allocation42_spill] sm:$0xff] %v15255_v5  ;;  %7261 = vmatpush.bf16.msra.mxu3 %v18361_v15  ;;  %10877 = vmatmul.msk.bf16.vlgmr.msra.gmra.mxu1 %vm3485_vm0, %v6964_v52  ;;  %v6196_v36 = vpop.xlane.xlu0 %6195  ;;  %v5675_v52 = vsel %vm3485_vm0, %v15264_v0, -inf }
 0x505   : > { %v15257_v58 = vpop.eup %11394  ;;  %v6681_v61 = vmul.f32 %v11393_v35, %v14929_v42  ;;  %v6190_v17 = vpop.xlane.xlu1 %6189  ;;  %7205 = vmatpush.bf16.msra.mxu1 %v18365_v48  ;;  %v5681_v42 = vsel %vm3485_vm0, %v15252_v30, -inf  ;;  %v5984_v57 = vmul.f32 1.442695, %v5818_v26  ;;  %v18371_v48 = vld [vmem:[#allocation72_spill] sm:$0xff] }
 0x506   : > { %v6251_v10 = vsel %vm3485_vm0, %v15257_v58, 0.0  ;;  %v15277_v15 = vpop.f32.mrf.mxu1  ;;  %v5816_v54 = vsub.f32 %v18371_v48, %v18370_v56  ;;  %v18376_v56 = vld [vmem:[#allocation71_spill] sm:$0xff]  ;;  %v15309_v0 = vpop.f32.mrf.mxu0 }
 0x507   : > { %v6809_v11 = vpack.c.bf16 %v6681_v61, %v6681_v61  ;;  %18367 = vst [vmem:[#allocation43_spill] sm:$0xff] %v15277_v15  ;;  %v15279_v18 = vpop.eup %11396  ;;  %11400 = vpow2.f32 %v5984_v57 }
 0x508   : > { %5682 = vmax.xlane.f32.xlu2 %v5681_v42  ;;  %6252 = vadd.xlane.f32.xlu1 %v6251_v10  ;;  %v15286_v6 = vpop.eup %11398  ;;  %v18373_v42 = vld [vmem:[#allocation220_spill] sm:$0xff]  ;;  %v5980_v10 = vmul.f32 1.442695, %v5816_v54  ;;  %18380 = vst [vmem:[#allocation156_spill] sm:$0xff] %v15309_v0 }
 0x509   : > { %v6991_v35 = vunpack.c.l.b16 %v6809_v11  ;;  %5676 = vmax.xlane.f32.xlu0 %v5675_v52  ;;  %v18372_v11 = vld [vmem:[#allocation222_spill] sm:$0xff]  ;;  %v6260_v52 = vsel %vm3485_vm0, %v15286_v6, 0.0  ;;  %v15311_v30 = vpop.f32.mrf.mxu2 }
 0x50a   : > { %v18374_v26 = vpack.c.b16 %v18372_v11, %v18373_v42  ;;  %v18377_v11 = vld [vmem:[#allocation77_spill] sm:$0xff]  ;;  %11402 = vpow2.f32 %v5980_v10  ;;  %18381 = vst [vmem:[#allocation154_spill] sm:$0xff] %v15311_v30  ;;  %v5684_v10 = vsel %vm3485_vm0, %v15309_v0, -inf }
 0x50b   : > { %v6992_v34 = vpack.c.b16 %v6991_v35, %v6990_v41  ;;  %v6208_v43 = vpop.xlane.xlu2 %6207  ;;  %v5690_v41 = vsel %vm3485_vm0, %v15277_v15, -inf  ;;  %v6266_v35 = vsel %vm3485_vm0, %v15279_v18, 0.0  ;;  %v5813_v42 = vsub.f32 %v18377_v11, %v14967_v63 }
 0x50c   : > { %v15281_v61 = vpop.xlane.xlu0 %5625  ;;  %11404 = vrcp.f32 %v6190_v17  ;;  %v5696_v11 = vsel %vm3485_vm0, %v15311_v30, -inf }
 0x50d   : > { %18368 = vst [vmem:[#allocation152_spill] sm:$0xff] %v15281_v61  ;;  %10878 = vmatmul.msk.bf16.vlgmr.msra.gmra.mxu2 %vm3485_vm0, %v6992_v34  ;;  %v15284_v13 = vpop.xlane.xlu1 %5613  ;;  %v18375_v34 = vld [vmem:[#allocation188_spill] sm:$0xff]  ;;  %11406 = vrcp.f32 %v6208_v43 }
 0x50e   : > { %18369 = vst [vmem:[#allocation150_spill] sm:$0xff] %v15284_v13  ;;  %7233 = vmatpush.bf16.msra.mxu2 %v18374_v26  ;;  %v5815_v48 = vsub.f32 %v18376_v56, %v18375_v34  ;;  %v15305_v26 = vpop.eup %11400  ;;  %v5974_v56 = vmul.f32 1.442695, %v5813_v42  ;;  %11408 = vrcp.f32 %v6196_v36  ;;  %v15325_v14 = vpop.f32.mrf.mxu1 }
 0x50f   : > { %v6278_v63 = vsel %vm3485_vm0, %v15305_v26, 0.0  ;;  %18385 = vst [vmem:[#allocation155_spill] sm:$0xff] %v15325_v14 }
 0x510   : > { %5691 = vmax.xlane.f32.xlu2 %v5690_v41  ;;  %6261 = vadd.xlane.f32.xlu1 %v6260_v52  ;;  %v5978_v54 = vmul.f32 1.442695, %v5815_v48  ;;  %v18383_v52 = vld [vmem:[#allocation74_spill] sm:$0xff]  ;;  %v15321_v17 = vpop.eup %11402  ;;  %v15323_v48 = vpop.f32.mrf.mxu3 }
 0x511   : > { %6267 = vadd.xlane.f32.xlu0 %v6266_v35  ;;  %v18382_v35 = vld [vmem:[#allocation187_spill] sm:$0xff]  ;;  %18384 = vst [vmem:[#allocation157_spill] sm:$0xff] %v15323_v48 }
 0x512   : > { %v5819_v34 = vsub.f32 %v18383_v52, %v18382_v35  ;;  %11410 = vpow2.f32 %v5978_v54  ;;  %v11405_v35 = vpop.eup %11404 }
 0x513   : > { %v15303_v57 = vpop.xlane.xlu2 %5631  ;;  %11412 = vpow2.f32 %v5974_v56  ;;  %v6684_v54 = vmul.f32 %v11405_v35, %v14945_v29  ;;  %v5693_v56 = vsel %vm3485_vm0, %v15325_v14, -inf }
 0x514   : > { %18378 = vst [vmem:[#allocation153_spill] sm:$0xff] %v15303_v57  ;;  %v15307_v41 = vpop.xlane.xlu0 %5622  ;;  %v5986_v42 = vmul.f32 1.442695, %v5819_v34 }
 0x515   : > { %18379 = vst [vmem:[#allocation151_spill] sm:$0xff] %v15307_v41  ;;  %v6202_v15 = vpop.xlane.xlu1 %6201  ;;  %v6812_v0 = vpack.c.bf16 %v6684_v54, %v6684_v54  ;;  %v18391_v54 = vld [vmem:[#allocation76_spill] sm:$0xff] }
 0x517   : > { %v7046_v57 = vunpack.c.l.b16 %v6812_v0 }
 0x518   : > { %6279 = vadd.xlane.f32.xlu2 %v6278_v63  ;;  %5685 = vmax.xlane.f32.xlu1 %v5684_v10  ;;  %v11407_v63 = vpop.eup %11406 }
 0x519   : > { %5697 = vmax.xlane.f32.xlu0 %v5696_v11  ;;  %v11409_v30 = vpop.eup %11408  ;;  %v5702_v11 = vsel %vm3485_vm0, %v15323_v48, -inf  ;;  %v6690_v34 = vmul.f32 %v11407_v63, %v14963_v46 }
 0x51a   : > { %v15330_v10 = vpop.eup %11410 }
 0x51b   : > { %v6193_v43 = vpop.xlane.xlu2 %6192  ;;  %v6818_v63 = vpack.c.bf16 %v6690_v34, %v6690_v34 }
 0x51c   : > { %11414 = vrcp.f32 %v6193_v43  ;;  %v6211_v36 = vpop.xlane.xlu0 %6210  ;;  %v6272_v43 = vsel %vm3485_vm0, %v15321_v17, 0.0 }
 0x51d   : > { %v6199_v52 = vpop.xlane.xlu1 %6198  ;;  %11416 = vrcp.f32 %v6211_v36  ;;  %v15337_v36 = vpop.eup %11412 }
 0x51e   : > { %11418 = vrcp.f32 %v6199_v52  ;;  %v18386_v52 = vld [vmem:[#allocation192_spill] sm:$0xff] }
 0x51f   : > { %11420 = vpow2.f32 %v5986_v42  ;;  %v6686_v42 = vmul.f32 %v11409_v30, %v18386_v52  ;;  %v18390_v52 = vld [vmem:[#allocation190_spill] sm:$0xff] }
 0x520   : > { %5703 = vmax.xlane.f32.xlu2 %v5702_v11  ;;  %6273 = vadd.xlane.f32.xlu1 %v6272_v43  ;;  %v5817_v13 = vsub.f32 %v18391_v54, %v18390_v52  ;;  %11422 = vrcp.f32 %v6202_v15  ;;  %v18395_v54 = vld [vmem:[#allocation169_spill] sm:$0xff] }
 0x521   : > { %5694 = vmax.xlane.f32.xlu0 %v5693_v56  ;;  %v6814_v30 = vpack.c.bf16 %v6686_v42, %v6686_v42 }
 0x522   : > { %v11415_v29 = vpop.eup %11414  ;;  %v5982_v0 = vmul.f32 1.442695, %v5817_v13  ;;  %v18400_v13 = vld [vmem:[#allocation275_spill] sm:$0xff] }
 0x523   : > { %v11417_v35 = vpop.eup %11416  ;;  %v6685_v48 = vmul.f32 %v11415_v29, %v15003_v1  ;;  %v15341_v41 = vpop.xlane.xlu2 %5616  ;;  %v18392_v1 = vld [vmem:[#allocation193_spill] sm:$0xff]  ;;  %v18393_v29 = vld [vmem:[#allocation75_spill] sm:$0xff]  ;;  %v7074_v42 = vunpack.c.l.b16 %v6814_v30 }
 0x524   : > { %18387 = vst [vmem:[#allocation96_spill] sm:$0xff] %v15341_v41  ;;  %v11419_v46 = vpop.eup %11418  ;;  %v6691_v11 = vmul.f32 %v11417_v35, %v15013_v55  ;;  %v15344_v14 = vpop.xlane.xlu0 %5634  ;;  %v5822_v41 = vsub.f32 %v18393_v29, %v18392_v1  ;;  %v18396_v1 = vld [vmem:[#allocation168_spill] sm:$0xff] }
 0x525   : > { %18388 = vst [vmem:[#allocation94_spill] sm:$0xff] %v15344_v14  ;;  %v15346_v61 = vpop.xlane.xlu1 %5628  ;;  %v15348_v5 = vpop.eup %11420  ;;  %v6813_v56 = vpack.c.bf16 %v6685_v48, %v6685_v48  ;;  %v6687_v43 = vmul.f32 %v11419_v46, %v15007_v40  ;;  %v6263_v14 = vsel %vm3485_vm0, %v15337_v36, 0.0  ;;  %v6269_v48 = vsel %vm3485_vm0, %v15330_v10, 0.0 }
 0x526   : > { %18389 = vst [vmem:[#allocation97_spill] sm:$0xff] %v15346_v61  ;;  %v6819_v34 = vpack.c.bf16 %v6691_v11, %v6691_v11  ;;  %v7130_v61 = vunpack.c.l.b16 %v6818_v63  ;;  %v6281_v40 = vsel %vm3485_vm0, %v15348_v5, 0.0  ;;  %v15361_v11 = vpop.f32.mrf.mxu0  ;;  %v18397_v29 = vpack.c.b16 %v18395_v54, %v18396_v1 }
 0x527   : > { %v7047_v55 = vunpack.c.l.b16 %v6813_v56  ;;  %v6815_v35 = vpack.c.bf16 %v6687_v43, %v6687_v43  ;;  %18394 = vst [vmem:[#allocation95_spill] sm:$0xff] %v15361_v11  ;;  %v5992_v56 = vmul.f32 1.442695, %v5822_v41  ;;  %v18401_v41 = vld [vmem:[#allocation273_spill] sm:$0xff] }
 0x528   : > { %v7131_v24 = vunpack.c.l.b16 %v6819_v34  ;;  %6264 = vadd.xlane.f32.xlu2 %v6263_v14  ;;  %6270 = vadd.xlane.f32.xlu1 %v6269_v48  ;;  %v11423_v14 = vpop.eup %11422  ;;  %v18402_v34 = vpack.c.b16 %v18400_v13, %v18401_v41  ;;  %v18405_v48 = vld [vmem:[#allocation166_spill] sm:$0xff] }
 0x529   : > { %v7048_v46 = vpack.c.b16 %v7047_v55, %v7046_v57  ;;  %v7075_v52 = vunpack.c.l.b16 %v6815_v35  ;;  %6282 = vadd.xlane.f32.xlu0 %v6281_v40  ;;  %v18403_v55 = vld [vmem:[#allocation178_spill] sm:$0xff]  ;;  %v18404_v40 = vld [vmem:[#allocation167_spill] sm:$0xff] }
 0x52a   : > { %v7132_v15 = vpack.c.b16 %v7131_v24, %v7130_v61  ;;  %v15372_v24 = vpop.f32.mrf.mxu2  ;;  %v15374_v61 = vpop.f32.mrf.mxu3  ;;  %v5820_v35 = vsub.f32 %v18403_v55, %v14991_v9 }
 0x52b   : > { %v7076_v43 = vpack.c.b16 %v7075_v52, %v7074_v42  ;;  %v6205_v63 = vpop.xlane.xlu2 %6204  ;;  %10880 = vmatmul.msk.bf16.vlgmr.msrb.gmra.mxu0 %vm3485_vm0, %v7048_v46  ;;  %18398 = vst [vmem:[#allocation100_spill] sm:$0xff] %v15372_v24  ;;  %v18406_v42 = vpack.c.b16 %v18404_v40, %v18405_v48  ;;  %v18407_v46 = vld [vmem:[#allocation181_spill] sm:$0xff]  ;;  %v5699_v9 = vsel %vm3485_vm0, %v15372_v24, -inf }
 0x52c   : > { %11424 = vrcp.f32 %v6205_v63  ;;  %7289 = vmatpush.bf16.msrb.mxu0 %v18397_v29  ;;  %10883 = vmatmul.msk.bf16.vlgmr.msrb.gmra.mxu3 %vm3485_vm0, %v7132_v15  ;;  %v15368_v57 = vpop.xlane.xlu0 %5643  ;;  %18399 = vst [vmem:[#allocation98_spill] sm:$0xff] %v15374_v61  ;;  %v5826_v52 = vsub.f32 %v18407_v46, %v14989_v28  ;;  %v6688_v15 = vmul.f32 %v11423_v14, %v14993_v59  ;;  %v5687_v63 = vsel %vm3485_vm0, %v15361_v11, -inf  ;;  %v18436_v11 = vld [vmem:[#allocation229_spill] sm:$0xff] }
 0x52d   : > { %v15370_v30 = vpop.xlane.xlu1 %6219  ;;  %7373 = vmatpush.bf16.msrb.mxu3 %v18402_v34  ;;  %10881 = vmatmul.msk.bf16.vlgmr.msrb.gmra.mxu1 %vm3485_vm0, %v7076_v43  ;;  %11426 = vpow2.f32 %v5982_v0  ;;  %v5705_v0 = vsel %vm3485_vm0, %v15374_v61, -inf  ;;  %v5988_v54 = vmul.f32 1.442695, %v5820_v35  ;;  %v15401_v34 = vpop.f32.mrf.mxu1 }
 0x52e   : > { %7317 = vmatpush.bf16.msrb.mxu1 %v18406_v42  ;;  %11428 = vpow2.f32 %v5992_v56  ;;  %v6000_v56 = vmul.f32 1.442695, %v5826_v52  ;;  %v6816_v1 = vpack.c.bf16 %v6688_v15, %v6688_v15  ;;  %18408 = vst [vmem:[#allocation101_spill] sm:$0xff] %v15401_v34  ;;  %v18409_v52 = vld [vmem:[#allocation180_spill] sm:$0xff] }
 0x52f   : > { %11430 = vpow2.f32 %v5988_v54  ;;  %v5824_v15 = vsub.f32 %v18409_v52, %v14987_v50 }
 0x530   : > { %5688 = vmax.xlane.f32.xlu2 %v5687_v63  ;;  %5700 = vmax.xlane.f32.xlu1 %v5699_v9  ;;  %11432 = vpow2.f32 %v6000_v56  ;;  %v7102_v40 = vunpack.c.l.b16 %v6816_v1  ;;  %v18410_v63 = vld [vmem:[#allocation34_spill] sm:$0xff]  ;;  %v18413_v1 = vld [vmem:[#allocation272_spill] sm:$0xff] }
 0x531   : > { %5706 = vmax.xlane.f32.xlu0 %v5705_v0  ;;  %v18411_v0 = vld [vmem:[#allocation182_spill] sm:$0xff] }
 0x532   : > { %v11425_v43 = vpop.eup %11424  ;;  %v5821_v9 = vsub.f32 %v18411_v0, %v18410_v63  ;;  %v18412_v56 = vld [vmem:[#allocation274_spill] sm:$0xff]  ;;  %v15427_v50 = vpop.f32.mrf.mxu2 }
 0x533   : > { %v6689_v28 = vmul.f32 %v11425_v43, %v15049_v44  ;;  %v6214_v29 = vpop.xlane.xlu2 %6213  ;;  %v15395_v59 = vpop.eup %11426  ;;  %v5714_v44 = vsel %vm3485_vm0, %v15401_v34, -inf  ;;  %18415 = vst [vmem:[#allocation99_spill] sm:$0xff] %v15427_v50  ;;  %v5720_v0 = vsel %vm3485_vm0, %v15427_v50, -inf }
 0x534   : > { %v6232_v14 = vpop.xlane.xlu0 %6231  ;;  %v15399_v41 = vpop.eup %11428  ;;  %v6275_v35 = vsel %vm3485_vm0, %v15395_v59, 0.0  ;;  %11434 = vrcp.f32 %v6214_v29 }
 0x535   : > { %v15397_v13 = vpop.xlane.xlu1 %5649  ;;  %v6817_v55 = vpack.c.bf16 %v6689_v28, %v6689_v28  ;;  %v6290_v42 = vsel %vm3485_vm0, %v15399_v41, 0.0  ;;  %v15416_v54 = vpop.eup %11430  ;;  %v18414_v28 = vpack.c.b16 %v18412_v56, %v18413_v1  ;;  %11436 = vrcp.f32 %v6232_v14 }
 0x536   : > { %v6284_v52 = vsel %vm3485_vm0, %v15416_v54, 0.0  ;;  %v15440_v1 = vpop.f32.mrf.mxu3 }
 0x537   : > { %v7103_v48 = vunpack.c.l.b16 %v6817_v55  ;;  %18418 = vst [vmem:[#allocation202_spill] sm:$0xff] %v15440_v1 }
 0x538   : > { %6276 = vadd.xlane.f32.xlu2 %v6275_v35  ;;  %6291 = vadd.xlane.f32.xlu1 %v6290_v42  ;;  %v5996_v35 = vmul.f32 1.442695, %v5824_v15  ;;  %v18416_v42 = vld [vmem:[#allocation185_spill] sm:$0xff]  ;;  %v15437_v15 = vpop.f32.mrf.mxu0 }
 0x539   : > { %v7104_v46 = vpack.c.b16 %v7103_v48, %v7102_v40  ;;  %5715 = vmax.xlane.f32.xlu0 %v5714_v44  ;;  %v15425_v48 = vpop.eup %11432  ;;  %v5990_v44 = vmul.f32 1.442695, %v5821_v9  ;;  %18417 = vst [vmem:[#allocation204_spill] sm:$0xff] %v15437_v15 }
 0x53a   : > { %v6302_v63 = vsel %vm3485_vm0, %v15425_v48, 0.0  ;;  %11438 = vpow2.f32 %v5996_v35  ;;  %v11435_v14 = vpop.eup %11434  ;;  %v5708_v35 = vsel %vm3485_vm0, %v15437_v15, -inf }
 0x53b   : > { %10882 = vmatmul.msk.bf16.vlgmr.msrb.gmra.mxu2 %vm3485_vm0, %v7104_v46  ;;  %v15414_v43 = vpop.xlane.xlu2 %5637  ;;  %v5827_v46 = vsub.f32 %v18416_v42, %v15027_v49  ;;  %11440 = vpow2.f32 %v5990_v44  ;;  %v11437_v42 = vpop.eup %11436 }
 0x53c   : > { %7345 = vmatpush.bf16.msrb.mxu2 %v18414_v28  ;;  %v15421_v55 = vpop.xlane.xlu0 %5655  ;;  %11442 = vrcp.f32 %v15370_v30  ;;  %v15442_v28 = vpop.f32.mrf.mxu1  ;;  %v6692_v30 = vmul.f32 %v11435_v14, %v15067_v51 }
 0x53d   : > { %v15423_v40 = vpop.xlane.xlu1 %5646  ;;  %v6002_v9 = vmul.f32 1.442695, %v5827_v46  ;;  %18419 = vst [vmem:[#allocation205_spill] sm:$0xff] %v15442_v28  ;;  %v5726_v46 = vsel %vm3485_vm0, %v15440_v1, -inf }
 0x53e   : > { %v6820_v61 = vpack.c.bf16 %v6692_v30, %v6692_v30 }
 0x540   : > { %6285 = vadd.xlane.f32.xlu2 %v6284_v52  ;;  %5721 = vmax.xlane.f32.xlu1 %v5720_v0  ;;  %v18420_v52 = vld [vmem:[#allocation31_spill] sm:$0xff]  ;;  %v15448_v44 = vpop.eup %11438 }
 0x541   : > { %6303 = vadd.xlane.f32.xlu0 %v6302_v63  ;;  %v18421_v63 = vld [vmem:[#allocation179_spill] sm:$0xff]  ;;  %v15455_v50 = vpop.eup %11440 }
 0x542   : > { %v5823_v0 = vsub.f32 %v18421_v63, %v18420_v52  ;;  %v6698_v52 = vmul.f32 %v11437_v42, %v15073_v37  ;;  %v18423_v42 = vld [vmem:[#allocation36_spill] sm:$0xff] }
 0x543   : > { %v6226_v49 = vpop.xlane.xlu2 %6225 }
 0x544   : > { %v6217_v29 = vpop.xlane.xlu0 %6216  ;;  %v6826_v1 = vpack.c.bf16 %v6698_v52, %v6698_v52  ;;  %v6287_v52 = vsel %vm3485_vm0, %v15455_v50, 0.0 }
 0x545   : > { %v6235_v56 = vpop.xlane.xlu1 %6234  ;;  %11444 = vrcp.f32 %v6217_v29  ;;  %v5717_v29 = vsel %vm3485_vm0, %v15442_v28, -inf }
 0x546   : > { %11446 = vrcp.f32 %v6235_v56  ;;  %v5994_v56 = vmul.f32 1.442695, %v5823_v0 }
 0x547   : > { %11448 = vpow2.f32 %v6002_v9  ;;  %v11443_v9 = vpop.eup %11442 }
 0x548   : > { %5709 = vmax.xlane.f32.xlu2 %v5708_v35  ;;  %5718 = vmax.xlane.f32.xlu1 %v5717_v29  ;;  %v6694_v24 = vmul.f32 %v11443_v9, %v15055_v60 }
 0x549   : > { %5727 = vmax.xlane.f32.xlu0 %v5726_v46  ;;  %v18424_v46 = vld [vmem:[#allocation184_spill] sm:$0xff] }
 0x54a   : > { %v5825_v0 = vsub.f32 %v18424_v46, %v18423_v42  ;;  %v6822_v9 = vpack.c.bf16 %v6694_v24, %v6694_v24 }
 0x54b   : > { %v11445_v63 = vpop.eup %11444  ;;  %v6223_v15 = vpop.xlane.xlu2 %6222 }
 0x54c   : > { %v11447_v34 = vpop.eup %11446  ;;  %v6693_v51 = vmul.f32 %v11445_v63, %v15119_v47  ;;  %11450 = vrcp.f32 %v6223_v15  ;;  %v15461_v35 = vpop.xlane.xlu0 %5640  ;;  %v6296_v47 = vsel %vm3485_vm0, %v15448_v44, 0.0  ;;  %v7158_v15 = vunpack.c.l.b16 %v6820_v61 }
 0x54d   : > { %v15459_v14 = vpop.xlane.xlu1 %5658  ;;  %18422 = vst [vmem:[#allocation203_spill] sm:$0xff] %v15461_v35  ;;  %v15463_v28 = vpop.eup %11448  ;;  %v6699_v37 = vmul.f32 %v11447_v34, %v15113_v38  ;;  %11452 = vpow2.f32 %v5994_v56  ;;  %v7242_v34 = vunpack.c.l.b16 %v6826_v1  ;;  %v5998_v60 = vmul.f32 1.442695, %v5825_v0  ;;  %v18429_v0 = vld [vmem:[#allocation144_spill] sm:$0xff] }
 0x54e   : > { %v6821_v29 = vpack.c.bf16 %v6693_v51, %v6693_v51  ;;  %11454 = vrcp.f32 %v6226_v49  ;;  %v6305_v38 = vsel %vm3485_vm0, %v15463_v28, 0.0 }
 0x54f   : > { %v6827_v30 = vpack.c.bf16 %v6699_v37, %v6699_v37 }
 0x550   : > { %v7159_v63 = vunpack.c.l.b16 %v6821_v29  ;;  %6297 = vadd.xlane.f32.xlu2 %v6296_v47  ;;  %6306 = vadd.xlane.f32.xlu1 %v6305_v38  ;;  %v18432_v38 = vld [vmem:[#allocation224_spill] sm:$0xff] }
 0x551   : > { %v7243_v56 = vunpack.c.l.b16 %v6827_v30  ;;  %6288 = vadd.xlane.f32.xlu0 %v6287_v52  ;;  %v15483_v30 = vpop.f32.mrf.mxu0  ;;  %v15485_v52 = vpop.f32.mrf.mxu3 }
 0x552   : > { %v11451_v51 = vpop.eup %11450  ;;  %v7160_v49 = vpack.c.b16 %v7159_v63, %v7158_v15  ;;  %18427 = vst [vmem:[#allocation209_spill] sm:$0xff] %v15483_v30  ;;  %v18430_v15 = vld [vmem:[#allocation22_spill] sm:$0xff] }
 0x553   : > { %v7244_v37 = vpack.c.b16 %v7243_v56, %v7242_v34  ;;  %v6695_v42 = vmul.f32 %v11451_v51, %v15131_v32  ;;  %v15476_v61 = vpop.xlane.xlu2 %5652  ;;  %v15478_v46 = vpop.eup %11452  ;;  %18428 = vst [vmem:[#allocation207_spill] sm:$0xff] %v15485_v52  ;;  %v5828_v24 = vsub.f32 %v18430_v15, %v18429_v0  ;;  %v18431_v32 = vld [vmem:[#allocation226_spill] sm:$0xff]  ;;  %v18434_v56 = vld [vmem:[#allocation183_spill] sm:$0xff]  ;;  %v7186_v0 = vunpack.c.l.b16 %v6822_v9 }
 0x554   : > { %18425 = vst [vmem:[#allocation208_spill] sm:$0xff] %v15476_v61  ;;  %v6229_v47 = vpop.xlane.xlu0 %6228  ;;  %10884 = vmatmul.msk.bf16.vlgmr.msra.gmra.mxu0 %vm3485_vm0, %v7160_v49  ;;  %v11455_v1 = vpop.eup %11454  ;;  %v18433_v34 = vpack.c.b16 %v18431_v32, %v18432_v38  ;;  %v5830_v51 = vsub.f32 %v18434_v56, %v15047_v4  ;;  %v18435_v49 = vld [vmem:[#allocation231_spill] sm:$0xff]  ;;  %v18438_v61 = vld [vmem:[#allocation25_spill] sm:$0xff]  ;;  %v5711_v4 = vsel %vm3485_vm0, %v15483_v30, -inf }
 0x555   : > { %v15480_v29 = vpop.xlane.xlu1 %5667  ;;  %v6823_v63 = vpack.c.bf16 %v6695_v42, %v6695_v42  ;;  %10887 = vmatmul.msk.bf16.vlgmr.msra.gmra.mxu3 %vm3485_vm0, %v7244_v37  ;;  %11456 = vrcp.f32 %v6229_v47  ;;  %v5834_v35 = vsub.f32 %v18438_v61, %v15065_v7  ;;  %v6293_v37 = vsel %vm3485_vm0, %v15478_v46, 0.0  ;;  %v15507_v9 = vpop.f32.mrf.mxu2  ;;  %v18440_v38 = vld [vmem:[#allocation227_spill] sm:$0xff] }
 0x556   : > { %18426 = vst [vmem:[#allocation206_spill] sm:$0xff] %v15480_v29  ;;  %7401 = vmatpush.bf16.msra.mxu0 %v18433_v34  ;;  %11458 = vpow2.f32 %v5998_v60  ;;  %v18437_v29 = vpack.c.b16 %v18435_v49, %v18436_v11  ;;  %v6696_v47 = vmul.f32 %v11455_v1, %v15109_v27  ;;  %v5729_v60 = vsel %vm3485_vm0, %v15485_v52, -inf  ;;  %v18441_v34 = vld [vmem:[#allocation225_spill] sm:$0xff] }
 0x557   : > { %v7187_v42 = vunpack.c.l.b16 %v6823_v63  ;;  %v6004_v15 = vmul.f32 1.442695, %v5828_v24  ;;  %18439 = vst [vmem:[#allocation48_spill] sm:$0xff] %v15507_v9  ;;  %v6016_v61 = vmul.f32 1.442695, %v5834_v35  ;;  %v18442_v56 = vpack.c.b16 %v18440_v38, %v18441_v34 }
 0x558   : > { %7485 = vmatpush.bf16.msra.mxu3 %v18437_v29  ;;  %6294 = vadd.xlane.f32.xlu2 %v6293_v37  ;;  %v6008_v29 = vmul.f32 1.442695, %v5830_v51  ;;  %v6824_v1 = vpack.c.bf16 %v6696_v47, %v6696_v47  ;;  %v5723_v35 = vsel %vm3485_vm0, %v15507_v9, -inf }
 0x559   : > { %v7188_v11 = vpack.c.b16 %v7187_v42, %v7186_v0  ;;  %5730 = vmax.xlane.f32.xlu1 %v5729_v60  ;;  %5712 = vmax.xlane.f32.xlu0 %v5711_v4  ;;  %v15516_v0 = vpop.f32.mrf.mxu1  ;;  %11460 = vpow2.f32 %v6004_v15  ;;  %v18444_v15 = vld [vmem:[#allocation35_spill] sm:$0xff] }
 0x55a   : > { %18443 = vst [vmem:[#allocation46_spill] sm:$0xff] %v15516_v0  ;;  %11462 = vpow2.f32 %v6008_v29  ;;  %v7214_v42 = vunpack.c.l.b16 %v6824_v1  ;;  %v18446_v1 = vld [vmem:[#allocation136_spill] sm:$0xff] }
 0x55b   : > { %v11457_v7 = vpop.eup %11456  ;;  %10885 = vmatmul.msk.bf16.vlgmr.msra.gmra.mxu1 %vm3485_vm0, %v7188_v11  ;;  %v6244_v63 = vpop.xlane.xlu2 %6243  ;;  %11464 = vpow2.f32 %v6016_v61  ;;  %v18445_v11 = vld [vmem:[#allocation24_spill] sm:$0xff] }
 0x55c   : > { %v15510_v27 = vpop.eup %11458  ;;  %v6697_v32 = vmul.f32 %v11457_v7, %v15155_v8  ;;  %7429 = vmatpush.bf16.msra.mxu1 %v18442_v56  ;;  %v6238_v49 = vpop.xlane.xlu0 %6237  ;;  %v5738_v8 = vsel %vm3485_vm0, %v15516_v0, -inf  ;;  %v5832_v29 = vsub.f32 %v18445_v11, %v18444_v15  ;;  %v18451_v11 = vld [vmem:[#allocation23_spill] sm:$0xff] }
 0x55d   : > { %v6256_v24 = vpop.xlane.xlu1 %6255  ;;  %v6299_v47 = vsel %vm3485_vm0, %v15510_v27, 0.0  ;;  %11466 = vrcp.f32 %v6238_v49  ;;  %v15550_v15 = vpop.f32.mrf.mxu2 }
 0x55e   : > { %v6825_v51 = vpack.c.bf16 %v6697_v32, %v6697_v32  ;;  %v5829_v32 = vsub.f32 %v18446_v1, %v15091_v20  ;;  %18450 = vst [vmem:[#allocation49_spill] sm:$0xff] %v15550_v15 }
 0x55f   : > { %v15524_v4 = vpop.eup %11460 }
 0x560   : > { %v7215_v37 = vunpack.c.l.b16 %v6825_v51  ;;  %5724 = vmax.xlane.f32.xlu2 %v5723_v35  ;;  %v15530_v61 = vpop.eup %11462  ;;  %v18447_v51 = vld [vmem:[#allocation230_spill] sm:$0xff]  ;;  %v18448_v35 = vld [vmem:[#allocation228_spill] sm:$0xff] }
 0x561   : > { %5739 = vmax.xlane.f32.xlu1 %v5738_v8  ;;  %6300 = vadd.xlane.f32.xlu0 %v6299_v47  ;;  %v15539_v56 = vpop.eup %11464  ;;  %v6314_v8 = vsel %vm3485_vm0, %v15530_v61, 0.0  ;;  %v6006_v47 = vmul.f32 1.442695, %v5829_v32 }
 0x562   : > { %v7216_v60 = vpack.c.b16 %v7215_v37, %v7214_v42  ;;  %v18449_v42 = vpack.c.b16 %v18447_v51, %v18448_v35  ;;  %v6012_v37 = vmul.f32 1.442695, %v5832_v29  ;;  %v6326_v20 = vsel %vm3485_vm0, %v15539_v56, 0.0  ;;  %v15556_v35 = vpop.f32.mrf.mxu0 }
 0x563   : > { %v15528_v7 = vpop.xlane.xlu2 %5673  ;;  %v5831_v29 = vsub.f32 %v18451_v11, %v15051_v25  ;;  %v11467_v51 = vpop.eup %11466  ;;  %18452 = vst [vmem:[#allocation47_spill] sm:$0xff] %v15556_v35  ;;  %v5744_v25 = vsel %vm3485_vm0, %v15550_v15, -inf  ;;  %v5732_v11 = vsel %vm3485_vm0, %v15556_v35, -inf }
 0x564   : > { %10886 = vmatmul.msk.bf16.vlgmr.msra.gmra.mxu2 %vm3485_vm0, %v7216_v60  ;;  %v15537_v34 = vpop.xlane.xlu0 %5661  ;;  %v6308_v60 = vsel %vm3485_vm0, %v15524_v4, 0.0  ;;  %11468 = vpow2.f32 %v6012_v37  ;;  %v6700_v37 = vmul.f32 %v11467_v51, %v15165_v23 }
 0x565   : > { %v15534_v38 = vpop.xlane.xlu1 %5679  ;;  %7457 = vmatpush.bf16.msra.mxu2 %v18449_v42  ;;  %11470 = vpow2.f32 %v6006_v47  ;;  %v15558_v42 = vpop.f32.mrf.mxu3  ;;  %v6010_v0 = vmul.f32 1.442695, %v5831_v29 }
 0x566   : > { %18453 = vst [vmem:[#allocation52_spill] sm:$0xff] %v15558_v42  ;;  %v5750_v47 = vsel %vm3485_vm0, %v15558_v42, -inf  ;;  %v15573_v29 = vpop.f32.mrf.mxu1  ;;  %v6828_v51 = vpack.c.bf16 %v6700_v37, %v6700_v37 }
 0x567   : > { %18457 = vst [vmem:[#allocation53_spill] sm:$0xff] %v15573_v29 }
 0x568   : > { %6315 = vadd.xlane.f32.xlu2 %v6314_v8  ;;  %v18454_v8 = vld [vmem:[#allocation146_spill] sm:$0xff] }
 0x569   : > { %6327 = vadd.xlane.f32.xlu1 %v6326_v20  ;;  %6309 = vadd.xlane.f32.xlu0 %v6308_v60  ;;  %v18455_v20 = vld [vmem:[#allocation26_spill] sm:$0xff] }
 0x56a   : > { %v5835_v60 = vsub.f32 %v18455_v20, %v18454_v8  ;;  %v15569_v9 = vpop.eup %11468 }
 0x56b   : > { %v15554_v49 = vpop.xlane.xlu2 %5670  ;;  %18456 = vst [vmem:[#allocation50_spill] sm:$0xff] %v15569_v9 }
 0x56c   : > { %v6250_v32 = vpop.xlane.xlu0 %6249 }
 0x56d   : > { %v6241_v1 = vpop.xlane.xlu1 %6240 }
 0x56e   : > { %11472 = vrcp.f32 %v6241_v1  ;;  %v15571_v1 = vpop.eup %11470 }
 0x56f   : > { %11474 = vrcp.f32 %v6256_v24  ;;  %v6018_v24 = vmul.f32 1.442695, %v5835_v60 }
 0x570   : > { %11476 = vrcp.f32 %v6244_v63  ;;  %5745 = vmax.xlane.f32.xlu2 %v5744_v25 }
 0x571   : > { %5751 = vmax.xlane.f32.xlu1 %v5750_v47  ;;  %5733 = vmax.xlane.f32.xlu0 %v5732_v11  ;;  %11478 = vpow2.f32 %v6010_v0  ;;  %v18458_v47 = vld [vmem:[#allocation143_spill] sm:$0xff]  ;;  %v18459_v11 = vld [vmem:[#allocation28_spill] sm:$0xff]  ;;  %v5741_v0 = vsel %vm3485_vm0, %v15573_v29, -inf }
 0x572   : > { %v5833_v35 = vsub.f32 %v18459_v11, %v18458_v47 }
 0x573   : > { %v6259_v8 = vpop.xlane.xlu2 %6258 }
 0x574   : > { %v11473_v63 = vpop.eup %11472  ;;  %11480 = vrcp.f32 %v6259_v8  ;;  %v6247_v25 = vpop.xlane.xlu0 %6246 }
 0x575   : > { %v11475_v23 = vpop.eup %11474  ;;  %v6701_v20 = vmul.f32 %v11473_v63, %v15208_v33  ;;  %v15576_v42 = vpop.xlane.xlu1 %5664  ;;  %11482 = vrcp.f32 %v6247_v25  ;;  %v6320_v33 = vsel %vm3485_vm0, %v15569_v9, 0.0  ;;  %v7270_v63 = vunpack.c.l.b16 %v6828_v51 }
 0x576   : > { %v11477_v15 = vpop.eup %11476  ;;  %11484 = vpow2.f32 %v6018_v24  ;;  %v6706_v30 = vmul.f32 %v11475_v23, %v15179_v45  ;;  %v6311_v25 = vsel %vm3485_vm0, %v15571_v1, 0.0 }
 0x577   : > { %v6829_v60 = vpack.c.bf16 %v6701_v20, %v6701_v20  ;;  %11486 = vrcp.f32 %v6250_v32  ;;  %v6702_v37 = vmul.f32 %v11477_v15, %v15171_v31  ;;  %v15588_v47 = vpop.eup %11478  ;;  %v6014_v32 = vmul.f32 1.442695, %v5833_v35  ;;  %v15590_v20 = vpop.f32.mrf.mxu0 }
 0x578   : > { %5742 = vmax.xlane.f32.xlu2 %v5741_v0  ;;  %18460 = vst [vmem:[#allocation51_spill] sm:$0xff] %v15590_v20  ;;  %v6834_v11 = vpack.c.bf16 %v6706_v30, %v6706_v30 }
 0x579   : > { %v7271_v8 = vunpack.c.l.b16 %v6829_v60  ;;  %6312 = vadd.xlane.f32.xlu1 %v6311_v25  ;;  %6321 = vadd.xlane.f32.xlu0 %v6320_v33  ;;  %v6830_v51 = vpack.c.bf16 %v6702_v37, %v6702_v37  ;;  %v18465_v37 = vld [vmem:[#allocation135_spill] sm:$0xff] }
 0x57a   : > { %v11481_v45 = vpop.eup %11480  ;;  %v7354_v9 = vunpack.c.l.b16 %v6834_v11 }
 0x57b   : > { %v7272_v24 = vpack.c.b16 %v7271_v8, %v7270_v63  ;;  %v11483_v23 = vpop.eup %11482  ;;  %v6707_v29 = vmul.f32 %v11481_v45, %v15232_v3  ;;  %v15593_v31 = vpop.xlane.xlu2 %5682  ;;  %v18461_v63 = vld [vmem:[#allocation9_spill] sm:$0xff]  ;;  %v18462_v8 = vld [vmem:[#allocation8_spill] sm:$0xff] }
 0x57c   : > { %v15595_v15 = vpop.eup %11484  ;;  %v6703_v60 = vmul.f32 %v11483_v23, %v15225_v19  ;;  %v15598_v0 = vpop.xlane.xlu0 %5676  ;;  %v18463_v30 = vpack.c.b16 %v18461_v63, %v18462_v8  ;;  %v18464_v3 = vld [vmem:[#allocation29_spill] sm:$0xff]  ;;  %v5735_v19 = vsel %vm3485_vm0, %v15590_v20, -inf  ;;  %v5836_v23 = vsub.f32 %v18465_v37, %v15111_v62  ;;  %v18468_v37 = vld [vmem:[#allocation10_spill] sm:$0xff] }
 0x57d   : > { %v6253_v25 = vpop.xlane.xlu1 %6252  ;;  %10888 = vmatmul.msk.bf16.vlgmr.msrb.gmra.mxu0 %vm3485_vm0, %v7272_v24  ;;  %v11487_v35 = vpop.eup %11486  ;;  %v6835_v33 = vpack.c.bf16 %v6707_v29, %v6707_v29  ;;  %v5838_v45 = vsub.f32 %v18464_v3, %v15093_v39  ;;  %v6329_v29 = vsel %vm3485_vm0, %v15595_v15, 0.0  ;;  %v6317_v39 = vsel %vm3485_vm0, %v15588_v47, 0.0 }
 0x57e   : > { %11488 = vrcp.f32 %v6253_v25  ;;  %7513 = vmatpush.bf16.msrb.mxu0 %v18463_v30  ;;  %v6831_v52 = vpack.c.bf16 %v6703_v60, %v6703_v60  ;;  %v7298_v25 = vunpack.c.l.b16 %v6830_v51  ;;  %v6704_v63 = vmul.f32 %v11487_v35, %v15206_v16  ;;  %v15615_v62 = vpop.f32.mrf.mxu3  ;;  %v18467_v35 = vld [vmem:[#allocation11_spill] sm:$0xff] }
 0x57f   : > { %11490 = vpow2.f32 %v6014_v32  ;;  %v7355_v24 = vunpack.c.l.b16 %v6835_v33  ;;  %v6024_v60 = vmul.f32 1.442695, %v5838_v45  ;;  %18466 = vst [vmem:[#allocation160_spill] sm:$0xff] %v15615_v62  ;;  %v6020_v11 = vmul.f32 1.442695, %v5836_v23  ;;  %v18471_v23 = vld [vmem:[#allocation7_spill] sm:$0xff] }
 0x580   : > { %v7299_v8 = vunpack.c.l.b16 %v6831_v52  ;;  %6330 = vadd.xlane.f32.xlu2 %v6329_v29  ;;  %v6832_v16 = vpack.c.bf16 %v6704_v63, %v6704_v63  ;;  %v18472_v29 = vld [vmem:[#allocation6_spill] sm:$0xff]  ;;  %v18475_v63 = vld [vmem:[#allocation27_spill] sm:$0xff] }
 0x581   : > { %v7356_v32 = vpack.c.b16 %v7355_v24, %v7354_v9  ;;  %6318 = vadd.xlane.f32.xlu0 %v6317_v39  ;;  %5736 = vmax.xlane.f32.xlu1 %v5735_v19  ;;  %v18469_v9 = vpack.c.b16 %v18467_v35, %v18468_v37  ;;  %v15627_v24 = vpop.f32.mrf.mxu2  ;;  %11492 = vpow2.f32 %v6024_v60  ;;  %v18474_v39 = vld [vmem:[#allocation149_spill] sm:$0xff] }
 0x582   : > { %v7300_v30 = vpack.c.b16 %v7299_v8, %v7298_v25  ;;  %18470 = vst [vmem:[#allocation158_spill] sm:$0xff] %v15627_v24  ;;  %v18473_v25 = vpack.c.b16 %v18471_v23, %v18472_v29  ;;  %11494 = vpow2.f32 %v6020_v11 }
 0x583   : > { %10891 = vmatmul.msk.bf16.vlgmr.msrb.gmra.mxu3 %vm3485_vm0, %v7356_v32  ;;  %v15618_v33 = vpop.xlane.xlu2 %5691  ;;  %v5840_v32 = vsub.f32 %v18475_v63, %v18474_v39  ;;  %v18481_v63 = vld [vmem:[#allocation13_spill] sm:$0xff] }
 0x584   : > { %v11489_v3 = vpop.eup %11488  ;;  %7597 = vmatpush.bf16.msrb.mxu3 %v18469_v9  ;;  %10889 = vmatmul.msk.bf16.vlgmr.msrb.gmra.mxu1 %vm3485_vm0, %v7300_v30  ;;  %v6268_v45 = vpop.xlane.xlu0 %6267  ;;  %v5747_v30 = vsel %vm3485_vm0, %v15627_v24, -inf }
 0x585   : > { %v15620_v51 = vpop.eup %11490  ;;  %v6705_v52 = vmul.f32 %v11489_v3, %v15257_v58  ;;  %v6262_v19 = vpop.xlane.xlu1 %6261  ;;  %7541 = vmatpush.bf16.msrb.mxu1 %v18473_v25  ;;  %v5753_v58 = vsel %vm3485_vm0, %v15615_v62, -inf  ;;  %v7326_v3 = vunpack.c.l.b16 %v6832_v16  ;;  %v6028_v9 = vmul.f32 1.442695, %v5840_v32  ;;  %v18490_v62 = vld [vmem:[#allocation86_spill] sm:$0xff] }
 0x586   : > { %v6323_v37 = vsel %vm3485_vm0, %v15620_v51, 0.0 }
 0x587   : > { %v6833_v8 = vpack.c.bf16 %v6705_v52, %v6705_v52  ;;  %v15640_v52 = vpop.f32.mrf.mxu0  ;;  %v15642_v11 = vpop.eup %11492  ;;  %11496 = vpow2.f32 %v6028_v9 }
 0x588   : > { %5754 = vmax.xlane.f32.xlu2 %v5753_v58  ;;  %18476 = vst [vmem:[#allocation161_spill] sm:$0xff] %v15640_v52  ;;  %v15649_v25 = vpop.eup %11494  ;;  %v18482_v58 = vld [vmem:[#allocation12_spill] sm:$0xff]  ;;  %v5756_v32 = vsel %vm3485_vm0, %v15640_v52, -inf }
 0x589   : > { %v7327_v35 = vunpack.c.l.b16 %v6833_v8  ;;  %5748 = vmax.xlane.f32.xlu0 %v5747_v30  ;;  %6324 = vadd.xlane.f32.xlu1 %v6323_v37  ;;  %18477 = vst [vmem:[#allocation159_spill] sm:$0xff] %v15642_v11  ;;  %v18480_v8 = vld [vmem:[#allocation134_spill] sm:$0xff]  ;;  %v6332_v30 = vsel %vm3485_vm0, %v15649_v25, 0.0  ;;  %v15672_v52 = vpop.f32.mrf.mxu2 }
 0x58a   : > { %18479 = vst [vmem:[#allocation162_spill] sm:$0xff] %v15649_v25  ;;  %v5842_v39 = vsub.f32 %v18480_v8, %v15115_v53  ;;  %v18485_v53 = vld [vmem:[#allocation91_spill] sm:$0xff]  ;;  %v18486_v8 = vld [vmem:[#allocation141_spill] sm:$0xff] }
 0x58b   : > { %v7328_v60 = vpack.c.b16 %v7327_v35, %v7326_v3  ;;  %v6280_v23 = vpop.xlane.xlu2 %6279  ;;  %v18483_v3 = vpack.c.b16 %v18481_v63, %v18482_v58  ;;  %v6338_v35 = vsel %vm3485_vm0, %v15642_v11, 0.0  ;;  %v5837_v63 = vsub.f32 %v18486_v8, %v18485_v53  ;;  %18489 = vst [vmem:[#allocation102_spill] sm:$0xff] %v15672_v52  ;;  %v15686_v11 = vpop.f32.mrf.mxu3 }
 0x58c   : > { %v15644_v29 = vpop.xlane.xlu0 %5697  ;;  %v6032_v37 = vmul.f32 1.442695, %v5842_v39  ;;  %v18491_v39 = vld [vmem:[#allocation137_spill] sm:$0xff]  ;;  %v5768_v53 = vsel %vm3485_vm0, %v15672_v52, -inf  ;;  %18495 = vst [vmem:[#allocation103_spill] sm:$0xff] %v15686_v11 }
 0x58d   : > { %18478 = vst [vmem:[#allocation164_spill] sm:$0xff] %v15644_v29  ;;  %10890 = vmatmul.msk.bf16.vlgmr.msrb.gmra.mxu2 %vm3485_vm0, %v7328_v60  ;;  %v15647_v16 = vpop.xlane.xlu1 %5685  ;;  %v15662_v60 = vpop.f32.mrf.mxu1 }
 0x58e   : > { %7569 = vmatpush.bf16.msrb.mxu2 %v18483_v3  ;;  %18484 = vst [vmem:[#allocation165_spill] sm:$0xff] %v15662_v60  ;;  %11498 = vpow2.f32 %v6032_v37  ;;  %v5762_v20 = vsel %vm3485_vm0, %v15662_v60, -inf }
 0x58f   : > { %11500 = vrcp.f32 %v6262_v19  ;;  %v15688_v52 = vpop.f32.mrf.mxu0 }
 0x590   : > { %5757 = vmax.xlane.f32.xlu2 %v5756_v32  ;;  %v15670_v32 = vpop.eup %11496  ;;  %11502 = vrcp.f32 %v6280_v23  ;;  %v18493_v23 = vld [vmem:[#allocation92_spill] sm:$0xff]  ;;  %18496 = vst [vmem:[#allocation108_spill] sm:$0xff] %v15688_v52 }
 0x591   : > { %6339 = vadd.xlane.f32.xlu0 %v6338_v35  ;;  %6333 = vadd.xlane.f32.xlu1 %v6332_v30  ;;  %18488 = vst [vmem:[#allocation104_spill] sm:$0xff] %v15670_v32  ;;  %v5839_v35 = vsub.f32 %v18491_v39, %v18490_v62  ;;  %v6022_v30 = vmul.f32 1.442695, %v5837_v63  ;;  %11504 = vrcp.f32 %v6268_v45  ;;  %v6344_v8 = vsel %vm3485_vm0, %v15670_v32, 0.0  ;;  %v18494_v39 = vld [vmem:[#allocation140_spill] sm:$0xff]  ;;  %v18497_v32 = vld [vmem:[#allocation90_spill] sm:$0xff] }
 0x592   : > { %v5843_v24 = vsub.f32 %v18494_v39, %v18493_v23  ;;  %v5774_v39 = vsel %vm3485_vm0, %v15686_v11, -inf }
 0x593   : > { %v15666_v58 = vpop.xlane.xlu2 %5703  ;;  %v6026_v19 = vmul.f32 1.442695, %v5839_v35  ;;  %11506 = vpow2.f32 %v6022_v30 }
 0x594   : > { %v15668_v9 = vpop.xlane.xlu0 %5694  ;;  %v15682_v37 = vpop.eup %11498 }
 0x595   : > { %18487 = vst [vmem:[#allocation163_spill] sm:$0xff] %v15668_v9  ;;  %v6274_v3 = vpop.xlane.xlu1 %6273  ;;  %v11501_v63 = vpop.eup %11500  ;;  %v6350_v30 = vsel %vm3485_vm0, %v15682_v37, 0.0  ;;  %v5759_v9 = vsel %vm3485_vm0, %v15688_v52, -inf }
 0x596   : > { %18492 = vst [vmem:[#allocation105_spill] sm:$0xff] %v15682_v37  ;;  %v11503_v60 = vpop.eup %11502  ;;  %v6708_v35 = vmul.f32 %v11501_v63, %v15286_v6 }
 0x597   : > { %v11505_v25 = vpop.eup %11504  ;;  %v6714_v23 = vmul.f32 %v11503_v60, %v15305_v26 }
 0x598   : > { %5763 = vmax.xlane.f32.xlu2 %v5762_v20 }
 0x599   : > { %5769 = vmax.xlane.f32.xlu0 %v5768_v53  ;;  %6345 = vadd.xlane.f32.xlu1 %v6344_v8  ;;  %v18498_v53 = vld [vmem:[#allocation138_spill] sm:$0xff] }
 0x59a   : > { %v5841_v8 = vsub.f32 %v18498_v53, %v18497_v32  ;;  %v15700_v32 = vpop.eup %11506  ;;  %v6842_v53 = vpack.c.bf16 %v6714_v23, %v6714_v23  ;;  %v18504_v23 = vld [vmem:[#allocation81_spill] sm:$0xff] }
 0x59b   : > { %v6265_v62 = vpop.xlane.xlu2 %6264 }
 0x59c   : > { %11508 = vrcp.f32 %v6265_v62  ;;  %v6283_v45 = vpop.xlane.xlu0 %6282  ;;  %v6034_v62 = vmul.f32 1.442695, %v5843_v24  ;;  %v7466_v29 = vunpack.c.l.b16 %v6842_v53 }
 0x59d   : > { %v6271_v20 = vpop.xlane.xlu1 %6270  ;;  %11510 = vrcp.f32 %v6283_v45  ;;  %v6030_v45 = vmul.f32 1.442695, %v5841_v8 }
 0x59e   : > { %11512 = vrcp.f32 %v6271_v20  ;;  %v6836_v20 = vpack.c.bf16 %v6708_v35, %v6708_v35  ;;  %v18502_v35 = vld [vmem:[#allocation93_spill] sm:$0xff] }
 0x59f   : > { %11514 = vpow2.f32 %v6026_v19  ;;  %v6710_v19 = vmul.f32 %v11505_v25, %v15279_v18  ;;  %v15713_v18 = vpop.f32.mrf.mxu1 }
 0x5a0   : > { %6351 = vadd.xlane.f32.xlu2 %v6350_v30  ;;  %11516 = vpow2.f32 %v6034_v62  ;;  %18501 = vst [vmem:[#allocation107_spill] sm:$0xff] %v15713_v18  ;;  %v7382_v37 = vunpack.c.l.b16 %v6836_v20 }
 0x5a1   : > { %5775 = vmax.xlane.f32.xlu1 %v5774_v39  ;;  %5760 = vmax.xlane.f32.xlu0 %v5759_v9  ;;  %11518 = vpow2.f32 %v6030_v45  ;;  %v6838_v25 = vpack.c.bf16 %v6710_v19, %v6710_v19  ;;  %v18503_v39 = vld [vmem:[#allocation139_spill] sm:$0xff]  ;;  %v5765_v19 = vsel %vm3485_vm0, %v15713_v18, -inf }
 0x5a2   : > { %v11509_v6 = vpop.eup %11508  ;;  %11520 = vrcp.f32 %v6274_v3 }
 0x5a3   : > { %v11511_v63 = vpop.eup %11510  ;;  %v6709_v24 = vmul.f32 %v11509_v6, %v15337_v36  ;;  %v15704_v26 = vpop.xlane.xlu2 %5688  ;;  %v5846_v6 = vsub.f32 %v18503_v39, %v18502_v35  ;;  %v7410_v3 = vunpack.c.l.b16 %v6838_v25 }
 0x5a4   : > { %v11513_v60 = vpop.eup %11512  ;;  %v6715_v30 = vmul.f32 %v11511_v63, %v15348_v5  ;;  %v15707_v52 = vpop.xlane.xlu0 %5706  ;;  %v6335_v5 = vsel %vm3485_vm0, %v15700_v32, 0.0  ;;  %v5850_v63 = vsub.f32 %v18504_v23, %v15175_v2  ;;  %v18510_v23 = vld [vmem:[#allocation239_spill] sm:$0xff] }
 0x5a5   : > { %18499 = vst [vmem:[#allocation106_spill] sm:$0xff] %v15707_v52  ;;  %v15709_v11 = vpop.xlane.xlu1 %5700  ;;  %v15711_v8 = vpop.eup %11514  ;;  %v6837_v9 = vpack.c.bf16 %v6709_v24, %v6709_v24  ;;  %v6711_v36 = vmul.f32 %v11513_v60, %v15330_v10  ;;  %v6040_v2 = vmul.f32 1.442695, %v5846_v6 }
 0x5a6   : > { %18500 = vst [vmem:[#allocation109_spill] sm:$0xff] %v15709_v11  ;;  %v6843_v62 = vpack.c.bf16 %v6715_v30, %v6715_v30  ;;  %v6341_v10 = vsel %vm3485_vm0, %v15711_v8, 0.0  ;;  %v15726_v30 = vpop.eup %11516  ;;  %v6048_v53 = vmul.f32 1.442695, %v5850_v63  ;;  %v18511_v63 = vld [vmem:[#allocation237_spill] sm:$0xff] }
 0x5a7   : > { %v7383_v52 = vunpack.c.l.b16 %v6837_v9  ;;  %v6839_v11 = vpack.c.bf16 %v6711_v36, %v6711_v36  ;;  %v15728_v9 = vpop.eup %11518 }
 0x5a8   : > { %v7467_v45 = vunpack.c.l.b16 %v6843_v62  ;;  %6336 = vadd.xlane.f32.xlu2 %v6335_v5  ;;  %v11521_v39 = vpop.eup %11520  ;;  %v18505_v62 = vld [vmem:[#allocation234_spill] sm:$0xff]  ;;  %v18506_v5 = vld [vmem:[#allocation232_spill] sm:$0xff] }
 0x5a9   : > { %v7384_v24 = vpack.c.b16 %v7383_v52, %v7382_v37  ;;  %v7411_v60 = vunpack.c.l.b16 %v6839_v11  ;;  %6342 = vadd.xlane.f32.xlu1 %v6341_v10  ;;  %5766 = vmax.xlane.f32.xlu0 %v5765_v19  ;;  %v18507_v25 = vpack.c.b16 %v18505_v62, %v18506_v5  ;;  %v18509_v37 = vld [vmem:[#allocation78_spill] sm:$0xff]  ;;  %v18513_v10 = vld [vmem:[#allocation85_spill] sm:$0xff]  ;;  %v6347_v62 = vsel %vm3485_vm0, %v15728_v9, 0.0 }
 0x5aa   : > { %v7468_v20 = vpack.c.b16 %v7467_v45, %v7466_v29  ;;  %v15739_v29 = vpop.f32.mrf.mxu2  ;;  %v5844_v6 = vsub.f32 %v18509_v37, %v15177_v21  ;;  %v18512_v45 = vpack.c.b16 %v18510_v23, %v18511_v63  ;;  %v5845_v19 = vsub.f32 %v18513_v10, %v15213_v22  ;;  %v18520_v63 = vld [vmem:[#allocation200_spill] sm:$0xff] }
 0x5ab   : > { %v7412_v36 = vpack.c.b16 %v7411_v60, %v7410_v3  ;;  %v6277_v35 = vpop.xlane.xlu2 %6276  ;;  %10892 = vmatmul.msk.bf16.vlgmr.msra.gmra.mxu0 %vm3485_vm0, %v7384_v24  ;;  %18508 = vst [vmem:[#allocation56_spill] sm:$0xff] %v15739_v29  ;;  %v18514_v3 = vld [vmem:[#allocation235_spill] sm:$0xff]  ;;  %v18515_v24 = vld [vmem:[#allocation233_spill] sm:$0xff]  ;;  %v6712_v21 = vmul.f32 %v11521_v39, %v15321_v17  ;;  %v6353_v22 = vsel %vm3485_vm0, %v15726_v30, 0.0 }
 0x5ac   : > { %11522 = vrcp.f32 %v6277_v35  ;;  %7625 = vmatpush.bf16.msra.mxu0 %v18507_v25  ;;  %10895 = vmatmul.msk.bf16.vlgmr.msra.gmra.mxu3 %vm3485_vm0, %v7468_v20  ;;  %v15735_v52 = vpop.xlane.xlu0 %5715  ;;  %v18516_v60 = vpack.c.b16 %v18514_v3, %v18515_v24  ;;  %v18517_v20 = vld [vmem:[#allocation83_spill] sm:$0xff]  ;;  %v15761_v25 = vpop.f32.mrf.mxu3 }
 0x5ad   : > { %v15737_v11 = vpop.xlane.xlu1 %6291  ;;  %7709 = vmatpush.bf16.msra.mxu3 %v18512_v45  ;;  %10893 = vmatmul.msk.bf16.vlgmr.msra.gmra.mxu1 %vm3485_vm0, %v7412_v36  ;;  %11524 = vpow2.f32 %v6040_v2  ;;  %v5851_v35 = vsub.f32 %v18517_v20, %v15230_v12  ;;  %v5771_v2 = vsel %vm3485_vm0, %v15739_v29, -inf  ;;  %v6036_v36 = vmul.f32 1.442695, %v5844_v6  ;;  %18518 = vst [vmem:[#allocation54_spill] sm:$0xff] %v15761_v25  ;;  %v18521_v45 = vld [vmem:[#allocation80_spill] sm:$0xff]  ;;  %v18546_v29 = vld [vmem:[#allocation97_spill] sm:$0xff] }
 0x5ae   : > { %7653 = vmatpush.bf16.msra.mxu1 %v18516_v60  ;;  %11526 = vpow2.f32 %v6048_v53  ;;  %v6038_v53 = vmul.f32 1.442695, %v5845_v19  ;;  %v6840_v37 = vpack.c.bf16 %v6712_v21, %v6712_v21  ;;  %v5848_v10 = vsub.f32 %v18521_v45, %v18520_v63  ;;  %v18523_v60 = vld [vmem:[#allocation39_spill] sm:$0xff]  ;;  %v18524_v19 = vld [vmem:[#allocation186_spill] sm:$0xff] }
 0x5af   : > { %v6050_v12 = vmul.f32 1.442695, %v5851_v35  ;;  %11528 = vpow2.f32 %v6036_v36  ;;  %v5849_v20 = vsub.f32 %v18524_v19, %v18523_v60  ;;  %v18525_v35 = vld [vmem:[#allocation153_spill] sm:$0xff]  ;;  %v18526_v21 = vld [vmem:[#allocation30_spill] sm:$0xff]  ;;  %v18528_v19 = vld [vmem:[#allocation79_spill] sm:$0xff] }
 0x5b0   : > { %6348 = vadd.xlane.f32.xlu2 %v6347_v62  ;;  %11530 = vpow2.f32 %v6038_v53  ;;  %v6044_v63 = vmul.f32 1.442695, %v5848_v10  ;;  %v18527_v53 = vld [vmem:[#allocation201_spill] sm:$0xff] }
 0x5b1   : > { %5772 = vmax.xlane.f32.xlu1 %v5771_v2  ;;  %6354 = vadd.xlane.f32.xlu0 %v6353_v22  ;;  %11532 = vpow2.f32 %v6050_v12  ;;  %v7438_v2 = vunpack.c.l.b16 %v6840_v37  ;;  %v6046_v60 = vmul.f32 1.442695, %v5849_v20  ;;  %v5847_v12 = vsub.f32 %v18528_v19, %v18527_v53  ;;  %v18533_v20 = vld [vmem:[#allocation238_spill] sm:$0xff] }
 0x5b2   : > { %v11523_v5 = vpop.eup %11522  ;;  %11534 = vpow2.f32 %v6044_v63 }
 0x5b3   : > { %v6713_v17 = vmul.f32 %v11523_v5, %v15395_v59  ;;  %v6286_v39 = vpop.xlane.xlu2 %6285  ;;  %v15764_v23 = vpop.eup %11524  ;;  %v5858_v59 = vsub.f32 %v18526_v21, %v18525_v35  ;;  %v5777_v5 = vsel %vm3485_vm0, %v15761_v25, -inf  ;;  %v18530_v35 = vld [vmem:[#allocation150_spill] sm:$0xff]  ;;  %v18531_v21 = vld [vmem:[#allocation191_spill] sm:$0xff]  ;;  %11536 = vpow2.f32 %v6046_v60 }
 0x5b4   : > { %18519 = vst [vmem:[#allocation57_spill] sm:$0xff] %v15764_v23  ;;  %v6304_v3 = vpop.xlane.xlu0 %6303  ;;  %v15770_v6 = vpop.eup %11526  ;;  %v6362_v45 = vsel %vm3485_vm0, %v15764_v23, 0.0  ;;  %v5852_v10 = vsub.f32 %v18531_v21, %v18530_v35  ;;  %v6042_v53 = vmul.f32 1.442695, %v5847_v12  ;;  %v18538_v35 = vld [vmem:[#allocation37_spill] sm:$0xff] }
 0x5b5   : > { %v15768_v24 = vpop.xlane.xlu1 %5721  ;;  %18522 = vst [vmem:[#allocation55_spill] sm:$0xff] %v15770_v6  ;;  %v6841_v62 = vpack.c.bf16 %v6713_v17, %v6713_v17  ;;  %v6374_v36 = vsel %vm3485_vm0, %v15770_v6, 0.0  ;;  %v6064_v37 = vmul.f32 1.442695, %v5858_v59 }
 0x5b6   : > { %v6052_v19 = vmul.f32 1.442695, %v5852_v10 }
 0x5b7   : > { %v7439_v22 = vunpack.c.l.b16 %v6841_v62  ;;  %v15784_v62 = vpop.eup %11528  ;;  %11538 = vpow2.f32 %v6064_v37  ;;  %v18541_v37 = vld [vmem:[#allocation42_spill] sm:$0xff] }
 0x5b8   : > { %5778 = vmax.xlane.f32.xlu2 %v5777_v5  ;;  %18529 = vst [vmem:[#allocation60_spill] sm:$0xff] %v15784_v62  ;;  %v15791_v18 = vpop.eup %11530  ;;  %11540 = vrcp.f32 %v6286_v39  ;;  %v6356_v63 = vsel %vm3485_vm0, %v15784_v62, 0.0  ;;  %v18542_v39 = vld [vmem:[#allocation189_spill] sm:$0xff] }
 0x5b9   : > { %v7440_v17 = vpack.c.b16 %v7439_v22, %v7438_v2  ;;  %6363 = vadd.xlane.f32.xlu1 %v6362_v45  ;;  %6375 = vadd.xlane.f32.xlu0 %v6374_v36  ;;  %18532 = vst [vmem:[#allocation58_spill] sm:$0xff] %v15791_v18  ;;  %v18534_v2 = vld [vmem:[#allocation236_spill] sm:$0xff]  ;;  %v15800_v59 = vpop.eup %11532  ;;  %11542 = vrcp.f32 %v6304_v3  ;;  %v5854_v10 = vsub.f32 %v18542_v39, %v18541_v37 }
 0x5ba   : > { %v18535_v22 = vpack.c.b16 %v18533_v20, %v18534_v2  ;;  %18536 = vst [vmem:[#allocation61_spill] sm:$0xff] %v15800_v59  ;;  %v6377_v20 = vsel %vm3485_vm0, %v15800_v59, 0.0  ;;  %v6359_v2 = vsel %vm3485_vm0, %v15791_v18, 0.0  ;;  %v15810_v60 = vpop.eup %11534  ;;  %11544 = vpow2.f32 %v6042_v53  ;;  %v18547_v18 = vld [vmem:[#allocation142_spill] sm:$0xff] }
 0x5bb   : > { %10894 = vmatmul.msk.bf16.vlgmr.msra.gmra.mxu2 %vm3485_vm0, %v7440_v17  ;;  %v15789_v5 = vpop.xlane.xlu2 %5709  ;;  %v18537_v17 = vld [vmem:[#allocation96_spill] sm:$0xff]  ;;  %18539 = vst [vmem:[#allocation59_spill] sm:$0xff] %v15810_v60  ;;  %v15812_v12 = vpop.eup %11536  ;;  %11546 = vpow2.f32 %v6052_v19  ;;  %v5857_v59 = vsub.f32 %v18547_v18, %v18546_v29  ;;  %v6056_v37 = vmul.f32 1.442695, %v5854_v10  ;;  %v6368_v19 = vsel %vm3485_vm0, %v15810_v60, 0.0 }
 0x5bc   : > { %7681 = vmatpush.bf16.msra.mxu2 %v18535_v22  ;;  %v15796_v45 = vpop.xlane.xlu0 %5727  ;;  %v5853_v21 = vsub.f32 %v18538_v35, %v18537_v17  ;;  %18540 = vst [vmem:[#allocation211_spill] sm:$0xff] %v15812_v12  ;;  %11548 = vrcp.f32 %v15737_v11 }
 0x5bd   : > { %v15798_v36 = vpop.xlane.xlu1 %5718  ;;  %v15816_v17 = vpop.eup %11538  ;;  %v6062_v60 = vmul.f32 1.442695, %v5857_v59 }
 0x5be   : > { %v6054_v22 = vmul.f32 1.442695, %v5853_v21  ;;  %18543 = vst [vmem:[#allocation210_spill] sm:$0xff] %v15816_v17  ;;  %v11541_v23 = vpop.eup %11540  ;;  %v6398_v39 = vsel %vm3485_vm0, %v15816_v17, 0.0 }
 0x5bf   : > { %v11543_v53 = vpop.eup %11542  ;;  %v6716_v11 = vmul.f32 %v11541_v23, %v15416_v54 }
 0x5c0   : > { %6357 = vadd.xlane.f32.xlu2 %v6356_v63  ;;  %v15825_v21 = vpop.eup %11544  ;;  %v6722_v29 = vmul.f32 %v11543_v53, %v15425_v48 }
 0x5c1   : > { %6378 = vadd.xlane.f32.xlu1 %v6377_v20  ;;  %6360 = vadd.xlane.f32.xlu0 %v6359_v2  ;;  %v18544_v20 = vld [vmem:[#allocation152_spill] sm:$0xff]  ;;  %v6844_v17 = vpack.c.bf16 %v6716_v11, %v6716_v11  ;;  %v6365_v59 = vsel %vm3485_vm0, %v15825_v21, 0.0 }
 0x5c2   : > { %v18545_v2 = vld [vmem:[#allocation32_spill] sm:$0xff]  ;;  %v6850_v53 = vpack.c.bf16 %v6722_v29, %v6722_v29 }
 0x5c3   : > { %v6298_v3 = vpop.xlane.xlu2 %6297  ;;  %v5856_v25 = vsub.f32 %v18545_v2, %v18544_v20  ;;  %v15832_v20 = vpop.eup %11546 }
 0x5c4   : > { %v6289_v35 = vpop.xlane.xlu0 %6288  ;;  %v11549_v10 = vpop.eup %11548 }
 0x5c5   : > { %v6307_v63 = vpop.xlane.xlu1 %6306  ;;  %11550 = vrcp.f32 %v6289_v35  ;;  %v6371_v35 = vsel %vm3485_vm0, %v15812_v12, 0.0  ;;  %v6060_v18 = vmul.f32 1.442695, %v5856_v25 }
 0x5c6   : > { %11552 = vrcp.f32 %v6307_v63  ;;  %v18549_v63 = vld [vmem:[#allocation33_spill] sm:$0xff] }
 0x5c7   : > { %11554 = vpow2.f32 %v6054_v22  ;;  %v18548_v22 = vld [vmem:[#allocation151_spill] sm:$0xff] }
 0x5c8   : > { %6369 = vadd.xlane.f32.xlu2 %v6368_v19  ;;  %v5855_v2 = vsub.f32 %v18549_v63, %v18548_v22  ;;  %11556 = vpow2.f32 %v6056_v37  ;;  %v18551_v22 = vld [vmem:[#allocation145_spill] sm:$0xff]  ;;  %v18552_v63 = vld [vmem:[#allocation88_spill] sm:$0xff] }
 0x5c9   : > { %6399 = vadd.xlane.f32.xlu1 %v6398_v39  ;;  %6372 = vadd.xlane.f32.xlu0 %v6371_v35  ;;  %v18550_v35 = vld [vmem:[#allocation94_spill] sm:$0xff] }
 0x5ca   : > { %v6058_v37 = vmul.f32 1.442695, %v5855_v2  ;;  %v5859_v11 = vsub.f32 %v18551_v22, %v18550_v35  ;;  %v6380_v2 = vsel %vm3485_vm0, %v15832_v20, 0.0 }
 0x5cb   : > { %v11551_v54 = vpop.eup %11550  ;;  %v6295_v23 = vpop.xlane.xlu2 %6294 }
 0x5cc   : > { %v11553_v19 = vpop.eup %11552  ;;  %v6717_v62 = vmul.f32 %v11551_v54, %v15455_v50  ;;  %11558 = vrcp.f32 %v6295_v23  ;;  %v15840_v25 = vpop.xlane.xlu0 %5712  ;;  %v5860_v54 = vsub.f32 %v18552_v63, %v15414_v43  ;;  %v6718_v23 = vmul.f32 %v11549_v10, %v15399_v41 }
 0x5cd   : > { %v15838_v12 = vpop.xlane.xlu1 %5730  ;;  %v15842_v48 = vpop.eup %11554  ;;  %11560 = vpow2.f32 %v6060_v18  ;;  %v6723_v39 = vmul.f32 %v11553_v19, %v15463_v28  ;;  %v7494_v18 = vunpack.c.l.b16 %v6844_v17  ;;  %v6066_v35 = vmul.f32 1.442695, %v5859_v11  ;;  %v18553_v11 = vld [vmem:[#allocation148_spill] sm:$0xff] }
 0x5ce   : > { %11562 = vpow2.f32 %v6062_v60  ;;  %v6845_v50 = vpack.c.bf16 %v6717_v62, %v6717_v62  ;;  %v6383_v28 = vsel %vm3485_vm0, %v15842_v48, 0.0  ;;  %v15856_v19 = vpop.eup %11556  ;;  %v7578_v60 = vunpack.c.l.b16 %v6850_v53 }
 0x5cf   : > { %11564 = vrcp.f32 %v6298_v3  ;;  %v6851_v6 = vpack.c.bf16 %v6723_v39, %v6723_v39  ;;  %v6068_v17 = vmul.f32 1.442695, %v5860_v54  ;;  %v6846_v10 = vpack.c.bf16 %v6718_v23, %v6718_v23  ;;  %v18554_v54 = vld [vmem:[#allocation121_spill] sm:$0xff] }
 0x5d0   : > { %v7495_v29 = vunpack.c.l.b16 %v6845_v50  ;;  %6366 = vadd.xlane.f32.xlu2 %v6365_v59  ;;  %11566 = vpow2.f32 %v6058_v37  ;;  %v18557_v37 = vld [vmem:[#allocation89_spill] sm:$0xff] }
 0x5d1   : > { %v7579_v62 = vunpack.c.l.b16 %v6851_v6  ;;  %6384 = vadd.xlane.f32.xlu1 %v6383_v28  ;;  %6381 = vadd.xlane.f32.xlu0 %v6380_v2  ;;  %v5866_v28 = vsub.f32 %v18557_v37, %v15421_v55  ;;  %v18558_v2 = vld [vmem:[#allocation123_spill] sm:$0xff] }
 0x5d2   : > { %v11559_v43 = vpop.eup %11558  ;;  %v7496_v41 = vpack.c.b16 %v7495_v29, %v7494_v18  ;;  %v5862_v18 = vsub.f32 %v18553_v11, %v15368_v57  ;;  %v18561_v57 = vld [vmem:[#allocation147_spill] sm:$0xff] }
 0x5d3   : > { %v15858_v3 = vpop.eup %11560  ;;  %v7580_v39 = vpack.c.b16 %v7579_v62, %v7578_v60  ;;  %v6719_v59 = vmul.f32 %v11559_v43, %v15478_v46  ;;  %v15861_v22 = vpop.xlane.xlu2 %5724  ;;  %v18555_v46 = vld [vmem:[#allocation120_spill] sm:$0xff]  ;;  %v18559_v60 = vld [vmem:[#allocation122_spill] sm:$0xff]  ;;  %v6386_v43 = vsel %vm3485_vm0, %v15856_v19, 0.0 }
 0x5d4   : > { %v15863_v50 = vpop.eup %11562  ;;  %v6301_v6 = vpop.xlane.xlu0 %6300  ;;  %10896 = vmatmul.msk.bf16.vlgmr.msrb.gmra.mxu0 %vm3485_vm0, %v7496_v41  ;;  %v18556_v23 = vpack.c.b16 %v18554_v54, %v18555_v46  ;;  %v18560_v62 = vpack.c.b16 %v18558_v2, %v18559_v60  ;;  %v5864_v41 = vsub.f32 %v18561_v57, %v15397_v13  ;;  %v6392_v55 = vsel %vm3485_vm0, %v15858_v3, 0.0  ;;  %v18563_v2 = vld [vmem:[#allocation119_spill] sm:$0xff]  ;;  %v18564_v60 = vld [vmem:[#allocation118_spill] sm:$0xff] }
 0x5d5   : > { %v15865_v63 = vpop.xlane.xlu1 %5739  ;;  %v11565_v53 = vpop.eup %11564  ;;  %v6847_v29 = vpack.c.bf16 %v6719_v59, %v6719_v59  ;;  %10899 = vmatmul.msk.bf16.vlgmr.msrb.gmra.mxu3 %vm3485_vm0, %v7580_v39  ;;  %11568 = vrcp.f32 %v6301_v6  ;;  %v7522_v39 = vunpack.c.l.b16 %v6846_v10  ;;  %v6072_v11 = vmul.f32 1.442695, %v5862_v18 }
 0x5d6   : > { %7737 = vmatpush.bf16.msrb.mxu0 %v18556_v23  ;;  %11570 = vpow2.f32 %v6066_v35  ;;  %7821 = vmatpush.bf16.msrb.mxu3 %v18560_v62  ;;  %v6720_v6 = vmul.f32 %v11565_v53, %v15448_v44  ;;  %v6395_v35 = vsel %vm3485_vm0, %v15863_v50, 0.0  ;;  %v15888_v46 = vpop.eup %11566  ;;  %v6080_v23 = vmul.f32 1.442695, %v5866_v28  ;;  %v18562_v53 = vld [vmem:[#allocation87_spill] sm:$0xff] }
 0x5d7   : > { %11572 = vpow2.f32 %v6068_v17  ;;  %v7523_v59 = vunpack.c.l.b16 %v6847_v29  ;;  %v6076_v17 = vmul.f32 1.442695, %v5864_v41  ;;  %v5863_v29 = vsub.f32 %v18562_v53, %v15423_v40  ;;  %v18566_v41 = vld [vmem:[#allocation194_spill] sm:$0xff] }
 0x5d8   : > { %6387 = vadd.xlane.f32.xlu2 %v6386_v43  ;;  %v6848_v37 = vpack.c.bf16 %v6720_v6, %v6720_v6  ;;  %v18565_v62 = vpack.c.b16 %v18563_v2, %v18564_v60  ;;  %11574 = vpow2.f32 %v6072_v11  ;;  %v6389_v6 = vsel %vm3485_vm0, %v15888_v46, 0.0  ;;  %v18569_v2 = vld [vmem:[#allocation208_spill] sm:$0xff] }
 0x5d9   : > { %v7524_v54 = vpack.c.b16 %v7523_v59, %v7522_v39  ;;  %6396 = vadd.xlane.f32.xlu1 %v6395_v35  ;;  %6393 = vadd.xlane.f32.xlu0 %v6392_v55  ;;  %v5867_v39 = vsub.f32 %v18566_v41, %v15459_v14  ;;  %11576 = vpow2.f32 %v6080_v23  ;;  %v18567_v59 = vld [vmem:[#allocation203_spill] sm:$0xff]  ;;  %v18568_v35 = vld [vmem:[#allocation196_spill] sm:$0xff]  ;;  %v18571_v41 = vld [vmem:[#allocation206_spill] sm:$0xff] }
 0x5da   : > { %v5861_v55 = vsub.f32 %v18568_v35, %v18567_v59  ;;  %11578 = vpow2.f32 %v6076_v17  ;;  %v18572_v59 = vld [vmem:[#allocation195_spill] sm:$0xff] }
 0x5db   : > { %v11569_v13 = vpop.eup %11568  ;;  %10897 = vmatmul.msk.bf16.vlgmr.msrb.gmra.mxu1 %vm3485_vm0, %v7524_v54  ;;  %v15891_v10 = vpop.xlane.xlu2 %6315  ;;  %v6074_v54 = vmul.f32 1.442695, %v5863_v29  ;;  %v6082_v14 = vmul.f32 1.442695, %v5867_v39  ;;  %v5870_v35 = vsub.f32 %v18572_v59, %v18571_v41  ;;  %v18579_v59 = vld [vmem:[#allocation41_spill] sm:$0xff] }
 0x5dc   : > { %v15893_v44 = vpop.eup %11570  ;;  %v6721_v18 = vmul.f32 %v11569_v13, %v15510_v27  ;;  %7765 = vmatpush.bf16.msrb.mxu1 %v18565_v62  ;;  %v6310_v28 = vpop.xlane.xlu0 %6309  ;;  %v7550_v13 = vunpack.c.l.b16 %v6848_v37  ;;  %v6070_v23 = vmul.f32 1.442695, %v5861_v55 }
 0x5dd   : > { %v6328_v43 = vpop.xlane.xlu1 %6327  ;;  %v15901_v57 = vpop.eup %11572  ;;  %v6401_v27 = vsel %vm3485_vm0, %v15893_v44, 0.0  ;;  %11580 = vpow2.f32 %v6074_v54 }
 0x5de   : > { %v6849_v40 = vpack.c.bf16 %v6721_v18, %v6721_v18  ;;  %v6404_v11 = vsel %vm3485_vm0, %v15901_v57, 0.0  ;;  %v18570_v18 = vld [vmem:[#allocation197_spill] sm:$0xff]  ;;  %v15915_v62 = vpop.eup %11574  ;;  %11582 = vpow2.f32 %v6082_v14 }
 0x5df   : > { %v5865_v17 = vsub.f32 %v18570_v18, %v18569_v2  ;;  %v15921_v37 = vpop.eup %11576  ;;  %11584 = vpow2.f32 %v6070_v23  ;;  %v6088_v18 = vmul.f32 1.442695, %v5870_v35  ;;  %v6410_v41 = vsel %vm3485_vm0, %v15915_v62, 0.0  ;;  %v18578_v23 = vld [vmem:[#allocation199_spill] sm:$0xff] }
 0x5e0   : > { %v7551_v53 = vunpack.c.l.b16 %v6849_v40  ;;  %6402 = vadd.xlane.f32.xlu2 %v6401_v27  ;;  %v18573_v40 = vld [vmem:[#allocation40_spill] sm:$0xff]  ;;  %11586 = vrcp.f32 %v6310_v28  ;;  %v5869_v35 = vsub.f32 %v18579_v59, %v15576_v42  ;;  %v18583_v59 = vld [vmem:[#allocation198_spill] sm:$0xff] }
 0x5e1   : > { %6405 = vadd.xlane.f32.xlu1 %v6404_v11  ;;  %6390 = vadd.xlane.f32.xlu0 %v6389_v6  ;;  %v5874_v39 = vsub.f32 %v18573_v40, %v15534_v38  ;;  %v15930_v6 = vpop.eup %11578  ;;  %v6078_v2 = vmul.f32 1.442695, %v5865_v17  ;;  %v6422_v38 = vsel %vm3485_vm0, %v15921_v37, 0.0  ;;  %v5868_v17 = vsub.f32 %v18578_v23, %v15537_v34 }
 0x5e2   : > { %v7552_v60 = vpack.c.b16 %v7551_v53, %v7550_v13  ;;  %18574 = vst [vmem:[#allocation214_spill] sm:$0xff] %v15930_v6  ;;  %v18575_v13 = vld [vmem:[#allocation125_spill] sm:$0xff]  ;;  %v18576_v53 = vld [vmem:[#allocation124_spill] sm:$0xff]  ;;  %v6086_v34 = vmul.f32 1.442695, %v5869_v35  ;;  %v5872_v35 = vsub.f32 %v18583_v59, %v15528_v7 }
 0x5e3   : > { %v15919_v29 = vpop.xlane.xlu2 %5745  ;;  %v18577_v11 = vpack.c.b16 %v18575_v13, %v18576_v53  ;;  %v6096_v54 = vmul.f32 1.442695, %v5874_v39  ;;  %v15941_v14 = vpop.eup %11580  ;;  %11588 = vpow2.f32 %v6078_v2  ;;  %v18580_v2 = vld [vmem:[#allocation44_spill] sm:$0xff] }
 0x5e4   : > { %10898 = vmatmul.msk.bf16.vlgmr.msrb.gmra.mxu2 %vm3485_vm0, %v7552_v60  ;;  %v15928_v55 = vpop.xlane.xlu0 %5733  ;;  %v6416_v60 = vsel %vm3485_vm0, %v15930_v6, 0.0  ;;  %v15945_v28 = vpop.eup %11582  ;;  %11590 = vpow2.f32 %v6088_v18 }
 0x5e5   : > { %v15925_v27 = vpop.xlane.xlu1 %5751  ;;  %7793 = vmatpush.bf16.msrb.mxu2 %v18577_v11  ;;  %v15951_v39 = vpop.eup %11584  ;;  %11592 = vpow2.f32 %v6096_v54  ;;  %v6413_v54 = vsel %vm3485_vm0, %v15941_v14, 0.0  ;;  %v6425_v23 = vsel %vm3485_vm0, %v15945_v28, 0.0 }
 0x5e6   : > { %v11587_v11 = vpop.eup %11586  ;;  %v6407_v42 = vsel %vm3485_vm0, %v15951_v39, 0.0 }
 0x5e8   : > { %6423 = vadd.xlane.f32.xlu2 %v6422_v38  ;;  %v6084_v38 = vmul.f32 1.442695, %v5868_v17 }
 0x5e9   : > { %6417 = vadd.xlane.f32.xlu1 %v6416_v60  ;;  %6411 = vadd.xlane.f32.xlu0 %v6410_v41  ;;  %v5875_v60 = vsub.f32 %v18580_v2, %v15593_v31  ;;  %v15958_v18 = vpop.eup %11588  ;;  %v6724_v41 = vmul.f32 %v11587_v11, %v15524_v4 }
 0x5ea   : > { %18581 = vst [vmem:[#allocation212_spill] sm:$0xff] %v15958_v18  ;;  %v15965_v17 = vpop.eup %11590 }
 0x5eb   : > { %v15949_v40 = vpop.xlane.xlu2 %5742  ;;  %18582 = vst [vmem:[#allocation215_spill] sm:$0xff] %v15965_v17  ;;  %v15967_v31 = vpop.eup %11592  ;;  %v6852_v11 = vpack.c.bf16 %v6724_v41, %v6724_v41  ;;  %v6092_v41 = vmul.f32 1.442695, %v5872_v35 }
 0x5ec   : > { %v6322_v53 = vpop.xlane.xlu0 %6321 }
 0x5ed   : > { %v6313_v13 = vpop.xlane.xlu1 %6312 }
 0x5ee   : > { %11594 = vrcp.f32 %v6313_v13 }
 0x5ef   : > { %11596 = vrcp.f32 %v6328_v43 }
 0x5f0   : > { %11598 = vrcp.f32 %v15891_v10  ;;  %6408 = vadd.xlane.f32.xlu2 %v6407_v42  ;;  %v6098_v10 = vmul.f32 1.442695, %v5875_v60  ;;  %v18584_v60 = vld [vmem:[#allocation45_spill] sm:$0xff] }
 0x5f1   : > { %6414 = vadd.xlane.f32.xlu1 %v6413_v54  ;;  %6426 = vadd.xlane.f32.xlu0 %v6425_v23  ;;  %11600 = vpow2.f32 %v6084_v38  ;;  %v6419_v38 = vsel %vm3485_vm0, %v15958_v18, 0.0  ;;  %v5873_v23 = vsub.f32 %v18584_v60, %v15598_v0  ;;  %v7606_v18 = vunpack.c.l.b16 %v6852_v11 }
 0x5f2   : > { %11602 = vpow2.f32 %v6086_v34  ;;  %v6434_v34 = vsel %vm3485_vm0, %v15965_v17, 0.0  ;;  %v6446_v0 = vsel %vm3485_vm0, %v15967_v31, 0.0 }
 0x5f3   : > { %v6331_v4 = vpop.xlane.xlu2 %6330  ;;  %v6094_v60 = vmul.f32 1.442695, %v5873_v23 }
 0x5f4   : > { %v11595_v43 = vpop.eup %11594  ;;  %11604 = vrcp.f32 %v6331_v4  ;;  %v6319_v42 = vpop.xlane.xlu0 %6318 }
 0x5f5   : > { %v11597_v13 = vpop.eup %11596  ;;  %v6725_v2 = vmul.f32 %v11595_v43, %v15571_v1  ;;  %v15972_v6 = vpop.xlane.xlu1 %5736  ;;  %11606 = vrcp.f32 %v6319_v42  ;;  %v18585_v1 = vld [vmem:[#allocation157_spill] sm:$0xff] }
 0x5f6   : > { %v11599_v54 = vpop.eup %11598  ;;  %11608 = vpow2.f32 %v6098_v10  ;;  %v5882_v43 = vsub.f32 %v18585_v1, %v15666_v58  ;;  %v6730_v59 = vmul.f32 %v11597_v13, %v15539_v56 }
 0x5f7   : > { %v6853_v7 = vpack.c.bf16 %v6725_v2, %v6725_v2  ;;  %11610 = vrcp.f32 %v6322_v53  ;;  %v15983_v4 = vpop.eup %11600  ;;  %v6726_v42 = vmul.f32 %v11599_v54, %v15530_v61 }
 0x5f8   : > { %6420 = vadd.xlane.f32.xlu2 %v6419_v38  ;;  %v15988_v2 = vpop.eup %11602  ;;  %v6112_v56 = vmul.f32 1.442695, %v5882_v43  ;;  %v6858_v53 = vpack.c.bf16 %v6730_v59, %v6730_v59  ;;  %11612 = vpow2.f32 %v6092_v41  ;;  %v18589_v59 = vld [vmem:[#allocation240_spill] sm:$0xff]  ;;  %v6428_v41 = vsel %vm3485_vm0, %v15983_v4, 0.0 }
 0x5f9   : > { %v7607_v10 = vunpack.c.l.b16 %v6853_v7  ;;  %18586 = vst [vmem:[#allocation213_spill] sm:$0xff] %v15988_v2  ;;  %6435 = vadd.xlane.f32.xlu1 %v6434_v34  ;;  %6447 = vadd.xlane.f32.xlu0 %v6446_v0  ;;  %v6854_v11 = vpack.c.bf16 %v6726_v42, %v6726_v42 }
 0x5fa   : > { %v11605_v35 = vpop.eup %11604 }
 0x5fb   : > { %v7608_v58 = vpack.c.b16 %v7607_v10, %v7606_v18  ;;  %v11607_v1 = vpop.eup %11606  ;;  %v6731_v13 = vmul.f32 %v11605_v35, %v15595_v15  ;;  %v15991_v17 = vpop.xlane.xlu2 %5754  ;;  %v18587_v18 = vld [vmem:[#allocation38_spill] sm:$0xff]  ;;  %v6431_v35 = vsel %vm3485_vm0, %v15988_v2, 0.0 }
 0x5fc   : > { %v15993_v61 = vpop.eup %11608  ;;  %v6727_v54 = vmul.f32 %v11607_v1, %v15588_v47  ;;  %v15996_v38 = vpop.xlane.xlu0 %5748  ;;  %v5871_v34 = vsub.f32 %v18587_v18, %v15554_v49  ;;  %v18588_v15 = vld [vmem:[#allocation242_spill] sm:$0xff]  ;;  %v18591_v47 = vld [vmem:[#allocation156_spill] sm:$0xff]  ;;  %v18592_v49 = vld [vmem:[#allocation95_spill] sm:$0xff]  ;;  %v7690_v1 = vunpack.c.l.b16 %v6858_v53 }
 0x5fd   : > { %v6325_v7 = vpop.xlane.xlu1 %6324  ;;  %10900 = vmatmul.msk.bf16.vlgmr.msra.gmra.mxu0 %vm3485_vm0, %v7608_v58  ;;  %v11611_v23 = vpop.eup %11610  ;;  %v6859_v43 = vpack.c.bf16 %v6731_v13, %v6731_v13  ;;  %v18590_v10 = vpack.c.b16 %v18588_v15, %v18589_v59  ;;  %v5876_v42 = vsub.f32 %v18591_v47, %v15647_v16  ;;  %v5877_v58 = vsub.f32 %v18592_v49, %v15704_v26  ;;  %v18593_v18 = vld [vmem:[#allocation50_spill] sm:$0xff] }
 0x5fe   : > { %11614 = vrcp.f32 %v6325_v7  ;;  %v6855_v0 = vpack.c.bf16 %v6727_v54, %v6727_v54  ;;  %v7634_v7 = vunpack.c.l.b16 %v6854_v11  ;;  %v6728_v15 = vmul.f32 %v11611_v23, %v18593_v18  ;;  %v16015_v54 = vpop.eup %11612 }
 0x5ff   : > { %7849 = vmatpush.bf16.msra.mxu0 %v18590_v10  ;;  %11616 = vpow2.f32 %v6094_v60  ;;  %v7691_v13 = vunpack.c.l.b16 %v6859_v43  ;;  %v6449_v60 = vsel %vm3485_vm0, %v15993_v61, 0.0  ;;  %v6090_v10 = vmul.f32 1.442695, %v5871_v34  ;;  %v18595_v34 = vld [vmem:[#allocation245_spill] sm:$0xff] }
 0x600   : > { %11618 = vpow2.f32 %v6112_v56  ;;  %v7635_v59 = vunpack.c.l.b16 %v6855_v0  ;;  %6429 = vadd.xlane.f32.xlu2 %v6428_v41  ;;  %v6100_v56 = vmul.f32 1.442695, %v5876_v42  ;;  %v6102_v26 = vmul.f32 1.442695, %v5877_v58  ;;  %v18594_v41 = vld [vmem:[#allocation247_spill] sm:$0xff] }
 0x601   : > { %v7692_v16 = vpack.c.b16 %v7691_v13, %v7690_v1  ;;  %6450 = vadd.xlane.f32.xlu1 %v6449_v60  ;;  %6432 = vadd.xlane.f32.xlu0 %v6431_v35  ;;  %v6856_v23 = vpack.c.bf16 %v6728_v15, %v6728_v15  ;;  %v18596_v0 = vpack.c.b16 %v18594_v41, %v18595_v34  ;;  %11620 = vpow2.f32 %v6090_v10  ;;  %v18598_v58 = vld [vmem:[#allocation43_spill] sm:$0xff]  ;;  %v18604_v60 = vld [vmem:[#allocation109_spill] sm:$0xff] }
 0x602   : > { %v7636_v47 = vpack.c.b16 %v7635_v59, %v7634_v7  ;;  %v5878_v1 = vsub.f32 %v18598_v58, %v15618_v33  ;;  %v18599_v13 = vld [vmem:[#allocation243_spill] sm:$0xff]  ;;  %v18600_v7 = vld [vmem:[#allocation241_spill] sm:$0xff]  ;;  %11622 = vpow2.f32 %v6100_v56  ;;  %v6440_v41 = vsel %vm3485_vm0, %v16015_v54, 0.0 }
 0x603   : > { %10903 = vmatmul.msk.bf16.vlgmr.msra.gmra.mxu3 %vm3485_vm0, %v7692_v16  ;;  %v16018_v53 = vpop.xlane.xlu2 %5757  ;;  %v18601_v18 = vpack.c.b16 %v18599_v13, %v18600_v7  ;;  %11624 = vpow2.f32 %v6102_v26  ;;  %v18605_v16 = vld [vmem:[#allocation100_spill] sm:$0xff]  ;;  %v7662_v10 = vunpack.c.l.b16 %v6856_v23  ;;  %v18606_v13 = vld [vmem:[#allocation163_spill] sm:$0xff] }
 0x604   : > { %v11615_v2 = vpop.eup %11614  ;;  %7933 = vmatpush.bf16.msra.mxu3 %v18596_v0  ;;  %10901 = vmatmul.msk.bf16.vlgmr.msra.gmra.mxu1 %vm3485_vm0, %v7636_v47  ;;  %v16027_v35 = vpop.xlane.xlu0 %6339  ;;  %v5881_v47 = vsub.f32 %v18605_v16, %v18604_v60  ;;  %v6104_v58 = vmul.f32 1.442695, %v5878_v1  ;;  %v18607_v7 = vld [vmem:[#allocation155_spill] sm:$0xff]  ;;  %v18610_v60 = vld [vmem:[#allocation98_spill] sm:$0xff] }
 0x605   : > { %v16020_v11 = vpop.eup %11616  ;;  %v6729_v43 = vmul.f32 %v11615_v2, %v15620_v51  ;;  %v6334_v42 = vpop.xlane.xlu1 %6333  ;;  %7877 = vmatpush.bf16.msra.mxu1 %v18601_v18  ;;  %v18602_v51 = vld [vmem:[#allocation164_spill] sm:$0xff]  ;;  %v18603_v2 = vld [vmem:[#allocation154_spill] sm:$0xff]  ;;  %v5879_v18 = vsub.f32 %v18607_v7, %v18606_v13 }
 0x606   : > { %v16029_v49 = vpop.eup %11618  ;;  %v5880_v15 = vsub.f32 %v18603_v2, %v18602_v51  ;;  %v6443_v0 = vsel %vm3485_vm0, %v16020_v11, 0.0  ;;  %v6110_v51 = vmul.f32 1.442695, %v5881_v47  ;;  %11626 = vpow2.f32 %v6104_v58 }
 0x607   : > { %18597 = vst [vmem:[#allocation112_spill] sm:$0xff] %v16029_v49  ;;  %v6857_v59 = vpack.c.bf16 %v6729_v43, %v6729_v43  ;;  %v6470_v33 = vsel %vm3485_vm0, %v16029_v49, 0.0  ;;  %v16046_v43 = vpop.eup %11620  ;;  %v6106_v7 = vmul.f32 1.442695, %v5879_v18  ;;  %v18633_v49 = vld [vmem:[#allocation162_spill] sm:$0xff] }
 0x608   : > { %6441 = vadd.xlane.f32.xlu2 %v6440_v41  ;;  %v6108_v56 = vmul.f32 1.442695, %v5880_v15  ;;  %v16052_v2 = vpop.eup %11622 }
 0x609   : > { %v7663_v34 = vunpack.c.l.b16 %v6857_v59  ;;  %6471 = vadd.xlane.f32.xlu1 %v6470_v33  ;;  %6444 = vadd.xlane.f32.xlu0 %v6443_v0  ;;  %18608 = vst [vmem:[#allocation110_spill] sm:$0xff] %v16052_v2  ;;  %v18609_v59 = vld [vmem:[#allocation106_spill] sm:$0xff]  ;;  %v16059_v15 = vpop.eup %11624  ;;  %v18614_v0 = vld [vmem:[#allocation244_spill] sm:$0xff]  ;;  %v6452_v58 = vsel %vm3485_vm0, %v16052_v2, 0.0 }
 0x60a   : > { %v5883_v16 = vsub.f32 %v18610_v60, %v18609_v59  ;;  %v18613_v33 = vld [vmem:[#allocation246_spill] sm:$0xff]  ;;  %11628 = vpow2.f32 %v6108_v56  ;;  %v6437_v59 = vsel %vm3485_vm0, %v16046_v43, 0.0  ;;  %v6455_v60 = vsel %vm3485_vm0, %v16059_v15, 0.0  ;;  %v18617_v56 = vld [vmem:[#allocation204_spill] sm:$0xff] }
 0x60b   : > { %v7664_v26 = vpack.c.b16 %v7663_v34, %v7662_v10  ;;  %v16050_v23 = vpop.xlane.xlu2 %5763  ;;  %v16061_v10 = vpop.f32.mrf.mxu0  ;;  %v18612_v34 = vld [vmem:[#allocation101_spill] sm:$0xff]  ;;  %v18615_v13 = vpack.c.b16 %v18613_v33, %v18614_v0  ;;  %11630 = vpow2.f32 %v6110_v51  ;;  %v5884_v18 = vsub.f32 %v18617_v56, %v15789_v5 }
 0x60c   : > { %v16056_v41 = vpop.xlane.xlu0 %5769  ;;  %18611 = vst [vmem:[#allocation113_spill] sm:$0xff] %v16061_v10  ;;  %v5886_v47 = vsub.f32 %v18612_v34, %v15735_v52  ;;  %v18616_v52 = vld [vmem:[#allocation99_spill] sm:$0xff]  ;;  %v16078_v51 = vpop.eup %11626  ;;  %11632 = vpow2.f32 %v6106_v7 }
 0x60d   : > { %10902 = vmatmul.msk.bf16.vlgmr.msra.gmra.mxu2 %vm3485_vm0, %v7664_v26  ;;  %v6346_v1 = vpop.xlane.xlu1 %6345  ;;  %v6114_v26 = vmul.f32 1.442695, %v5883_v16  ;;  %v5888_v34 = vsub.f32 %v18616_v52, %v15768_v24  ;;  %18618 = vst [vmem:[#allocation111_spill] sm:$0xff] %v16078_v51  ;;  %v16080_v33 = vpop.f32.mrf.mxu1  ;;  %v18620_v16 = vld [vmem:[#allocation202_spill] sm:$0xff] }
 0x60e   : > { %7905 = vmatpush.bf16.msra.mxu2 %v18615_v13  ;;  %v6120_v10 = vmul.f32 1.442695, %v5886_v47  ;;  %18619 = vst [vmem:[#allocation116_spill] sm:$0xff] %v16080_v33  ;;  %v5890_v0 = vsub.f32 %v18620_v16, %v15796_v45  ;;  %v6458_v45 = vsel %vm3485_vm0, %v16078_v51, 0.0 }
 0x60f   : > { %11634 = vpow2.f32 %v6114_v26  ;;  %v6124_v5 = vmul.f32 1.442695, %v5888_v34 }
 0x610   : > { %6438 = vadd.xlane.f32.xlu2 %v6437_v59  ;;  %v16084_v59 = vpop.eup %11628  ;;  %11636 = vpow2.f32 %v6120_v10  ;;  %v6128_v7 = vmul.f32 1.442695, %v5890_v0 }
 0x611   : > { %6456 = vadd.xlane.f32.xlu1 %v6455_v60  ;;  %6453 = vadd.xlane.f32.xlu0 %v6452_v58  ;;  %18621 = vst [vmem:[#allocation114_spill] sm:$0xff] %v16084_v59  ;;  %v16090_v60 = vpop.eup %11630  ;;  %v6116_v58 = vmul.f32 1.442695, %v5884_v18  ;;  %11638 = vrcp.f32 %v6334_v42  ;;  %v6464_v56 = vsel %vm3485_vm0, %v16084_v59, 0.0 }
 0x612   : > { %18622 = vst [vmem:[#allocation117_spill] sm:$0xff] %v16090_v60  ;;  %11640 = vrcp.f32 %v16027_v35  ;;  %v6467_v26 = vsel %vm3485_vm0, %v16090_v60, 0.0  ;;  %v16101_v16 = vpop.eup %11632  ;;  %v18627_v35 = vld [vmem:[#allocation205_spill] sm:$0xff] }
 0x613   : > { %v6352_v13 = vpop.xlane.xlu2 %6351  ;;  %v16092_v52 = vpop.f32.mrf.mxu0  ;;  %18624 = vst [vmem:[#allocation218_spill] sm:$0xff] %v16101_v16  ;;  %11642 = vpow2.f32 %v6124_v5  ;;  %v5887_v34 = vsub.f32 %v18627_v35, %v15798_v36 }
 0x614   : > { %v16088_v24 = vpop.xlane.xlu0 %5760  ;;  %18623 = vst [vmem:[#allocation115_spill] sm:$0xff] %v16092_v52  ;;  %11644 = vpow2.f32 %v6116_v58 }
 0x615   : > { %v16086_v47 = vpop.xlane.xlu1 %5775  ;;  %v16103_v42 = vpop.eup %11634  ;;  %11646 = vpow2.f32 %v6128_v7  ;;  %v6122_v35 = vmul.f32 1.442695, %v5887_v34 }
 0x616   : > { %18625 = vst [vmem:[#allocation216_spill] sm:$0xff] %v16103_v42  ;;  %v16105_v10 = vpop.eup %11636  ;;  %v16111_v5 = vpop.f32.mrf.mxu1  ;;  %v6473_v58 = vsel %vm3485_vm0, %v16103_v42, 0.0 }
 0x617   : > { %18626 = vst [vmem:[#allocation73_spill] sm:$0xff] %v16105_v10  ;;  %v11639_v0 = vpop.eup %11638 }
 0x618   : > { %6459 = vadd.xlane.f32.xlu2 %v6458_v45  ;;  %v11641_v33 = vpop.eup %11640  ;;  %18628 = vst [vmem:[#allocation84_spill] sm:$0xff] %v16111_v5  ;;  %v6732_v59 = vmul.f32 %v11639_v0, %v18633_v49  ;;  %v18635_v5 = vld [vmem:[#allocation159_spill] sm:$0xff]  ;;  %v16135_v0 = vpop.f32.mrf.mxu2 }
 0x619   : > { %6468 = vadd.xlane.f32.xlu1 %v6467_v26  ;;  %6465 = vadd.xlane.f32.xlu0 %v6464_v56  ;;  %v18629_v26 = vld [vmem:[#allocation207_spill] sm:$0xff]  ;;  %v16117_v7 = vpop.eup %11642  ;;  %v6734_v60 = vmul.f32 %v11641_v33, %v18635_v5  ;;  %18636 = vst [vmem:[#allocation217_spill] sm:$0xff] %v16135_v0  ;;  %v18638_v0 = vld [vmem:[#allocation46_spill] sm:$0xff] }
 0x61a   : > { %v5891_v56 = vsub.f32 %v18629_v26, %v15838_v12  ;;  %18630 = vst [vmem:[#allocation223_spill] sm:$0xff] %v16117_v7  ;;  %v6482_v12 = vsel %vm3485_vm0, %v16105_v10, 0.0  ;;  %v6488_v49 = vsel %vm3485_vm0, %v16117_v7, 0.0  ;;  %v6860_v5 = vpack.c.bf16 %v6732_v59, %v6732_v59  ;;  %v18637_v10 = vld [vmem:[#allocation48_spill] sm:$0xff] }
 0x61b   : > { %v6337_v18 = vpop.xlane.xlu2 %6336  ;;  %v16119_v36 = vpop.f32.mrf.mxu0 }
 0x61c   : > { %11648 = vrcp.f32 %v6337_v18  ;;  %v16109_v52 = vpop.xlane.xlu0 %5766  ;;  %18631 = vst [vmem:[#allocation221_spill] sm:$0xff] %v16119_v36  ;;  %v18632_v18 = vld [vmem:[#allocation209_spill] sm:$0xff] }
 0x61d   : > { %v6343_v45 = vpop.xlane.xlu1 %6342  ;;  %v5885_v51 = vsub.f32 %v18632_v18, %v15840_v25  ;;  %v6130_v25 = vmul.f32 1.442695, %v5891_v56 }
 0x61e   : > { %11650 = vrcp.f32 %v6343_v45  ;;  %v16124_v45 = vpop.eup %11644  ;;  %v16147_v59 = vpop.f32.mrf.mxu1 }
 0x61f   : > { %11652 = vrcp.f32 %v6346_v1  ;;  %18634 = vst [vmem:[#allocation219_spill] sm:$0xff] %v16124_v45  ;;  %v6461_v1 = vsel %vm3485_vm0, %v16101_v16, 0.0  ;;  %v16131_v26 = vpop.eup %11646  ;;  %v6118_v33 = vmul.f32 1.442695, %v5885_v51  ;;  %v5889_v16 = vsub.f32 %v18637_v10, %v15861_v22  ;;  %v18640_v22 = vld [vmem:[#allocation47_spill] sm:$0xff] }
 0x620   : > { %11654 = vrcp.f32 %v6352_v13  ;;  %6474 = vadd.xlane.f32.xlu2 %v6473_v58  ;;  %18639 = vst [vmem:[#allocation70_spill] sm:$0xff] %v16147_v59  ;;  %v6494_v10 = vsel %vm3485_vm0, %v16131_v26, 0.0 }
 0x621   : > { %6483 = vadd.xlane.f32.xlu1 %v6482_v12  ;;  %6462 = vadd.xlane.f32.xlu0 %v6461_v1  ;;  %11656 = vpow2.f32 %v6122_v35  ;;  %v6862_v12 = vpack.c.bf16 %v6734_v60, %v6734_v60  ;;  %v5894_v35 = vsub.f32 %v18638_v0, %v15865_v63  ;;  %v5892_v60 = vsub.f32 %v18640_v22, %v15928_v55 }
 0x622   : > { %v11649_v34 = vpop.eup %11648  ;;  %v6126_v0 = vmul.f32 1.442695, %v5889_v16 }
 0x623   : > { %v6733_v58 = vmul.f32 %v11649_v34, %v15700_v32  ;;  %v6349_v18 = vpop.xlane.xlu2 %6348  ;;  %v6476_v32 = vsel %vm3485_vm0, %v16124_v45, 0.0  ;;  %v7718_v34 = vunpack.c.l.b16 %v6860_v5  ;;  %v6136_v55 = vmul.f32 1.442695, %v5894_v35 }
 0x624   : > { %v11651_v13 = vpop.eup %11650  ;;  %11658 = vrcp.f32 %v6349_v18  ;;  %v6355_v7 = vpop.xlane.xlu0 %6354 }
 0x625   : > { %v11653_v36 = vpop.eup %11652  ;;  %v6735_v1 = vmul.f32 %v11651_v13, %v15711_v8  ;;  %v16141_v56 = vpop.xlane.xlu1 %5772  ;;  %v6861_v51 = vpack.c.bf16 %v6733_v58, %v6733_v58  ;;  %11660 = vrcp.f32 %v6355_v7  ;;  %v18641_v13 = vld [vmem:[#allocation104_spill] sm:$0xff]  ;;  %v7746_v7 = vunpack.c.l.b16 %v6862_v12  ;;  %v18642_v58 = vld [vmem:[#allocation105_spill] sm:$0xff] }
 0x626   : > { %v11655_v42 = vpop.eup %11654  ;;  %11662 = vpow2.f32 %v6130_v25  ;;  %v6736_v18 = vmul.f32 %v11653_v36, %v18641_v13  ;;  %v16157_v25 = vpop.f32.mrf.mxu0  ;;  %v18645_v36 = vld [vmem:[#allocation52_spill] sm:$0xff]  ;;  %v6132_v12 = vmul.f32 1.442695, %v5892_v60 }
 0x627   : > { %v6863_v8 = vpack.c.bf16 %v6735_v1, %v6735_v1  ;;  %11664 = vpow2.f32 %v6118_v33  ;;  %v7719_v63 = vunpack.c.l.b16 %v6861_v51  ;;  %v6738_v2 = vmul.f32 %v11655_v42, %v18642_v58  ;;  %v16155_v59 = vpop.eup %11656  ;;  %18643 = vst [vmem:[#allocation82_spill] sm:$0xff] %v16157_v25  ;;  %v18644_v33 = vld [vmem:[#allocation49_spill] sm:$0xff]  ;;  %v16178_v60 = vpop.f32.mrf.mxu2 }
 0x628   : > { %6477 = vadd.xlane.f32.xlu2 %v6476_v32  ;;  %v5896_v5 = vsub.f32 %v18644_v33, %v15919_v29  ;;  %v5898_v16 = vsub.f32 %v18645_v36, %v15925_v27  ;;  %11666 = vpow2.f32 %v6126_v0  ;;  %v18646_v29 = vld [vmem:[#allocation65_spill] sm:$0xff]  ;;  %v18650_v0 = vld [vmem:[#allocation62_spill] sm:$0xff] }
 0x629   : > { %v7747_v45 = vunpack.c.l.b16 %v6863_v8  ;;  %v7720_v1 = vpack.c.b16 %v7719_v63, %v7718_v34  ;;  %6489 = vadd.xlane.f32.xlu1 %v6488_v49  ;;  %6495 = vadd.xlane.f32.xlu0 %v6494_v10  ;;  %v6864_v8 = vpack.c.bf16 %v6736_v18, %v6736_v18  ;;  %v6866_v49 = vpack.c.bf16 %v6738_v2, %v6738_v2  ;;  %v18647_v34 = vld [vmem:[#allocation64_spill] sm:$0xff]  ;;  %v18652_v33 = vld [vmem:[#allocation158_spill] sm:$0xff] }
 0x62a   : > { %v11659_v22 = vpop.eup %11658  ;;  %v18648_v63 = vpack.c.b16 %v18646_v29, %v18647_v34  ;;  %11668 = vpow2.f32 %v6136_v55  ;;  %v6140_v58 = vmul.f32 1.442695, %v5896_v5  ;;  %v5897_v36 = vsub.f32 %v18652_v33, %v15996_v38  ;;  %v16187_v29 = vpop.f32.mrf.mxu1 }
 0x62b   : > { %v7748_v51 = vpack.c.b16 %v7747_v45, %v7746_v7  ;;  %v11661_v42 = vpop.eup %11660  ;;  %v6737_v32 = vmul.f32 %v11659_v22, %v15728_v9  ;;  %10904 = vmatmul.msk.bf16.vlgmr.msrb.gmra.mxu0 %vm3485_vm0, %v7720_v1  ;;  %v16165_v13 = vpop.xlane.xlu2 %5778  ;;  %v18649_v7 = vld [vmem:[#allocation63_spill] sm:$0xff]  ;;  %v6144_v1 = vmul.f32 1.442695, %v5898_v16  ;;  %11670 = vpow2.f32 %v6132_v12  ;;  %18653 = vst [vmem:[#allocation72_spill] sm:$0xff] %v16187_v29 }
 0x62c   : > { %v16167_v35 = vpop.eup %11662  ;;  %v6739_v10 = vmul.f32 %v11661_v42, %v15726_v30  ;;  %7961 = vmatpush.bf16.msrb.mxu0 %v18648_v63  ;;  %v6376_v45 = vpop.xlane.xlu0 %6375  ;;  %v18651_v2 = vpack.c.b16 %v18649_v7, %v18650_v0  ;;  %v6485_v30 = vsel %vm3485_vm0, %v16155_v59, 0.0  ;;  %v7802_v55 = vunpack.c.l.b16 %v6866_v49 }
 0x62d   : > { %10905 = vmatmul.msk.bf16.vlgmr.msrb.gmra.mxu1 %vm3485_vm0, %v7748_v51  ;;  %v16174_v27 = vpop.xlane.xlu1 %6363  ;;  %v16176_v9 = vpop.eup %11664  ;;  %v6865_v18 = vpack.c.bf16 %v6737_v32, %v6737_v32  ;;  %v7774_v51 = vunpack.c.l.b16 %v6864_v8  ;;  %11672 = vrcp.f32 %v6376_v45  ;;  %v6497_v34 = vsel %vm3485_vm0, %v16167_v35, 0.0  ;;  %v18655_v8 = vld [vmem:[#allocation53_spill] sm:$0xff]  ;;  %v18656_v45 = vld [vmem:[#allocation51_spill] sm:$0xff] }
 0x62e   : > { %7989 = vmatpush.bf16.msrb.mxu1 %v18651_v2  ;;  %v6867_v22 = vpack.c.bf16 %v6739_v10, %v6739_v10  ;;  %v6479_v5 = vsel %vm3485_vm0, %v16176_v9, 0.0  ;;  %v16193_v16 = vpop.f32.mrf.mxu0  ;;  %v16195_v38 = vpop.eup %11666  ;;  %11674 = vpow2.f32 %v6140_v58  ;;  %v5895_v10 = vsub.f32 %v18655_v8, %v15949_v40 }
 0x62f   : > { %v7775_v42 = vunpack.c.l.b16 %v6865_v18  ;;  %18654 = vst [vmem:[#allocation222_spill] sm:$0xff] %v16193_v16  ;;  %11676 = vpow2.f32 %v6144_v1  ;;  %v5893_v18 = vsub.f32 %v18656_v45, %v15972_v6  ;;  %v6142_v7 = vmul.f32 1.442695, %v5897_v36  ;;  %v16210_v1 = vpop.f32.mrf.mxu2  ;;  %v18661_v6 = vld [vmem:[#allocation67_spill] sm:$0xff]  ;;  %v18662_v36 = vld [vmem:[#allocation66_spill] sm:$0xff] }
 0x630   : > { %v7803_v32 = vunpack.c.l.b16 %v6867_v22  ;;  %6486 = vadd.xlane.f32.xlu2 %v6485_v30  ;;  %v16199_v63 = vpop.eup %11668  ;;  %v18657_v30 = vld [vmem:[#allocation69_spill] sm:$0xff]  ;;  %v18658_v22 = vld [vmem:[#allocation68_spill] sm:$0xff]  ;;  %18660 = vst [vmem:[#allocation220_spill] sm:$0xff] %v16210_v1  ;;  %v18665_v45 = vld [vmem:[#allocation55_spill] sm:$0xff] }
 0x631   : > { %v7776_v12 = vpack.c.b16 %v7775_v42, %v7774_v51  ;;  %6498 = vadd.xlane.f32.xlu1 %v6497_v34  ;;  %6480 = vadd.xlane.f32.xlu0 %v6479_v5  ;;  %v16204_v2 = vpop.eup %11670  ;;  %v18659_v33 = vpack.c.b16 %v18657_v30, %v18658_v22  ;;  %v18663_v42 = vpack.c.b16 %v18661_v6, %v18662_v36  ;;  %v18664_v34 = vld [vmem:[#allocation160_spill] sm:$0xff] }
 0x632   : > { %v7804_v49 = vpack.c.b16 %v7803_v32, %v7802_v55  ;;  %v6138_v55 = vmul.f32 1.442695, %v5895_v10  ;;  %v6134_v32 = vmul.f32 1.442695, %v5893_v18  ;;  %v5899_v5 = vsub.f32 %v18664_v34, %v15991_v17  ;;  %v18669_v36 = vld [vmem:[#allocation60_spill] sm:$0xff] }
 0x633   : > { %10906 = vmatmul.msk.bf16.vlgmr.msrb.gmra.mxu2 %vm3485_vm0, %v7776_v12  ;;  %v6358_v0 = vpop.xlane.xlu2 %6357  ;;  %v11673_v51 = vpop.eup %11672  ;;  %v6491_v12 = vsel %vm3485_vm0, %v16195_v38, 0.0  ;;  %v6500_v30 = vsel %vm3485_vm0, %v16204_v2, 0.0  ;;  %v6506_v10 = vsel %vm3485_vm0, %v16199_v63, 0.0 }
 0x634   : > { %8017 = vmatpush.bf16.msrb.mxu2 %v18659_v33  ;;  %11678 = vrcp.f32 %v6358_v0  ;;  %10907 = vmatmul.msk.bf16.vlgmr.msrb.gmra.mxu3 %vm3485_vm0, %v7804_v49  ;;  %v6361_v40 = vpop.xlane.xlu0 %6360  ;;  %v16219_v8 = vpop.eup %11674  ;;  %v6746_v0 = vmul.f32 %v11673_v51, %v18665_v45  ;;  %v18668_v51 = vld [vmem:[#allocation102_spill] sm:$0xff] }
 0x635   : > { %v6379_v58 = vpop.xlane.xlu1 %6378  ;;  %8045 = vmatpush.bf16.msrb.mxu3 %v18663_v42  ;;  %v16221_v49 = vpop.f32.mrf.mxu1  ;;  %v5904_v6 = vsub.f32 %v18668_v51, %v16056_v41  ;;  %v18673_v51 = vld [vmem:[#allocation103_spill] sm:$0xff] }
 0x636   : > { %11680 = vrcp.f32 %v6379_v58  ;;  %v16228_v18 = vpop.eup %11676  ;;  %v16232_v58 = vpop.f32.mrf.mxu0  ;;  %v6874_v45 = vpack.c.bf16 %v6746_v0, %v6746_v0 }
 0x637   : > { %11682 = vrcp.f32 %v6361_v40  ;;  %18667 = vst [vmem:[#allocation188_spill] sm:$0xff] %v16232_v58  ;;  %v6146_v40 = vmul.f32 1.442695, %v5899_v5  ;;  %v18671_v5 = vld [vmem:[#allocation58_spill] sm:$0xff]  ;;  %v16246_v0 = vpop.f32.mrf.mxu2  ;;  %v18677_v58 = vld [vmem:[#allocation59_spill] sm:$0xff] }
 0x638   : > { %11684 = vpow2.f32 %v6142_v7  ;;  %6492 = vadd.xlane.f32.xlu2 %v6491_v12  ;;  %v18666_v7 = vld [vmem:[#allocation161_spill] sm:$0xff]  ;;  %18672 = vst [vmem:[#allocation71_spill] sm:$0xff] %v16246_v0 }
 0x639   : > { %6501 = vadd.xlane.f32.xlu1 %v6500_v30  ;;  %6507 = vadd.xlane.f32.xlu0 %v6506_v10  ;;  %11686 = vpow2.f32 %v6138_v55  ;;  %v5900_v22 = vsub.f32 %v18666_v7, %v16018_v53  ;;  %v18670_v30 = vld [vmem:[#allocation61_spill] sm:$0xff] }
 0x63a   : > { %v11679_v17 = vpop.eup %11678  ;;  %11688 = vpow2.f32 %v6134_v32 }
 0x63b   : > { %v6740_v42 = vmul.f32 %v11679_v17, %v18669_v36  ;;  %v6370_v34 = vpop.xlane.xlu2 %6369  ;;  %v6148_v1 = vmul.f32 1.442695, %v5900_v22  ;;  %v6518_v17 = vsel %vm3485_vm0, %v16228_v18, 0.0  ;;  %v5906_v36 = vsub.f32 %v18673_v51, %v16086_v47 }
 0x63c   : > { %v11681_v33 = vpop.eup %11680  ;;  %11690 = vrcp.f32 %v6370_v34  ;;  %v6373_v29 = vpop.xlane.xlu0 %6372 }
 0x63d   : > { %v11683_v12 = vpop.eup %11682  ;;  %v6747_v10 = vmul.f32 %v11681_v33, %v18670_v30  ;;  %v16238_v55 = vpop.xlane.xlu1 %6399  ;;  %11692 = vrcp.f32 %v16174_v27  ;;  %v6868_v32 = vpack.c.bf16 %v6740_v42, %v6740_v42  ;;  %v6156_v33 = vmul.f32 1.442695, %v5904_v6 }
 0x63e   : > { %v16240_v53 = vpop.eup %11684  ;;  %v6741_v7 = vmul.f32 %v11683_v12, %v18671_v5  ;;  %11694 = vrcp.f32 %v6373_v29  ;;  %v7914_v27 = vunpack.c.l.b16 %v6874_v45  ;;  %v6512_v29 = vsel %vm3485_vm0, %v16219_v8, 0.0  ;;  %v18675_v45 = vld [vmem:[#allocation56_spill] sm:$0xff]  ;;  %v16264_v0 = vpop.f32.mrf.mxu0 }
 0x63f   : > { %v6875_v41 = vpack.c.bf16 %v6747_v10, %v6747_v10  ;;  %11696 = vpow2.f32 %v6146_v40  ;;  %v16250_v30 = vpop.eup %11686  ;;  %v6515_v22 = vsel %vm3485_vm0, %v16240_v53, 0.0  ;;  %v18674_v40 = vld [vmem:[#allocation108_spill] sm:$0xff]  ;;  %v7830_v10 = vunpack.c.l.b16 %v6868_v32  ;;  %18676 = vst [vmem:[#allocation77_spill] sm:$0xff] %v16264_v0 }
 0x640   : > { %v6869_v34 = vpack.c.bf16 %v6741_v7, %v6741_v7  ;;  %6519 = vadd.xlane.f32.xlu2 %v6518_v17  ;;  %v16256_v12 = vpop.eup %11688  ;;  %v5901_v6 = vsub.f32 %v18674_v40, %v16088_v24  ;;  %v16260_v7 = vpop.f32.mrf.mxu1  ;;  %11698 = vpow2.f32 %v6148_v1  ;;  %v6160_v25 = vmul.f32 1.442695, %v5906_v36  ;;  %v18680_v36 = vld [vmem:[#allocation253_spill] sm:$0xff] }
 0x641   : > { %v7915_v42 = vunpack.c.l.b16 %v6875_v41  ;;  %6516 = vadd.xlane.f32.xlu1 %v6515_v22  ;;  %6513 = vadd.xlane.f32.xlu0 %v6512_v29  ;;  %v5905_v41 = vsub.f32 %v18675_v45, %v16141_v56  ;;  %11700 = vpow2.f32 %v6156_v33  ;;  %v18679_v33 = vld [vmem:[#allocation255_spill] sm:$0xff] }
 0x642   : > { %v7831_v5 = vunpack.c.l.b16 %v6869_v34  ;;  %v11691_v47 = vpop.eup %11690  ;;  %v6150_v40 = vmul.f32 1.442695, %v5901_v6  ;;  %v16280_v6 = vpop.f32.mrf.mxu2 }
 0x643   : > { %v7916_v17 = vpack.c.b16 %v7915_v42, %v7914_v27  ;;  %v11693_v51 = vpop.eup %11692  ;;  %v6744_v24 = vmul.f32 %v11691_v47, %v18677_v58  ;;  %v6367_v32 = vpop.xlane.xlu2 %6366  ;;  %v18678_v27 = vld [vmem:[#allocation211_spill] sm:$0xff]  ;;  %v6158_v58 = vmul.f32 1.442695, %v5905_v41  ;;  %v18683_v47 = vld [vmem:[#allocation248_spill] sm:$0xff]  ;;  %v6509_v41 = vsel %vm3485_vm0, %v16250_v30, 0.0 }
 0x644   : > { %v7832_v16 = vpack.c.b16 %v7831_v5, %v7830_v10  ;;  %v11695_v34 = vpop.eup %11694  ;;  %11702 = vrcp.f32 %v6367_v32  ;;  %v6382_v29 = vpop.xlane.xlu0 %6381  ;;  %v18681_v10 = vpack.c.b16 %v18679_v33, %v18680_v36  ;;  %v18682_v5 = vld [vmem:[#allocation250_spill] sm:$0xff] }
 0x645   : > { %v6385_v22 = vpop.xlane.xlu1 %6384  ;;  %10911 = vmatmul.msk.bf16.vlgmr.msra.gmra.mxu3 %vm3485_vm0, %v7916_v17  ;;  %v16268_v1 = vpop.eup %11696  ;;  %v6872_v56 = vpack.c.bf16 %v6744_v24, %v6744_v24  ;;  %v6745_v42 = vmul.f32 %v11695_v34, %v18678_v27  ;;  %v18684_v45 = vpack.c.b16 %v18682_v5, %v18683_v47  ;;  %v6503_v17 = vsel %vm3485_vm0, %v16256_v12, 0.0  ;;  %v18685_v24 = vld [vmem:[#allocation54_spill] sm:$0xff] }
 0x646   : > { %11704 = vrcp.f32 %v6385_v22  ;;  %10908 = vmatmul.msk.bf16.vlgmr.msra.gmra.mxu0 %vm3485_vm0, %v7832_v16  ;;  %8157 = vmatpush.bf16.msra.mxu3 %v18681_v10  ;;  %v5907_v32 = vsub.f32 %v18685_v24, %v16165_v13  ;;  %v18686_v16 = vld [vmem:[#allocation57_spill] sm:$0xff]  ;;  %v16285_v27 = vpop.eup %11698  ;;  %v16293_v36 = vpop.f32.mrf.mxu3 }
 0x647   : > { %8073 = vmatpush.bf16.msra.mxu0 %v18684_v45  ;;  %11706 = vrcp.f32 %v6382_v29  ;;  %v6742_v34 = vmul.f32 %v11693_v51, %v18686_v16  ;;  %v6873_v22 = vpack.c.bf16 %v6745_v42, %v6745_v42  ;;  %v6521_v29 = vsel %vm3485_vm0, %v16268_v1, 0.0  ;;  %v16291_v33 = vpop.eup %11700 }
 0x648   : > { %11708 = vpow2.f32 %v6160_v25  ;;  %6504 = vadd.xlane.f32.xlu2 %v6503_v17  ;;  %v7886_v25 = vunpack.c.l.b16 %v6872_v56  ;;  %v16295_v42 = vpop.f32.mrf.mxu1  ;;  %v6162_v5 = vmul.f32 1.442695, %v5907_v32 }
 0x649   : > { %11710 = vpow2.f32 %v6150_v40  ;;  %v7887_v10 = vunpack.c.l.b16 %v6873_v22  ;;  %6510 = vadd.xlane.f32.xlu1 %v6509_v41  ;;  %6522 = vadd.xlane.f32.xlu0 %v6521_v29  ;;  %18687 = vst [vmem:[#allocation187_spill] sm:$0xff] %v16295_v42  ;;  %v6870_v47 = vpack.c.bf16 %v6742_v34, %v6742_v34  ;;  %v16302_v29 = vpop.f32.mrf.mxu0 }
 0x64a   : > { %v11703_v13 = vpop.eup %11702  ;;  %11712 = vpow2.f32 %v6158_v58  ;;  %18688 = vst [vmem:[#allocation74_spill] sm:$0xff] %v16302_v29  ;;  %v18689_v58 = vld [vmem:[#allocation165_spill] sm:$0xff] }
 0x64b   : > { %v7888_v45 = vpack.c.b16 %v7887_v10, %v7886_v25  ;;  %v6743_v17 = vmul.f32 %v11703_v13, %v15825_v21  ;;  %v6388_v24 = vpop.xlane.xlu2 %6387  ;;  %11714 = vrcp.f32 %v16238_v55  ;;  %v5902_v42 = vsub.f32 %v18689_v58, %v16050_v23  ;;  %v18690_v21 = vld [vmem:[#allocation107_spill] sm:$0xff]  ;;  %v18692_v10 = vld [vmem:[#allocation252_spill] sm:$0xff] }
 0x64c   : > { %v11705_v51 = vpop.eup %11704  ;;  %v6394_v22 = vpop.xlane.xlu0 %6393  ;;  %v5903_v55 = vsub.f32 %v18690_v21, %v16109_v52  ;;  %v7858_v23 = vunpack.c.l.b16 %v6870_v47  ;;  %v6524_v52 = vsel %vm3485_vm0, %v16285_v27, 0.0 }
 0x64d   : > { %v11707_v16 = vpop.eup %11706  ;;  %v6749_v40 = vmul.f32 %v11705_v51, %v15842_v48  ;;  %v6397_v56 = vpop.xlane.xlu1 %6396  ;;  %v6871_v32 = vpack.c.bf16 %v6743_v17, %v6743_v17  ;;  %10910 = vmatmul.msk.bf16.vlgmr.msra.gmra.mxu2 %vm3485_vm0, %v7888_v45  ;;  %v18691_v48 = vld [vmem:[#allocation254_spill] sm:$0xff]  ;;  %v6536_v51 = vsel %vm3485_vm0, %v16291_v33, 0.0 }
 0x64e   : > { %v16300_v41 = vpop.eup %11708  ;;  %v6748_v34 = vmul.f32 %v11707_v16, %v15832_v20  ;;  %11716 = vrcp.f32 %v6397_v56  ;;  %v18693_v13 = vpack.c.b16 %v18691_v48, %v18692_v10  ;;  %v16323_v56 = vpop.f32.mrf.mxu2 }
 0x64f   : > { %v6877_v25 = vpack.c.bf16 %v6749_v40, %v6749_v40  ;;  %11718 = vrcp.f32 %v6394_v22  ;;  %v16315_v0 = vpop.eup %11710  ;;  %v7859_v20 = vunpack.c.l.b16 %v6871_v32  ;;  %v6542_v40 = vsel %vm3485_vm0, %v16300_v41, 0.0  ;;  %v16325_v32 = vpop.f32.mrf.mxu3 }
 0x650   : > { %8129 = vmatpush.bf16.msra.mxu2 %v18693_v13  ;;  %11720 = vpow2.f32 %v6162_v5  ;;  %v6876_v17 = vpack.c.bf16 %v6748_v34, %v6748_v34  ;;  %v16317_v16 = vpop.eup %11712  ;;  %6537 = vadd.xlane.f32.xlu2 %v6536_v51  ;;  %v6152_v22 = vmul.f32 1.442695, %v5902_v42  ;;  %v6154_v34 = vmul.f32 1.442695, %v5903_v55  ;;  %v18694_v13 = vld [vmem:[#allocation251_spill] sm:$0xff]  ;;  %v18695_v51 = vld [vmem:[#allocation249_spill] sm:$0xff] }
 0x651   : > { %v7943_v45 = vunpack.c.l.b16 %v6877_v25  ;;  %11722 = vrcp.f32 %v6388_v24  ;;  %v7860_v58 = vpack.c.b16 %v7859_v20, %v7858_v23  ;;  %6525 = vadd.xlane.f32.xlu1 %v6524_v52  ;;  %6543 = vadd.xlane.f32.xlu0 %v6542_v40  ;;  %v11715_v5 = vpop.eup %11714  ;;  %v18696_v29 = vpack.c.b16 %v18694_v13, %v18695_v51  ;;  %v16336_v55 = vpop.f32.mrf.mxu0  ;;  %v18699_v40 = vld [vmem:[#allocation173_spill] sm:$0xff] }
 0x652   : > { %v7942_v21 = vunpack.c.l.b16 %v6876_v17  ;;  %v16334_v17 = vpop.f32.mrf.mxu1  ;;  %18698 = vst [vmem:[#allocation190_spill] sm:$0xff] %v16336_v55 }
 0x653   : > { %10909 = vmatmul.msk.bf16.vlgmr.msra.gmra.mxu1 %vm3485_vm0, %v7860_v58  ;;  %v6403_v25 = vpop.xlane.xlu2 %6402  ;;  %18697 = vst [vmem:[#allocation192_spill] sm:$0xff] %v16334_v17  ;;  %v18700_v58 = vld [vmem:[#allocation172_spill] sm:$0xff] }
 0x654   : > { %v11717_v47 = vpop.eup %11716  ;;  %v7944_v24 = vpack.c.b16 %v7943_v45, %v7942_v21  ;;  %8101 = vmatpush.bf16.msra.mxu1 %v18696_v29  ;;  %11724 = vrcp.f32 %v6403_v25  ;;  %v6391_v23 = vpop.xlane.xlu0 %6390  ;;  %v18701_v21 = vpack.c.b16 %v18699_v40, %v18700_v58  ;;  %v18702_v29 = vld [vmem:[#allocation210_spill] sm:$0xff] }
 0x655   : > { %v11719_v48 = vpop.eup %11718  ;;  %v6753_v10 = vmul.f32 %v11717_v47, %v15863_v50  ;;  %v6406_v42 = vpop.xlane.xlu1 %6405  ;;  %11726 = vpow2.f32 %v6152_v22  ;;  %v6754_v47 = vmul.f32 %v11715_v5, %v18702_v29  ;;  %v6527_v22 = vsel %vm3485_vm0, %v16315_v0, 0.0 }
 0x656   : > { %v16332_v20 = vpop.eup %11720  ;;  %v6752_v45 = vmul.f32 %v11719_v48, %v15858_v3  ;;  %10912 = vmatmul.msk.bf16.vlgmr.msrb.gmra.mxu0 %vm3485_vm0, %v7944_v24  ;;  %11728 = vrcp.f32 %v6391_v23  ;;  %v6539_v24 = vsel %vm3485_vm0, %v16317_v16, 0.0  ;;  %v16350_v48 = vpop.f32.mrf.mxu2 }
 0x657   : > { %v11723_v52 = vpop.eup %11722  ;;  %v6881_v50 = vpack.c.bf16 %v6753_v10, %v6753_v10  ;;  %8185 = vmatpush.bf16.msrb.mxu0 %v18701_v21  ;;  %11730 = vpow2.f32 %v6154_v34  ;;  %v6545_v3 = vsel %vm3485_vm0, %v16332_v20, 0.0  ;;  %18703 = vst [vmem:[#allocation76_spill] sm:$0xff] %v16350_v48  ;;  %v16355_v23 = vpop.f32.mrf.mxu3 }
 0x658   : > { %v6880_v25 = vpack.c.bf16 %v6752_v45, %v6752_v45  ;;  %6528 = vadd.xlane.f32.xlu2 %v6527_v22  ;;  %v6750_v10 = vmul.f32 %v11723_v52, %v15856_v19  ;;  %18704 = vst [vmem:[#allocation193_spill] sm:$0xff] %v16355_v23  ;;  %v6882_v45 = vpack.c.bf16 %v6754_v47, %v6754_v47  ;;  %11732 = vrcp.f32 %v6406_v42  ;;  %v18707_v47 = vld [vmem:[#allocation176_spill] sm:$0xff] }
 0x659   : > { %v7999_v13 = vunpack.c.l.b16 %v6881_v50  ;;  %6546 = vadd.xlane.f32.xlu1 %v6545_v3  ;;  %6540 = vadd.xlane.f32.xlu0 %v6539_v24  ;;  %v18706_v3 = vld [vmem:[#allocation177_spill] sm:$0xff] }
 0x65a   : > { %v7998_v51 = vunpack.c.l.b16 %v6880_v25  ;;  %v11725_v5 = vpop.eup %11724  ;;  %v16360_v48 = vpop.f32.mrf.mxu1  ;;  %v6878_v19 = vpack.c.bf16 %v6750_v10, %v6750_v10  ;;  %v8026_v24 = vunpack.c.l.b16 %v6882_v45 }
 0x65b   : > { %v16353_v34 = vpop.eup %11726  ;;  %v6755_v40 = vmul.f32 %v11725_v5, %v15893_v44  ;;  %v6424_v58 = vpop.xlane.xlu2 %6423  ;;  %18705 = vst [vmem:[#allocation75_spill] sm:$0xff] %v16360_v48 }
 0x65c   : > { %v8000_v50 = vpack.c.b16 %v7999_v13, %v7998_v51  ;;  %v11729_v21 = vpop.eup %11728  ;;  %v6412_v22 = vpop.xlane.xlu0 %6411  ;;  %v18708_v13 = vpack.c.b16 %v18706_v3, %v18707_v47  ;;  %v6530_v23 = vsel %vm3485_vm0, %v16353_v34, 0.0 }
 0x65d   : > { %v6418_v29 = vpop.xlane.xlu1 %6417  ;;  %v16358_v17 = vpop.eup %11730  ;;  %v6883_v52 = vpack.c.bf16 %v6755_v40, %v6755_v40  ;;  %v6751_v25 = vmul.f32 %v11729_v21, %v15888_v46  ;;  %11734 = vrcp.f32 %v6412_v22  ;;  %v7970_v46 = vunpack.c.l.b16 %v6878_v19 }
 0x65e   : > { %10914 = vmatmul.msk.bf16.vlgmr.msrb.gmra.mxu2 %vm3485_vm0, %v8000_v50  ;;  %v16367_v44 = vpop.f32.mrf.mxu0  ;;  %v6533_v42 = vsel %vm3485_vm0, %v16358_v17, 0.0  ;;  %11736 = vrcp.f32 %v6424_v58  ;;  %v11733_v40 = vpop.eup %11732 }
 0x65f   : > { %8241 = vmatpush.bf16.msrb.mxu2 %v18708_v13  ;;  %18709 = vst [vmem:[#allocation169_spill] sm:$0xff] %v16367_v44  ;;  %v8027_v51 = vunpack.c.l.b16 %v6883_v52  ;;  %v6879_v5 = vpack.c.bf16 %v6751_v25, %v6751_v25  ;;  %v16373_v21 = vpop.f32.mrf.mxu2  ;;  %v18711_v52 = vld [vmem:[#allocation175_spill] sm:$0xff]  ;;  %v18712_v25 = vld [vmem:[#allocation174_spill] sm:$0xff]  ;;  %v16379_v13 = vpop.f32.mrf.mxu3  ;;  %v6756_v19 = vmul.f32 %v11733_v40, %v15901_v57 }
 0x660   : > { %6531 = vadd.xlane.f32.xlu2 %v6530_v23  ;;  %18710 = vst [vmem:[#allocation168_spill] sm:$0xff] %v16373_v21  ;;  %v18713_v22 = vpack.c.b16 %v18711_v52, %v18712_v25  ;;  %v18721_v21 = vld [vmem:[#allocation214_spill] sm:$0xff] }
 0x661   : > { %v8028_v10 = vpack.c.b16 %v8027_v51, %v8026_v24  ;;  %v7971_v50 = vunpack.c.l.b16 %v6879_v5  ;;  %6534 = vadd.xlane.f32.xlu0 %v6533_v42  ;;  %18714 = vst [vmem:[#allocation275_spill] sm:$0xff] %v16379_v13  ;;  %v18715_v24 = vld [vmem:[#allocation171_spill] sm:$0xff]  ;;  %v18716_v51 = vld [vmem:[#allocation170_spill] sm:$0xff] }
 0x662   : > { %v18717_v5 = vpack.c.b16 %v18715_v24, %v18716_v51 }
 0x663   : > { %v7972_v3 = vpack.c.b16 %v7971_v50, %v7970_v46  ;;  %v6409_v45 = vpop.xlane.xlu2 %6408  ;;  %10915 = vmatmul.msk.bf16.vlgmr.msrb.gmra.mxu3 %vm3485_vm0, %v8028_v10  ;;  %v11735_v58 = vpop.eup %11734 }
 0x664   : > { %11738 = vrcp.f32 %v6409_v45  ;;  %8269 = vmatpush.bf16.msrb.mxu3 %v18713_v22  ;;  %v6427_v47 = vpop.xlane.xlu0 %6426  ;;  %v11737_v42 = vpop.eup %11736  ;;  %v6758_v50 = vmul.f32 %v11735_v58, %v15915_v62 }
 0x665   : > { %v6415_v23 = vpop.xlane.xlu1 %6414  ;;  %11740 = vrcp.f32 %v6418_v29  ;;  %10913 = vmatmul.msk.bf16.vlgmr.msrb.gmra.mxu1 %vm3485_vm0, %v7972_v3  ;;  %v16386_v46 = vpop.f32.mrf.mxu1  ;;  %v6884_v29 = vpack.c.bf16 %v6756_v19, %v6756_v19  ;;  %v6762_v3 = vmul.f32 %v11737_v42, %v15921_v37 }
 0x666   : > { %11742 = vrcp.f32 %v6415_v23  ;;  %8213 = vmatpush.bf16.msrb.mxu1 %v18717_v5  ;;  %v16388_v10 = vpop.f32.mrf.mxu0 }
 0x667   : > { %18718 = vst [vmem:[#allocation273_spill] sm:$0xff] %v16388_v10  ;;  %11744 = vrcp.f32 %v6427_v47  ;;  %v16392_v25 = vpop.f32.mrf.mxu2  ;;  %v16395_v5 = vpop.f32.mrf.mxu3  ;;  %v6886_v47 = vpack.c.bf16 %v6758_v50, %v6758_v50  ;;  %v8054_v58 = vunpack.c.l.b16 %v6884_v29  ;;  %v6890_v19 = vpack.c.bf16 %v6762_v3, %v6762_v3 }
 0x668   : > { %18719 = vst [vmem:[#allocation178_spill] sm:$0xff] %v16392_v25 }
 0x669   : > { %v8082_v44 = vunpack.c.l.b16 %v6886_v47  ;;  %v8138_v48 = vunpack.c.l.b16 %v6890_v19 }
 0x66a   : > { %v11739_v45 = vpop.eup %11738 }
 0x66b   : > { %v11741_v52 = vpop.eup %11740  ;;  %v6757_v57 = vmul.f32 %v11739_v45, %v15951_v39  ;;  %v6421_v40 = vpop.xlane.xlu2 %6420 }
 0x66c   : > { %v11743_v22 = vpop.eup %11742  ;;  %11746 = vrcp.f32 %v6421_v40  ;;  %v6448_v24 = vpop.xlane.xlu0 %6447  ;;  %v6760_v39 = vmul.f32 %v11741_v52, %v18721_v21  ;;  %v18725_v52 = vld [vmem:[#allocation256_spill] sm:$0xff] }
 0x66d   : > { %v6436_v23 = vpop.xlane.xlu1 %6435  ;;  %v11745_v51 = vpop.eup %11744  ;;  %v6885_v10 = vpack.c.bf16 %v6757_v57, %v6757_v57  ;;  %v6759_v62 = vmul.f32 %v11743_v22, %v15941_v14  ;;  %11748 = vrcp.f32 %v6448_v24  ;;  %v18723_v22 = vld [vmem:[#allocation212_spill] sm:$0xff] }
 0x66e   : > { %v6763_v37 = vmul.f32 %v11745_v51, %v15945_v28  ;;  %v16399_v42 = vpop.f32.mrf.mxu1  ;;  %v16402_v55 = vpop.f32.mrf.mxu0  ;;  %v6888_v29 = vpack.c.bf16 %v6760_v39, %v6760_v39 }
 0x66f   : > { %18720 = vst [vmem:[#allocation167_spill] sm:$0xff] %v16399_v42  ;;  %v8055_v45 = vunpack.c.l.b16 %v6885_v10  ;;  %v6887_v13 = vpack.c.bf16 %v6759_v62, %v6759_v62  ;;  %v18724_v10 = vld [vmem:[#allocation258_spill] sm:$0xff] }
 0x670   : > { %v6891_v40 = vpack.c.bf16 %v6763_v37, %v6763_v37  ;;  %18722 = vst [vmem:[#allocation166_spill] sm:$0xff] %v16402_v55  ;;  %v18726_v24 = vpack.c.b16 %v18724_v10, %v18725_v52  ;;  %v18728_v37 = vld [vmem:[#allocation257_spill] sm:$0xff]  ;;  %v8110_v39 = vunpack.c.l.b16 %v6888_v29 }
 0x671   : > { %v8056_v25 = vpack.c.b16 %v8055_v45, %v8054_v58  ;;  %v8083_v50 = vunpack.c.l.b16 %v6887_v13  ;;  %v16409_v13 = vpop.f32.mrf.mxu2 }
 0x672   : > { %v11747_v57 = vpop.eup %11746  ;;  %v8139_v14 = vunpack.c.l.b16 %v6891_v40  ;;  %v18730_v40 = vld [vmem:[#allocation263_spill] sm:$0xff] }
 0x673   : > { %v8084_v3 = vpack.c.b16 %v8083_v50, %v8082_v44  ;;  %v6761_v28 = vmul.f32 %v11747_v57, %v18723_v22  ;;  %v6430_v51 = vpop.xlane.xlu2 %6429  ;;  %10916 = vmatmul.msk.bf16.vlgmr.msra.gmra.mxu0 %vm3485_vm0, %v8056_v25  ;;  %v11749_v58 = vpop.eup %11748  ;;  %v18727_v44 = vld [vmem:[#allocation259_spill] sm:$0xff]  ;;  %v18731_v50 = vld [vmem:[#allocation261_spill] sm:$0xff] }
 0x674   : > { %v8140_v21 = vpack.c.b16 %v8139_v14, %v8138_v48  ;;  %11750 = vrcp.f32 %v6430_v51  ;;  %8297 = vmatpush.bf16.msra.mxu0 %v18726_v24  ;;  %v6433_v47 = vpop.xlane.xlu0 %6432  ;;  %v18729_v25 = vpack.c.b16 %v18727_v44, %v18728_v37  ;;  %v16416_v48 = vpop.f32.mrf.mxu3  ;;  %v18732_v57 = vpack.c.b16 %v18730_v40, %v18731_v50 }
 0x675   : > { %v6451_v62 = vpop.xlane.xlu1 %6450  ;;  %v6889_v19 = vpack.c.bf16 %v6761_v28, %v6761_v28  ;;  %10917 = vmatmul.msk.bf16.vlgmr.msra.gmra.mxu1 %vm3485_vm0, %v8084_v3  ;;  %v6770_v14 = vmul.f32 %v11749_v58, %v15967_v31 }
 0x676   : > { %11752 = vrcp.f32 %v6451_v62  ;;  %10919 = vmatmul.msk.bf16.vlgmr.msra.gmra.mxu3 %vm3485_vm0, %v8140_v21  ;;  %8325 = vmatpush.bf16.msra.mxu1 %v18729_v25  ;;  %v16422_v22 = vpop.f32.mrf.mxu1 }
 0x677   : > { %11754 = vrcp.f32 %v6433_v47  ;;  %v8111_v45 = vunpack.c.l.b16 %v6889_v19  ;;  %8381 = vmatpush.bf16.msra.mxu3 %v18732_v57  ;;  %18733 = vst [vmem:[#allocation181_spill] sm:$0xff] %v16422_v22  ;;  %v6898_v29 = vpack.c.bf16 %v6770_v14, %v6770_v14  ;;  %v18734_v47 = vld [vmem:[#allocation262_spill] sm:$0xff]  ;;  %v18735_v19 = vld [vmem:[#allocation260_spill] sm:$0xff] }
 0x678   : > { %v18736_v44 = vpack.c.b16 %v18734_v47, %v18735_v19 }
 0x679   : > { %v8112_v3 = vpack.c.b16 %v8111_v45, %v8110_v39  ;;  %v16430_v37 = vpop.f32.mrf.mxu2  ;;  %v18738_v39 = vld [vmem:[#allocation213_spill] sm:$0xff]  ;;  %v8250_v57 = vunpack.c.l.b16 %v6898_v29 }
 0x67a   : > { %v7627_v28 = vpop.f32.mrf.mxu0  ;;  %v11751_v51 = vpop.eup %11750  ;;  %18737 = vst [vmem:[#allocation180_spill] sm:$0xff] %v16430_v37 }
 0x67b   : > { %v6764_v10 = vmul.f32 %v11751_v51, %v15983_v4  ;;  %v6442_v52 = vpop.xlane.xlu2 %6441  ;;  %10918 = vmatmul.msk.bf16.vlgmr.msra.gmra.mxu2 %vm3485_vm0, %v8112_v3  ;;  %v8772_v14 = vpack.c.bf16 %v7627_v28, %v7627_v28 }
 0x67c   : > { %v11753_v21 = vpop.eup %11752  ;;  %11756 = vrcp.f32 %v6442_v52  ;;  %8353 = vmatpush.bf16.msra.mxu2 %v18736_v44  ;;  %v6445_v58 = vpop.xlane.xlu0 %6444 }
 0x67d   : > { %v11755_v24 = vpop.eup %11754  ;;  %v6771_v62 = vmul.f32 %v11753_v21, %v15993_v61  ;;  %v6472_v31 = vpop.xlane.xlu1 %6471  ;;  %11758 = vrcp.f32 %v6436_v23  ;;  %v6892_v25 = vpack.c.bf16 %v6764_v10, %v6764_v10 }
 0x67e   : > { %v6765_v4 = vmul.f32 %v11755_v24, %v18738_v39  ;;  %11760 = vrcp.f32 %v6445_v58  ;;  %v16433_v40 = vpop.f32.mrf.mxu3  ;;  %v16436_v58 = vunpack.c.l.b16 %v8772_v14 }
 0x67f   : > { %v6899_v45 = vpack.c.bf16 %v6771_v62, %v6771_v62  ;;  %18739 = vst [vmem:[#allocation34_spill] sm:$0xff] %v16433_v40  ;;  %v8166_v3 = vunpack.c.l.b16 %v6892_v25 }
 0x680   : > { %v6893_v50 = vpack.c.bf16 %v6765_v4, %v6765_v4 }
 0x681   : > { %v8251_v61 = vunpack.c.l.b16 %v6899_v45  ;;  %v7655_v52 = vpop.f32.mrf.mxu1 }
 0x682   : > { %v8167_v51 = vunpack.c.l.b16 %v6893_v50  ;;  %v7629_v21 = vpop.f32.mrf.mxu0  ;;  %v11757_v47 = vpop.eup %11756  ;;  %v18741_v50 = vld [vmem:[#allocation16_spill] sm:$0xff] }
 0x683   : > { %v8252_v19 = vpack.c.b16 %v8251_v61, %v8250_v57  ;;  %v8773_v44 = vpack.c.bf16 %v7629_v21, %v7629_v21  ;;  %v11759_v42 = vpop.eup %11758  ;;  %v6768_v10 = vmul.f32 %v11757_v47, %v16015_v54  ;;  %v6439_v24 = vpop.xlane.xlu2 %6438  ;;  %v18740_v54 = vld [vmem:[#allocation17_spill] sm:$0xff]  ;;  %v18743_v61 = vld [vmem:[#allocation215_spill] sm:$0xff] }
 0x684   : > { %v8168_v23 = vpack.c.b16 %v8167_v51, %v8166_v3  ;;  %v11761_v62 = vpop.eup %11760  ;;  %11762 = vrcp.f32 %v6439_v24  ;;  %v6454_v28 = vpop.xlane.xlu0 %6453  ;;  %v18742_v57 = vpack.c.b16 %v18740_v54, %v18741_v50  ;;  %v6766_v14 = vmul.f32 %v11759_v42, %v18743_v61  ;;  %v18745_v21 = vld [vmem:[#allocation19_spill] sm:$0xff] }
 0x685   : > { %v16438_v39 = vunpack.c.l.b16 %v8773_v44  ;;  %v6457_v29 = vpop.xlane.xlu1 %6456  ;;  %v6896_v25 = vpack.c.bf16 %v6768_v10, %v6768_v10  ;;  %v6769_v4 = vmul.f32 %v11761_v62, %v16020_v11  ;;  %v16449_v3 = vpop.f32.mrf.mxu2  ;;  %v18746_v11 = vld [vmem:[#allocation18_spill] sm:$0xff]  ;;  %v8774_v44 = vpack.c.bf16 %v7655_v52, %v7655_v52 }
 0x686   : > { %11764 = vrcp.f32 %v6457_v29  ;;  %10920 = vmatmul.msk.bf16.vlgmr.msrb.gmra.mxu0 %vm3485_vm0, %v8168_v23  ;;  %10923 = vmatmul.msk.bf16.vlgmr.msrb.gmra.mxu3 %vm3485_vm0, %v8252_v19  ;;  %18744 = vst [vmem:[#allocation182_spill] sm:$0xff] %v16449_v3  ;;  %v18747_v47 = vpack.c.b16 %v18745_v21, %v18746_v11  ;;  %v16454_v23 = vpop.f32.mrf.mxu3  ;;  %v6894_v50 = vpack.c.bf16 %v6766_v14, %v6766_v14 }
 0x687   : > { %8409 = vmatpush.bf16.msrb.mxu0 %v18742_v57  ;;  %11766 = vrcp.f32 %v6454_v28  ;;  %v6897_v51 = vpack.c.bf16 %v6769_v4, %v6769_v4  ;;  %18748 = vst [vmem:[#allocation274_spill] sm:$0xff] %v16454_v23  ;;  %v8222_v10 = vunpack.c.l.b16 %v6896_v25  ;;  %v16457_v4 = vunpack.c.l.b16 %v8774_v44 }
 0x688   : > { %8493 = vmatpush.bf16.msrb.mxu3 %v18747_v47  ;;  %11768 = vrcp.f32 %v6472_v31  ;;  %v18749_v47 = vld [vmem:[#allocation110_spill] sm:$0xff]  ;;  %v18751_v31 = vld [vmem:[#allocation20_spill] sm:$0xff] }
 0x689   : > { %v8223_v24 = vunpack.c.l.b16 %v6897_v51  ;;  %v7657_v19 = vpop.f32.mrf.mxu1 }
 0x68a   : > { %v11763_v62 = vpop.eup %11762  ;;  %v8775_v29 = vpack.c.bf16 %v7657_v19, %v7657_v19 }
 0x68b   : > { %v8224_v28 = vpack.c.b16 %v8223_v24, %v8222_v10  ;;  %v6767_v42 = vmul.f32 %v11763_v62, %v16046_v43  ;;  %v6460_v57 = vpop.xlane.xlu2 %6459  ;;  %v18750_v10 = vld [vmem:[#allocation21_spill] sm:$0xff] }
 0x68c   : > { %v11765_v54 = vpop.eup %11764  ;;  %v16460_v52 = vunpack.c.l.b16 %v8775_v29  ;;  %v6466_v25 = vpop.xlane.xlu0 %6465  ;;  %v18752_v44 = vpack.c.b16 %v18750_v10, %v18751_v31  ;;  %v18753_v10 = vld [vmem:[#allocation117_spill] sm:$0xff] }
 0x68d   : > { %v11767_v61 = vpop.eup %11766  ;;  %v6773_v21 = vmul.f32 %v11765_v54, %v16059_v15  ;;  %v6469_v11 = vpop.xlane.xlu1 %6468  ;;  %v6895_v51 = vpack.c.bf16 %v6767_v42, %v6767_v42  ;;  %10922 = vmatmul.msk.bf16.vlgmr.msrb.gmra.mxu2 %vm3485_vm0, %v8224_v28  ;;  %v8194_v15 = vunpack.c.l.b16 %v6894_v50  ;;  %v18754_v50 = vld [vmem:[#allocation15_spill] sm:$0xff] }
 0x68e   : > { %v6772_v45 = vmul.f32 %v11767_v61, %v18749_v47  ;;  %11770 = vrcp.f32 %v6469_v11  ;;  %8465 = vmatpush.bf16.msrb.mxu2 %v18752_v44  ;;  %v16469_v54 = vpop.f32.mrf.mxu3  ;;  %v11769_v28 = vpop.eup %11768 }
 0x68f   : > { %v6901_v14 = vpack.c.bf16 %v6773_v21, %v6773_v21  ;;  %11772 = vrcp.f32 %v6466_v25  ;;  %v8195_v24 = vunpack.c.l.b16 %v6895_v51  ;;  %v18755_v25 = vld [vmem:[#allocation14_spill] sm:$0xff] }
 0x690   : > { %v6900_v19 = vpack.c.bf16 %v6772_v45, %v6772_v45  ;;  %v7683_v62 = vpop.f32.mrf.mxu2  ;;  %11774 = vrcp.f32 %v6460_v57  ;;  %v18756_v45 = vpack.c.b16 %v18754_v50, %v18755_v25 }
 0x691   : > { %v8279_v29 = vunpack.c.l.b16 %v6901_v14  ;;  %v8196_v42 = vpack.c.b16 %v8195_v24, %v8194_v15  ;;  %v18757_v14 = vld [vmem:[#allocation114_spill] sm:$0xff] }
 0x692   : > { %v8278_v61 = vunpack.c.l.b16 %v6900_v19  ;;  %v8776_v19 = vpack.c.bf16 %v7683_v62, %v7683_v62 }
 0x693   : > { %v6475_v47 = vpop.xlane.xlu2 %6474  ;;  %10921 = vmatmul.msk.bf16.vlgmr.msrb.gmra.mxu1 %vm3485_vm0, %v8196_v42 }
 0x694   : > { %v11771_v21 = vpop.eup %11770  ;;  %v8280_v11 = vpack.c.b16 %v8279_v29, %v8278_v61  ;;  %11776 = vrcp.f32 %v6475_v47  ;;  %8437 = vmatpush.bf16.msrb.mxu1 %v18756_v45  ;;  %v6463_v57 = vpop.xlane.xlu0 %6462  ;;  %v18758_v29 = vld [vmem:[#allocation266_spill] sm:$0xff]  ;;  %v18759_v61 = vld [vmem:[#allocation264_spill] sm:$0xff]  ;;  %v18762_v45 = vld [vmem:[#allocation111_spill] sm:$0xff] }
 0x695   : > { %v11773_v43 = vpop.eup %11772  ;;  %v6777_v31 = vmul.f32 %v11771_v21, %v18753_v10  ;;  %v6484_v51 = vpop.xlane.xlu1 %6483  ;;  %v18760_v42 = vpack.c.b16 %v18758_v29, %v18759_v61  ;;  %11778 = vrcp.f32 %v6463_v57  ;;  %v18761_v21 = vld [vmem:[#allocation112_spill] sm:$0xff] }
 0x696   : > { %v6776_v44 = vmul.f32 %v11773_v43, %v18757_v14  ;;  %10924 = vmatmul.msk.bf16.vlgmr.msra.gmra.mxu0 %vm3485_vm0, %v8280_v11  ;;  %v11775_v15 = vpop.eup %11774  ;;  %v6778_v47 = vmul.f32 %v11769_v28, %v18761_v21  ;;  %v16483_v14 = vunpack.c.l.b16 %v8776_v19  ;;  %v16487_v62 = vpop.f32.mrf.mxu3  ;;  %v18763_v61 = vld [vmem:[#allocation216_spill] sm:$0xff]  ;;  %11780 = vrcp.f32 %v6484_v51 }
 0x697   : > { %v6905_v24 = vpack.c.bf16 %v6777_v31, %v6777_v31  ;;  %8521 = vmatpush.bf16.msra.mxu0 %v18760_v42  ;;  %v6774_v37 = vmul.f32 %v11775_v15, %v18762_v45  ;;  %v18766_v45 = vld [vmem:[#allocation268_spill] sm:$0xff] }
 0x698   : > { %v6904_v10 = vpack.c.bf16 %v6776_v44, %v6776_v44  ;;  %v7685_v22 = vpop.f32.mrf.mxu2  ;;  %v6906_v31 = vpack.c.bf16 %v6778_v47, %v6778_v47 }
 0x699   : > { %v8335_v50 = vunpack.c.l.b16 %v6905_v24  ;;  %v8777_v25 = vpack.c.bf16 %v7685_v22, %v7685_v22  ;;  %v6902_v15 = vpack.c.bf16 %v6774_v37, %v6774_v37 }
 0x69a   : > { %v8334_v3 = vunpack.c.l.b16 %v6904_v10  ;;  %v11777_v43 = vpop.eup %11776  ;;  %v18764_v10 = vld [vmem:[#allocation218_spill] sm:$0xff] }
 0x69b   : > { %v16485_v11 = vunpack.c.l.b16 %v8777_v25  ;;  %v6779_v57 = vmul.f32 %v11777_v43, %v18763_v61  ;;  %v6478_v42 = vpop.xlane.xlu2 %6477  ;;  %v11779_v28 = vpop.eup %11778  ;;  %v18765_v25 = vld [vmem:[#allocation270_spill] sm:$0xff]  ;;  %v8306_v61 = vunpack.c.l.b16 %v6902_v15  ;;  %v18772_v15 = vld [vmem:[#allocation267_spill] sm:$0xff] }
 0x69c   : > { %v8336_v29 = vpack.c.b16 %v8335_v50, %v8334_v3  ;;  %v6496_v24 = vpop.xlane.xlu0 %6495  ;;  %v6775_v19 = vmul.f32 %v11779_v28, %v18764_v10  ;;  %v18767_v47 = vpack.c.b16 %v18765_v25, %v18766_v45  ;;  %v8362_v3 = vunpack.c.l.b16 %v6906_v31  ;;  %v11781_v51 = vpop.eup %11780  ;;  %v18770_v28 = vld [vmem:[#allocation269_spill] sm:$0xff] }
 0x69d   : > { %v6490_v22 = vpop.xlane.xlu1 %6489  ;;  %v6907_v21 = vpack.c.bf16 %v6779_v57, %v6779_v57  ;;  %11782 = vrcp.f32 %v6496_v24  ;;  %v18775_v25 = vld [vmem:[#allocation73_spill] sm:$0xff] }
 0x69e   : > { %10926 = vmatmul.msk.bf16.vlgmr.msra.gmra.mxu2 %vm3485_vm0, %v8336_v29  ;;  %v6903_v43 = vpack.c.bf16 %v6775_v19, %v6775_v19  ;;  %11784 = vrcp.f32 %v6478_v42  ;;  %v16497_v40 = vpop.f32.mrf.mxu3  ;;  %v18769_v29 = vld [vmem:[#allocation271_spill] sm:$0xff]  ;;  %v18773_v19 = vld [vmem:[#allocation265_spill] sm:$0xff]  ;;  %v6782_v45 = vmul.f32 %v11781_v51, %v18775_v25 }
 0x69f   : > { %8577 = vmatpush.bf16.msra.mxu2 %v18767_v47  ;;  %v8363_v50 = vunpack.c.l.b16 %v6907_v21  ;;  %18768 = vst [vmem:[#allocation272_spill] sm:$0xff] %v16497_v40  ;;  %11786 = vrcp.f32 %v6490_v22  ;;  %v18771_v10 = vpack.c.b16 %v18769_v29, %v18770_v28  ;;  %v18776_v47 = vld [vmem:[#allocation219_spill] sm:$0xff] }
 0x6a0   : > { %v8307_v55 = vunpack.c.l.b16 %v6903_v43 }
 0x6a1   : > { %v8364_v44 = vpack.c.b16 %v8363_v50, %v8362_v3 }
 0x6a2   : > { %v8308_v37 = vpack.c.b16 %v8307_v55, %v8306_v61  ;;  %v18774_v55 = vpack.c.b16 %v18772_v15, %v18773_v19 }
 0x6a3   : > { %v6487_v57 = vpop.xlane.xlu2 %6486  ;;  %10927 = vmatmul.msk.bf16.vlgmr.msra.gmra.mxu3 %vm3485_vm0, %v8364_v44  ;;  %v11783_v24 = vpop.eup %11782 }
 0x6a4   : > { %11788 = vrcp.f32 %v6487_v57  ;;  %8605 = vmatpush.bf16.msra.mxu3 %v18771_v10  ;;  %v6481_v21 = vpop.xlane.xlu0 %6480  ;;  %10925 = vmatmul.msk.bf16.vlgmr.msra.gmra.mxu1 %vm3485_vm0, %v8308_v37  ;;  %v11785_v42 = vpop.eup %11784  ;;  %v6786_v44 = vmul.f32 %v11783_v24, %v16131_v26 }
 0x6a5   : > { %v6499_v31 = vpop.xlane.xlu1 %6498  ;;  %8549 = vmatpush.bf16.msra.mxu1 %v18774_v55  ;;  %v11787_v22 = vpop.eup %11786  ;;  %v6780_v3 = vmul.f32 %v11785_v42, %v18776_v47  ;;  %v18777_v42 = vld [vmem:[#allocation223_spill] sm:$0xff] }
 0x6a6   : > { %11790 = vrcp.f32 %v6499_v31  ;;  %v6914_v37 = vpack.c.bf16 %v6786_v44, %v6786_v44  ;;  %v16513_v51 = vpop.f32.mrf.mxu3  ;;  %v6784_v19 = vmul.f32 %v11787_v22, %v18777_v42  ;;  %v18785_v42 = vld [vmem:[#allocation130_spill] sm:$0xff] }
 0x6a7   : > { %11792 = vrcp.f32 %v6481_v21  ;;  %v6910_v21 = vpack.c.bf16 %v6782_v45, %v6782_v45  ;;  %v6908_v15 = vpack.c.bf16 %v6780_v3, %v6780_v3 }
 0x6a8   : > { %v8474_v47 = vunpack.c.l.b16 %v6914_v37 }
 0x6a9   : > { %v8418_v44 = vunpack.c.l.b16 %v6910_v21  ;;  %v8390_v40 = vunpack.c.l.b16 %v6908_v15  ;;  %v18778_v21 = vld [vmem:[#allocation129_spill] sm:$0xff]  ;;  %v18779_v15 = vld [vmem:[#allocation128_spill] sm:$0xff] }
 0x6aa   : > { %v11789_v50 = vpop.eup %11788 }
 0x6ab   : > { %v6783_v61 = vmul.f32 %v11789_v50, %v16155_v59  ;;  %v6493_v57 = vpop.xlane.xlu2 %6492 }
 0x6ac   : > { %v11791_v43 = vpop.eup %11790  ;;  %11794 = vrcp.f32 %v6493_v57  ;;  %v6508_v31 = vpop.xlane.xlu0 %6507  ;;  %v6912_v57 = vpack.c.bf16 %v6784_v19, %v6784_v19 }
 0x6ad   : > { %v11793_v29 = vpop.eup %11792  ;;  %v6787_v28 = vmul.f32 %v11791_v43, %v16167_v35  ;;  %v6502_v10 = vpop.xlane.xlu1 %6501  ;;  %v6911_v26 = vpack.c.bf16 %v6783_v61, %v6783_v61 }
 0x6ae   : > { %v6781_v24 = vmul.f32 %v11793_v29, %v16176_v9  ;;  %11796 = vrcp.f32 %v6502_v10  ;;  %v16520_v37 = vpop.f32.mrf.mxu3  ;;  %v18782_v10 = vld [vmem:[#allocation126_spill] sm:$0xff] }
 0x6af   : > { %v6915_v55 = vpack.c.bf16 %v6787_v28, %v6787_v28  ;;  %v8419_v25 = vunpack.c.l.b16 %v6911_v26  ;;  %11798 = vrcp.f32 %v6508_v31  ;;  %v8446_v31 = vunpack.c.l.b16 %v6912_v57 }
 0x6b0   : > { %v6909_v59 = vpack.c.bf16 %v6781_v24, %v6781_v24  ;;  %v18784_v24 = vld [vmem:[#allocation131_spill] sm:$0xff] }
 0x6b1   : > { %v8475_v50 = vunpack.c.l.b16 %v6915_v55  ;;  %v8420_v45 = vpack.c.b16 %v8419_v25, %v8418_v44  ;;  %v18786_v19 = vpack.c.b16 %v18784_v24, %v18785_v42 }
 0x6b2   : > { %v8391_v35 = vunpack.c.l.b16 %v6909_v59  ;;  %v11795_v43 = vpop.eup %11794 }
 0x6b3   : > { %v8476_v23 = vpack.c.b16 %v8475_v50, %v8474_v47  ;;  %v6785_v61 = vmul.f32 %v11795_v43, %v16195_v38  ;;  %v6520_v9 = vpop.xlane.xlu2 %6519  ;;  %v18781_v38 = vld [vmem:[#allocation127_spill] sm:$0xff]  ;;  %v18788_v43 = vld [vmem:[#allocation132_spill] sm:$0xff] }
 0x6b4   : > { %v8392_v3 = vpack.c.b16 %v8391_v35, %v8390_v40  ;;  %v6514_v22 = vpop.xlane.xlu0 %6513  ;;  %10929 = vmatmul.msk.bf16.vlgmr.msrb.gmra.mxu1 %vm3485_vm0, %v8420_v45  ;;  %v18780_v40 = vpack.c.b16 %v18778_v21, %v18779_v15  ;;  %v18783_v26 = vpack.c.b16 %v18781_v38, %v18782_v10  ;;  %v11797_v55 = vpop.eup %11796  ;;  %v18787_v35 = vld [vmem:[#allocation133_spill] sm:$0xff] }
 0x6b5   : > { %v6517_v29 = vpop.xlane.xlu1 %6516  ;;  %10931 = vmatmul.msk.bf16.vlgmr.msrb.gmra.mxu3 %vm3485_vm0, %v8476_v23  ;;  %v6913_v28 = vpack.c.bf16 %v6785_v61, %v6785_v61  ;;  %v11799_v59 = vpop.eup %11798  ;;  %v18789_v45 = vpack.c.b16 %v18787_v35, %v18788_v43 }
 0x6b6   : > { %11800 = vrcp.f32 %v6517_v29  ;;  %10928 = vmatmul.msk.bf16.vlgmr.msrb.gmra.mxu0 %vm3485_vm0, %v8392_v3  ;;  %8661 = vmatpush.bf16.msrb.mxu1 %v18783_v26  ;;  %v6790_v21 = vmul.f32 %v11799_v59, %v16199_v63 }
 0x6b7   : > { %8633 = vmatpush.bf16.msrb.mxu0 %v18780_v40  ;;  %11802 = vrcp.f32 %v6514_v22  ;;  %v8447_v23 = vunpack.c.l.b16 %v6913_v28  ;;  %8717 = vmatpush.bf16.msrb.mxu3 %v18786_v19  ;;  %v6788_v22 = vmul.f32 %v11797_v55, %v16204_v2  ;;  %v16538_v28 = vpop.f32.mrf.mxu3  ;;  %v16542_v40 = vpop.f32.mrf.mxu0 }
 0x6b8   : > { %11804 = vrcp.f32 %v6520_v9  ;;  %v6918_v42 = vpack.c.bf16 %v6790_v21, %v6790_v21 }
 0x6b9   : > { %v8448_v25 = vpack.c.b16 %v8447_v23, %v8446_v31  ;;  %v6916_v23 = vpack.c.bf16 %v6788_v22, %v6788_v22  ;;  %v11235_v22 = vld [vmem:[%s17145_s4 + $0x8] sm:$0xff] }
 0x6bb   : > { %v6505_v50 = vpop.xlane.xlu2 %6504  ;;  %10930 = vmatmul.msk.bf16.vlgmr.msrb.gmra.mxu2 %vm3485_vm0, %v8448_v25  ;;  %v8502_v35 = vunpack.c.l.b16 %v6916_v23 }
 0x6bc   : > { %v11801_v47 = vpop.eup %11800  ;;  %11806 = vrcp.f32 %v6505_v50  ;;  %8689 = vmatpush.bf16.msrb.mxu2 %v18789_v45  ;;  %v6523_v3 = vpop.xlane.xlu0 %6522  ;;  %v8530_v45 = vunpack.c.l.b16 %v6918_v42 }
 0x6bd   : > { %v11803_v44 = vpop.eup %11802  ;;  %v6511_v57 = vpop.xlane.xlu1 %6510  ;;  %v6793_v9 = vmul.f32 %v11801_v47, %v16240_v53 }
 0x6be   : > { %v11805_v61 = vpop.eup %11804  ;;  %v6792_v29 = vmul.f32 %v11803_v44, %v16219_v8  ;;  %11808 = vrcp.f32 %v6511_v57  ;;  %v16547_v44 = vpop.f32.mrf.mxu1 }
 0x6bf   : > { %11810 = vrcp.f32 %v6523_v3  ;;  %v6794_v15 = vmul.f32 %v11805_v61, %v16228_v18  ;;  %v6921_v38 = vpack.c.bf16 %v6793_v9, %v6793_v9  ;;  %v16549_v57 = vpop.f32.mrf.mxu3 }
 0x6c0   : > { %v6920_v10 = vpack.c.bf16 %v6792_v29, %v6792_v29 }
 0x6c1   : > { %v6922_v19 = vpack.c.bf16 %v6794_v15, %v6794_v15  ;;  %v8559_v63 = vunpack.c.l.b16 %v6921_v38  ;;  %v11237_v15 = vld [vmem:[%s17145_s4 + $0x18] sm:$0xff]  ;;  %v11234_v38 = vld [vmem:[%s17145_s4] sm:$0xff] }
 0x6c2   : > { %v11807_v26 = vpop.eup %11806  ;;  %v8558_v59 = vunpack.c.l.b16 %v6920_v10  ;;  %v16563_v10 = vpop.f32.mrf.mxu0 }
 0x6c3   : > { %v6789_v53 = vmul.f32 %v11807_v26, %v16256_v12  ;;  %v6538_v8 = vpop.xlane.xlu2 %6537  ;;  %v8586_v61 = vunpack.c.l.b16 %v6922_v19  ;;  %v16569_v19 = vpop.f32.mrf.mxu2 }
 0x6c4   : > { %v11809_v31 = vpop.eup %11808  ;;  %v6544_v25 = vpop.xlane.xlu0 %6543  ;;  %v8560_v9 = vpack.c.b16 %v8559_v63, %v8558_v59 }
 0x6c5   : > { %v11811_v24 = vpop.eup %11810  ;;  %v6791_v2 = vmul.f32 %v11809_v31, %v16250_v30  ;;  %v6526_v55 = vpop.xlane.xlu1 %6525  ;;  %v6917_v18 = vpack.c.bf16 %v6789_v53, %v6789_v53  ;;  %v11236_v30 = vld [vmem:[%s17145_s4 + $0x10] sm:$0xff] }
 0x6c6   : > { %v6795_v47 = vmul.f32 %v11811_v24, %v16268_v1  ;;  %11812 = vrcp.f32 %v6526_v55 }
 0x6c7   : > { %v6919_v50 = vpack.c.bf16 %v6791_v2, %v6791_v2  ;;  %v8503_v43 = vunpack.c.l.b16 %v6917_v18  ;;  %11814 = vrcp.f32 %v6544_v25  ;;  %v16573_v25 = vpop.f32.mrf.mxu1  ;;  %v16576_v18 = vpop.f32.mrf.mxu3 }
 0x6c8   : > { %v6923_v12 = vpack.c.bf16 %v6795_v47, %v6795_v47  ;;  %11816 = vrcp.f32 %v6538_v8 }
 0x6c9   : > { %v8531_v3 = vunpack.c.l.b16 %v6919_v50  ;;  %v8504_v1 = vpack.c.b16 %v8503_v43, %v8502_v35 }
 0x6ca   : > { %v8587_v29 = vunpack.c.l.b16 %v6923_v12 }
 0x6cb   : > { %v8532_v21 = vpack.c.b16 %v8531_v3, %v8530_v45  ;;  %v6529_v31 = vpop.xlane.xlu2 %6528  ;;  %10932 = vmatmul.msk.bf16.vlgmr.msra.gmra.mxu0 %vm3485_vm0, %v8504_v1  ;;  %10934 = vmatmul.msk.bf16.vlgmr.msra.gmra.mxu2 %vm3485_vm0, %v8560_v9  ;;  %v16579_v45 = vpop.f32.mrf.mxu0 }
 0x6cc   : > { %v8588_v26 = vpack.c.b16 %v8587_v29, %v8586_v61  ;;  %v11813_v23 = vpop.eup %11812  ;;  %11818 = vrcp.f32 %v6529_v31  ;;  %v6541_v8 = vpop.xlane.xlu0 %6540  ;;  %9367 = vmatpush.bf16.msra.mxu2 %v11236_v30  ;;  %9209 = vmatpush.bf16.msra.mxu0 %v11235_v22 }
 0x6cd   : > { %v6547_v53 = vpop.xlane.xlu1 %6546  ;;  %10933 = vmatmul.msk.bf16.vlgmr.msra.gmra.mxu1 %vm3485_vm0, %v8532_v21  ;;  %v11815_v24 = vpop.eup %11814  ;;  %v6796_v2 = vmul.f32 %v11813_v23, %v16285_v27 }
 0x6ce   : > { %11820 = vrcp.f32 %v6547_v53  ;;  %10935 = vmatmul.msk.bf16.vlgmr.msra.gmra.mxu3 %vm3485_vm0, %v8588_v26  ;;  %v11817_v42 = vpop.eup %11816  ;;  %9288 = vmatpush.bf16.msra.mxu1 %v11234_v38  ;;  %v6802_v55 = vmul.f32 %v11815_v24, %v16300_v41  ;;  %v16583_v21 = vpop.f32.mrf.mxu2  ;;  %v11238_v38 = vld [vmem:[%s17145_s4 + $0x20] sm:$0xff]  ;;  %v11241_v24 = vld [vmem:[%s17145_s4 + $0x38] sm:$0xff] }
 0x6cf   : > { %11822 = vrcp.f32 %v6541_v8  ;;  %9462 = vmatpush.bf16.msra.mxu3 %v11237_v15  ;;  %v6800_v63 = vmul.f32 %v11817_v42, %v16291_v33  ;;  %v6924_v50 = vpack.c.bf16 %v6796_v2, %v6796_v2  ;;  %v11240_v8 = vld [vmem:[%s17145_s4 + $0x30] sm:$0xff] }
 0x6d0   : > { %v6930_v3 = vpack.c.bf16 %v6802_v55, %v6802_v55  ;;  %v16588_v23 = vpop.f32.mrf.mxu1 }
 0x6d1   : > { %v6928_v30 = vpack.c.bf16 %v6800_v63, %v6800_v63  ;;  %v8614_v1 = vunpack.c.l.b16 %v6924_v50  ;;  %v16598_v63 = vpop.f32.mrf.mxu3 }
 0x6d2   : > { %v11819_v59 = vpop.eup %11818 }
 0x6d3   : > { %v6797_v35 = vmul.f32 %v11819_v59, %v16315_v0  ;;  %v6532_v43 = vpop.xlane.xlu2 %6531  ;;  %v8698_v0 = vunpack.c.l.b16 %v6930_v3  ;;  %v16603_v50 = vpop.f32.mrf.mxu0  ;;  %v18790_v3 = vld [vmem:[#allocation84_spill] sm:$0xff] }
 0x6d4   : > { %v11821_v47 = vpop.eup %11820  ;;  %11824 = vrcp.f32 %v6532_v43  ;;  %v6535_v41 = vpop.xlane.xlu0 %6534 }
 0x6d5   : > { %v11823_v12 = vpop.eup %11822  ;;  %v6803_v27 = vmul.f32 %v11821_v47, %v16332_v20  ;;  %v6925_v61 = vpack.c.bf16 %v6797_v35, %v6797_v35  ;;  %11826 = vrcp.f32 %v6535_v41  ;;  %v8670_v20 = vunpack.c.l.b16 %v6928_v30  ;;  %v18791_v30 = vld [vmem:[#allocation116_spill] sm:$0xff] }
 0x6d6   : > { %v6801_v33 = vmul.f32 %v11823_v12, %v16317_v16  ;;  %v16605_v43 = vpop.f32.mrf.mxu2 }
 0x6d7   : > { %v6931_v9 = vpack.c.bf16 %v6803_v27, %v6803_v27  ;;  %v8615_v29 = vunpack.c.l.b16 %v6925_v61  ;;  %v8727_v27 = vpack.c.bf16 %v18790_v3, %v18790_v3  ;;  %v8726_v61 = vpack.c.bf16 %v18791_v30, %v18791_v30 }
 0x6d8   : > { %v6929_v22 = vpack.c.bf16 %v6801_v33, %v6801_v33  ;;  %v8731_v33 = vpack.c.bf16 %v16325_v32, %v16325_v32  ;;  %v8743_v3 = vpack.c.bf16 %v16260_v7, %v16260_v7  ;;  %v8747_v30 = vpack.c.bf16 %v16416_v48, %v16416_v48 }
 0x6d9   : > { %v8699_v15 = vunpack.c.l.b16 %v6931_v9  ;;  %v8616_v26 = vpack.c.b16 %v8615_v29, %v8614_v1  ;;  %v8729_v9 = vpack.c.bf16 %v16178_v60, %v16178_v60  ;;  %v16618_v1 = vpop.f32.mrf.mxu1  ;;  %v8730_v29 = vpack.c.bf16 %v16293_v36, %v16293_v36 }
 0x6da   : > { %v8671_v31 = vunpack.c.l.b16 %v6929_v22  ;;  %v11825_v53 = vpop.eup %11824  ;;  %v8871_v22 = vunpack.c.l.b16 %v8727_v27  ;;  %v8911_v7 = vunpack.c.l.b16 %v8743_v3  ;;  %v18797_v3 = vld [vmem:[#allocation75_spill] sm:$0xff] }
 0x6db   : > { %v8700_v16 = vpack.c.b16 %v8699_v15, %v8698_v0  ;;  %v11827_v42 = vpop.eup %11826  ;;  %v6798_v55 = vmul.f32 %v11825_v53, %v16353_v34  ;;  %10936 = vmatmul.msk.bf16.vlgmr.msrb.gmra.mxu0 %vm3485_vm0, %v8616_v26  ;;  %v18792_v0 = vld [vmem:[#allocation217_spill] sm:$0xff]  ;;  %v8875_v26 = vunpack.c.l.b16 %v8731_v33  ;;  %v8873_v32 = vunpack.c.l.b16 %v8729_v9 }
 0x6dc   : > { %v8672_v2 = vpack.c.b16 %v8671_v31, %v8670_v20  ;;  %v6799_v59 = vmul.f32 %v11827_v42, %v16358_v17  ;;  %9557 = vmatpush.bf16.msrb.mxu0 %v11238_v38  ;;  %v11239_v17 = vld [vmem:[%s17145_s4 + $0x28] sm:$0xff]  ;;  %v8728_v15 = vpack.c.bf16 %v18792_v0, %v18792_v0  ;;  %v16625_v38 = vpop.f32.mrf.mxu3  ;;  %v8870_v20 = vunpack.c.l.b16 %v8726_v61  ;;  %v16627_v31 = vpop.f32.mrf.mxu0 }
 0x6dd   : > { %v6926_v47 = vpack.c.bf16 %v6798_v55, %v6798_v55  ;;  %v8874_v60 = vunpack.c.l.b16 %v8730_v29  ;;  %v8745_v61 = vpack.c.bf16 %v16323_v56, %v16323_v56  ;;  %v8746_v9 = vpack.c.bf16 %v16395_v5, %v16395_v5 }
 0x6de   : > { %10938 = vmatmul.msk.bf16.vlgmr.msrb.gmra.mxu2 %vm3485_vm0, %v8672_v2  ;;  %10939 = vmatmul.msk.bf16.vlgmr.msrb.gmra.mxu3 %vm3485_vm0, %v8700_v16  ;;  %v6927_v35 = vpack.c.bf16 %v6799_v59, %v6799_v59  ;;  %v8885_v53 = vpack.c.b16 %v8871_v22, %v8870_v20  ;;  %v8872_v16 = vunpack.c.l.b16 %v8728_v15  ;;  %v16631_v42 = vpop.f32.mrf.mxu2  ;;  %v18794_v59 = vld [vmem:[#allocation113_spill] sm:$0xff]  ;;  %v8744_v29 = vpack.c.bf16 %v16280_v6, %v16280_v6  ;;  %v18796_v6 = vld [vmem:[#allocation222_spill] sm:$0xff] }
 0x6df   : > { %9747 = vmatpush.bf16.msrb.mxu2 %v11240_v8  ;;  %9842 = vmatpush.bf16.msrb.mxu3 %v11241_v24  ;;  %v8642_v34 = vunpack.c.l.b16 %v6926_v47  ;;  %v18793_v8 = vld [vmem:[#allocation115_spill] sm:$0xff]  ;;  %v8887_v36 = vpack.c.b16 %v8875_v26, %v8874_v60  ;;  %v8724_v47 = vpack.c.bf16 %v18794_v59, %v18794_v59  ;;  %v8915_v0 = vunpack.c.l.b16 %v8747_v30 }
 0x6e0   : > { %v8643_v12 = vunpack.c.l.b16 %v6927_v35  ;;  %v8725_v24 = vpack.c.bf16 %v18793_v8, %v18793_v8  ;;  %v8886_v2 = vpack.c.b16 %v8873_v32, %v8872_v16  ;;  %v8913_v15 = vunpack.c.l.b16 %v8745_v61  ;;  %v18795_v32 = vld [vmem:[#allocation188_spill] sm:$0xff] }
 0x6e1   : > { %v8914_v20 = vunpack.c.l.b16 %v8746_v9  ;;  %v8912_v26 = vunpack.c.l.b16 %v8744_v29  ;;  %v8741_v60 = vpack.c.bf16 %v18795_v32, %v18795_v32  ;;  %v8740_v8 = vpack.c.bf16 %v18796_v6, %v18796_v6  ;;  %v18798_v29 = vld [vmem:[#allocation178_spill] sm:$0xff]  ;;  %v18799_v32 = vld [vmem:[#allocation169_spill] sm:$0xff] }
 0x6e2   : > { %v8644_v41 = vpack.c.b16 %v8643_v12, %v8642_v34  ;;  %v16633_v55 = vpop.f32.mrf.mxu1  ;;  %v8869_v35 = vunpack.c.l.b16 %v8725_v24  ;;  %v8868_v12 = vunpack.c.l.b16 %v8724_v47  ;;  %v8761_v30 = vpack.c.bf16 %v16409_v13, %v16409_v13  ;;  %v18800_v6 = vld [vmem:[#allocation190_spill] sm:$0xff] }
 0x6e3   : > { %v8927_v5 = vpack.c.b16 %v8915_v0, %v8914_v20  ;;  %v8926_v16 = vpack.c.b16 %v8913_v15, %v8912_v26  ;;  %v8909_v24 = vunpack.c.l.b16 %v8741_v60  ;;  %v8908_v59 = vunpack.c.l.b16 %v8740_v8 }
 0x6e4   : > { %10937 = vmatmul.msk.bf16.vlgmr.msrb.gmra.mxu1 %vm3485_vm0, %v8644_v41  ;;  %v8884_v27 = vpack.c.b16 %v8869_v35, %v8868_v12  ;;  %v8742_v41 = vpack.c.bf16 %v16221_v49, %v16221_v49  ;;  %v8759_v35 = vpack.c.bf16 %v16386_v46, %v16386_v46  ;;  %v8762_v9 = vpack.c.bf16 %v16469_v54, %v16469_v54 }
 0x6e5   : > { %9652 = vmatpush.bf16.msrb.mxu1 %v11239_v17  ;;  %v16644_v17 = vpop.f32.mrf.mxu0  ;;  %v8924_v12 = vpack.c.b16 %v8909_v24, %v8908_v59  ;;  %v8760_v46 = vpack.c.bf16 %v18798_v29, %v18798_v29  ;;  %v8953_v20 = vunpack.c.l.b16 %v8761_v30  ;;  %v8757_v60 = vpack.c.bf16 %v18799_v32, %v18799_v32 }
 0x6e6   : > { %v16640_v34 = vpop.f32.mrf.mxu3  ;;  %v16652_v33 = vpop.f32.mrf.mxu2  ;;  %v8910_v49 = vunpack.c.l.b16 %v8742_v41  ;;  %v8763_v41 = vpack.c.bf16 %v16487_v62, %v16487_v62  ;;  %v8954_v62 = vunpack.c.l.b16 %v8762_v9  ;;  %v8756_v8 = vpack.c.bf16 %v18800_v6, %v18800_v6 }
 0x6e7   : > { %v8952_v26 = vunpack.c.l.b16 %v8760_v46  ;;  %v8949_v59 = vunpack.c.l.b16 %v8757_v60  ;;  %v8778_v9 = vpack.c.bf16 %v16520_v37, %v16520_v37  ;;  %v18803_v60 = vpack.c.b16 %v16438_v39, %v16436_v58 }
 0x6e8   : > { %v8925_v56 = vpack.c.b16 %v8911_v7, %v8910_v49  ;;  %v8951_v7 = vunpack.c.l.b16 %v8759_v35  ;;  %v8955_v15 = vunpack.c.l.b16 %v8763_v41  ;;  %v8948_v35 = vunpack.c.l.b16 %v8756_v8 }
 0x6e9   : > { %v8779_v41 = vpack.c.bf16 %v16538_v28, %v16538_v28  ;;  %v18802_v28 = vpack.c.b16 %v16485_v11, %v16483_v14  ;;  %v8793_v14 = vpack.c.bf16 %v16631_v42, %v16631_v42  ;;  %v8789_v58 = vpack.c.bf16 %v16603_v50, %v16603_v50 }
 0x6ea   : > { %v16659_v22 = vpop.f32.mrf.mxu1  ;;  %v8967_v54 = vpack.c.b16 %v8955_v15, %v8954_v62  ;;  %v18801_v62 = vpack.c.b16 %v16460_v52, %v16457_v4  ;;  %v8790_v4 = vpack.c.bf16 %v16588_v23, %v16588_v23  ;;  %v8795_v52 = vpack.c.bf16 %v16625_v38, %v16625_v38 }
 0x6eb   : > { %10944 = vmatmul.msk.bf16.vlgmr.msra.gmra.mxu0 %vm3485_vm0, %v8885_v53  ;;  %v8995_v29 = vunpack.c.l.b16 %v8779_v41  ;;  %v9033_v8 = vunpack.c.l.b16 %v8793_v14 }
 0x6ec   : > { %v9030_v38 = vunpack.c.l.b16 %v8790_v4  ;;  %v9035_v6 = vunpack.c.l.b16 %v8795_v52 }
 0x6ee   : > { %10968 = vmatmul.msk.bf16.vlgmr.msra.gmra.mxu2 %vm3485_vm0, %v8886_v2  ;;  %10980 = vmatmul.msk.bf16.vlgmr.msra.gmra.mxu3 %vm3485_vm0, %v8887_v36  ;;  %v16661_v48 = vpop.f32.mrf.mxu3  ;;  %v16672_v36 = vpop.f32.mrf.mxu2 }
 0x6f0   : > { %v16665_v53 = vpop.f32.mrf.mxu0 }
 0x6f2   : > { %v16674_v2 = vpop.f32.mrf.mxu1 }
 0x6f4   : > { %10956 = vmatmul.msk.bf16.vlgmr.msra.gmra.mxu1 %vm3485_vm0, %v8884_v27  ;;  %v8758_v27 = vpack.c.bf16 %v18797_v3, %v18797_v3 }
 0x6f6   : > { %v8950_v0 = vunpack.c.l.b16 %v8758_v27  ;;  %v8964_v27 = vpack.c.b16 %v8949_v59, %v8948_v35 }
 0x6f8   : > { %v16686_v61 = vpop.f32.mrf.mxu0 }
 0x6f9   : > { %v16676_v47 = vpop.f32.mrf.mxu3 }
 0x6fa   : > { %v16695_v13 = vpop.f32.mrf.mxu1  ;;  %v8810_v52 = vpack.c.bf16 %v16676_v47, %v16676_v47 }
 0x6fb   : > { %10945 = vmatmul.msk.bf16.gmra.mxu0 %vm3485_vm0, %v8925_v56  ;;  %v8965_v56 = vpack.c.b16 %v8951_v7, %v8950_v0  ;;  %v8994_v0 = vunpack.c.l.b16 %v8778_v9  ;;  %v8807_v50 = vpack.c.bf16 %v16695_v13, %v16695_v13 }
 0x6fd   : > { %v9007_v15 = vpack.c.b16 %v8995_v29, %v8994_v0  ;;  %v9029_v29 = vunpack.c.l.b16 %v8789_v58  ;;  %v9071_v14 = vunpack.c.l.b16 %v8807_v50 }
 0x6fe   : > { %10969 = vmatmul.msk.bf16.gmra.mxu2 %vm3485_vm0, %v8926_v16  ;;  %10981 = vmatmul.msk.bf16.gmra.mxu3 %vm3485_vm0, %v8927_v5  ;;  %v16693_v49 = vpop.f32.mrf.mxu2  ;;  %v8966_v16 = vpack.c.b16 %v8953_v20, %v8952_v26  ;;  %v8791_v26 = vpack.c.bf16 %v16618_v1, %v16618_v1  ;;  %v8794_v1 = vpack.c.bf16 %v16598_v63, %v16598_v63 }
 0x6ff   : > { %v8788_v63 = vpack.c.bf16 %v16579_v45, %v16579_v45 }
 0x700   : > { %v9031_v23 = vunpack.c.l.b16 %v8791_v26  ;;  %v9034_v42 = vunpack.c.l.b16 %v8794_v1  ;;  %v8806_v26 = vpack.c.bf16 %v16674_v2, %v16674_v2 }
 0x701   : > { %v16699_v5 = vpop.f32.mrf.mxu3 }
 0x702   : > { %v9045_v35 = vpack.c.b16 %v9031_v23, %v9030_v38  ;;  %v8811_v45 = vpack.c.bf16 %v16699_v5, %v16699_v5  ;;  %v9070_v13 = vunpack.c.l.b16 %v8806_v26 }
 0x703   : > { %v16704_v24 = vpop.f32.mrf.mxu0 }
 0x704   : > { %10957 = vmatmul.msk.bf16.gmra.mxu1 %vm3485_vm0, %v8924_v12 }
 0x706   : > { %v8133_v12 = vpop.f32.mrf.mxu2 }
 0x707   : > { %v8809_v4 = vpack.c.bf16 %v8133_v12, %v8133_v12 }
 0x709   : > { %v16712_v30 = vpop.f32.mrf.mxu3  ;;  %v9073_v23 = vunpack.c.l.b16 %v8809_v4 }
 0x70b   : > { %10946 = vmatmul.msk.bf16.gmra.mxu0 %vm3485_vm0, %v8965_v56  ;;  %v16717_v7 = vpop.f32.mrf.mxu0 }
 0x70e   : > { %10970 = vmatmul.msk.bf16.gmra.mxu2 %vm3485_vm0, %v8966_v16  ;;  %10982 = vmatmul.msk.bf16.gmra.mxu3 %vm3485_vm0, %v8967_v54  ;;  %v8792_v54 = vpack.c.bf16 %v16605_v43, %v16605_v43 }
 0x710   : > { %v16708_v3 = vpop.f32.mrf.mxu1  ;;  %v16719_v46 = vpop.f32.mrf.mxu2  ;;  %v9032_v59 = vunpack.c.l.b16 %v8792_v54  ;;  %v9075_v54 = vunpack.c.l.b16 %v8811_v45 }
 0x711   : > { %v16732_v37 = vpop.f32.mrf.mxu3 }
 0x712   : > { %v9046_v41 = vpack.c.b16 %v9033_v8, %v9032_v59  ;;  %v9085_v8 = vpack.c.b16 %v9071_v14, %v9070_v13 }
 0x713   : > { %v16734_v56 = vpop.f32.mrf.mxu0 }
 0x714   : > { %10958 = vmatmul.msk.bf16.gmra.mxu1 %vm3485_vm0, %v8964_v27  ;;  %v9047_v27 = vpack.c.b16 %v9035_v6, %v9034_v42  ;;  %v9074_v6 = vunpack.c.l.b16 %v8810_v52  ;;  %v8805_v42 = vpack.c.bf16 %v16686_v61, %v16686_v61 }
 0x716   : > { %v9087_v47 = vpack.c.b16 %v9075_v54, %v9074_v6 }
 0x718   : > { %v16721_v20 = vpop.f32.mrf.mxu1  ;;  %v16738_v32 = vpop.f32.mrf.mxu2 }
 0x71b   : > { %10947 = vmatmul.msk.bf16.gmra.mxu0 %vm3485_vm0, %v18801_v62  ;;  %v16760_v39 = vpop.f32.mrf.mxu0 }
 0x71e   : > { %10971 = vmatmul.msk.bf16.gmra.mxu2 %vm3485_vm0, %v18802_v28  ;;  %10983 = vmatmul.msk.bf16.gmra.mxu3 %vm3485_vm0, %v9007_v15  ;;  %v9028_v15 = vunpack.c.l.b16 %v8788_v63  ;;  %v9069_v63 = vunpack.c.l.b16 %v8805_v42 }
 0x720   : > { %v9044_v62 = vpack.c.b16 %v9029_v29, %v9028_v15  ;;  %v18820_v15 = vld [vmem:[#allocation192_spill] sm:$0xff] }
 0x721   : > { %v16746_v11 = vpop.f32.mrf.mxu1  ;;  %v16765_v43 = vpop.f32.mrf.mxu2 }
 0x722   : > { %v8822_v14 = vpack.c.bf16 %v16746_v11, %v16746_v11  ;;  %v8824_v54 = vpack.c.bf16 %v16765_v43, %v16765_v43 }
 0x724   : > { %10959 = vmatmul.msk.bf16.gmra.mxu1 %vm3485_vm0, %v18803_v60  ;;  %v8808_v60 = vpack.c.bf16 %v16693_v49, %v16693_v49  ;;  %v8804_v49 = vpack.c.bf16 %v16665_v53, %v16665_v53 }
 0x726   : > { %v16756_v16 = vpop.f32.mrf.mxu3  ;;  %v9072_v5 = vunpack.c.l.b16 %v8808_v60 }
 0x729   : > { %v8329_v9 = vpop.f32.mrf.mxu1  ;;  %v8357_v1 = vpop.f32.mrf.mxu2 }
 0x72a   : > { %v8823_v26 = vpack.c.bf16 %v8329_v9, %v8329_v9  ;;  %v8825_v60 = vpack.c.bf16 %v8357_v1, %v8357_v1  ;;  %v8826_v9 = vpack.c.bf16 %v16756_v16, %v16756_v16  ;;  %v9112_v1 = vunpack.c.l.b16 %v8824_v54 }
 0x72b   : > { %10948 = vmatmul.msk.bf16.gmra.mxu0 %vm3485_vm0, %v9045_v35  ;;  %v9086_v35 = vpack.c.b16 %v9073_v23, %v9072_v5  ;;  %v9110_v5 = vunpack.c.l.b16 %v8822_v14 }
 0x72e   : > { %10972 = vmatmul.msk.bf16.gmra.mxu2 %vm3485_vm0, %v9046_v41  ;;  %10984 = vmatmul.msk.bf16.gmra.mxu3 %vm3485_vm0, %v9047_v27  ;;  %v8385_v0 = vpop.f32.mrf.mxu3 }
 0x72f   : > { %v8827_v13 = vpack.c.bf16 %v8385_v0, %v8385_v0 }
 0x731   : > { %v16780_v38 = vpop.f32.mrf.mxu1  ;;  %v9115_v42 = vunpack.c.l.b16 %v8827_v13 }
 0x733   : > { %v8411_v28 = vpop.f32.mrf.mxu0 }
 0x734   : > { %10960 = vmatmul.msk.bf16.gmra.mxu1 %vm3485_vm0, %v9044_v62  ;;  %v8828_v12 = vpack.c.bf16 %v8411_v28, %v8411_v28  ;;  %v9068_v62 = vunpack.c.l.b16 %v8804_v49  ;;  %v8821_v49 = vpack.c.bf16 %v16760_v39, %v16760_v39 }
 0x736   : > { %v16787_v27 = vunpack.c.l.b16 %v8828_v12  ;;  %v9084_v53 = vpack.c.b16 %v9069_v63, %v9068_v62  ;;  %v9113_v12 = vunpack.c.l.b16 %v8825_v60 }
 0x738   : > { %v8495_v2 = vpop.f32.mrf.mxu3  ;;  %v9126_v16 = vpack.c.b16 %v9113_v12, %v9112_v1 }
 0x739   : > { %v8834_v29 = vpack.c.bf16 %v8495_v2, %v8495_v2  ;;  %v16795_v45 = vpop.f32.mrf.mxu1  ;;  %v9111_v2 = vunpack.c.l.b16 %v8823_v26 }
 0x73b   : > { %v8413_v59 = vpop.f32.mrf.mxu0  ;;  %10949 = vmatmul.msk.bf16.gmra.mxu0 %vm3485_vm0, %v9085_v8  ;;  %v16797_v4 = vunpack.c.l.b16 %v8834_v29 }
 0x73c   : > { %v8829_v58 = vpack.c.bf16 %v8413_v59, %v8413_v59  ;;  %v9114_v59 = vunpack.c.l.b16 %v8826_v9 }
 0x73e   : > { %v16789_v41 = vunpack.c.l.b16 %v8829_v58  ;;  %10973 = vmatmul.msk.bf16.gmra.mxu2 %vm3485_vm0, %v9086_v35  ;;  %10985 = vmatmul.msk.bf16.gmra.mxu3 %vm3485_vm0, %v9087_v47  ;;  %v8467_v61 = vpop.f32.mrf.mxu2  ;;  %v9125_v47 = vpack.c.b16 %v9111_v2, %v9110_v5  ;;  %v9127_v63 = vpack.c.b16 %v9115_v42, %v9114_v59 }
 0x73f   : > { %v8832_v6 = vpack.c.bf16 %v8467_v61, %v8467_v61  ;;  %v8820_v61 = vpack.c.bf16 %v16734_v56, %v16734_v56 }
 0x740   : > { %v8497_v50 = vpop.f32.mrf.mxu3 }
 0x741   : > { %v8835_v28 = vpack.c.bf16 %v8497_v50, %v8497_v50  ;;  %v16810_v43 = vunpack.c.l.b16 %v8832_v6  ;;  %v9109_v50 = vunpack.c.l.b16 %v8821_v49 }
 0x743   : > { %v16799_v52 = vunpack.c.l.b16 %v8835_v28  ;;  %v9108_v28 = vunpack.c.l.b16 %v8820_v61 }
 0x744   : > { %10961 = vmatmul.msk.bf16.gmra.mxu1 %vm3485_vm0, %v9084_v53 }
 0x745   : > { %v9124_v14 = vpack.c.b16 %v9109_v50, %v9108_v28 }
 0x746   : > { %v8469_v8 = vpop.f32.mrf.mxu2 }
 0x747   : > { %v8833_v11 = vpack.c.bf16 %v8469_v8, %v8469_v8 }
 0x748   : > { %v8523_v0 = vpop.f32.mrf.mxu0 }
 0x749   : > { %v16812_v35 = vunpack.c.l.b16 %v8833_v11 }
 0x74a   : > { %v8551_v58 = vpop.f32.mrf.mxu1 }
 0x74b   : > { %10950 = vmatmul.msk.bf16.gmra.mxu0 %vm3485_vm0, %v9125_v47  ;;  %v8838_v13 = vpack.c.bf16 %v8551_v58, %v8551_v58  ;;  %v8836_v58 = vpack.c.bf16 %v8523_v0, %v8523_v0 }
 0x74d   : > { %v9150_v6 = vunpack.c.l.b16 %v8838_v13  ;;  %v9148_v28 = vunpack.c.l.b16 %v8836_v58 }
 0x74e   : > { %10974 = vmatmul.msk.bf16.gmra.mxu2 %vm3485_vm0, %v9126_v16  ;;  %10986 = vmatmul.msk.bf16.gmra.mxu3 %vm3485_vm0, %v9127_v63  ;;  %v8579_v62 = vpop.f32.mrf.mxu2 }
 0x74f   : > { %v8840_v54 = vpack.c.bf16 %v8579_v62, %v8579_v62 }
 0x750   : > { %v8525_v26 = vpop.f32.mrf.mxu0 }
 0x751   : > { %v8607_v53 = vpop.f32.mrf.mxu3  ;;  %v9152_v42 = vunpack.c.l.b16 %v8840_v54  ;;  %v8837_v47 = vpack.c.bf16 %v8525_v26, %v8525_v26 }
 0x752   : > { %v8553_v39 = vpop.f32.mrf.mxu1  ;;  %v8842_v56 = vpack.c.bf16 %v8607_v53, %v8607_v53 }
 0x753   : > { %v8839_v60 = vpack.c.bf16 %v8553_v39, %v8553_v39  ;;  %v9149_v50 = vunpack.c.l.b16 %v8837_v47  ;;  %v18811_v47 = vld [vmem:[#allocation72_spill] sm:$0xff] }
 0x754   : > { %10962 = vmatmul.msk.bf16.gmra.mxu1 %vm3485_vm0, %v9124_v14  ;;  %v9154_v49 = vunpack.c.l.b16 %v8842_v56  ;;  %v18804_v14 = vld [vmem:[#allocation82_spill] sm:$0xff] }
 0x755   : > { %v9151_v9 = vunpack.c.l.b16 %v8839_v60  ;;  %v8733_v60 = vpack.c.bf16 %v18804_v14, %v18804_v14 }
 0x756   : > { %v8581_v2 = vpop.f32.mrf.mxu2 }
 0x757   : > { %v8841_v8 = vpack.c.bf16 %v8581_v2, %v8581_v2  ;;  %v9165_v11 = vpack.c.b16 %v9151_v9, %v9150_v6  ;;  %v9164_v9 = vpack.c.b16 %v9149_v50, %v9148_v28  ;;  %v18805_v2 = vld [vmem:[#allocation221_spill] sm:$0xff]  ;;  %v18806_v6 = vld [vmem:[#allocation71_spill] sm:$0xff] }
 0x758   : > { %v8635_v12 = vpop.f32.mrf.mxu0  ;;  %v8732_v0 = vpack.c.bf16 %v18805_v2, %v18805_v2  ;;  %v8737_v56 = vpack.c.bf16 %v18806_v6, %v18806_v6 }
 0x759   : > { %v8609_v5 = vpop.f32.mrf.mxu3  ;;  %v9153_v1 = vunpack.c.l.b16 %v8841_v8  ;;  %v8844_v62 = vpack.c.bf16 %v8635_v12, %v8635_v12  ;;  %v8877_v12 = vunpack.c.l.b16 %v8733_v60 }
 0x75a   : > { %v8843_v59 = vpack.c.bf16 %v8609_v5, %v8609_v5  ;;  %v8881_v58 = vunpack.c.l.b16 %v8737_v56 }
 0x75b   : > { %v9166_v16 = vpack.c.b16 %v9153_v1, %v9152_v42  ;;  %10951 = vmatmul.msk.bf16.gmra.mxu0 %vm3485_vm0, %v9165_v11  ;;  %v16833_v8 = vunpack.c.l.b16 %v8844_v62  ;;  %v18807_v42 = vld [vmem:[#allocation275_spill] sm:$0xff]  ;;  %v18808_v1 = vld [vmem:[#allocation220_spill] sm:$0xff] }
 0x75c   : > { %v9155_v63 = vunpack.c.l.b16 %v8843_v59  ;;  %v8739_v11 = vpack.c.bf16 %v18807_v42, %v18807_v42  ;;  %v8736_v59 = vpack.c.bf16 %v18808_v1, %v18808_v1  ;;  %v18810_v42 = vld [vmem:[#allocation70_spill] sm:$0xff] }
 0x75d   : > { %v8734_v1 = vpack.c.bf16 %v18810_v42, %v18810_v42  ;;  %v18815_v42 = vld [vmem:[#allocation77_spill] sm:$0xff] }
 0x75e   : > { %v9167_v61 = vpack.c.b16 %v9155_v63, %v9154_v49  ;;  %10975 = vmatmul.msk.bf16.gmra.mxu2 %vm3485_vm0, %v9166_v16  ;;  %v8876_v49 = vunpack.c.l.b16 %v8732_v0  ;;  %v18809_v16 = vld [vmem:[#allocation193_spill] sm:$0xff]  ;;  %v8883_v60 = vunpack.c.l.b16 %v8739_v11  ;;  %v8735_v0 = vpack.c.bf16 %v18811_v47, %v18811_v47 }
 0x75f   : > { %v8738_v63 = vpack.c.bf16 %v18809_v16, %v18809_v16 }
 0x760   : > { %10987 = vmatmul.msk.bf16.gmra.mxu3 %vm3485_vm0, %v9167_v61  ;;  %v8637_v53 = vpop.f32.mrf.mxu0  ;;  %v8888_v14 = vpack.c.b16 %v8877_v12, %v8876_v49 }
 0x761   : > { %v8691_v39 = vpop.f32.mrf.mxu2  ;;  %v8845_v26 = vpack.c.bf16 %v8637_v53, %v8637_v53  ;;  %v8719_v13 = vpop.f32.mrf.mxu3  ;;  %v8882_v56 = vunpack.c.l.b16 %v8738_v63  ;;  %v8879_v63 = vunpack.c.l.b16 %v8735_v0  ;;  %v8748_v0 = vpack.c.bf16 %v18815_v42, %v18815_v42 }
 0x762   : > { %v8663_v54 = vpop.f32.mrf.mxu1  ;;  %v8848_v61 = vpack.c.bf16 %v8691_v39, %v8691_v39  ;;  %v8850_v50 = vpack.c.bf16 %v8719_v13, %v8719_v13 }
 0x763   : > { %v16835_v5 = vunpack.c.l.b16 %v8845_v26  ;;  %v8846_v62 = vpack.c.bf16 %v8663_v54, %v8663_v54  ;;  %v8880_v26 = vunpack.c.l.b16 %v8736_v59 }
 0x764   : > { %10963 = vmatmul.msk.bf16.gmra.mxu1 %vm3485_vm0, %v9164_v9  ;;  %v16850_v13 = vunpack.c.l.b16 %v8848_v61  ;;  %v16855_v12 = vunpack.c.l.b16 %v8850_v50  ;;  %v8878_v50 = vunpack.c.l.b16 %v8734_v1  ;;  %v18817_v1 = vld [vmem:[#allocation274_spill] sm:$0xff] }
 0x765   : > { %v8890_v39 = vpack.c.b16 %v8881_v58, %v8880_v26  ;;  %v16857_v11 = vunpack.c.l.b16 %v8846_v62  ;;  %v8755_v61 = vpack.c.bf16 %v18817_v1, %v18817_v1  ;;  %v18818_v58 = vld [vmem:[#allocation76_spill] sm:$0xff]  ;;  %v8751_v1 = vpack.c.bf16 %v18820_v15, %v18820_v15 }
 0x767   : > { %18812 = vst [vmem:[#allocation185_spill] sm:$0xff] %v16857_v11 }
 0x768   : > { %v9211_v53 = vpop.f32.mrf.mxu0 }
 0x769   : > { %v8693_v28 = vpop.f32.mrf.mxu2  ;;  %v8721_v2 = vpop.f32.mrf.mxu3 }
 0x76a   : > { %v8849_v9 = vpack.c.bf16 %v8693_v28, %v8693_v28  ;;  %v8665_v6 = vpop.f32.mrf.mxu1  ;;  %v8851_v23 = vpack.c.bf16 %v8721_v2, %v8721_v2  ;;  %v8891_v28 = vpack.c.b16 %v8883_v60, %v8882_v56  ;;  %v8889_v2 = vpack.c.b16 %v8879_v63, %v8878_v50 }
 0x76b   : > { %v8847_v16 = vpack.c.bf16 %v8665_v6, %v8665_v6  ;;  %10992 = vmatmul.msk.bf16.vlgmr.msrb.gmra.mxu0 %vm3485_vm0, %v8888_v14  ;;  %v18814_v14 = vld [vmem:[#allocation74_spill] sm:$0xff]  ;;  %v8916_v63 = vunpack.c.l.b16 %v8748_v0 }
 0x76c   : > { %v16852_v54 = vunpack.c.l.b16 %v8849_v9  ;;  %v16859_v59 = vunpack.c.l.b16 %v8851_v23  ;;  %v8749_v60 = vpack.c.bf16 %v18814_v14, %v18814_v14  ;;  %v8752_v14 = vpack.c.bf16 %v18818_v58, %v18818_v58 }
 0x76d   : > { %v16861_v49 = vunpack.c.l.b16 %v8847_v16  ;;  %v18816_v16 = vld [vmem:[#allocation168_spill] sm:$0xff] }
 0x76e   : > { %11016 = vmatmul.msk.bf16.vlgmr.msrb.gmra.mxu2 %vm3485_vm0, %v8890_v39  ;;  %v8753_v56 = vpack.c.bf16 %v18816_v16, %v18816_v16 }
 0x76f   : > { %18813 = vst [vmem:[#allocation31_spill] sm:$0xff] %v16861_v49 }
 0x770   : > { %11028 = vmatmul.msk.bf16.vlgmr.msrb.gmra.mxu3 %vm3485_vm0, %v8891_v28  ;;  %v9213_v23 = vpop.f32.mrf.mxu0  ;;  %v8917_v28 = vunpack.c.l.b16 %v8749_v60 }
 0x771   : > { %v9369_v62 = vpop.f32.mrf.mxu2  ;;  %v9464_v26 = vpop.f32.mrf.mxu3 }
 0x772   : > { %v9290_v9 = vpop.f32.mrf.mxu1  ;;  %v8928_v16 = vpack.c.b16 %v8917_v28, %v8916_v63  ;;  %v8919_v28 = vunpack.c.l.b16 %v8751_v1  ;;  %v8771_v1 = vpack.c.bf16 %v16513_v51, %v16513_v51 }
 0x773   : > { %v9291_v6 = vadd.f32 %v9290_v9, %v9211_v53  ;;  %v18819_v53 = vld [vmem:[#allocation34_spill] sm:$0xff]  ;;  %v8921_v9 = vunpack.c.l.b16 %v8753_v56 }
 0x774   : > { %11004 = vmatmul.msk.bf16.vlgmr.msrb.gmra.mxu1 %vm3485_vm0, %v8889_v2  ;;  %v8754_v50 = vpack.c.bf16 %v18819_v53, %v18819_v53 }
 0x775   : > { %v9409_v39 = vadd.f32 %v9369_v62, %v9291_v6  ;;  %v8923_v62 = vunpack.c.l.b16 %v8755_v61  ;;  %v8920_v6 = vunpack.c.l.b16 %v8752_v14 }
 0x776   : > { %v8922_v49 = vunpack.c.l.b16 %v8754_v50 }
 0x777   : > { %v16882_v47 = vadd.f32 %v9464_v26, %v9409_v39  ;;  %v8930_v58 = vpack.c.b16 %v8921_v9, %v8920_v6  ;;  %v18821_v26 = vld [vmem:[#allocation187_spill] sm:$0xff] }
 0x778   : > { %v9216_v42 = vpop.f32.mrf.mxu0  ;;  %v8750_v0 = vpack.c.bf16 %v18821_v26, %v18821_v26  ;;  %v8931_v56 = vpack.c.b16 %v8923_v62, %v8922_v49 }
 0x779   : > { %v9371_v29 = vpop.f32.mrf.mxu2  ;;  %v9466_v2 = vpop.f32.mrf.mxu3 }
 0x77a   : > { %v9292_v60 = vpop.f32.mrf.mxu1  ;;  %v8918_v14 = vunpack.c.l.b16 %v8750_v0 }
 0x77b   : > { %v9293_v11 = vadd.f32 %v9292_v60, %v9213_v23  ;;  %10993 = vmatmul.msk.bf16.gmra.mxu0 %vm3485_vm0, %v8928_v16  ;;  %v18823_v23 = vld [vmem:[#allocation166_spill] sm:$0xff]  ;;  %v18824_v60 = vld [vmem:[#allocation273_spill] sm:$0xff] }
 0x77c   : > { %v8765_v53 = vpack.c.bf16 %v18823_v23, %v18823_v23  ;;  %v8929_v16 = vpack.c.b16 %v8919_v28, %v8918_v14 }
 0x77d   : > { %v9410_v39 = vadd.f32 %v9371_v29, %v9293_v11  ;;  %v8764_v29 = vpack.c.bf16 %v18824_v60, %v18824_v60  ;;  %v18825_v11 = vld [vmem:[#allocation182_spill] sm:$0xff]  ;;  %v18828_v60 = vld [vmem:[#allocation181_spill] sm:$0xff] }
 0x77e   : > { %11017 = vmatmul.msk.bf16.gmra.mxu2 %vm3485_vm0, %v8930_v58  ;;  %v8769_v49 = vpack.c.bf16 %v18825_v11, %v18825_v11  ;;  %v18826_v58 = vld [vmem:[#allocation180_spill] sm:$0xff]  ;;  %v8767_v51 = vpack.c.bf16 %v18828_v60, %v18828_v60 }
 0x77f   : > { %v16892_v61 = vadd.f32 %v9466_v2, %v9410_v39  ;;  %v8957_v2 = vunpack.c.l.b16 %v8765_v53  ;;  %v8768_v26 = vpack.c.bf16 %v18826_v58, %v18826_v58  ;;  %v8956_v39 = vunpack.c.l.b16 %v8764_v29 }
 0x780   : > { %11029 = vmatmul.msk.bf16.gmra.mxu3 %vm3485_vm0, %v8931_v56  ;;  %v9218_v63 = vpop.f32.mrf.mxu0  ;;  %v8961_v28 = vunpack.c.l.b16 %v8769_v49 }
 0x781   : > { %18822 = vst [vmem:[#allocation179_spill] sm:$0xff] %v16892_v61  ;;  %v9374_v15 = vpop.f32.mrf.mxu2  ;;  %v9469_v50 = vpop.f32.mrf.mxu3 }
 0x782   : > { %v9295_v9 = vpop.f32.mrf.mxu1 }
 0x783   : > { %v9296_v6 = vadd.f32 %v9295_v9, %v9216_v42  ;;  %v18827_v42 = vld [vmem:[#allocation272_spill] sm:$0xff]  ;;  %v8968_v9 = vpack.c.b16 %v8957_v2, %v8956_v39  ;;  %v8959_v2 = vunpack.c.l.b16 %v8767_v51 }
 0x784   : > { %11005 = vmatmul.msk.bf16.gmra.mxu1 %vm3485_vm0, %v8929_v16  ;;  %v8770_v56 = vpack.c.bf16 %v18827_v42, %v18827_v42 }
 0x785   : > { %v9411_v62 = vadd.f32 %v9374_v15, %v9296_v6  ;;  %v8963_v15 = vunpack.c.l.b16 %v8771_v1  ;;  %v8960_v6 = vunpack.c.l.b16 %v8768_v26 }
 0x786   : > { %v8962_v61 = vunpack.c.l.b16 %v8770_v56 }
 0x787   : > { %v16906_v0 = vadd.f32 %v9469_v50, %v9411_v62  ;;  %v8970_v58 = vpack.c.b16 %v8961_v28, %v8960_v6  ;;  %v18829_v50 = vld [vmem:[#allocation167_spill] sm:$0xff] }
 0x788   : > { %v9221_v14 = vpop.f32.mrf.mxu0  ;;  %v8766_v29 = vpack.c.bf16 %v18829_v50, %v18829_v50  ;;  %v8971_v49 = vpack.c.b16 %v8963_v15, %v8962_v61  ;;  %v8780_v61 = vpack.c.bf16 %v16542_v40, %v16542_v40 }
 0x789   : > { %v9376_v23 = vpop.f32.mrf.mxu2  ;;  %v9471_v16 = vpop.f32.mrf.mxu3 }
 0x78a   : > { %v9297_v53 = vpop.f32.mrf.mxu1  ;;  %v8958_v26 = vunpack.c.l.b16 %v8766_v29  ;;  %v8996_v51 = vunpack.c.l.b16 %v8780_v61 }
 0x78b   : > { %v9298_v11 = vadd.f32 %v9297_v53, %v9218_v63  ;;  %10994 = vmatmul.msk.bf16.gmra.mxu0 %vm3485_vm0, %v8968_v9  ;;  %v8781_v63 = vpack.c.bf16 %v16563_v10, %v16563_v10  ;;  %v8784_v53 = vpack.c.bf16 %v16569_v19, %v16569_v19  ;;  %v8787_v10 = vpack.c.bf16 %v16576_v18, %v16576_v18 }
 0x78c   : > { %v8969_v9 = vpack.c.b16 %v8959_v2, %v8958_v26  ;;  %v8783_v19 = vpack.c.bf16 %v16573_v25, %v16573_v25 }
 0x78d   : > { %v9412_v62 = vadd.f32 %v9376_v23, %v9298_v11  ;;  %v8785_v23 = vpack.c.bf16 %v16583_v21, %v16583_v21  ;;  %v9000_v50 = vunpack.c.l.b16 %v8784_v53  ;;  %v9003_v29 = vunpack.c.l.b16 %v8787_v10 }
 0x78e   : > { %11018 = vmatmul.msk.bf16.gmra.mxu2 %vm3485_vm0, %v8970_v58  ;;  %v8801_v53 = vpack.c.bf16 %v16672_v36, %v16672_v36 }
 0x78f   : > { %v16916_v1 = vadd.f32 %v9471_v16, %v9412_v62  ;;  %v8997_v16 = vunpack.c.l.b16 %v8781_v63  ;;  %v9001_v40 = vunpack.c.l.b16 %v8785_v23 }
 0x790   : > { %11030 = vmatmul.msk.bf16.gmra.mxu3 %vm3485_vm0, %v8971_v49  ;;  %v9223_v39 = vpop.f32.mrf.mxu0 }
 0x791   : > { %v9379_v42 = vpop.f32.mrf.mxu2  ;;  %v9474_v56 = vpop.f32.mrf.mxu3  ;;  %v9008_v21 = vpack.c.b16 %v8997_v16, %v8996_v51  ;;  %v9010_v18 = vpack.c.b16 %v9001_v40, %v9000_v50 }
 0x792   : > { %v9300_v28 = vpop.f32.mrf.mxu1 }
 0x793   : > { %v9301_v6 = vadd.f32 %v9300_v28, %v9221_v14  ;;  %v8786_v14 = vpack.c.bf16 %v16549_v57, %v16549_v57 }
 0x794   : > { %11006 = vmatmul.msk.bf16.gmra.mxu1 %vm3485_vm0, %v8969_v9 }
 0x795   : > { %v9413_v15 = vadd.f32 %v9379_v42, %v9301_v6  ;;  %v9002_v26 = vunpack.c.l.b16 %v8786_v14  ;;  %v8782_v42 = vpack.c.bf16 %v16547_v44, %v16547_v44  ;;  %v8796_v44 = vpack.c.bf16 %v16627_v31, %v16627_v31 }
 0x796   : > { %v8800_v14 = vpack.c.bf16 %v16652_v33, %v16652_v33  ;;  %v9041_v31 = vunpack.c.l.b16 %v8801_v53  ;;  %v8799_v33 = vpack.c.bf16 %v16659_v22, %v16659_v22  ;;  %v8816_v53 = vpack.c.bf16 %v16719_v46, %v16719_v46 }
 0x797   : > { %v16930_v60 = vadd.f32 %v9474_v56, %v9413_v15  ;;  %v9011_v63 = vpack.c.b16 %v9003_v29, %v9002_v26  ;;  %v8999_v56 = vunpack.c.l.b16 %v8783_v19  ;;  %v8998_v9 = vunpack.c.l.b16 %v8782_v42 }
 0x798   : > { %v9226_v11 = vpop.f32.mrf.mxu0  ;;  %v9040_v29 = vunpack.c.l.b16 %v8800_v14  ;;  %v8818_v14 = vpack.c.bf16 %v16712_v30, %v16712_v30  ;;  %v8815_v46 = vpack.c.bf16 %v16721_v20, %v16721_v20 }
 0x799   : > { %v9381_v58 = vpop.f32.mrf.mxu2  ;;  %v9476_v62 = vpop.f32.mrf.mxu3  ;;  %v9009_v15 = vpack.c.b16 %v8999_v56, %v8998_v9 }
 0x79a   : > { %v9302_v49 = vpop.f32.mrf.mxu1 }
 0x79b   : > { %v9303_v2 = vadd.f32 %v9302_v49, %v9223_v39  ;;  %10995 = vmatmul.msk.bf16.gmra.mxu0 %vm3485_vm0, %v9008_v21  ;;  %v8797_v39 = vpack.c.bf16 %v16644_v17, %v16644_v17  ;;  %v8803_v17 = vpack.c.bf16 %v16661_v48, %v16661_v48  ;;  %v9050_v48 = vpack.c.b16 %v9041_v31, %v9040_v29 }
 0x79c   : > { %v9082_v29 = vunpack.c.l.b16 %v8818_v14 }
 0x79d   : > { %v9414_v57 = vadd.f32 %v9381_v58, %v9303_v2  ;;  %v9037_v51 = vunpack.c.l.b16 %v8797_v39  ;;  %v9036_v58 = vunpack.c.l.b16 %v8796_v44 }
 0x79e   : > { %11019 = vmatmul.msk.bf16.gmra.mxu2 %vm3485_vm0, %v9010_v18  ;;  %v8798_v18 = vpack.c.bf16 %v16633_v55, %v16633_v55  ;;  %v8812_v55 = vpack.c.bf16 %v16704_v24, %v16704_v24 }
 0x79f   : > { %v16940_v28 = vadd.f32 %v9476_v62, %v9414_v57  ;;  %v9048_v36 = vpack.c.b16 %v9037_v51, %v9036_v58  ;;  %v9043_v62 = vunpack.c.l.b16 %v8803_v17  ;;  %v9039_v57 = vunpack.c.l.b16 %v8799_v33 }
 0x7a0   : > { %11031 = vmatmul.msk.bf16.gmra.mxu3 %vm3485_vm0, %v9011_v63  ;;  %v9228_v6 = vpop.f32.mrf.mxu0  ;;  %v9038_v56 = vunpack.c.l.b16 %v8798_v18  ;;  %v9076_v51 = vunpack.c.l.b16 %v8812_v55 }
 0x7a1   : > { %v9384_v25 = vpop.f32.mrf.mxu2  ;;  %v9479_v61 = vpop.f32.mrf.mxu3 }
 0x7a2   : > { %v9305_v23 = vpop.f32.mrf.mxu1 }
 0x7a3   : > { %v9306_v16 = vadd.f32 %v9305_v23, %v9226_v11  ;;  %v8802_v11 = vpack.c.bf16 %v16640_v34, %v16640_v34 }
 0x7a4   : > { %11007 = vmatmul.msk.bf16.gmra.mxu1 %vm3485_vm0, %v9009_v15  ;;  %v8817_v15 = vpack.c.bf16 %v16738_v32, %v16738_v32 }
 0x7a5   : > { %v9415_v10 = vadd.f32 %v9384_v25, %v9306_v16  ;;  %v9042_v26 = vunpack.c.l.b16 %v8802_v11  ;;  %v9080_v11 = vunpack.c.l.b16 %v8816_v53 }
 0x7a6   : > { %v9081_v24 = vunpack.c.l.b16 %v8817_v15  ;;  %v18831_v15 = vpack.c.b16 %v16812_v35, %v16810_v43 }
 0x7a7   : > { %v16954_v40 = vadd.f32 %v9479_v61, %v9415_v10  ;;  %v9051_v42 = vpack.c.b16 %v9043_v62, %v9042_v26  ;;  %v9049_v61 = vpack.c.b16 %v9039_v57, %v9038_v56  ;;  %v8814_v62 = vpack.c.bf16 %v16708_v3, %v16708_v3 }
 0x7a8   : > { %v9231_v21 = vpop.f32.mrf.mxu0 }
 0x7a9   : > { %v9386_v50 = vpop.f32.mrf.mxu2  ;;  %v9481_v49 = vpop.f32.mrf.mxu3 }
 0x7aa   : > { %v9307_v19 = vpop.f32.mrf.mxu1 }
 0x7ab   : > { %v9308_v2 = vadd.f32 %v9307_v19, %v9228_v6  ;;  %10996 = vmatmul.msk.bf16.gmra.mxu0 %vm3485_vm0, %v9048_v36  ;;  %v8813_v6 = vpack.c.bf16 %v16717_v7, %v16717_v7  ;;  %v8819_v7 = vpack.c.bf16 %v16732_v37, %v16732_v37  ;;  %v9090_v37 = vpack.c.b16 %v9081_v24, %v9080_v11 }
 0x7ac   : > { %v9079_v19 = vunpack.c.l.b16 %v8815_v46 }
 0x7ad   : > { %v9416_v34 = vadd.f32 %v9386_v50, %v9308_v2  ;;  %v9077_v44 = vunpack.c.l.b16 %v8813_v6  ;;  %v9083_v31 = vunpack.c.l.b16 %v8819_v7  ;;  %v9078_v2 = vunpack.c.l.b16 %v8814_v62  ;;  %v18836_v62 = vld [vmem:[#allocation31_spill] sm:$0xff] }
 0x7ae   : > { %11020 = vmatmul.msk.bf16.gmra.mxu2 %vm3485_vm0, %v9050_v48 }
 0x7af   : > { %v16964_v63 = vadd.f32 %v9481_v49, %v9416_v34  ;;  %v9088_v32 = vpack.c.b16 %v9077_v44, %v9076_v51  ;;  %v9091_v49 = vpack.c.b16 %v9083_v31, %v9082_v29  ;;  %v9089_v34 = vpack.c.b16 %v9079_v19, %v9078_v2 }
 0x7b0   : > { %11032 = vmatmul.msk.bf16.gmra.mxu3 %vm3485_vm0, %v9051_v42  ;;  %v9233_v9 = vpop.f32.mrf.mxu0  ;;  %v18834_v31 = vpack.c.b16 %v16852_v54, %v16850_v13 }
 0x7b1   : > { %v9389_v22 = vpop.f32.mrf.mxu2  ;;  %v9484_v25 = vpop.f32.mrf.mxu3 }
 0x7b2   : > { %v9310_v39 = vpop.f32.mrf.mxu1 }
 0x7b3   : > { %v9311_v23 = vadd.f32 %v9310_v39, %v9231_v21 }
 0x7b4   : > { %11008 = vmatmul.msk.bf16.gmra.mxu1 %vm3485_vm0, %v9049_v61  ;;  %v18830_v61 = vpack.c.b16 %v16789_v41, %v16787_v27 }
 0x7b5   : > { %v9417_v16 = vadd.f32 %v9389_v22, %v9311_v23  ;;  %v8830_v23 = vpack.c.bf16 %v16780_v38, %v16780_v38 }
 0x7b7   : > { %v16978_v10 = vadd.f32 %v9484_v25, %v9417_v16  ;;  %v8831_v25 = vpack.c.bf16 %v16795_v45, %v16795_v45  ;;  %v18832_v45 = vpack.c.b16 %v16799_v52, %v16797_v4  ;;  %v9118_v27 = vunpack.c.l.b16 %v8830_v23 }
 0x7b8   : > { %v9236_v17 = vpop.f32.mrf.mxu0  ;;  %v18833_v4 = vpack.c.b16 %v16835_v5, %v16833_v8 }
 0x7b9   : > { %v9391_v58 = vpop.f32.mrf.mxu2  ;;  %v9486_v21 = vpop.f32.mrf.mxu3  ;;  %v9119_v16 = vunpack.c.l.b16 %v8831_v25  ;;  %v18839_v25 = vld [vmem:[#allocation179_spill] sm:$0xff] }
 0x7ba   : > { %v9312_v50 = vpop.f32.mrf.mxu1 }
 0x7bb   : > { %v9313_v36 = vadd.f32 %v9312_v50, %v9233_v9  ;;  %10997 = vmatmul.msk.bf16.gmra.mxu0 %vm3485_vm0, %v9088_v32  ;;  %v9129_v38 = vpack.c.b16 %v9119_v16, %v9118_v27  ;;  %v18835_v50 = vpack.c.b16 %v16859_v59, %v16855_v12 }
 0x7bd   : > { %v9418_v30 = vadd.f32 %v9391_v58, %v9313_v36 }
 0x7be   : > { %11021 = vmatmul.msk.bf16.gmra.mxu2 %vm3485_vm0, %v9090_v37 }
 0x7bf   : > { %v16988_v33 = vadd.f32 %v9486_v21, %v9418_v30  ;;  %v18837_v30 = vld [vmem:[#allocation185_spill] sm:$0xff] }
 0x7c0   : > { %11033 = vmatmul.msk.bf16.gmra.mxu3 %vm3485_vm0, %v9091_v49  ;;  %v9238_v26 = vpop.f32.mrf.mxu0  ;;  %v18838_v49 = vpack.c.b16 %v18836_v62, %v18837_v30 }
 0x7c1   : > { %v9394_v20 = vpop.f32.mrf.mxu2  ;;  %v9489_v48 = vpop.f32.mrf.mxu3 }
 0x7c2   : > { %v9315_v18 = vpop.f32.mrf.mxu1 }
 0x7c3   : > { %v9316_v42 = vadd.f32 %v9315_v18, %v9236_v17 }
 0x7c4   : > { %11009 = vmatmul.msk.bf16.gmra.mxu1 %vm3485_vm0, %v9089_v34 }
 0x7c5   : > { %v9419_v57 = vadd.f32 %v9394_v20, %v9316_v42 }
 0x7c7   : > { %v16992_v3 = vadd.f32 %v9489_v48, %v9419_v57 }
 0x7c8   : > { %v9241_v56 = vpop.f32.mrf.mxu0 }
 0x7c9   : > { %v9396_v9 = vpop.f32.mrf.mxu2  ;;  %v9491_v22 = vpop.f32.mrf.mxu3 }
 0x7ca   : > { %v9317_v6 = vpop.f32.mrf.mxu1 }
 0x7cb   : > { %v9318_v39 = vadd.f32 %v9317_v6, %v9238_v26  ;;  %10998 = vmatmul.msk.bf16.gmra.mxu0 %vm3485_vm0, %v18830_v61 }
 0x7cd   : > { %v9420_v55 = vadd.f32 %v9396_v9, %v9318_v39 }
 0x7ce   : > { %11022 = vmatmul.msk.bf16.gmra.mxu2 %vm3485_vm0, %v18831_v15 }
 0x7cf   : > { %v17006_v44 = vadd.f32 %v9491_v22, %v9420_v55  ;;  %v17044_v22 = vld [vmem:[%s17146_s5] ss:$0 sm:$0xff] }
 0x7d0   : > { %11034 = vmatmul.msk.bf16.gmra.mxu3 %vm3485_vm0, %v18832_v45  ;;  %v9243_v41 = vpop.f32.mrf.mxu0 }
 0x7d1   : > { %v9399_v53 = vpop.f32.mrf.mxu2  ;;  %v9494_v7 = vpop.f32.mrf.mxu3 }
 0x7d2   : > { %v9320_v51 = vpop.f32.mrf.mxu1 }
 0x7d3   : > { %v9321_v14 = vadd.f32 %v9320_v51, %v9241_v56 }
 0x7d4   : > { %11010 = vmatmul.msk.bf16.gmra.mxu1 %vm3485_vm0, %v9129_v38 }
 0x7d5   : > { %v9421_v24 = vadd.f32 %v9399_v53, %v9321_v14 }
 0x7d7   : > { %v17013_v43 = vadd.f32 %v9494_v7, %v9421_v24 }
 0x7d8   : > { %v9246_v35 = vpop.f32.mrf.mxu0 }
 0x7d9   : > { %v9401_v17 = vpop.f32.mrf.mxu2  ;;  %v9496_v32 = vpop.f32.mrf.mxu3 }
 0x7da   : > { %v9322_v58 = vpop.f32.mrf.mxu1 }
 0x7db   : > { %v9323_v11 = vadd.f32 %v9322_v58, %v9243_v41  ;;  %10999 = vmatmul.msk.bf16.gmra.mxu0 %vm3485_vm0, %v18833_v4 }
 0x7dd   : > { %v9422_v52 = vadd.f32 %v9401_v17, %v9323_v11 }
 0x7de   : > { %11023 = vmatmul.msk.bf16.gmra.mxu2 %vm3485_vm0, %v18834_v31 }
 0x7df   : > { %v17023_v21 = vadd.f32 %v9496_v32, %v9422_v52 }
 0x7e0   : > { %11035 = vmatmul.msk.bf16.gmra.mxu3 %vm3485_vm0, %v18835_v50  ;;  %v9248_v46 = vpop.f32.mrf.mxu0 }
 0x7e1   : > { %v9404_v36 = vpop.f32.mrf.mxu2 }
 0x7e2   : > { %v9325_v29 = vpop.f32.mrf.mxu1 }
 0x7e3   : > { %v9326_v37 = vadd.f32 %v9325_v29, %v9246_v35  ;;  %v9499_v8 = vpop.f32.mrf.mxu3 }
 0x7e4   : > { %11011 = vmatmul.msk.bf16.gmra.mxu1 %vm3485_vm0, %v18838_v49 }
 0x7e5   : > { %v9423_v5 = vadd.f32 %v9404_v36, %v9326_v37 }
 0x7e7   : > { %v17033_v13 = vadd.f32 %v9499_v8, %v9423_v5 }
 0x7e8   : > { %v9559_v19 = vpop.f32.mrf.mxu0 }
 0x7e9   : > { %v9406_v54 = vpop.f32.mrf.mxu2  ;;  %v9599_v48 = vadd.f32 %v9559_v19, %v16882_v47 }
 0x7ea   : > { %v9327_v12 = vpop.f32.mrf.mxu1 }
 0x7eb   : > { %v9328_v59 = vadd.f32 %v9327_v12, %v9248_v46  ;;  %v9501_v2 = vpop.f32.mrf.mxu3 }
 0x7ed   : > { %v9424_v26 = vadd.f32 %v9406_v54, %v9328_v59 }
 0x7ef   : > { %v17035_v20 = vadd.f32 %v9501_v2, %v9424_v26 }
 0x7f0   : > { %v9561_v18 = vpop.f32.mrf.mxu0 }
 0x7f1   : > { %v9749_v34 = vpop.f32.mrf.mxu2  ;;  %v9600_v39 = vadd.f32 %v9561_v18, %v18839_v25 }
 0x7f2   : > { %v9654_v42 = vpop.f32.mrf.mxu1 }
 0x7f3   : > { %v9694_v57 = vadd.f32 %v9654_v42, %v9599_v48  ;;  %v9844_v56 = vpop.f32.mrf.mxu3 }
 0x7f5   : > { %v9789_v9 = vadd.f32 %v9749_v34, %v9694_v57 }
 0x7f7   : > { %v9884_v6 = vadd.f32 %v9844_v56, %v9789_v9 }
 0x7f8   : > { %v9564_v47 = vpop.f32.mrf.mxu0 }
 0x7f9   : > { %v9903_v61 = vadd.f32 %v17044_v22, %v9884_v6  ;;  %v9751_v23 = vpop.f32.mrf.mxu2  ;;  %v9601_v41 = vadd.f32 %v9564_v47, %v16906_v0 }
 0x7fa   : > { %v9656_v55 = vpop.f32.mrf.mxu1 }
 0x7fb   : > { %9919 = vst [vmem:[%s17048_s17] sm:$0xff] %v9903_v61  ;;  %v9695_v15 = vadd.f32 %v9656_v55, %v9600_v39  ;;  %v9846_v16 = vpop.f32.mrf.mxu3 }
 0x7fd   : > { %v9790_v45 = vadd.f32 %v9751_v23, %v9695_v15 }
 0x7ff   : > { %v9885_v27 = vadd.f32 %v9846_v16, %v9790_v45 }
 0x800   : > { %v9566_v7 = vpop.f32.mrf.mxu0 }
 0x801   : > { %v9904_v53 = vadd.f32 %v17044_v22, %v9885_v27  ;;  %v9754_v51 = vpop.f32.mrf.mxu2  ;;  %v9602_v58 = vadd.f32 %v9566_v7, %v16916_v1 }
 0x802   : > { %v9659_v38 = vpop.f32.mrf.mxu1 }
 0x803   : > { %9920 = vst [vmem:[%s17048_s17 + $0x8] sm:$0xff] %v9904_v53  ;;  %v9696_v14 = vadd.f32 %v9659_v38, %v9601_v41  ;;  %v9849_v24 = vpop.f32.mrf.mxu3 }
 0x805   : > { %v9791_v35 = vadd.f32 %v9754_v51, %v9696_v14 }
 0x807   : > { %v9886_v17 = vadd.f32 %v9849_v24, %v9791_v35 }
 0x808   : > { %v9569_v11 = vpop.f32.mrf.mxu0 }
 0x809   : > { %v9905_v32 = vadd.f32 %v17044_v22, %v9886_v17  ;;  %v9756_v4 = vpop.f32.mrf.mxu2  ;;  %v9603_v36 = vadd.f32 %v9569_v11, %v16930_v60 }
 0x80a   : > { %v9661_v52 = vpop.f32.mrf.mxu1 }
 0x80b   : > { %9921 = vst [vmem:[%s17048_s17 + $0x10] sm:$0xff] %v9905_v32  ;;  %v9697_v0 = vadd.f32 %v9661_v52, %v9602_v58  ;;  %v9851_v31 = vpop.f32.mrf.mxu3 }
 0x80d   : > { %v9792_v50 = vadd.f32 %v9756_v4, %v9697_v0 }
 0x80f   : > { %v9887_v46 = vadd.f32 %v9851_v31, %v9792_v50 }
 0x810   : > { %v9571_v37 = vpop.f32.mrf.mxu0 }
 0x811   : > { %v9906_v29 = vadd.f32 %v17044_v22, %v9887_v46  ;;  %v9759_v8 = vpop.f32.mrf.mxu2  ;;  %v9604_v54 = vadd.f32 %v9571_v37, %v16940_v28 }
 0x812   : > { %v9664_v5 = vpop.f32.mrf.mxu1 }
 0x813   : > { %9922 = vst [vmem:[%s17048_s17 + $0x18] sm:$0xff] %v9906_v29  ;;  %v9698_v1 = vadd.f32 %v9664_v5, %v9603_v36  ;;  %v9854_v62 = vpop.f32.mrf.mxu3 }
 0x815   : > { %v9793_v30 = vadd.f32 %v9759_v8, %v9698_v1 }
 0x817   : > { %v9888_v49 = vadd.f32 %v9854_v62, %v9793_v30 }
 0x818   : > { %v9574_v12 = vpop.f32.mrf.mxu0 }
 0x819   : > { %v9907_v19 = vadd.f32 %v17044_v22, %v9888_v49  ;;  %v9761_v59 = vpop.f32.mrf.mxu2  ;;  %v9605_v34 = vadd.f32 %v9574_v12, %v16954_v40 }
 0x81a   : > { %v9666_v2 = vpop.f32.mrf.mxu1 }
 0x81b   : > { %9923 = vst [vmem:[%s17048_s17 + $0x20] sm:$0xff] %v9907_v19  ;;  %v9699_v60 = vadd.f32 %v9666_v2, %v9604_v54  ;;  %v9856_v26 = vpop.f32.mrf.mxu3 }
 0x81d   : > { %v9794_v48 = vadd.f32 %v9761_v59, %v9699_v60 }
 0x81f   : > { %v9889_v18 = vadd.f32 %v9856_v26, %v9794_v48 }
 0x820   : > { %v9576_v57 = vpop.f32.mrf.mxu0 }
 0x821   : > { %v9908_v42 = vadd.f32 %v17044_v22, %v9889_v18  ;;  %v9764_v56 = vpop.f32.mrf.mxu2  ;;  %v9606_v61 = vadd.f32 %v9576_v57, %v16964_v63 }
 0x822   : > { %v9669_v9 = vpop.f32.mrf.mxu1 }
 0x823   : > { %9924 = vst [vmem:[%s17048_s17 + $0x28] sm:$0xff] %v9908_v42  ;;  %v9700_v28 = vadd.f32 %v9669_v9, %v9605_v34  ;;  %v9859_v6 = vpop.f32.mrf.mxu3 }
 0x825   : > { %v9795_v25 = vadd.f32 %v9764_v56, %v9700_v28 }
 0x827   : > { %v9890_v39 = vadd.f32 %v9859_v6, %v9795_v25 }
 0x828   : > { %v9579_v23 = vpop.f32.mrf.mxu0 }
 0x829   : > { %v9909_v47 = vadd.f32 %v17044_v22, %v9890_v39  ;;  %v9766_v55 = vpop.f32.mrf.mxu2  ;;  %v9607_v41 = vadd.f32 %v9579_v23, %v16978_v10 }
 0x82a   : > { %v9671_v15 = vpop.f32.mrf.mxu1 }
 0x82b   : > { %9925 = vst [vmem:[%s17048_s17 + $0x30] sm:$0xff] %v9909_v47  ;;  %v9701_v40 = vadd.f32 %v9671_v15, %v9606_v61  ;;  %v9861_v16 = vpop.f32.mrf.mxu3 }
 0x82d   : > { %v9796_v45 = vadd.f32 %v9766_v55, %v9701_v40 }
 0x82f   : > { %v9891_v27 = vadd.f32 %v9861_v16, %v9796_v45 }
 0x830   : > { %v9581_v7 = vpop.f32.mrf.mxu0 }
 0x831   : > { %v9910_v53 = vadd.f32 %v17044_v22, %v9891_v27  ;;  %v9769_v51 = vpop.f32.mrf.mxu2  ;;  %v9608_v17 = vadd.f32 %v9581_v7, %v16988_v33 }
 0x832   : > { %v9674_v38 = vpop.f32.mrf.mxu1 }
 0x833   : > { %9926 = vst [vmem:[%s17048_s17 + $0x38] sm:$0xff] %v9910_v53  ;;  %v9702_v63 = vadd.f32 %v9674_v38, %v9607_v41  ;;  %v9864_v14 = vpop.f32.mrf.mxu3 }
 0x835   : > { %v9797_v24 = vadd.f32 %v9769_v51, %v9702_v63 }
 0x837   : > { %v9892_v35 = vadd.f32 %v9864_v14, %v9797_v24 }
 0x838   : > { %v9584_v32 = vpop.f32.mrf.mxu0 }
 0x839   : > { %v9911_v58 = vadd.f32 %v17044_v22, %v9892_v35  ;;  %v9771_v11 = vpop.f32.mrf.mxu2  ;;  %v9609_v50 = vadd.f32 %v9584_v32, %v16992_v3 }
 0x83a   : > { %v9676_v4 = vpop.f32.mrf.mxu1 }
 0x83b   : > { %9927 = vst [vmem:[%s17048_s17 + $0x40] sm:$0xff] %v9911_v58  ;;  %v9703_v10 = vadd.f32 %v9676_v4, %v9608_v17  ;;  %v9866_v52 = vpop.f32.mrf.mxu3 }
 0x83d   : > { %v9798_v0 = vadd.f32 %v9771_v11, %v9703_v10 }
 0x83f   : > { %v9893_v31 = vadd.f32 %v9866_v52, %v9798_v0 }
 0x840   : > { %v9586_v36 = vpop.f32.mrf.mxu0 }
 0x841   : > { %v9912_v46 = vadd.f32 %v17044_v22, %v9893_v31  ;;  %v9774_v29 = vpop.f32.mrf.mxu2  ;;  %v9610_v62 = vadd.f32 %v9586_v36, %v17006_v44 }
 0x842   : > { %v9679_v37 = vpop.f32.mrf.mxu1 }
 0x843   : > { %9928 = vst [vmem:[%s17048_s17 + $0x48] sm:$0xff] %v9912_v46  ;;  %v9704_v33 = vadd.f32 %v9679_v37, %v9609_v50  ;;  %v9869_v8 = vpop.f32.mrf.mxu3 }
 0x845   : > { %v9799_v5 = vadd.f32 %v9774_v29, %v9704_v33 }
 0x847   : > { %v9894_v1 = vadd.f32 %v9869_v8, %v9799_v5 }
 0x848   : > { %v9589_v49 = vpop.f32.mrf.mxu0 }
 0x849   : > { %v9913_v30 = vadd.f32 %v17044_v22, %v9894_v1  ;;  %v9776_v54 = vpop.f32.mrf.mxu2  ;;  %v9611_v60 = vadd.f32 %v9589_v49, %v17013_v43 }
 0x84a   : > { %v9681_v19 = vpop.f32.mrf.mxu1 }
 0x84b   : > { %9929 = vst [vmem:[%s17048_s17 + $0x50] sm:$0xff] %v9913_v30  ;;  %v9705_v3 = vadd.f32 %v9681_v19, %v9610_v62  ;;  %v9871_v12 = vpop.f32.mrf.mxu3 }
 0x84d   : > { %v9800_v59 = vadd.f32 %v9776_v54, %v9705_v3 }
 0x84f   : > { %v9895_v2 = vadd.f32 %v9871_v12, %v9800_v59 }
 0x850   : > { %v9591_v18 = vpop.f32.mrf.mxu0 }
 0x851   : > { %v9914_v26 = vadd.f32 %v17044_v22, %v9895_v2  ;;  %v9779_v48 = vpop.f32.mrf.mxu2  ;;  %v9612_v9 = vadd.f32 %v9591_v18, %v17023_v21 }
 0x852   : > { %v9684_v34 = vpop.f32.mrf.mxu1 }
 0x853   : > { %9930 = vst [vmem:[%s17048_s17 + $0x58] sm:$0xff] %v9914_v26  ;;  %v9706_v44 = vadd.f32 %v9684_v34, %v9611_v60  ;;  %v9874_v42 = vpop.f32.mrf.mxu3 }
 0x855   : > { %v9801_v57 = vadd.f32 %v9779_v48, %v9706_v44 }
 0x857   : > { %v9896_v56 = vadd.f32 %v9874_v42, %v9801_v57 }
 0x858   : > { %v9594_v61 = vpop.f32.mrf.mxu0 }
 0x859   : > { %v9915_v28 = vadd.f32 %v17044_v22, %v9896_v56  ;;  %v9781_v6 = vpop.f32.mrf.mxu2  ;;  %v9613_v55 = vadd.f32 %v9594_v61, %v17033_v13 }
 0x85a   : > { %v9686_v25 = vpop.f32.mrf.mxu1 }
 0x85b   : > { %9931 = vst [vmem:[%s17048_s17 + $0x60] sm:$0xff] %v9915_v28  ;;  %v9707_v43 = vadd.f32 %v9686_v25, %v9612_v9  ;;  %v9876_v39 = vpop.f32.mrf.mxu3 }
 0x85d   : > { %v9802_v47 = vadd.f32 %v9781_v6, %v9707_v43 }
 0x85f   : > { %v9897_v23 = vadd.f32 %v9876_v39, %v9802_v47 }
 0x860   : > { %v9596_v41 = vpop.f32.mrf.mxu0 }
 0x861   : > { %v9916_v15 = vadd.f32 %v17044_v22, %v9897_v23  ;;  %v9784_v40 = vpop.f32.mrf.mxu2  ;;  %v9614_v7 = vadd.f32 %v9596_v41, %v17035_v20 }
 0x862   : > { %v9689_v16 = vpop.f32.mrf.mxu1 }
 0x863   : > { %9932 = vst [vmem:[%s17048_s17 + $0x68] sm:$0xff] %v9916_v15  ;;  %v9708_v21 = vadd.f32 %v9689_v16, %v9613_v55  ;;  %v9879_v45 = vpop.f32.mrf.mxu3 }
 0x865   : > { %v9803_v27 = vadd.f32 %v9784_v40, %v9708_v21 }
 0x867   : > { %v9898_v53 = vadd.f32 %v9879_v45, %v9803_v27 }
 0x869   : > { %v9917_v13 = vadd.f32 %v17044_v22, %v9898_v53  ;;  %v9786_v63 = vpop.f32.mrf.mxu2 }
 0x86a   : > { %v9691_v51 = vpop.f32.mrf.mxu1 }
 0x86b   : > { %9933 = vst [vmem:[%s17048_s17 + $0x70] sm:$0xff] %v9917_v13  ;;  %v9709_v38 = vadd.f32 %v9691_v51, %v9614_v7  ;;  %v9881_v24 = vpop.f32.mrf.mxu3 }
 0x86d   : > { %v9804_v14 = vadd.f32 %v9786_v63, %v9709_v38 }
 0x86f   : > { %v9899_v35 = vadd.f32 %v9881_v24, %v9804_v14 }
 0x871   : > { %v9918_v20 = vadd.f32 %v17044_v22, %v9899_v35 }
 0x873   : > { %9934 = vst [vmem:[%s17048_s17 + $0x78] sm:$0xff] %v9918_v20 }
 0x874   : > { %11855 = shalt.err (!%p11852_p7)
}
 0x875   : > { %s11924_s24 = smov 128   ;;  %s11925_s17 = smov 8  }
 0x876   : > { %11242 = dma.vmem_to_hbm [thread:$0]  (%p12012_p3), %s9951_s30, 2048, %s9953_s20, %s9936_s9, %s11924_s24, %s11924_s24, %s11925_s17  }
 0x877 PF: > { %p11248_p9 = scmp.ge.s32.totalorder %s11922_s28, 2  ;;  %s9967_s25 = sand.u32 1, %s11894_s21  }
 0x878   : > { %s9968_s16 = scalar_lea.sflag [#allocation3], %s9967_s25 }
 0x879   : > { %p11245_p10 = pnand %p11248_p9, %p12021_p8 }
 0x87b   : > { %p11246_p11 = pneg %p11245_p10 }
 0x87d   : > { %11889 = dma.done.wait (%p11246_p11), %s9968_s16, 2048  }
 0x87e   : > { %11891 = vsyncadd (%p11246_p11), %s9968_s16, 4294965248  ;;  %s19_s28 = sadd.s32 1, %s11922_s28   ;;  %s18840_s10 = sld [smem:[#allocation5_spill]] }
 0x87f   : > { %p16_p12 = scmp.ge.s32.totalorder %s19_s28, 6   ;;  %s18841_s21 = smov %s11898_s22 }
 0x880   : > { %s18842_s22 = smov %s11902_s23  ;;  %s18843_s23 = smov %s12030_s15 }
 0x881   : > { %s18844_s24 = smov %s11914_s26  ;;  %s18845_s25 = smov %s11918_s27 }
 0x882   : > { %s18846_s26 = smov %s18849_s7  ;;  %18 = sbr.rel (!%p16_p12) target bundleno = 5 (0x5), region = 79 }
 0x884   : > { %s18847_s27 = smov %s18840_s10 }
 0x887   :  { %9974 = vsyncpa [#allocation3], 1 }
 0x888   :  { %9976 = vsyncpa [#allocation3 + $0x1], 1 }

</bundles_post_ra>
